<compile_context>
chip_gen: v6e
topology: v6e:2x2x1
jax: 0.10.0
libtpu: 0.0.40
codegen_flags: <defaults>
</compile_context>

<pallas_src>
import jax
import jax.numpy as jnp
from jax.experimental import pallas as pl
from jax.experimental.pallas import tpu as pltpu

# ----------------------------- model config ---------------------------------
LAYERS = [4, 32, 32, 32, 2]
IN_DIM = LAYERS[0]
HID = LAYERS[1]                        # all interior widths equal
OUT_DIM = LAYERS[-1]
NUM_MID = len(LAYERS) - 3              # linears[1 .. L-3] inside the loop (=2)

PACK = 4                               # batch rows packed per 128-lane row
LANE = PACK * HID                      # 128
PIN = PACK * IN_DIM                    # 16
POUT = PACK * OUT_DIM                  # 8

DEFAULT_TB = 256                       # batch tile (rows); must be multiple of 32

HIGH = jax.lax.Precision.HIGHEST


# ------------------------------ Pallas kernel -------------------------------
def pinn_kernel(x_ref,
                w_in_ref, b_in_ref,          # fused linear[0]|attention1|attention2
                wm_ref, bm_ref,              # stacked linear[1..L-3]   (block-diag)
                rw1_ref, rb1_ref,            # stacked res_block.linear1 (block-diag)
                rw2_ref, rb2_ref,            # stacked res_block.linear2 (block-diag)
                wl_ref, bl_ref,              # linear[-1]               (block-diag)
                out_ref):
    act = jnp.tanh

    def dense(v, w, b):
        return jnp.dot(v, w, preferred_element_type=jnp.float32,
                       precision=HIGH) + b

    x = x_ref[...]                                        # [PB, 16] (4 rows packed)

    # One fused matmul + one tanh for a / encoder_1 / encoder_2, then slice at
    # 128-lane boundaries (lane-aligned, no cross-lane shuffles).
    enc = act(dense(x, w_in_ref[...], b_in_ref[...]))     # [PB, 384]
    a = enc[:, 0 * LANE:1 * LANE]                         # [PB, 128]
    e1 = enc[:, 1 * LANE:2 * LANE]
    e2 = enc[:, 2 * LANE:3 * LANE]

    diff = e1 - e2                                        # hoisted out of the loop
    a = e2 + a * diff                                     # a*e1 + (1-a)*e2

    for i in range(NUM_MID):                              # static unroll (2 iters)
        a = act(dense(a, wm_ref[i], bm_ref[i]))
        # ResBlock: linear2(act(linear1(a))) + a
        h = dense(act(dense(a, rw1_ref[i], rb1_ref[i])), rw2_ref[i], rb2_ref[i])
        a = h + a
        a = e2 + a * diff

    out_ref[...] = dense(a, wl_ref[...], bl_ref[...])     # [PB, 8]
    # non_negative=False -> no softplus applied.


# ------------------------------ wrapper --------------------------------------
def res_ia_pinn_forward(x, packed_params, tb=DEFAULT_TB):
    """x: [B, IN_DIM] f32. Returns [B, OUT_DIM] f32."""
    assert tb % (PACK * 8) == 0, "tb must be a multiple of 32"
    (w_in, b_in, wm, bm, rw1, rb1, rw2, rb2, wl, bl) = packed_params

    B = x.shape[0]
    Bp = ((B + tb - 1) // tb) * tb                      # pad batch to tile multiple
    if Bp != B:
        x = jnp.pad(x, ((0, Bp - B), (0, 0)))

    # Lane-pack 4 batch rows per row: free row-major reshape.
    xp = x.reshape(Bp // PACK, PIN)                     # [Bp/4, 16]
    pb = tb // PACK                                     # packed rows per tile
    grid = (Bp // tb,)

    full2d = lambda shape: pl.BlockSpec(shape, lambda i: (0, 0))
    full3d = lambda shape: pl.BlockSpec(shape, lambda i: (0, 0, 0))

    out_packed = pl.pallas_call(
        pinn_kernel,
        out_shape=jax.ShapeDtypeStruct((Bp // PACK, POUT), jnp.float32),
        grid_spec=pltpu.PrefetchScalarGridSpec(
            num_scalar_prefetch=0,
            grid=grid,
            in_specs=[
                pl.BlockSpec((pb, PIN), lambda i: (i, 0)),        # packed x
                full2d((PIN, 3 * LANE)), full2d((1, 3 * LANE)),   # fused input proj
                full3d((NUM_MID, LANE, LANE)), full3d((NUM_MID, 1, LANE)),  # mid
                full3d((NUM_MID, LANE, LANE)), full3d((NUM_MID, 1, LANE)),  # res lin1
                full3d((NUM_MID, LANE, LANE)), full3d((NUM_MID, 1, LANE)),  # res lin2
                full2d((LANE, POUT)), full2d((1, POUT)),          # output layer
            ],
            # TODO(synk): output is only 8/128 lanes dense (masked vst); fine for
            # OUT_DIM=2 but present a lane-dense slab if this ever feeds another kernel.
            out_specs=pl.BlockSpec((pb, POUT), lambda i: (i, 0)),
        ),
        compiler_params=pltpu.CompilerParams(
            dimension_semantics=("parallel",)),          # grid splits across TCs (v7x)
    )(xp, w_in, b_in, wm, bm, rw1, rb1, rw2, rb2, wl, bl)

    return out_packed.reshape(Bp, OUT_DIM)[:B]


# ------------------------ parameter packing helpers ---------------------------
def _block_diag(w):
    """[din, dout] -> [PACK*din, PACK*dout] block-diagonal replication."""
    din, dout = w.shape
    out = jnp.zeros((PACK * din, PACK * dout), w.dtype)
    for p in range(PACK):
        out = out.at[p * din:(p + 1) * din, p * dout:(p + 1) * dout].set(w)
    return out


def _tile_bias(b):
    """[1, d] -> [1, PACK*d]."""
    return jnp.tile(b, (1, PACK))


def pack_params(params):
    """Logical per-layer params -> lane-packed / fused kernel params."""
    (wf, bf, wa1, ba1, wa2, ba2, wm, bm, rw1, rb1, rw2, rb2, wl, bl) = params
    w_in = jnp.concatenate(
        [_block_diag(wf), _block_diag(wa1), _block_diag(wa2)], axis=1)   # [16, 384]
    b_in = jnp.concatenate(
        [_tile_bias(bf), _tile_bias(ba1), _tile_bias(ba2)], axis=1)      # [1, 384]
    wm_p = jnp.stack([_block_diag(wm[i]) for i in range(NUM_MID)])       # [2,128,128]
    bm_p = jnp.stack([_tile_bias(bm[i]) for i in range(NUM_MID)])        # [2,1,128]
    rw1_p = jnp.stack([_block_diag(rw1[i]) for i in range(NUM_MID)])
    rb1_p = jnp.stack([_tile_bias(rb1[i]) for i in range(NUM_MID)])
    rw2_p = jnp.stack([_block_diag(rw2[i]) for i in range(NUM_MID)])
    rb2_p = jnp.stack([_tile_bias(rb2[i]) for i in range(NUM_MID)])
    wl_p = _block_diag(wl)                                               # [128, 8]
    bl_p = _tile_bias(bl)                                                # [1, 8]
    return (w_in, b_in, wm_p, bm_p, rw1_p, rb1_p, rw2_p, rb2_p, wl_p, bl_p)


# -------------------------- deterministic init -------------------------------
def kaiming_uniform_tanh(key, fan_in, shape):
    gain = 5.0 / 3.0                       # PyTorch gain for tanh
    bound = gain * (3.0 / fan_in) ** 0.5
    return jax.random.uniform(key, shape, jnp.float32, -bound, bound)


def default_linear_init(key, fan_in, shape):
    bound = 1.0 / (fan_in ** 0.5)          # PyTorch default nn.Linear init
    return jax.random.uniform(key, shape, jnp.float32, -bound, bound)


def make_params(key):
    """Logical params; weights stored [in, out] (transposed vs torch)."""
    ks = iter(jax.random.split(key, 64))
    wf = kaiming_uniform_tanh(next(ks), IN_DIM, (IN_DIM, HID))
    bf = jnp.zeros((1, HID), jnp.float32)
    wa1 = kaiming_uniform_tanh(next(ks), IN_DIM, (IN_DIM, HID))
    ba1 = jnp.zeros((1, HID), jnp.float32)
    wa2 = kaiming_uniform_tanh(next(ks), IN_DIM, (IN_DIM, HID))
    ba2 = jnp.zeros((1, HID), jnp.float32)
    wm = jnp.stack([kaiming_uniform_tanh(next(ks), HID, (HID, HID))
                    for _ in range(NUM_MID)])
    bm = jnp.zeros((NUM_MID, 1, HID), jnp.float32)
    rw1 = jnp.stack([default_linear_init(next(ks), HID, (HID, HID))
                     for _ in range(NUM_MID)])
    rb1 = jnp.stack([default_linear_init(next(ks), HID, (1, HID))
                     for _ in range(NUM_MID)])
    rw2 = jnp.stack([default_linear_init(next(ks), HID, (HID, HID))
                     for _ in range(NUM_MID)])
    rb2 = jnp.stack([default_linear_init(next(ks), HID, (1, HID))
                     for _ in range(NUM_MID)])
    wl = kaiming_uniform_tanh(next(ks), HID, (HID, OUT_DIM))
    bl = jnp.zeros((1, OUT_DIM), jnp.float32)
    return (wf, bf, wa1, ba1, wa2, ba2, wm, bm, rw1, rb1, rw2, rb2, wl, bl)


# ------------------------ pure-JAX reference (check) --------------------------
def reference_forward(x, params):
    (wf, bf, wa1, ba1, wa2, ba2, wm, bm, rw1, rb1, rw2, rb2, wl, bl) = params
    act = jnp.tanh
    dense = lambda v, w, b: jnp.dot(v, w, precision=HIGH) + b
    a = act(dense(x, wf, bf))
    e1 = act(dense(x, wa1, ba1))
    e2 = act(dense(x, wa2, ba2))
    a = a * e1 + (1.0 - a) * e2
    for i in range(NUM_MID):
        a = act(dense(a, wm[i], bm[i]))
        h = dense(act(dense(a, rw1[i], rb1[i])), rw2[i], rb2[i])
        a = h + a
        a = a * e1 + (1.0 - a) * e2
    return dense(a, wl, bl)


# ---------------------------------- main --------------------------------------
if __name__ == "__main__":
    key = jax.random.PRNGKey(0)
    kx, kp = jax.random.split(key)
    params = make_params(kp)
    packed = pack_params(params)

    # Main check: batch large enough for 2 grid steps (engages both TCs on v7x).
    BATCH = 512
    x = jax.random.normal(kx, (BATCH, IN_DIM), jnp.float32)
    out = jax.block_until_ready(res_ia_pinn_forward(x, packed))
    ref = jax.block_until_ready(reference_forward(x, params))
    assert out.shape == (BATCH, OUT_DIM)
    assert jnp.allclose(out, ref, atol=1e-4, rtol=1e-4)

    # Ragged-batch check: exercises the padding path (batch not a tile multiple).
    x_small = jax.random.normal(jax.random.PRNGKey(1), (10, IN_DIM), jnp.float32)
    out_s = jax.block_until_ready(res_ia_pinn_forward(x_small, packed))
    ref_s = jax.block_until_ready(reference_forward(x_small, params))
    assert out_s.shape == (10, OUT_DIM)
    assert jnp.allclose(out_s, ref_s, atol=1e-4, rtol=1e-4)

    print("KERNEL_OK")
</pallas_src>

<mosaic_0001>
module attributes {stable_mosaic.version = 11 : i64} {
  func.func @pinn_kernel(%arg0: i32, %arg1: memref<64x16xf32, #tpu.memory_space<vmem>>, %arg2: memref<16x384xf32, #tpu.memory_space<vmem>>, %arg3: memref<1x384xf32, #tpu.memory_space<vmem>>, %arg4: memref<2x128x128xf32, #tpu.memory_space<vmem>>, %arg5: memref<2x1x128xf32, #tpu.memory_space<vmem>>, %arg6: memref<2x128x128xf32, #tpu.memory_space<vmem>>, %arg7: memref<2x1x128xf32, #tpu.memory_space<vmem>>, %arg8: memref<2x128x128xf32, #tpu.memory_space<vmem>>, %arg9: memref<2x1x128xf32, #tpu.memory_space<vmem>>, %arg10: memref<128x8xf32, #tpu.memory_space<vmem>>, %arg11: memref<1x8xf32, #tpu.memory_space<vmem>>, %arg12: memref<64x8xf32, #tpu.memory_space<vmem>>) attributes {dimension_semantics = [#tpu.dimension_semantics<parallel>], iteration_bounds = array<i64: 2>, scalar_prefetch = 0 : i64, scratch_operands = 0 : i64, tpu.core_type = #tpu.core_type<tc>, window_params = [{transform_indices = @transform_0, window_bounds = array<i64: 64, 16>}, {pipeline_mode = #tpu.pipeline_mode<synchronous>, transform_indices = @transform_1, window_bounds = array<i64: 16, 384>}, {pipeline_mode = #tpu.pipeline_mode<synchronous>, transform_indices = @transform_2, window_bounds = array<i64: 1, 384>}, {pipeline_mode = #tpu.pipeline_mode<synchronous>, transform_indices = @transform_3, window_bounds = array<i64: 2, 128, 128>}, {pipeline_mode = #tpu.pipeline_mode<synchronous>, transform_indices = @transform_4, window_bounds = array<i64: 2, 1, 128>}, {pipeline_mode = #tpu.pipeline_mode<synchronous>, transform_indices = @transform_5, window_bounds = array<i64: 2, 128, 128>}, {pipeline_mode = #tpu.pipeline_mode<synchronous>, transform_indices = @transform_6, window_bounds = array<i64: 2, 1, 128>}, {pipeline_mode = #tpu.pipeline_mode<synchronous>, transform_indices = @transform_7, window_bounds = array<i64: 2, 128, 128>}, {pipeline_mode = #tpu.pipeline_mode<synchronous>, transform_indices = @transform_8, window_bounds = array<i64: 2, 1, 128>}, {pipeline_mode = #tpu.pipeline_mode<synchronous>, transform_indices = @transform_9, window_bounds = array<i64: 128, 8>}, {pipeline_mode = #tpu.pipeline_mode<synchronous>, transform_indices = @transform_10, window_bounds = array<i64: 1, 8>}, {transform_indices = @transform_11, window_bounds = array<i64: 64, 8>}]} {
    %c0 = arith.constant 0 : index
    %c0_0 = arith.constant 0 : index
    %0 = vector.load %arg1[%c0, %c0_0] : memref<64x16xf32, #tpu.memory_space<vmem>>, vector<64x16xf32>
    %c0_1 = arith.constant 0 : index
    %c0_2 = arith.constant 0 : index
    %1 = vector.load %arg2[%c0_1, %c0_2] : memref<16x384xf32, #tpu.memory_space<vmem>>, vector<16x384xf32>
    %c0_3 = arith.constant 0 : index
    %c0_4 = arith.constant 0 : index
    %2 = vector.load %arg3[%c0_3, %c0_4] : memref<1x384xf32, #tpu.memory_space<vmem>>, vector<1x384xf32>
    %cst = arith.constant dense<0.000000e+00> : vector<64x384xf32>
    %3 = tpu.matmul %0, %1, %cst {dimension_numbers = #tpu.dot_dimension_numbers<[1], [0], [0], [1], [0, 0, 1, 1], [], []>, precision = #tpu.contract_precision<fp32>} : vector<64x16xf32>, vector<16x384xf32>, vector<64x384xf32> -> vector<64x384xf32>
    %4 = vector.broadcast %2 : vector<1x384xf32> to vector<64x384xf32>
    %5 = arith.addf %3, %4 : vector<64x384xf32>
    %6 = math.tanh %5 : vector<64x384xf32>
    %7 = vector.extract_strided_slice %6 {offsets = [0, 0], sizes = [64, 128], strides = [1, 1]} : vector<64x384xf32> to vector<64x128xf32>
    %8 = vector.extract_strided_slice %6 {offsets = [0, 128], sizes = [64, 128], strides = [1, 1]} : vector<64x384xf32> to vector<64x128xf32>
    %9 = vector.extract_strided_slice %6 {offsets = [0, 256], sizes = [64, 128], strides = [1, 1]} : vector<64x384xf32> to vector<64x128xf32>
    %10 = arith.subf %8, %9 : vector<64x128xf32>
    %11 = arith.mulf %7, %10 : vector<64x128xf32>
    %12 = arith.addf %9, %11 : vector<64x128xf32>
    %c0_5 = arith.constant 0 : index
    %c0_6 = arith.constant 0 : index
    %c0_7 = arith.constant 0 : index
    %13 = vector.load %arg4[%c0_5, %c0_6, %c0_7] : memref<2x128x128xf32, #tpu.memory_space<vmem>>, vector<1x128x128xf32>
    %14 = vector.shape_cast %13 : vector<1x128x128xf32> to vector<128x128xf32>
    %c0_8 = arith.constant 0 : index
    %c0_9 = arith.constant 0 : index
    %c0_10 = arith.constant 0 : index
    %15 = vector.load %arg5[%c0_8, %c0_9, %c0_10] : memref<2x1x128xf32, #tpu.memory_space<vmem>>, vector<1x1x128xf32>
    %16 = vector.shape_cast %15 : vector<1x1x128xf32> to vector<1x128xf32>
    %cst_11 = arith.constant dense<0.000000e+00> : vector<64x128xf32>
    %17 = tpu.matmul %12, %14, %cst_11 {dimension_numbers = #tpu.dot_dimension_numbers<[1], [0], [0], [1], [0, 0, 1, 1], [], []>, precision = #tpu.contract_precision<fp32>} : vector<64x128xf32>, vector<128x128xf32>, vector<64x128xf32> -> vector<64x128xf32>
    %18 = vector.broadcast %16 : vector<1x128xf32> to vector<64x128xf32>
    %19 = arith.addf %17, %18 : vector<64x128xf32>
    %20 = math.tanh %19 : vector<64x128xf32>
    %c0_12 = arith.constant 0 : index
    %c0_13 = arith.constant 0 : index
    %c0_14 = arith.constant 0 : index
    %21 = vector.load %arg6[%c0_12, %c0_13, %c0_14] : memref<2x128x128xf32, #tpu.memory_space<vmem>>, vector<1x128x128xf32>
    %22 = vector.shape_cast %21 : vector<1x128x128xf32> to vector<128x128xf32>
    %c0_15 = arith.constant 0 : index
    %c0_16 = arith.constant 0 : index
    %c0_17 = arith.constant 0 : index
    %23 = vector.load %arg7[%c0_15, %c0_16, %c0_17] : memref<2x1x128xf32, #tpu.memory_space<vmem>>, vector<1x1x128xf32>
    %24 = vector.shape_cast %23 : vector<1x1x128xf32> to vector<1x128xf32>
    %cst_18 = arith.constant dense<0.000000e+00> : vector<64x128xf32>
    %25 = tpu.matmul %20, %22, %cst_18 {dimension_numbers = #tpu.dot_dimension_numbers<[1], [0], [0], [1], [0, 0, 1, 1], [], []>, precision = #tpu.contract_precision<fp32>} : vector<64x128xf32>, vector<128x128xf32>, vector<64x128xf32> -> vector<64x128xf32>
    %26 = vector.broadcast %24 : vector<1x128xf32> to vector<64x128xf32>
    %27 = arith.addf %25, %26 : vector<64x128xf32>
    %28 = math.tanh %27 : vector<64x128xf32>
    %c0_19 = arith.constant 0 : index
    %c0_20 = arith.constant 0 : index
    %c0_21 = arith.constant 0 : index
    %29 = vector.load %arg8[%c0_19, %c0_20, %c0_21] : memref<2x128x128xf32, #tpu.memory_space<vmem>>, vector<1x128x128xf32>
    %30 = vector.shape_cast %29 : vector<1x128x128xf32> to vector<128x128xf32>
    %c0_22 = arith.constant 0 : index
    %c0_23 = arith.constant 0 : index
    %c0_24 = arith.constant 0 : index
    %31 = vector.load %arg9[%c0_22, %c0_23, %c0_24] : memref<2x1x128xf32, #tpu.memory_space<vmem>>, vector<1x1x128xf32>
    %32 = vector.shape_cast %31 : vector<1x1x128xf32> to vector<1x128xf32>
    %cst_25 = arith.constant dense<0.000000e+00> : vector<64x128xf32>
    %33 = tpu.matmul %28, %30, %cst_25 {dimension_numbers = #tpu.dot_dimension_numbers<[1], [0], [0], [1], [0, 0, 1, 1], [], []>, precision = #tpu.contract_precision<fp32>} : vector<64x128xf32>, vector<128x128xf32>, vector<64x128xf32> -> vector<64x128xf32>
    %34 = vector.broadcast %32 : vector<1x128xf32> to vector<64x128xf32>
    %35 = arith.addf %33, %34 : vector<64x128xf32>
    %36 = arith.addf %35, %20 : vector<64x128xf32>
    %37 = arith.mulf %36, %10 : vector<64x128xf32>
    %38 = arith.addf %9, %37 : vector<64x128xf32>
    %c1 = arith.constant 1 : index
    %c0_26 = arith.constant 0 : index
    %c0_27 = arith.constant 0 : index
    %39 = vector.load %arg4[%c1, %c0_26, %c0_27] : memref<2x128x128xf32, #tpu.memory_space<vmem>>, vector<1x128x128xf32>
    %40 = vector.shape_cast %39 : vector<1x128x128xf32> to vector<128x128xf32>
    %c1_28 = arith.constant 1 : index
    %c0_29 = arith.constant 0 : index
    %c0_30 = arith.constant 0 : index
    %41 = vector.load %arg5[%c1_28, %c0_29, %c0_30] : memref<2x1x128xf32, #tpu.memory_space<vmem>>, vector<1x1x128xf32>
    %42 = vector.shape_cast %41 : vector<1x1x128xf32> to vector<1x128xf32>
    %cst_31 = arith.constant dense<0.000000e+00> : vector<64x128xf32>
    %43 = tpu.matmul %38, %40, %cst_31 {dimension_numbers = #tpu.dot_dimension_numbers<[1], [0], [0], [1], [0, 0, 1, 1], [], []>, precision = #tpu.contract_precision<fp32>} : vector<64x128xf32>, vector<128x128xf32>, vector<64x128xf32> -> vector<64x128xf32>
    %44 = vector.broadcast %42 : vector<1x128xf32> to vector<64x128xf32>
    %45 = arith.addf %43, %44 : vector<64x128xf32>
    %46 = math.tanh %45 : vector<64x128xf32>
    %c1_32 = arith.constant 1 : index
    %c0_33 = arith.constant 0 : index
    %c0_34 = arith.constant 0 : index
    %47 = vector.load %arg6[%c1_32, %c0_33, %c0_34] : memref<2x128x128xf32, #tpu.memory_space<vmem>>, vector<1x128x128xf32>
    %48 = vector.shape_cast %47 : vector<1x128x128xf32> to vector<128x128xf32>
    %c1_35 = arith.constant 1 : index
    %c0_36 = arith.constant 0 : index
    %c0_37 = arith.constant 0 : index
    %49 = vector.load %arg7[%c1_35, %c0_36, %c0_37] : memref<2x1x128xf32, #tpu.memory_space<vmem>>, vector<1x1x128xf32>
    %50 = vector.shape_cast %49 : vector<1x1x128xf32> to vector<1x128xf32>
    %cst_38 = arith.constant dense<0.000000e+00> : vector<64x128xf32>
    %51 = tpu.matmul %46, %48, %cst_38 {dimension_numbers = #tpu.dot_dimension_numbers<[1], [0], [0], [1], [0, 0, 1, 1], [], []>, precision = #tpu.contract_precision<fp32>} : vector<64x128xf32>, vector<128x128xf32>, vector<64x128xf32> -> vector<64x128xf32>
    %52 = vector.broadcast %50 : vector<1x128xf32> to vector<64x128xf32>
    %53 = arith.addf %51, %52 : vector<64x128xf32>
    %54 = math.tanh %53 : vector<64x128xf32>
    %c1_39 = arith.constant 1 : index
    %c0_40 = arith.constant 0 : index
    %c0_41 = arith.constant 0 : index
    %55 = vector.load %arg8[%c1_39, %c0_40, %c0_41] : memref<2x128x128xf32, #tpu.memory_space<vmem>>, vector<1x128x128xf32>
    %56 = vector.shape_cast %55 : vector<1x128x128xf32> to vector<128x128xf32>
    %c1_42 = arith.constant 1 : index
    %c0_43 = arith.constant 0 : index
    %c0_44 = arith.constant 0 : index
    %57 = vector.load %arg9[%c1_42, %c0_43, %c0_44] : memref<2x1x128xf32, #tpu.memory_space<vmem>>, vector<1x1x128xf32>
    %58 = vector.shape_cast %57 : vector<1x1x128xf32> to vector<1x128xf32>
    %cst_45 = arith.constant dense<0.000000e+00> : vector<64x128xf32>
    %59 = tpu.matmul %54, %56, %cst_45 {dimension_numbers = #tpu.dot_dimension_numbers<[1], [0], [0], [1], [0, 0, 1, 1], [], []>, precision = #tpu.contract_precision<fp32>} : vector<64x128xf32>, vector<128x128xf32>, vector<64x128xf32> -> vector<64x128xf32>
    %60 = vector.broadcast %58 : vector<1x128xf32> to vector<64x128xf32>
    %61 = arith.addf %59, %60 : vector<64x128xf32>
    %62 = arith.addf %61, %46 : vector<64x128xf32>
    %63 = arith.mulf %62, %10 : vector<64x128xf32>
    %64 = arith.addf %9, %63 : vector<64x128xf32>
    %c0_46 = arith.constant 0 : index
    %c0_47 = arith.constant 0 : index
    %65 = vector.load %arg10[%c0_46, %c0_47] : memref<128x8xf32, #tpu.memory_space<vmem>>, vector<128x8xf32>
    %c0_48 = arith.constant 0 : index
    %c0_49 = arith.constant 0 : index
    %66 = vector.load %arg11[%c0_48, %c0_49] : memref<1x8xf32, #tpu.memory_space<vmem>>, vector<1x8xf32>
    %cst_50 = arith.constant dense<0.000000e+00> : vector<64x8xf32>
    %67 = tpu.matmul %64, %65, %cst_50 {dimension_numbers = #tpu.dot_dimension_numbers<[1], [0], [0], [1], [0, 0, 1, 1], [], []>, precision = #tpu.contract_precision<fp32>} : vector<64x128xf32>, vector<128x8xf32>, vector<64x8xf32> -> vector<64x8xf32>
    %68 = vector.broadcast %66 : vector<1x8xf32> to vector<64x8xf32>
    %69 = arith.addf %67, %68 : vector<64x8xf32>
    %c0_51 = arith.constant 0 : index
    %c0_52 = arith.constant 0 : index
    %70 = vector.load %arg12[%c0_51, %c0_52] : memref<64x8xf32, #tpu.memory_space<vmem>>, vector<64x8xf32>
    tpu.vector_store %arg12[%c0_51, %c0_52], %69 {strides = array<i32>} : memref<64x8xf32, #tpu.memory_space<vmem>>, vector<64x8xf32>,
    return
  }
  func.func @transform_0(%arg0: i32) -> (i32, i32) {
    %c0_i32 = arith.constant 0 : i32
    %c0_i32_0 = arith.constant 0 : i32
    return %arg0, %c0_i32 : i32, i32
  }
  func.func @transform_1(%arg0: i32) -> (i32, i32) {
    %c0_i32 = arith.constant 0 : i32
    %c0_i32_0 = arith.constant 0 : i32
    %c0_i32_1 = arith.constant 0 : i32
    return %c0_i32, %c0_i32_0 : i32, i32
  }
  func.func @transform_2(%arg0: i32) -> (i32, i32) {
    %c0_i32 = arith.constant 0 : i32
    %c0_i32_0 = arith.constant 0 : i32
    %c0_i32_1 = arith.constant 0 : i32
    return %c0_i32, %c0_i32_0 : i32, i32
  }
  func.func @transform_3(%arg0: i32) -> (i32, i32, i32) {
    %c0_i32 = arith.constant 0 : i32
    %c0_i32_0 = arith.constant 0 : i32
    %c0_i32_1 = arith.constant 0 : i32
    %c0_i32_2 = arith.constant 0 : i32
    return %c0_i32, %c0_i32_0, %c0_i32_1 : i32, i32, i32
  }
  func.func @transform_4(%arg0: i32) -> (i32, i32, i32) {
    %c0_i32 = arith.constant 0 : i32
    %c0_i32_0 = arith.constant 0 : i32
    %c0_i32_1 = arith.constant 0 : i32
    %c0_i32_2 = arith.constant 0 : i32
    return %c0_i32, %c0_i32_0, %c0_i32_1 : i32, i32, i32
  }
  func.func @transform_5(%arg0: i32) -> (i32, i32, i32) {
    %c0_i32 = arith.constant 0 : i32
    %c0_i32_0 = arith.constant 0 : i32
    %c0_i32_1 = arith.constant 0 : i32
    %c0_i32_2 = arith.constant 0 : i32
    return %c0_i32, %c0_i32_0, %c0_i32_1 : i32, i32, i32
  }
  func.func @transform_6(%arg0: i32) -> (i32, i32, i32) {
    %c0_i32 = arith.constant 0 : i32
    %c0_i32_0 = arith.constant 0 : i32
    %c0_i32_1 = arith.constant 0 : i32
    %c0_i32_2 = arith.constant 0 : i32
    return %c0_i32, %c0_i32_0, %c0_i32_1 : i32, i32, i32
  }
  func.func @transform_7(%arg0: i32) -> (i32, i32, i32) {
    %c0_i32 = arith.constant 0 : i32
    %c0_i32_0 = arith.constant 0 : i32
    %c0_i32_1 = arith.constant 0 : i32
    %c0_i32_2 = arith.constant 0 : i32
    return %c0_i32, %c0_i32_0, %c0_i32_1 : i32, i32, i32
  }
  func.func @transform_8(%arg0: i32) -> (i32, i32, i32) {
    %c0_i32 = arith.constant 0 : i32
    %c0_i32_0 = arith.constant 0 : i32
    %c0_i32_1 = arith.constant 0 : i32
    %c0_i32_2 = arith.constant 0 : i32
    return %c0_i32, %c0_i32_0, %c0_i32_1 : i32, i32, i32
  }
  func.func @transform_9(%arg0: i32) -> (i32, i32) {
    %c0_i32 = arith.constant 0 : i32
    %c0_i32_0 = arith.constant 0 : i32
    %c0_i32_1 = arith.constant 0 : i32
    return %c0_i32, %c0_i32_0 : i32, i32
  }
  func.func @transform_10(%arg0: i32) -> (i32, i32) {
    %c0_i32 = arith.constant 0 : i32
    %c0_i32_0 = arith.constant 0 : i32
    %c0_i32_1 = arith.constant 0 : i32
    return %c0_i32, %c0_i32_0 : i32, i32
  }
  func.func @transform_11(%arg0: i32) -> (i32, i32) {
    %c0_i32 = arith.constant 0 : i32
    %c0_i32_0 = arith.constant 0 : i32
    return %arg0, %c0_i32 : i32, i32
  }
}

</mosaic_0001>

<bundles_post_ra>
// kernel: tpu_custom_call.1
= control target key start
LH: loop header
LB: loop body
LE: loop exit
PB: predicated region body
PF: predicated region fallthrough
CT: control target
= control target key end

     0   :  { %16 = vsyncpa [#allocation3], 0  ;;  %s16650_s0 = inlined_call_operand.vmem [shape: f32[128,16], index: 0, kind: input, shape index: {}]   ;;  %s16651_s1 = inlined_call_operand.hbm [shape: f32[16,384], index: 1, kind: input, shape index: {}]   ;;  %s16652_s2 = inlined_call_operand.vmem [shape: f32[1,384], index: 2, kind: input, shape index: {}]   ;;  %s16653_s3 = inlined_call_operand.vmem [shape: f32[2,128,128], index: 3, kind: input, shape index: {}]   ;;  %s16654_s4 = inlined_call_operand.vmem [shape: f32[2,1,128], index: 4, kind: input, shape index: {}]   ;;  %s16655_s5 = inlined_call_operand.hbm [shape: f32[2,128,128], index: 5, kind: input, shape index: {}]   ;;  %s16656_s6 = inlined_call_operand.vmem [shape: f32[2,1,128], index: 6, kind: input, shape index: {}]   ;;  %s16657_s7 = inlined_call_operand.hbm [shape: f32[2,128,128], index: 7, kind: input, shape index: {}]   ;;  %s16658_s8 = inlined_call_operand.vmem [shape: f32[2,1,128], index: 8, kind: input, shape index: {}]   ;;  %s16659_s9 = inlined_call_operand.vmem [shape: f32[128,8], index: 9, kind: input, shape index: {}]   ;;  %s16660_s10 = inlined_call_operand.vmem [shape: f32[1,8], index: 10, kind: input, shape index: {}]   ;;  %s16661_s11 = inlined_call_operand.vmem [shape: f32[128,8], index: 11, kind: output, shape index: {}]  }
   0x1   :  { %17 = vsyncpa [#allocation5], 0  ;;  %s12442_s17 = smov 0  }
   0x2 LB: > { %s12374_s18 = smov [#allocation4]   ;;  %s9069_s20 = sadd.s32 4294967295, %s12372_s17   ;;  %s12372_s17 = sphi %s12442_s17, %s23_s17  }
   0x3   : > { %s324_s19 = sshll.u32 %s12374_s18, 4  ;;  %p9071_p0 = scmp.ge.s32.totalorder %s12372_s17, 1  ;;  %s325_s19 = int_to_ptr.vmem [resolvable:$true] %s324_s19 }
   0x4   : > { %p290_p1 = scmp.lt.s32.totalorder %s12372_s17, 3  ;;  %p12452_p2 = scmp.eq.s32.totalorder %s9069_s20, 0 }
   0x5   : > { %s12375_s23 = smov [#allocation2]   ;;  %s12376_s26 = smov [#allocation6]  }
   0x6   : > { %p12456_p3 = pnand %p9071_p0, %p290_p1  ;;  %s302_s24 = sshll.u32 %s12375_s23, 4  ;;  %s12462_s24 = int_to_ptr.vmem [resolvable:$true] %s302_s24 }
   0x7   : > { %s12470_s27 = sshll.u32 %s12376_s26, 4  ;;  %s12291_s28 = scalar_lea.vmem %s325_s19, 4096  ;;  %s341_s27 = int_to_ptr.vmem [resolvable:$true] %s12470_s27 }
   0x8   : > { %p12136_p4 = pneg %p12456_p3  ;;  %p12292_p7 = scmp.ne.s32.totalorder %s325_s19, %s12291_s28 }
   0x9   : > { %p12299_p10 = scmp.lt.s32.totalorder %s325_s19, %s325_s19  ;;  %p12300_p11 = scmp.lt.s32.totalorder %s12291_s28, %s12291_s28 }
   0xa   : > { %p12466_p5 = pnand %p12452_p2, %p12136_p4 }
   0xb   : > { %p12301_p12 = por %p12300_p11, %p12299_p10 }
   0xc   : > { %p12282_p6 = pneg %p12466_p5 }
   0xe   : > { %p12294_p8 = pnand %p12292_p7, %p12282_p6 }
  0x10   : > { %p12295_p9 = pneg %p12294_p8 }
  0x12   : > { %p12302_p13 = pnand %p12301_p12, %p12295_p9 }
  0x14   : > { %12305 = shalt.err (!%p12302_p13)
}
  0x15   : > { %s12377_s29 = smov 128   ;;  %s12378_s30 = smov 8  }
  0x16   : > { %12142 = dma.hbm_to_vmem [thread:$0]  (!%p12466_p5), %s16655_s5, 4096, %s325_s19, [#allocation5], %s12377_s29, %s12377_s29, %s12378_s30  }
  0x17   : > { %s12317_s14 = scalar_lea.vmem %s12462_s24, 768  ;;  %p12325_p7 = scmp.lt.s32.totalorder %s12462_s24, %s12462_s24 }
  0x18   : > { %p12318_p0 = scmp.ne.s32.totalorder %s12462_s24, %s12317_s14  ;;  %p12326_p8 = scmp.lt.s32.totalorder %s12317_s14, %s12317_s14 }
  0x1a   : > { %p12320_p1 = pnand %p12318_p0, %p12282_p6  ;;  %p12327_p9 = por %p12326_p8, %p12325_p7 }
  0x1c   : > { %p12321_p4 = pneg %p12320_p1 }
  0x1e   : > { %p12328_p10 = pnand %p12327_p9, %p12321_p4 }
  0x20   : > { %12331 = shalt.err (!%p12328_p10)
}
  0x21   : > { %s12379_s15 = smov 384   ;;  %s12380_s16 = smov 24  }
  0x22   : > { %12139 = dma.hbm_to_vmem [thread:$0]  (!%p12466_p5), %s16651_s1, 768, %s12462_s24, [#allocation3], %s12379_s15, %s12379_s15, %s12380_s16  }
  0x23   : > { %s12343_s23 = scalar_lea.vmem %s341_s27, 4096  ;;  %p12351_p0 = scmp.lt.s32.totalorder %s341_s27, %s341_s27 }
  0x24   : > { %p12344_p11 = scmp.ne.s32.totalorder %s341_s27, %s12343_s23  ;;  %p12352_p1 = scmp.lt.s32.totalorder %s12343_s23, %s12343_s23 }
  0x26   : > { %p12346_p12 = pnand %p12344_p11, %p12282_p6  ;;  %p12353_p4 = por %p12352_p1, %p12351_p0 }
  0x28   : > { %p12347_p13 = pneg %p12346_p12 }
  0x2a   : > { %p12354_p7 = pnand %p12353_p4, %p12347_p13 }
  0x2c   : > { %12357 = shalt.err (!%p12354_p7)
}
  0x2d   : > { %12145 = dma.hbm_to_vmem [thread:$0]  (!%p12466_p5), %s16657_s7, 4096, %s341_s27, [#allocation5], %s12377_s29, %s12377_s29, %s12378_s30  }
  0x2e   : > { %374 = sbr.rel (%p12456_p3) target bundleno = 2518 (0x9d6), region = 64 }
  0x33   : > { %12363 = dma.done.wait (%p12452_p2), [#allocation3], 768  }
  0x34   : > { %12365 = vsyncadd (%p12452_p2), [#allocation3], 4294966528 }
  0x35   : > { %12367 = dma.done.wait (%p12452_p2), [#allocation5], 8192  }
  0x36   : > { %12369 = vsyncadd (%p12452_p2), [#allocation5], 4294959104  ;;  %s9080_s24 = sshll.u32 %s9069_s20, 3  ;;  %v12381_v0 = vmov 0.0   ;;  %vm465_vm0 = vcmask 130048   ;;  %v446_v1 = vld [vmem:[#allocation2 + $0x20] sm:$0xff] }
  0x37   : > { %558 = vmatprep.mubr.f32.mxu0 %v12381_v0  ;;  %p423_p5 = scmp.lt.s32.totalorder %s9080_s24, 15  ;;  %731 = vmatprep.mubr.f32.mxu1 %v12381_v0  ;;  %v445_v2 = vld [vmem:[#allocation2 + $0x18] sm:$0xff]  ;;  %v443_v3 = vld [vmem:[#allocation2 + $0x8] sm:$0xff]  ;;  %v12528_v4 = vand.u32 4294901760, %v446_v1  ;;  %v442_v7 = vld [vmem:[#allocation2] sm:$0xff]  ;;  %vm8973_vm1 = vcmask 64512  }
  0x38   : > { %v12530_v5 = vand.u32 4294901760, %v445_v2  ;;  %v12532_v6 = vand.u32 4294901760, %v443_v3  ;;  %v12536_v10 = vand.u32 4294901760, %v442_v7 }
  0x39   : > { %s17927_s24 = smov (!%p423_p5, %s9080_s24), 15  ;;  %519 = vmatprep.subr.mxu0 %v12528_v4  ;;  %v12544_v15 = vsub.f32 %v446_v1, %v12528_v4 }
  0x3a   : > { %s9081_s22 = sshll.u32 %s17927_s24, 3  ;;  %v12549_v17 = vsub.f32 %v445_v2, %v12530_v5  ;;  %v12552_v18 = vsub.f32 %v443_v3, %v12532_v6  ;;  %521 = vmatpush1.msra.mxu0 %v12530_v5  ;;  %v12556_v19 = vsub.f32 %v442_v7, %v12536_v10 }
  0x3b   : > { %s12526_s21 = scalar_lea.vmem %s16650_s0, %s9081_s22  ;;  %523 = vmatprep.subr.mxu0 %v12532_v6  ;;  %v677_v23 = vand.u32 4294901760, %v12544_v15  ;;  %s16626_s30 = scalar_lea.vmem %s16661_s11, %s9081_s22 }
  0x3c   : > { %v434_v8 = vld [vmem:[%s12526_s21] sm:$0xff]  ;;  %v435_v9 = vld [vmem:[%s12526_s21 + $0x8] sm:$0xff]  ;;  %v436_v13 = vld [vmem:[%s12526_s21 + $0x10] sm:$0xff]  ;;  %v683_v25 = vand.u32 4294901760, %v12549_v17  ;;  %v689_v26 = vand.u32 4294901760, %v12552_v18  ;;  %525 = vmatpush1.msra.mxu0 %v12536_v10  ;;  %v695_v27 = vand.u32 4294901760, %v12556_v19 }
  0x3d   : > { %v467_v11 = vsel %vm465_vm0, %v434_v8, 0  ;;  %v470_v12 = vsel %vm465_vm0, %v435_v9, 0  ;;  %v437_v14 = vld [vmem:[%s12526_s21 + $0x18] sm:$0xff]  ;;  %v473_v21 = vsel %vm465_vm0, %v436_v13, 0  ;;  %v678_v31 = vsub.f32 %v12544_v15, %v677_v23  ;;  %818 = vmatprep.subr.mxu0 %v12544_v15  ;;  %v438_v39 = vld [vmem:[%s12526_s21 + $0x20] sm:$0xff]  ;;  %v439_v40 = vld [vmem:[%s12526_s21 + $0x28] sm:$0xff] }
  0x3e   : > { %v12546_v16 = vand.u32 4294901760, %v467_v11  ;;  %v12558_v20 = vand.u32 4294901760, %v470_v12  ;;  %v476_v22 = vsel %vm465_vm0, %v437_v14, 0  ;;  %v12574_v29 = vand.u32 4294901760, %v473_v21  ;;  %v440_v51 = vld [vmem:[%s12526_s21 + $0x30] sm:$0xff]  ;;  %v441_v59 = vld [vmem:[%s12526_s21 + $0x38] sm:$0xff] }
  0x3f   : > { %v12576_v30 = vand.u32 4294901760, %v476_v22  ;;  %v684_v33 = vsub.f32 %v12549_v17, %v683_v25  ;;  %v690_v34 = vsub.f32 %v12552_v18, %v689_v26  ;;  %v696_v35 = vsub.f32 %v12556_v19, %v695_v27 }
  0x40   : > { %v12565_v24 = vsub.f32 %v467_v11, %v12546_v16  ;;  %v12572_v28 = vsub.f32 %v470_v12, %v12558_v20  ;;  %v12598_v37 = vsub.f32 %v473_v21, %v12574_v29  ;;  %v679_v41 = vand.u32 4294901760, %v678_v31 }
  0x41   : > { %v12601_v38 = vsub.f32 %v476_v22, %v12576_v30  ;;  %v685_v43 = vand.u32 4294901760, %v684_v33  ;;  %v691_v44 = vand.u32 4294901760, %v690_v34  ;;  %v697_v45 = vand.u32 4294901760, %v696_v35 }
  0x42   : > { %v12582_v32 = vand.u32 4294901760, %v12565_v24  ;;  %v12595_v36 = vand.u32 4294901760, %v12572_v28  ;;  %v12610_v47 = vand.u32 4294901760, %v12598_v37  ;;  %680 = vmatprep.subr.mxu1 %v679_v41  ;;  %v479_v49 = vsel %vm465_vm0, %v438_v39, 0 }
  0x43   : > { %v482_v50 = vsel %vm465_vm0, %v439_v40, 0  ;;  %686 = vmatpush1.msra.mxu1 %v685_v43  ;;  %v12618_v52 = vand.u32 4294901760, %v12601_v38  ;;  %v12620_v53 = vand.u32 4294901760, %v479_v49  ;;  %v485_v58 = vsel %vm465_vm0, %v440_v51, 0 }
  0x44   : > { %v562_v42 = vsub.f32 %v12565_v24, %v12582_v32  ;;  %v573_v46 = vsub.f32 %v12572_v28, %v12595_v36  ;;  %692 = vmatprep.subr.mxu1 %v691_v44  ;;  %v584_v55 = vsub.f32 %v12598_v37, %v12610_v47  ;;  %v12627_v56 = vand.u32 4294901760, %v482_v50 }
  0x45   : > { %698 = vmatpush1.msra.mxu1 %v697_v45  ;;  %v12631_v57 = vsub.f32 %v479_v49, %v12620_v53  ;;  %v595_v60 = vsub.f32 %v12601_v38, %v12618_v52  ;;  %v12651_v1 = vand.u32 4294901760, %v485_v58  ;;  %v488_v2 = vsel %vm465_vm0, %v441_v59, 0 }
  0x46   : > { %v12612_v48 = vand.u32 4294901760, %v562_v42  ;;  %v12623_v54 = vand.u32 4294901760, %v573_v46  ;;  %733 = vmatmul.mubr.f32.vlgmr.msra.gmra.mxu1 %v12546_v16  ;;  %954 = vmatprep.subr.mxu1 %v12528_v4  ;;  %v12643_v61 = vand.u32 4294901760, %v584_v55  ;;  %v12649_v63 = vsub.f32 %v482_v50, %v12627_v56 }
  0x47   : > { %738 = vmatprep.mubr.f32.mxu1 %v12381_v0  ;;  %956 = vmatpush1.msra.mxu1 %v12530_v5  ;;  %v12646_v62 = vand.u32 4294901760, %v12631_v57  ;;  %v12659_v3 = vand.u32 4294901760, %v595_v60  ;;  %v12670_v9 = vsub.f32 %v485_v58, %v12651_v1  ;;  %v12672_v11 = vand.u32 4294901760, %v488_v2  ;;  %v2141_v60 = vld [vmem:[%s16653_s3 + $0x48] sm:$0xff] }
  0x48   : > { %564 = vmatmul.mubr.f32.vlgmr.msra.gmra.mxu0 %v12612_v48  ;;  %958 = vmatprep.subr.mxu1 %v12532_v6  ;;  %v12666_v8 = vand.u32 4294901760, %v12649_v63 }
  0x49   : > { %821 = vmatpush1.msra.mxu0 %v12549_v17  ;;  %569 = vmatprep.mubr.f32.mxu0 %v12381_v0  ;;  %v606_v7 = vsub.f32 %v12631_v57, %v12646_v62  ;;  %v12686_v14 = vand.u32 4294901760, %v12670_v9  ;;  %v12689_v21 = vsub.f32 %v488_v2, %v12672_v11  ;;  %v12973_v2 = vand.u32 4294901760, %v2141_v60 }
  0x4a   : > { %824 = vmatprep.subr.mxu0 %v12552_v18  ;;  %740 = vmatmul.mubr.f32.gmra.mxu1 %v12558_v20  ;;  %v617_v13 = vsub.f32 %v12649_v63, %v12666_v8 }
  0x4b   : > { %827 = vmatpush1.msra.mxu0 %v12556_v19  ;;  %745 = vmatprep.mubr.f32.mxu1 %v12381_v0  ;;  %v12681_v12 = vand.u32 4294901760, %v606_v7  ;;  %v628_v15 = vsub.f32 %v12670_v9, %v12686_v14  ;;  %v12700_v22 = vand.u32 4294901760, %v12689_v21  ;;  %17268 = vst [vmem:[#allocation25_spill] sm:$0xff] %v12973_v2 }
  0x4c   : > { %575 = vmatmul.mubr.f32.gmra.mxu0 %v12623_v54  ;;  %960 = vmatpush1.msra.mxu1 %v12536_v10 }
  0x4d   : > { %580 = vmatprep.mubr.f32.mxu0 %v12381_v0  ;;  %1097 = vmatprep.subr.mxu0 %v677_v23  ;;  %v447_v23 = vld [vmem:[#allocation2 + $0x28] sm:$0xff]  ;;  %v12706_v31 = vand.u32 4294901760, %v628_v15  ;;  %v639_v33 = vsub.f32 %v12689_v21, %v12700_v22 }
  0x4e   : > { %747 = vmatmul.mubr.f32.gmra.mxu1 %v12574_v29  ;;  %1228 = vmatprep.subr.mxu1 %v12528_v4  ;;  %v12695_v4 = vand.u32 4294901760, %v617_v13  ;;  %v12710_v34 = vand.u32 4294901760, %v447_v23 }
  0x4f   : > { %752 = vmatprep.mubr.f32.mxu1 %v12381_v0  ;;  %v12716_v35 = vand.u32 4294901760, %v639_v33 }
  0x50   : > { %586 = vmatmul.mubr.f32.gmra.mxu0 %v12643_v61  ;;  %v12719_v39 = vsub.f32 %v447_v23, %v12710_v34 }
  0x51   : > { %591 = vmatprep.mubr.f32.mxu0 %v12381_v0 }
  0x52   : > { %754 = vmatmul.mubr.f32.gmra.mxu1 %v12576_v30  ;;  %v12726_v40 = vand.u32 4294901760, %v12719_v39 }
  0x53   : > { %759 = vmatprep.mubr.f32.mxu1 %v12381_v0 }
  0x54   : > { %597 = vmatmul.mubr.f32.gmra.mxu0 %v12659_v3  ;;  %v1503_v41 = vsub.f32 %v12719_v39, %v12726_v40 }
  0x55   : > { %602 = vmatprep.mubr.f32.mxu0 %v12381_v0 }
  0x56   : > { %761 = vmatmul.mubr.f32.gmra.mxu1 %v12620_v53  ;;  %v1504_v42 = vand.u32 4294901760, %v1503_v41 }
  0x57   : > { %766 = vmatprep.mubr.f32.mxu1 %v12381_v0 }
  0x58   : > { %608 = vmatmul.mubr.f32.gmra.mxu0 %v12681_v12 }
  0x59   : > { %613 = vmatprep.mubr.f32.mxu0 %v12381_v0 }
  0x5a   : > { %768 = vmatmul.mubr.f32.gmra.mxu1 %v12627_v56 }
  0x5b   : > { %773 = vmatprep.mubr.f32.mxu1 %v12381_v0 }
  0x5c   : > { %619 = vmatmul.mubr.f32.gmra.mxu0 %v12695_v4 }
  0x5d   : > { %624 = vmatprep.mubr.f32.mxu0 %v12381_v0 }
  0x5e   : > { %775 = vmatmul.mubr.f32.gmra.mxu1 %v12651_v1 }
  0x5f   : > { %780 = vmatprep.mubr.f32.mxu1 %v12381_v0 }
  0x60   : > { %630 = vmatmul.mubr.f32.gmra.mxu0 %v12706_v31 }
  0x61   : > { %635 = vmatprep.mubr.f32.mxu0 %v12381_v0 }
  0x62   : > { %782 = vmatmul.mubr.f32.gmra.mxu1 %v12672_v11 }
  0x63   : > { %993 = vmatprep.mubr.f32.mxu1 %v12381_v0 }
  0x64   : > { %641 = vmatmul.mubr.f32.gmra.mxu0 %v12716_v35 }
  0x65   : > { %860 = vmatprep.mubr.f32.mxu0 %v12381_v0 }
  0x66   : > { %997 = vmatmul.mubr.f32.vlgmr.msra.gmra.mxu1 %v12582_v32 }
  0x67   : > { %1230 = vmatpush1.msra.mxu1 %v12530_v5  ;;  %1002 = vmatprep.mubr.f32.mxu1 %v12381_v0  ;;  %v444_v5 = vld [vmem:[#allocation2 + $0x10] sm:$0xff] }
  0x68   : > { %863 = vmatmul.mubr.f32.vlgmr.msra.gmra.mxu0 %v12565_v24  ;;  %1232 = vmatprep.subr.mxu1 %v12532_v6  ;;  %v12760_v6 = vand.u32 4294901760, %v444_v5 }
  0x69   : > { %1101 = vmatpush1.msra.mxu0 %v683_v25  ;;  %868 = vmatprep.mubr.f32.mxu0 %v12381_v0  ;;  %v2146_v25 = vld [vmem:[%s16653_s3 + $0x70] sm:$0xff] }
  0x6a   : > { %1105 = vmatprep.subr.mxu0 %v689_v26  ;;  %1006 = vmatmul.mubr.f32.gmra.mxu1 %v12595_v36 }
  0x6b   : > { %1109 = vmatpush1.msra.mxu0 %v695_v27  ;;  %1011 = vmatprep.mubr.f32.mxu1 %v12381_v0  ;;  %v12895_v27 = vand.u32 4294901760, %v2146_v25 }
  0x6c   : > { %871 = vmatmul.mubr.f32.gmra.mxu0 %v12572_v28  ;;  %10180 = vmatprep.subr.mxu0 %v12710_v34 }
  0x6d   : > { %876 = vmatprep.mubr.f32.mxu0 %v12381_v0  ;;  %1234 = vmatpush1.msra.mxu1 %v12536_v10  ;;  %v12767_v10 = vsub.f32 %v444_v5, %v12760_v6  ;;  %17254 = vst [vmem:[#allocation11_spill] sm:$0xff] %v12895_v27 }
  0x6e   : > { %10196 = vmatprep.subr.mxu1 %v1504_v42  ;;  %1015 = vmatmul.mubr.f32.gmra.mxu1 %v12610_v47 }
  0x6f   : > { %1020 = vmatprep.mubr.f32.mxu1 %v12381_v0  ;;  %v12774_v17 = vand.u32 4294901760, %v12767_v10 }
  0x70   : > { %879 = vmatmul.mubr.f32.gmra.mxu0 %v12598_v37 }
  0x71   : > { %884 = vmatprep.mubr.f32.mxu0 %v12381_v0  ;;  %v1510_v18 = vsub.f32 %v12767_v10, %v12774_v17 }
  0x72   : > { %1024 = vmatmul.mubr.f32.gmra.mxu1 %v12618_v52 }
  0x73   : > { %1029 = vmatprep.mubr.f32.mxu1 %v12381_v0  ;;  %v1511_v19 = vand.u32 4294901760, %v1510_v18 }
  0x74   : > { %887 = vmatmul.mubr.f32.gmra.mxu0 %v12601_v38 }
  0x75   : > { %892 = vmatprep.mubr.f32.mxu0 %v12381_v0 }
  0x76   : > { %1033 = vmatmul.mubr.f32.gmra.mxu1 %v12646_v62 }
  0x77   : > { %1038 = vmatprep.mubr.f32.mxu1 %v12381_v0 }
  0x78   : > { %895 = vmatmul.mubr.f32.gmra.mxu0 %v12631_v57 }
  0x79   : > { %900 = vmatprep.mubr.f32.mxu0 %v12381_v0 }
  0x7a   : > { %1042 = vmatmul.mubr.f32.gmra.mxu1 %v12666_v8 }
  0x7b   : > { %1047 = vmatprep.mubr.f32.mxu1 %v12381_v0 }
  0x7c   : > { %903 = vmatmul.mubr.f32.gmra.mxu0 %v12649_v63 }
  0x7d   : > { %908 = vmatprep.mubr.f32.mxu0 %v12381_v0 }
  0x7e   : > { %1051 = vmatmul.mubr.f32.gmra.mxu1 %v12686_v14 }
  0x7f   : > { %1056 = vmatprep.mubr.f32.mxu1 %v12381_v0 }
  0x80   : > { %911 = vmatmul.mubr.f32.gmra.mxu0 %v12670_v9 }
  0x81   : > { %916 = vmatprep.mubr.f32.mxu0 %v12381_v0 }
  0x82   : > { %1060 = vmatmul.mubr.f32.gmra.mxu1 %v12700_v22 }
  0x83   : > { %1267 = vmatprep.mubr.f32.mxu1 %v12381_v0 }
  0x84   : > { %919 = vmatmul.mubr.f32.gmra.mxu0 %v12689_v21 }
  0x85   : > { %1142 = vmatprep.mubr.f32.mxu0 %v12381_v0 }
  0x86   : > { %1269 = vmatmul.mubr.f32.vlgmr.msra.gmra.mxu1 %v12546_v16 }
  0x87   : > { %10197 = vmatpush3.msra.mxu1 %v1504_v42  ;;  %1274 = vmatprep.mubr.f32.mxu1 %v12381_v0  ;;  %v2138_v42 = vld [vmem:[%s16653_s3 + $0x30] sm:$0xff] }
  0x88   : > { %1144 = vmatmul.mubr.f32.vlgmr.msra.gmra.mxu0 %v12546_v16  ;;  %10198 = vmatprep.subr.mxu1 %v1511_v19 }
  0x89   : > { %10181 = vmatpush3.msra.mxu0 %v12710_v34  ;;  %1149 = vmatprep.mubr.f32.mxu0 %v12381_v0 }
  0x8a   : > { %10182 = vmatprep.subr.mxu0 %v12760_v6  ;;  %1276 = vmatmul.mubr.f32.gmra.mxu1 %v12558_v20 }
  0x8b   : > { %10183 = vmatpush3.msra.mxu0 %v12760_v6  ;;  %1281 = vmatprep.mubr.f32.mxu1 %v12381_v0 }
  0x8c   : > { %1151 = vmatmul.mubr.f32.gmra.mxu0 %v12558_v20  ;;  %10212 = vmatprep.subr.mxu0 %v12719_v39 }
  0x8d   : > { %1156 = vmatprep.mubr.f32.mxu0 %v12381_v0  ;;  %10199 = vmatpush3.msra.mxu1 %v1511_v19 }
  0x8e   : > { %10228 = vmatprep.subr.mxu1 %v12710_v34  ;;  %1283 = vmatmul.mubr.f32.gmra.mxu1 %v12574_v29 }
  0x8f   : > { %1288 = vmatprep.mubr.f32.mxu1 %v12381_v0 }
  0x90   : > { %1158 = vmatmul.mubr.f32.gmra.mxu0 %v12574_v29 }
  0x91   : > { %1163 = vmatprep.mubr.f32.mxu0 %v12381_v0 }
  0x92   : > { %1290 = vmatmul.mubr.f32.gmra.mxu1 %v12576_v30 }
  0x93   : > { %1295 = vmatprep.mubr.f32.mxu1 %v12381_v0 }
  0x94   : > { %1165 = vmatmul.mubr.f32.gmra.mxu0 %v12576_v30 }
  0x95   : > { %1170 = vmatprep.mubr.f32.mxu0 %v12381_v0 }
  0x96   : > { %1297 = vmatmul.mubr.f32.gmra.mxu1 %v12620_v53 }
  0x97   : > { %1302 = vmatprep.mubr.f32.mxu1 %v12381_v0 }
  0x98   : > { %1172 = vmatmul.mubr.f32.gmra.mxu0 %v12620_v53 }
  0x99   : > { %1177 = vmatprep.mubr.f32.mxu0 %v12381_v0 }
  0x9a   : > { %1304 = vmatmul.mubr.f32.gmra.mxu1 %v12627_v56 }
  0x9b   : > { %1309 = vmatprep.mubr.f32.mxu1 %v12381_v0 }
  0x9c   : > { %1179 = vmatmul.mubr.f32.gmra.mxu0 %v12627_v56 }
  0x9d   : > { %1184 = vmatprep.mubr.f32.mxu0 %v12381_v0 }
  0x9e   : > { %1311 = vmatmul.mubr.f32.gmra.mxu1 %v12651_v1 }
  0x9f   : > { %1316 = vmatprep.mubr.f32.mxu1 %v12381_v0 }
  0xa0   : > { %1186 = vmatmul.mubr.f32.gmra.mxu0 %v12651_v1 }
  0xa1   : > { %1191 = vmatprep.mubr.f32.mxu0 %v12381_v0  ;;  %v450_v0 = vlaneseq }
  0xa2   : > { %1318 = vmatmul.mubr.f32.gmra.mxu1 %v12672_v11 }
  0xa3   : > { %10200 = vmatprep.mubr.f32.mxu1 %v12546_v16 }
  0xa4   : > { %1193 = vmatmul.mubr.f32.gmra.mxu0 %v12672_v11 }
  0xa5   : > { %10184 = vmatprep.mubr.f32.mxu0 %v12612_v48 }
  0xa6   : > { %10201 = vmatmul.mubr.f32.vlgmr.msra.gmra.mxu1 %v12558_v20 }
  0xa7   : > { %10229 = vmatpush3.msra.mxu1 %v12710_v34  ;;  %10203 = vmatprep.mubr.f32.mxu1 %v12574_v29 }
  0xa8   : > { %10185 = vmatmul.mubr.f32.vlgmr.msra.gmra.mxu0 %v12623_v54  ;;  %10230 = vmatprep.subr.mxu1 %v12760_v6  ;;  %v2142_v54 = vld [vmem:[%s16653_s3 + $0x50] sm:$0xff] }
  0xa9   : > { %10213 = vmatpush3.msra.mxu0 %v12719_v39  ;;  %10187 = vmatprep.mubr.f32.mxu0 %v12643_v61  ;;  %v12959_v58 = vand.u32 4294901760, %v2142_v54 }
  0xaa   : > { %10214 = vmatprep.subr.mxu0 %v12767_v10  ;;  %10204 = vmatmul.mubr.f32.gmra.mxu1 %v12576_v30 }
  0xab   : > { %10215 = vmatpush3.msra.mxu0 %v12767_v10  ;;  %10206 = vmatprep.mubr.f32.mxu1 %v12620_v53  ;;  %17265 = vst [vmem:[#allocation22_spill] sm:$0xff] %v12959_v58 }
  0xac   : > { %10188 = vmatmul.mubr.f32.gmra.mxu0 %v12659_v3  ;;  %10244 = vmatprep.subr.mxu0 %v12726_v40 }
  0xad   : > { %10190 = vmatprep.mubr.f32.mxu0 %v12681_v12  ;;  %10231 = vmatpush3.msra.mxu1 %v12760_v6 }
  0xae   : > { %10260 = vmatprep.subr.mxu1 %v12710_v34  ;;  %10207 = vmatmul.mubr.f32.gmra.mxu1 %v12627_v56 }
  0xaf   : > { %10209 = vmatprep.mubr.f32.mxu1 %v12651_v1 }
  0xb0   : > { %10191 = vmatmul.mubr.f32.gmra.mxu0 %v12695_v4 }
  0xb1   : > { %10193 = vmatprep.mubr.f32.mxu0 %v12706_v31 }
  0xb2   : > { %10210 = vmatmul.mubr.f32.gmra.mxu1 %v12672_v11 }
  0xb3   : > { %10232 = vmatprep.mubr.f32.mxu1 %v12582_v32 }
  0xb4   : > { %10194 = vmatmul.mubr.f32.gmra.mxu0 %v12716_v35 }
  0xb5   : > { %10216 = vmatprep.mubr.f32.mxu0 %v12565_v24  ;;  %v12887_v24 = vshrl.u32 %v450_v0, 7 }
  0xb6   : > { %10233 = vmatmul.mubr.f32.vlgmr.msra.gmra.mxu1 %v12595_v36 }
  0xb7   : > { %10261 = vmatpush3.msra.mxu1 %v12710_v34  ;;  %10235 = vmatprep.mubr.f32.mxu1 %v12610_v47  ;;  %v452_v36 = vsub.s32 0, %v12887_v24  ;;  %v2143_v47 = vld [vmem:[%s16653_s3 + $0x58] sm:$0xff] }
  0xb8   : > { %10217 = vmatmul.mubr.f32.vlgmr.msra.gmra.mxu0 %v12572_v28  ;;  %10262 = vmatprep.subr.mxu1 %v12760_v6  ;;  %v2145_v28 = vld [vmem:[%s16653_s3 + $0x68] sm:$0xff] }
  0xb9   : > { %10245 = vmatpush3.msra.mxu0 %v12726_v40  ;;  %10219 = vmatprep.mubr.f32.mxu0 %v12598_v37  ;;  %v12908_v32 = vand.u32 4294901760, %v2145_v28  ;;  %v2144_v37 = vld [vmem:[%s16653_s3 + $0x60] sm:$0xff] }
  0xba   : > { %10246 = vmatprep.subr.mxu0 %v12774_v17  ;;  %10236 = vmatmul.mubr.f32.gmra.mxu1 %v12618_v52  ;;  %v12929_v46 = vand.u32 4294901760, %v2144_v37 }
  0xbb   : > { %10247 = vmatpush3.msra.mxu0 %v12774_v17  ;;  %10238 = vmatprep.mubr.f32.mxu1 %v12646_v62  ;;  %17257 = vst [vmem:[#allocation14_spill] sm:$0xff] %v12908_v32  ;;  %v12927_v45 = vsub.f32 %v2145_v28, %v12908_v32 }
  0xbc   : > { %10220 = vmatmul.mubr.f32.gmra.mxu0 %v12601_v38  ;;  %10263 = vmatpush3.msra.mxu1 %v12760_v6  ;;  %v12919_v38 = vld [vmem:[%s16652_s2] sm:$0x7]  ;;  %17260 = vst [vmem:[#allocation17_spill] sm:$0xff] %v12929_v46  ;;  %v12942_v51 = vsub.f32 %v2144_v37, %v12929_v46 }
  0xbd   : > { %10222 = vmatprep.mubr.f32.mxu0 %v12631_v57  ;;  %17259 = vst [vmem:[#allocation16_spill] sm:$0xff] %v12927_v45  ;;  %v12939_v50 = vand.u32 4294901760, %v12927_v45  ;;  %v12946_v52 = vrot.slane %v12919_v38, %v452_v36 }
  0xbe   : > { %10239 = vmatmul.mubr.f32.gmra.mxu1 %v12666_v8  ;;  %17262 = vst [vmem:[#allocation19_spill] sm:$0xff] %v12942_v51  ;;  %v12957_v57 = vand.u32 4294901760, %v12942_v51  ;;  %v2140_v8 = vld [vmem:[%s16653_s3 + $0x40] sm:$0xff] }
  0xbf   : > { %10241 = vmatprep.mubr.f32.mxu1 %v12686_v14  ;;  %17261 = vst [vmem:[#allocation18_spill] sm:$0xff] %v12939_v50  ;;  %v12990_v14 = vsub.f32 %v2141_v60, %v12973_v2 }
  0xc0   : > { %10223 = vmatmul.mubr.f32.gmra.mxu0 %v12649_v63  ;;  %17264 = vst [vmem:[#allocation21_spill] sm:$0xff] %v12957_v57  ;;  %v2341_v63 = vsub.f32 %v12942_v51, %v12957_v57 }
  0xc1   : > { %10225 = vmatprep.mubr.f32.mxu0 %v12670_v9  ;;  %17271 = vst [vmem:[#allocation28_spill] sm:$0xff] %v12990_v14  ;;  %v13008_v34 = vand.u32 4294901760, %v12990_v14 }
  0xc2   : > { %10242 = vmatmul.mubr.f32.gmra.mxu1 %v12700_v22  ;;  %v2342_v12 = vand.u32 4294901760, %v2341_v63  ;;  %v2139_v22 = vld [vmem:[%s16653_s3 + $0x38] sm:$0xff] }
  0xc3   : > { %10264 = vmatprep.mubr.f32.mxu1 %v12546_v16  ;;  %17273 = vst [vmem:[#allocation30_spill] sm:$0xff] %v13008_v34  ;;  %v13013_v39 = vand.u32 4294901760, %v2139_v22  ;;  %v2362_v17 = vsub.f32 %v12990_v14, %v13008_v34 }
  0xc4   : > { %10226 = vmatmul.mubr.f32.gmra.mxu0 %v12689_v21  ;;  %v12992_v21 = vand.u32 4294901760, %v2140_v8 }
  0xc5   : > { %10248 = vmatprep.mubr.f32.mxu0 %v12546_v16  ;;  %v2147_v16 = vld [vmem:[%s16653_s3 + $0x78] sm:$0xff]  ;;  %17275 = vst [vmem:[#allocation32_spill] sm:$0xff] %v13013_v39  ;;  %v13029_v19 = vsub.f32 %v2139_v22, %v13013_v39  ;;  %v2363_v37 = vand.u32 4294901760, %v2362_v17 }
  0xc6   : > { %10265 = vmatmul.mubr.f32.vlgmr.msra.gmra.mxu1 %v12558_v20  ;;  %17272 = vst [vmem:[#allocation29_spill] sm:$0xff] %v12992_v21  ;;  %v13011_v35 = vsub.f32 %v2140_v8, %v12992_v21 }
  0xc7   : > { %10267 = vmatprep.mubr.f32.mxu1 %v12574_v29  ;;  %17277 = vst [vmem:[#allocation34_spill] sm:$0xff] %v13029_v19 }
  0xc8   : > { %10249 = vmatmul.mubr.f32.vlgmr.msra.gmra.mxu0 %v12558_v20  ;;  %v12885_v20 = vand.u32 4294901760, %v2147_v16  ;;  %17274 = vst [vmem:[#allocation31_spill] sm:$0xff] %v13011_v35  ;;  %v13026_v18 = vand.u32 4294901760, %v13011_v35 }
  0xc9   : > { %10251 = vmatprep.mubr.f32.mxu0 %v12574_v29 }
  0xca   : > { %10268 = vmatmul.mubr.f32.gmra.mxu1 %v12576_v30  ;;  %17252 = vst [vmem:[#allocation9_spill] sm:$0xff] %v12885_v20  ;;  %v12893_v26 = vsub.f32 %v2147_v16, %v12885_v20  ;;  %10276 = vmatprep.subr.mxu0 %v12885_v20  ;;  %17276 = vst [vmem:[#allocation33_spill] sm:$0xff] %v13026_v18  ;;  %v13034_v16 = vand.u32 4294901760, %v2138_v42 }
  0xcb   : > { %10270 = vmatprep.mubr.f32.mxu1 %v12620_v53  ;;  %10277 = vmatpush3.msra.mxu0 %v12885_v20 }
  0xcc   : > { %10252 = vmatmul.mubr.f32.gmra.mxu0 %v12576_v30  ;;  %17253 = vst [vmem:[#allocation10_spill] sm:$0xff] %v12893_v26  ;;  %v12903_v29 = vand.u32 4294901760, %v12893_v26  ;;  %v12906_v30 = vsub.f32 %v2146_v25, %v12895_v27  ;;  %10278 = vmatprep.subr.mxu0 %v12895_v27  ;;  %17278 = vst [vmem:[#allocation35_spill] sm:$0xff] %v13034_v16  ;;  %v2137_v25 = vld [vmem:[%s16653_s3 + $0x28] sm:$0xff] }
  0xcd   : > { %10254 = vmatprep.mubr.f32.mxu0 %v12620_v53  ;;  %10279 = vmatpush3.msra.mxu0 %v12895_v27  ;;  %v12948_v53 = vand.u32 4294901760, %v2143_v47 }
  0xce   : > { %10271 = vmatmul.mubr.f32.gmra.mxu1 %v12627_v56  ;;  %17255 = vst [vmem:[#allocation12_spill] sm:$0xff] %v12903_v29  ;;  %17256 = vst [vmem:[#allocation13_spill] sm:$0xff] %v12906_v30  ;;  %v2320_v43 = vsub.f32 %v12893_v26, %v12903_v29  ;;  %v12924_v44 = vand.u32 4294901760, %v12906_v30  ;;  %10280 = vmatprep.subr.mxu0 %v12908_v32 }
  0xcf   : > { %10273 = vmatprep.mubr.f32.mxu1 %v12651_v1  ;;  %10281 = vmatpush3.msra.mxu0 %v12908_v32  ;;  %17263 = vst [vmem:[#allocation20_spill] sm:$0xff] %v12948_v53  ;;  %v12962_v59 = vsub.f32 %v2143_v47, %v12948_v53  ;;  %v13045_v47 = vand.u32 4294901760, %v13029_v19 }
  0xd0   : > { %10255 = vmatmul.mubr.f32.gmra.mxu0 %v12627_v56  ;;  %17258 = vst [vmem:[#allocation15_spill] sm:$0xff] %v12924_v44  ;;  %v2321_v48 = vand.u32 4294901760, %v2320_v43  ;;  %v2327_v49 = vsub.f32 %v12906_v30, %v12924_v44  ;;  %10282 = vmatprep.subr.mxu0 %v12929_v46  ;;  %v2334_v56 = vsub.f32 %v12927_v45, %v12939_v50 }
  0xd1   : > { %10257 = vmatprep.mubr.f32.mxu0 %v12651_v1  ;;  %10283 = vmatpush3.msra.mxu0 %v12929_v46  ;;  %17266 = vst [vmem:[#allocation23_spill] sm:$0xff] %v12962_v59  ;;  %v12971_v1 = vsub.f32 %v2142_v54, %v12959_v58  ;;  %v12978_v7 = vand.u32 4294901760, %v12962_v59  ;;  %v2369_v43 = vsub.f32 %v13011_v35, %v13026_v18  ;;  %17279 = vst [vmem:[#allocation36_spill] sm:$0xff] %v13045_v47 }
  0xd2   : > { %10274 = vmatmul.mubr.f32.gmra.mxu1 %v12672_v11  ;;  %10320 = vmatprep.subr.mxu1 %v2321_v48  ;;  %v2328_v55 = vand.u32 4294901760, %v2327_v49  ;;  %v2335_v62 = vand.u32 4294901760, %v2334_v56  ;;  %v13052_v54 = vsub.f32 %v2138_v42, %v13034_v16 }
  0xd3   : > { %10321 = vmatpush3.msra.mxu1 %v2321_v48  ;;  %10284 = vmatprep.subr.mxu0 %v12948_v53  ;;  %17267 = vst [vmem:[#allocation24_spill] sm:$0xff] %v12971_v1  ;;  %17269 = vst [vmem:[#allocation26_spill] sm:$0xff] %v12978_v7  ;;  %v12987_v13 = vand.u32 4294901760, %v12971_v1  ;;  %v2348_v15 = vsub.f32 %v12962_v59, %v12978_v7  ;;  %v13047_v48 = vand.u32 4294901760, %v2137_v25 }
  0xd4   : > { %10258 = vmatmul.mubr.f32.gmra.mxu0 %v12672_v11  ;;  %10322 = vmatprep.subr.mxu1 %v2328_v55  ;;  %17281 = vst [vmem:[#allocation38_spill] sm:$0xff] %v13052_v54 }
  0xd5   : > { %10285 = vmatpush3.msra.mxu0 %v12948_v53  ;;  %10323 = vmatpush3.msra.mxu1 %v2328_v55  ;;  %17270 = vst [vmem:[#allocation27_spill] sm:$0xff] %v12987_v13  ;;  %v2355_v33 = vsub.f32 %v12971_v1, %v12987_v13  ;;  %v2349_v41 = vand.u32 4294901760, %v2348_v15  ;;  %17280 = vst [vmem:[#allocation37_spill] sm:$0xff] %v13047_v48  ;;  %v2136_v55 = vld [vmem:[%s16653_s3 + $0x20] sm:$0xff]  ;;  %v13063_v63 = vsub.f32 %v2137_v25, %v13047_v48 }
  0xd6   : > { %10286 = vmatprep.subr.mxu0 %v12959_v58  ;;  %10324 = vmatprep.subr.mxu1 %v2335_v62 }
  0xd7   : > { %10287 = vmatpush3.msra.mxu0 %v12959_v58  ;;  %10325 = vmatpush3.msra.mxu1 %v2335_v62  ;;  %v2356_v10 = vand.u32 4294901760, %v2355_v33  ;;  %v2376_v62 = vsub.f32 %v13029_v19, %v13045_v47  ;;  %17282 = vst [vmem:[#allocation39_spill] sm:$0xff] %v13063_v63  ;;  %v13080_v33 = vand.u32 4294901760, %v13063_v63 }
  0xd8   : > { %10288 = vmatprep.subr.mxu0 %v12973_v2  ;;  %10326 = vmatprep.subr.mxu1 %v2342_v12 }
  0xd9   : > { %10289 = vmatpush3.msra.mxu0 %v12973_v2  ;;  %10327 = vmatpush3.msra.mxu1 %v2342_v12  ;;  %v2135_v12 = vld [vmem:[%s16653_s3 + $0x18] sm:$0xff]  ;;  %17285 = vst [vmem:[#allocation42_spill] sm:$0xff] %v13080_v33 }
  0xda   : > { %10290 = vmatprep.subr.mxu0 %v12992_v21  ;;  %10328 = vmatprep.subr.mxu1 %v2349_v41 }
  0xdb   : > { %10291 = vmatpush3.msra.mxu0 %v12992_v21  ;;  %10329 = vmatpush3.msra.mxu1 %v2349_v41  ;;  %v13085_v41 = vand.u32 4294901760, %v2135_v12 }
  0xdc   : > { %10292 = vmatprep.subr.mxu0 %v13013_v39  ;;  %10330 = vmatprep.subr.mxu1 %v2356_v10 }
  0xdd   : > { %10293 = vmatpush3.msra.mxu0 %v13013_v39  ;;  %10331 = vmatpush3.msra.mxu1 %v2356_v10  ;;  %17287 = vst [vmem:[#allocation44_spill] sm:$0xff] %v13085_v41  ;;  %v2134_v10 = vld [vmem:[%s16653_s3 + $0x10] sm:$0xff] }
  0xde   : > { %10294 = vmatprep.subr.mxu0 %v13034_v16  ;;  %10332 = vmatprep.subr.mxu1 %v2363_v37 }
  0xdf   : > { %10295 = vmatpush3.msra.mxu0 %v13034_v16  ;;  %10333 = vmatpush3.msra.mxu1 %v2363_v37 }
  0xe0   : > { %10296 = vmatprep.subr.mxu0 %v13047_v48 }
  0xe1   : > { %10297 = vmatpush3.msra.mxu0 %v13047_v48 }
 0x106   : > { %v734_v11 = vpop.f32.mrf.mxu1 }
 0x108   : > { %v565_v61 = vpop.f32.mrf.mxu0  ;;  %v13003_v31 = vpop.f32.mrf.mxu1 }
 0x109   : > { %v566_v3 = vadd.f32 %v565_v61, %v12946_v52  ;;  %v2370_v61 = vand.u32 4294901760, %v2369_v43  ;;  %v13103_v43 = vsub.f32 %v2135_v12, %v13085_v41 }
 0x10a   : > { %v12984_v9 = vpop.f32.mrf.mxu0  ;;  %v741_v6 = vpop.f32.mrf.mxu1 }
 0x10b   : > { %v12995_v4 = vadd.f32 %v734_v11, %v566_v3  ;;  %v13065_v3 = vand.u32 4294901760, %v2136_v55  ;;  %v13071_v11 = vand.u32 4294901760, %v13052_v54  ;;  %10334 = vmatprep.subr.mxu1 %v2370_v61  ;;  %17289 = vst [vmem:[#allocation46_spill] sm:$0xff] %v13103_v43 }
 0x10c   : > { %v576_v23 = vpop.f32.mrf.mxu0  ;;  %v13040_v36 = vpop.f32.mrf.mxu1  ;;  %10335 = vmatpush3.msra.mxu1 %v2370_v61  ;;  %v2133_v61 = vld [vmem:[%s16653_s3 + $0x8] sm:$0xff] }
 0x10d   : > { %v577_v40 = vadd.f32 %v576_v23, %v12946_v52  ;;  %17283 = vst [vmem:[#allocation40_spill] sm:$0xff] %v13065_v3  ;;  %17284 = vst [vmem:[#allocation41_spill] sm:$0xff] %v13071_v11  ;;  %v2377_v23 = vand.u32 4294901760, %v2376_v62  ;;  %10298 = vmatprep.subr.mxu0 %v13065_v3 }
 0x10e   : > { %v13021_v5 = vpop.f32.mrf.mxu0  ;;  %v748_v60 = vpop.f32.mrf.mxu1  ;;  %10299 = vmatpush3.msra.mxu0 %v13065_v3 }
 0x10f   : > { %v13032_v0 = vadd.f32 %v741_v6, %v577_v40  ;;  %v13083_v40 = vsub.f32 %v2136_v55, %v13065_v3  ;;  %v2383_v6 = vsub.f32 %v13052_v54, %v13071_v11  ;;  %10336 = vmatprep.subr.mxu1 %v2377_v23  ;;  %10300 = vmatprep.subr.mxu0 %v13085_v41  ;;  %v13119_v11 = vand.u32 4294901760, %v13103_v43 }
 0x110   : > { %v587_v28 = vpop.f32.mrf.mxu0  ;;  %v13077_v22 = vpop.f32.mrf.mxu1  ;;  %10337 = vmatpush3.msra.mxu1 %v2377_v23  ;;  %10301 = vmatpush3.msra.mxu0 %v13085_v41  ;;  %v2132_v23 = vld [vmem:[%s16653_s3] sm:$0xff] }
 0x111   : > { %v588_v49 = vadd.f32 %v587_v28, %v12946_v52  ;;  %17286 = vst [vmem:[#allocation43_spill] sm:$0xff] %v13083_v40  ;;  %v2390_v28 = vsub.f32 %v13063_v63, %v13080_v33  ;;  %v13100_v37 = vand.u32 4294901760, %v13083_v40  ;;  %17291 = vst [vmem:[#allocation48_spill] sm:$0xff] %v13119_v11 }
 0x112   : > { %v13058_v56 = vpop.f32.mrf.mxu0  ;;  %v755_v25 = vpop.f32.mrf.mxu1 }
 0x113   : > { %v13068_v8 = vadd.f32 %v748_v60, %v588_v49  ;;  %17288 = vst [vmem:[#allocation45_spill] sm:$0xff] %v13100_v37  ;;  %v13105_v49 = vand.u32 4294901760, %v2134_v10  ;;  %v2384_v60 = vand.u32 4294901760, %v2383_v6  ;;  %v2391_v12 = vand.u32 4294901760, %v2390_v28 }
 0x114   : > { %v598_v15 = vpop.f32.mrf.mxu0  ;;  %v2397_v33 = vsub.f32 %v13083_v40, %v13100_v37 }
 0x115   : > { %v599_v42 = vadd.f32 %v598_v15, %v12946_v52  ;;  %17290 = vst [vmem:[#allocation47_spill] sm:$0xff] %v13105_v49  ;;  %v13114_v15 = vpop.f32.mrf.mxu1  ;;  %10338 = vmatprep.subr.mxu1 %v2384_v60  ;;  %10302 = vmatprep.subr.mxu0 %v13105_v49 }
 0x116   : > { %v13095_v17 = vpop.f32.mrf.mxu0  ;;  %10339 = vmatpush3.msra.mxu1 %v2384_v60  ;;  %v2398_v47 = vand.u32 4294901760, %v2397_v33  ;;  %10303 = vmatpush3.msra.mxu0 %v13105_v49 }
 0x117   : > { %v13108_v55 = vadd.f32 %v755_v25, %v599_v42  ;;  %v13122_v42 = vsub.f32 %v2134_v10, %v13105_v49  ;;  %v13126_v25 = vand.u32 4294901760, %v2133_v61  ;;  %v762_v37 = vpop.f32.mrf.mxu1  ;;  %v2404_v10 = vsub.f32 %v13103_v43, %v13119_v11  ;;  %10340 = vmatprep.subr.mxu1 %v2391_v12 }
 0x118   : > { %v609_v62 = vpop.f32.mrf.mxu0  ;;  %10341 = vmatpush3.msra.mxu1 %v2391_v12 }
 0x119   : > { %17292 = vst [vmem:[#allocation49_spill] sm:$0xff] %v13122_v42  ;;  %v610_v6 = vadd.f32 %v609_v62, %v12946_v52  ;;  %17293 = vst [vmem:[#allocation50_spill] sm:$0xff] %v13126_v25  ;;  %v13137_v18 = vand.u32 4294901760, %v13122_v42  ;;  %v13139_v62 = vand.u32 4294901760, %v2132_v23  ;;  %v13145_v13 = vsub.f32 %v2133_v61, %v13126_v25  ;;  %10304 = vmatprep.subr.mxu0 %v13126_v25  ;;  %v13148_v33 = vpop.f32.mrf.mxu1 }
 0x11a   : > { %v13132_v28 = vpop.f32.mrf.mxu0  ;;  %v2405_v11 = vand.u32 4294901760, %v2404_v10  ;;  %10305 = vmatpush3.msra.mxu0 %v13126_v25  ;;  %10342 = vmatprep.subr.mxu1 %v2398_v47 }
 0x11b   : > { %17294 = vst [vmem:[#allocation51_spill] sm:$0xff] %v13137_v18  ;;  %17295 = vst [vmem:[#allocation52_spill] sm:$0xff] %v13139_v62  ;;  %v13142_v34 = vadd.f32 %v762_v37, %v610_v6  ;;  %v2411_v7 = vsub.f32 %v13122_v42, %v13137_v18  ;;  %v13153_v57 = vsub.f32 %v2132_v23, %v13139_v62  ;;  %v13158_v61 = vand.u32 4294901760, %v13145_v13  ;;  %v769_v12 = vpop.f32.mrf.mxu1 }
 0x11c   : > { %17296 = vst [vmem:[#allocation53_spill] sm:$0xff] %v13145_v13  ;;  %v620_v60 = vpop.f32.mrf.mxu0  ;;  %10306 = vmatprep.subr.mxu0 %v13139_v62  ;;  %10343 = vmatpush3.msra.mxu1 %v2398_v47 }
 0x11d   : > { %17297 = vst [vmem:[#allocation54_spill] sm:$0xff] %v13153_v57  ;;  %v621_v37 = vadd.f32 %v620_v60, %v12946_v52  ;;  %17298 = vst [vmem:[#allocation55_spill] sm:$0xff] %v13158_v61  ;;  %v2412_v10 = vand.u32 4294901760, %v2411_v7  ;;  %v13164_v18 = vand.u32 4294901760, %v13153_v57  ;;  %10307 = vmatpush3.msra.mxu0 %v13139_v62  ;;  %10344 = vmatprep.subr.mxu1 %v2405_v11  ;;  %v13170_v44 = vpop.f32.mrf.mxu1 }
 0x11e   : > { %v13161_v6 = vpop.f32.mrf.mxu0  ;;  %v2418_v60 = vsub.f32 %v13145_v13, %v13158_v61  ;;  %10364 = vmatprep.subr.mxu0 %v12893_v26  ;;  %10345 = vmatpush3.msra.mxu1 %v2405_v11 }
 0x11f   : > { %17299 = vst [vmem:[#allocation56_spill] sm:$0xff] %v13164_v18  ;;  %v770_v23 = vadd.f32 %v769_v12, %v621_v37  ;;  %v2425_v47 = vsub.f32 %v13153_v57, %v13164_v18  ;;  %10346 = vmatprep.subr.mxu1 %v2412_v10  ;;  %v776_v37 = vpop.f32.mrf.mxu1 }
 0x120   : > { %v631_v50 = vpop.f32.mrf.mxu0  ;;  %v2419_v29 = vand.u32 4294901760, %v2418_v60  ;;  %10347 = vmatpush3.msra.mxu1 %v2412_v10 }
 0x121   : > { %v632_v7 = vadd.f32 %v631_v50, %v12946_v52  ;;  %v2426_v12 = vand.u32 4294901760, %v2425_v47  ;;  %v13177_v13 = vpop.f32.mrf.mxu1 }
 0x122   : > { %v13175_v42 = vpop.f32.mrf.mxu0  ;;  %10348 = vmatprep.subr.mxu1 %v2419_v29 }
 0x123   : > { %v777_v43 = vadd.f32 %v776_v37, %v632_v7  ;;  %10349 = vmatpush3.msra.mxu1 %v2419_v29  ;;  %v783_v18 = vpop.f32.mrf.mxu1 }
 0x124   : > { %v642_v61 = vpop.f32.mrf.mxu0  ;;  %10350 = vmatprep.subr.mxu1 %v2426_v12 }
 0x125   : > { %v643_v11 = vadd.f32 %v642_v61, %v12946_v52  ;;  %10351 = vmatpush3.msra.mxu1 %v2426_v12  ;;  %v13183_v57 = vpop.f32.mrf.mxu1 }
 0x126   : > { %v13180_v62 = vpop.f32.mrf.mxu0  ;;  %10408 = vmatprep.subr.mxu1 %v12885_v20 }
 0x127   : > { %v784_v50 = vadd.f32 %v783_v18, %v643_v11  ;;  %v998_v7 = vpop.f32.mrf.mxu1 }
 0x128   : > { %v864_v60 = vpop.f32.mrf.mxu0 }
 0x129   : > { %v865_v10 = vadd.f32 %v864_v60, %v12995_v4  ;;  %v13188_v40 = vpop.f32.mrf.mxu1 }
 0x12a   : > { %v13186_v47 = vpop.f32.mrf.mxu0 }
 0x12b   : > { %v999_v37 = vadd.f32 %v998_v7, %v865_v10  ;;  %v1007_v12 = vpop.f32.mrf.mxu1 }
 0x12c   : > { %v872_v29 = vpop.f32.mrf.mxu0 }
 0x12d   : > { %v873_v52 = vadd.f32 %v872_v29, %v13032_v0  ;;  %v13193_v25 = vpop.f32.mrf.mxu1 }
 0x12e   : > { %v13191_v61 = vpop.f32.mrf.mxu0 }
 0x12f   : > { %v1008_v18 = vadd.f32 %v1007_v12, %v873_v52  ;;  %v1016_v4 = vpop.f32.mrf.mxu1 }
 0x130   : > { %v880_v11 = vpop.f32.mrf.mxu0 }
 0x131   : > { %v881_v63 = vadd.f32 %v880_v11, %v13068_v8  ;;  %v13198_v10 = vpop.f32.mrf.mxu1 }
 0x132   : > { %v13196_v49 = vpop.f32.mrf.mxu0 }
 0x133   : > { %v1017_v60 = vadd.f32 %v1016_v4, %v881_v63  ;;  %v1025_v0 = vpop.f32.mrf.mxu1 }
 0x134   : > { %v888_v54 = vpop.f32.mrf.mxu0 }
 0x135   : > { %v889_v7 = vadd.f32 %v888_v54, %v13108_v55  ;;  %v13205_v12 = vpop.f32.mrf.mxu1 }
 0x136   : > { %v13201_v41 = vpop.f32.mrf.mxu0 }
 0x137   : > { %v13203_v29 = vadd.f32 %v1025_v0, %v889_v7  ;;  %v1034_v11 = vpop.f32.mrf.mxu1 }
 0x138   : > { %v896_v52 = vpop.f32.mrf.mxu0 }
 0x139   : > { %v897_v19 = vadd.f32 %v896_v52, %v13142_v34  ;;  %v13212_v4 = vpop.f32.mrf.mxu1 }
 0x13a   : > { %v13208_v8 = vpop.f32.mrf.mxu0 }
 0x13b   : > { %v13210_v3 = vadd.f32 %v1034_v11, %v897_v19  ;;  %v1043_v55 = vpop.f32.mrf.mxu1 }
 0x13c   : > { %v904_v63 = vpop.f32.mrf.mxu0 }
 0x13d   : > { %17300 = vst [vmem:[#allocation57_spill] sm:$0xff] %v13210_v3  ;;  %v905_v35 = vadd.f32 %v904_v63, %v770_v23  ;;  %v13218_v0 = vpop.f32.mrf.mxu1 }
 0x13e   : > { %v13214_v54 = vpop.f32.mrf.mxu0 }
 0x13f   : > { %v13216_v48 = vadd.f32 %v1043_v55, %v905_v35  ;;  %v1052_v34 = vpop.f32.mrf.mxu1 }
 0x140   : > { %v912_v7 = vpop.f32.mrf.mxu0 }
 0x141   : > { %17301 = vst [vmem:[#allocation58_spill] sm:$0xff] %v13216_v48  ;;  %v913_v14 = vadd.f32 %v912_v7, %v777_v43  ;;  %v13224_v11 = vpop.f32.mrf.mxu1 }
 0x142   : > { %v13220_v1 = vpop.f32.mrf.mxu0  ;;  %17303 = vst [vmem:[#allocation60_spill] sm:$0xff] %v13224_v11 }
 0x143   : > { %v13222_v52 = vadd.f32 %v1052_v34, %v913_v14  ;;  %v1061_v23 = vpop.f32.mrf.mxu1 }
 0x144   : > { %v920_v19 = vpop.f32.mrf.mxu0 }
 0x145   : > { %17302 = vst [vmem:[#allocation59_spill] sm:$0xff] %v13222_v52  ;;  %v921_v16 = vadd.f32 %v920_v19, %v784_v50  ;;  %v13230_v55 = vpop.f32.mrf.mxu1 }
 0x146   : > { %v13226_v39 = vpop.f32.mrf.mxu0  ;;  %17305 = vst [vmem:[#allocation62_spill] sm:$0xff] %v13230_v55 }
 0x147   : > { %v13228_v63 = vadd.f32 %v1061_v23, %v921_v16  ;;  %v1270_v43 = vpop.f32.mrf.mxu1 }
 0x148   : > { %v1145_v35 = vpop.f32.mrf.mxu0 }
 0x149   : > { %17304 = vst [vmem:[#allocation61_spill] sm:$0xff] %v13228_v63  ;;  %v1146_v59 = vadd.f32 %v1145_v35, %v999_v37  ;;  %v13236_v34 = vpop.f32.mrf.mxu1  ;;  %v456_v63 = vsub.s32 1, %v12887_v24 }
 0x14a   : > { %v13232_v21 = vpop.f32.mrf.mxu0 }
 0x14b   : > { %v13234_v7 = vadd.f32 %v1270_v43, %v1146_v59  ;;  %v1277_v50 = vpop.f32.mrf.mxu1 }
 0x14c   : > { %v1152_v14 = vpop.f32.mrf.mxu0 }
 0x14d   : > { %v1153_v51 = vadd.f32 %v1152_v14, %v1008_v18  ;;  %v13242_v23 = vpop.f32.mrf.mxu1  ;;  %12168 = vtanh.f32 %v13234_v7 }
 0x14e   : > { %v13238_v2 = vpop.f32.mrf.mxu0 }
 0x14f   : > { %v13240_v19 = vadd.f32 %v1277_v50, %v1153_v51  ;;  %v1284_v37 = vpop.f32.mrf.mxu1 }
 0x150   : > { %v1159_v16 = vpop.f32.mrf.mxu0 }
 0x151   : > { %v1160_v45 = vadd.f32 %v1159_v16, %v1017_v60  ;;  %v13250_v43 = vpop.f32.mrf.mxu1 }
 0x152   : > { %v13244_v58 = vpop.f32.mrf.mxu0 }
 0x153   : > { %v13246_v35 = vadd.f32 %v1284_v37, %v1160_v45  ;;  %v13254_v18 = vpop.f32.mrf.mxu1 }
 0x154   : > { %v13248_v59 = vpop.f32.mrf.mxu0 }
 0x155   : > { %17306 = vst [vmem:[#allocation63_spill] sm:$0xff] %v13246_v35  ;;  %v13258_v51 = vpop.f32.mrf.mxu1 }
 0x156   : > { %v13252_v30 = vpop.f32.mrf.mxu0  ;;  %17308 = vst [vmem:[#allocation65_spill] sm:$0xff] %v13258_v51 }
 0x157   : > { %v13262_v60 = vpop.f32.mrf.mxu1 }
 0x158   : > { %v13256_v14 = vpop.f32.mrf.mxu0  ;;  %17310 = vst [vmem:[#allocation67_spill] sm:$0xff] %v13262_v60 }
 0x159   : > { %17307 = vst [vmem:[#allocation64_spill] sm:$0xff] %v13256_v14  ;;  %v13266_v45 = vpop.f32.mrf.mxu1 }
 0x15a   : > { %v13260_v50 = vpop.f32.mrf.mxu0  ;;  %17312 = vst [vmem:[#allocation69_spill] sm:$0xff] %v13266_v45 }
 0x15b   : > { %17309 = vst [vmem:[#allocation66_spill] sm:$0xff] %v13260_v50  ;;  %v13270_v26 = vpop.f32.mrf.mxu1 }
 0x15c   : > { %v13264_v16 = vpop.f32.mrf.mxu0  ;;  %17314 = vst [vmem:[#allocation71_spill] sm:$0xff] %v13270_v26 }
 0x15d   : > { %17311 = vst [vmem:[#allocation68_spill] sm:$0xff] %v13264_v16  ;;  %v13274_v46 = vpop.f32.mrf.mxu1 }
 0x15e   : > { %v13268_v37 = vpop.f32.mrf.mxu0  ;;  %17316 = vst [vmem:[#allocation73_spill] sm:$0xff] %v13274_v46 }
 0x15f   : > { %17313 = vst [vmem:[#allocation70_spill] sm:$0xff] %v13268_v37  ;;  %v13278_v27 = vpop.f32.mrf.mxu1 }
 0x160   : > { %v13272_v53 = vpop.f32.mrf.mxu0  ;;  %17318 = vst [vmem:[#allocation75_spill] sm:$0xff] %v13278_v27 }
 0x161   : > { %17315 = vst [vmem:[#allocation72_spill] sm:$0xff] %v13272_v53  ;;  %v13282_v52 = vpop.f32.mrf.mxu1  ;;  %v457_v53 = vrot.slane %v12919_v38, %v456_v63 }
 0x162   : > { %v13276_v32 = vpop.f32.mrf.mxu0  ;;  %17320 = vst [vmem:[#allocation77_spill] sm:$0xff] %v13282_v52 }
 0x163   : > { %17317 = vst [vmem:[#allocation74_spill] sm:$0xff] %v13276_v32  ;;  %v13287_v45 = vpop.f32.mrf.mxu1  ;;  %v568_v27 = vadd.f32 %v12984_v9, %v457_v53  ;;  %v590_v3 = vadd.f32 %v13058_v56, %v457_v53 }
 0x164   : > { %v13280_v20 = vpop.f32.mrf.mxu0  ;;  %17322 = vst [vmem:[#allocation79_spill] sm:$0xff] %v13287_v45  ;;  %v579_v45 = vadd.f32 %v13021_v5, %v457_v53  ;;  %v601_v5 = vadd.f32 %v13095_v17, %v457_v53  ;;  %v623_v17 = vadd.f32 %v13161_v6, %v457_v53 }
 0x165   : > { %17319 = vst [vmem:[#allocation76_spill] sm:$0xff] %v13280_v20  ;;  %v13289_v26 = vpop.f32.mrf.mxu1  ;;  %v751_v56 = vadd.f32 %v13077_v22, %v590_v3  ;;  %v634_v22 = vadd.f32 %v13175_v42, %v457_v53 }
 0x166   : > { %v13285_v16 = vpop.f32.mrf.mxu0  ;;  %17323 = vst [vmem:[#allocation80_spill] sm:$0xff] %v13289_v26  ;;  %v737_v26 = vadd.f32 %v13003_v31, %v568_v27  ;;  %v744_v55 = vadd.f32 %v13040_v36, %v579_v45 }
 0x167   : > { %17321 = vst [vmem:[#allocation78_spill] sm:$0xff] %v13285_v16  ;;  %v10202_v48 = vpop.f32.mrf.mxu1  ;;  %v883_v45 = vadd.f32 %v13196_v49, %v751_v56  ;;  %v1167_v56 = vadd.f32 %v13248_v59, %v13203_v29 }
 0x168   : > { %v10186_v37 = vpop.f32.mrf.mxu0  ;;  %v867_v9 = vadd.f32 %v13186_v47, %v737_v26  ;;  %v875_v31 = vadd.f32 %v13191_v61, %v744_v55  ;;  %v612_v26 = vadd.f32 %v13132_v28, %v457_v53 }
 0x169   : > { %v13292_v60 = vpop.f32.mrf.mxu1 }
 0x16a   : > { %v1397_v46 = vpop.f32.mrf.mxu0  ;;  %v1001_v47 = vadd.f32 %v13188_v40, %v867_v9  ;;  %v645_v40 = vadd.f32 %v13180_v62, %v457_v53  ;;  %v1010_v28 = vadd.f32 %v13193_v25, %v875_v31  ;;  %v765_v9 = vadd.f32 %v13148_v33, %v612_v26 }
 0x16b   : > { %v13297_v52 = vpop.f32.mrf.mxu1  ;;  %v779_v33 = vadd.f32 %v13177_v13, %v634_v22 }
 0x16c   : > { %v10189_v32 = vpop.f32.mrf.mxu0  ;;  %v1148_v61 = vadd.f32 %v13232_v21, %v1001_v47  ;;  %v1155_v6 = vadd.f32 %v13238_v2, %v1010_v28  ;;  %v772_v21 = vadd.f32 %v13170_v44, %v623_v17  ;;  %v899_v42 = vadd.f32 %v13208_v8, %v765_v9  ;;  %v17333_v28 = vld [vmem:[#allocation64_spill] sm:$0xff] }
 0x16d   : > { %v13301_v16 = vpop.f32.mrf.mxu1 }
 0x16e   : > { %v13295_v20 = vpop.f32.mrf.mxu0  ;;  %17324 = vst [vmem:[#allocation81_spill] sm:$0xff] %v13301_v16  ;;  %v460_v16 = vsub.s32 2, %v12887_v24  ;;  %v758_v24 = vadd.f32 %v13114_v15, %v601_v5  ;;  %v1019_v5 = vadd.f32 %v13198_v10, %v883_v45  ;;  %v1273_v53 = vadd.f32 %v13236_v34, %v1148_v61  ;;  %v17330_v45 = vld [vmem:[#allocation65_spill] sm:$0xff] }
 0x16f   : > { %v13307_v14 = vpop.f32.mrf.mxu1  ;;  %v1280_v34 = vadd.f32 %v13242_v23, %v1155_v6 }
 0x170   : > { %v13299_v50 = vpop.f32.mrf.mxu0  ;;  %v13329_v36 = vrot.slane %v12919_v38, %v460_v16  ;;  %v891_v38 = vadd.f32 %v13201_v41, %v758_v24  ;;  %v786_v41 = vadd.f32 %v13183_v57, %v645_v40  ;;  %v1162_v44 = vadd.f32 %v13244_v58, %v1019_v5  ;;  %v17327_v24 = vld [vmem:[#allocation60_spill] sm:$0xff] }
 0x171   : > { %v13313_v35 = vpop.f32.mrf.mxu1  ;;  %12170 = vtanh.f32 %v1273_v53 }
 0x172   : > { %v13305_v63 = vpop.f32.mrf.mxu0  ;;  %17326 = vst [vmem:[#allocation83_spill] sm:$0xff] %v13313_v35  ;;  %v1408_v49 = vadd.f32 %v10186_v37, %v13329_v36  ;;  %v1398_v31 = vadd.f32 %v1397_v46, %v13329_v36  ;;  %v1028_v2 = vadd.f32 %v13205_v12, %v891_v38  ;;  %v907_v37 = vadd.f32 %v13214_v54, %v772_v21 }
 0x173   : > { %v13320_v27 = vpop.f32.mrf.mxu1  ;;  %v1428_v57 = vadd.f32 %v10189_v32, %v13329_v36  ;;  %v1037_v46 = vadd.f32 %v13212_v4, %v899_v42  ;;  %v915_v12 = vadd.f32 %v13220_v1, %v779_v33  ;;  %v923_v54 = vadd.f32 %v13226_v39, %v786_v41  ;;  %v17335_v33 = vld [vmem:[#allocation66_spill] sm:$0xff] }
 0x174   : > { %v13311_v51 = vpop.f32.mrf.mxu0  ;;  %v1555_v13 = vadd.f32 %v10202_v48, %v1408_v49  ;;  %v1169_v58 = vadd.f32 %v13252_v30, %v1028_v2  ;;  %v1549_v47 = vadd.f32 %v13292_v60, %v1398_v31  ;;  %v1418_v23 = vadd.f32 %v13295_v20, %v13329_v36 }
 0x175   : > { %17325 = vst [vmem:[#allocation82_spill] sm:$0xff] %v13311_v51  ;;  %v13326_v35 = vpop.f32.mrf.mxu1  ;;  %v1046_v48 = vadd.f32 %v13218_v0, %v907_v37  ;;  %12172 = vtanh.f32 %v13240_v19  ;;  %v1287_v32 = vadd.f32 %v13250_v43, %v1162_v44  ;;  %v1448_v1 = vadd.f32 %v13299_v50, %v13329_v36  ;;  %v17329_v0 = vld [vmem:[#allocation63_spill] sm:$0xff]  ;;  %v17331_v22 = vld [vmem:[#allocation81_spill] sm:$0xff] }
 0x176   : > { %v13318_v11 = vpop.f32.mrf.mxu0  ;;  %12174 = vtanh.f32 %v1280_v34  ;;  %v1292_v30 = vadd.f32 %v13254_v18, %v1167_v56  ;;  %v1567_v59 = vadd.f32 %v13297_v52, %v1428_v57  ;;  %v1055_v20 = vadd.f32 %v17327_v24, %v915_v12  ;;  %v17338_v12 = vld [vmem:[#allocation58_spill] sm:$0xff] }
 0x177   : > { %v10234_v3 = vpop.f32.mrf.mxu1  ;;  %12176 = vtanh.f32 %v17329_v0  ;;  %v1438_v19 = vadd.f32 %v13305_v63, %v13329_v36  ;;  %v1294_v61 = vadd.f32 %v17330_v45, %v1169_v58  ;;  %v1561_v18 = vadd.f32 %v17331_v22, %v1418_v23  ;;  %v13397_v23 = vpop.eup %12168  ;;  %v17343_v45 = vld [vmem:[#allocation74_spill] sm:$0xff] }
 0x178   : > { %v10218_v51 = vpop.f32.mrf.mxu0  ;;  %12178 = vtanh.f32 %v1287_v32  ;;  %v1579_v38 = vadd.f32 %v13307_v14, %v1448_v1  ;;  %v1176_v41 = vadd.f32 %v17335_v33, %v1037_v46  ;;  %v1458_v31 = vadd.f32 %v13318_v11, %v13329_v36  ;;  %v17341_v32 = vld [vmem:[#allocation70_spill] sm:$0xff]  ;;  %v17348_v33 = vld [vmem:[#allocation77_spill] sm:$0xff] }
 0x179   : > { %v1790_v15 = vpop.f32.mrf.mxu1  ;;  %v1674_v29 = vadd.f32 %v10218_v51, %v1555_v13  ;;  %v17328_v51 = vld [vmem:[#allocation62_spill] sm:$0xff]  ;;  %12180 = vtanh.f32 %v1292_v30  ;;  %v17337_v13 = vld [vmem:[#allocation67_spill] sm:$0xff]  ;;  %v1183_v1 = vadd.f32 %v17341_v32, %v1046_v48 }
 0x17a   : > { %v1666_v55 = vpop.f32.mrf.mxu0  ;;  %v13373_v17 = vadd.f32 %v17328_v51, %v923_v54  ;;  %12182 = vtanh.f32 %v1294_v61  ;;  %v1585_v30 = vadd.f32 %v13326_v35, %v1458_v31  ;;  %v1190_v61 = vadd.f32 %v17343_v45, %v1055_v20 }
 0x17b   : > { %v10237_v25 = vpop.f32.mrf.mxu1  ;;  %v1667_v60 = vadd.f32 %v1666_v55, %v1549_v47  ;;  %v1799_v40 = vadd.f32 %v10234_v3, %v1674_v29  ;;  %v17332_v55 = vld [vmem:[#allocation57_spill] sm:$0xff]  ;;  %v17336_v3 = vld [vmem:[#allocation83_spill] sm:$0xff] }
 0x17c   : > { %v10221_v16 = vpop.f32.mrf.mxu0  ;;  %v1174_v9 = vadd.f32 %v17333_v28, %v17332_v55  ;;  %v17334_v6 = vld [vmem:[#allocation82_spill] sm:$0xff]  ;;  %v17340_v29 = vld [vmem:[#allocation69_spill] sm:$0xff] }
 0x17d   : > { %v1806_v8 = vpop.f32.mrf.mxu1  ;;  %v1688_v52 = vadd.f32 %v10221_v16, %v1567_v59  ;;  %v1468_v49 = vadd.f32 %v17334_v6, %v13329_v36  ;;  %v1791_v5 = vadd.f32 %v1790_v15, %v1667_v60  ;;  %v1573_v16 = vadd.f32 %v17336_v3, %v1438_v19  ;;  %v17339_v15 = vld [vmem:[#allocation68_spill] sm:$0xff]  ;;  %v17342_v19 = vld [vmem:[#allocation71_spill] sm:$0xff]  ;;  %v17344_v28 = vld [vmem:[#allocation73_spill] sm:$0xff] }
 0x17e   : > { %v1680_v62 = vpop.f32.mrf.mxu0  ;;  %v1299_v57 = vadd.f32 %v17337_v13, %v1174_v9  ;;  %v12171_v51 = vpop.eup %12170  ;;  %v17345_v9 = vld [vmem:[#allocation78_spill] sm:$0xff] }
 0x17f   : > { %v10240_v26 = vpop.f32.mrf.mxu1  ;;  %v1681_v42 = vadd.f32 %v1680_v62, %v1561_v18  ;;  %v1815_v44 = vadd.f32 %v10237_v25, %v1688_v52  ;;  %v1181_v62 = vadd.f32 %v17339_v15, %v17338_v12  ;;  %v1591_v54 = vadd.f32 %v13320_v27, %v1468_v49 }
 0x180   : > { %v10224_v10 = vpop.f32.mrf.mxu0  ;;  %v1301_v25 = vadd.f32 %v17340_v29, %v1176_v41  ;;  %v1315_v41 = vadd.f32 %v17348_v33, %v1190_v61 }
 0x181   : > { %v1822_v4 = vpop.f32.mrf.mxu1  ;;  %v1702_v2 = vadd.f32 %v10224_v10, %v1579_v38  ;;  %v1807_v11 = vadd.f32 %v1806_v8, %v1681_v42  ;;  %v1306_v8 = vadd.f32 %v17342_v19, %v1181_v62  ;;  %v1197_v38 = vadd.f32 %v17345_v9, %v13373_v17  ;;  %v17347_v42 = vld [vmem:[#allocation76_spill] sm:$0xff] }
 0x182   : > { %v1694_v7 = vpop.f32.mrf.mxu0  ;;  %v12173_v52 = vpop.eup %12172 }
 0x183   : > { %v13378_v50 = vpop.f32.mrf.mxu1  ;;  %v1695_v46 = vadd.f32 %v1694_v7, %v1573_v16  ;;  %v1831_v59 = vadd.f32 %v10240_v26, %v1702_v2  ;;  %v12175_v55 = vpop.eup %12174 }
 0x184   : > { %v10227_v39 = vpop.f32.mrf.mxu0 }
 0x185   : > { %v13387_v63 = vpop.f32.mrf.mxu1  ;;  %v1716_v27 = vadd.f32 %v10227_v39, %v1591_v54  ;;  %v1823_v22 = vadd.f32 %v1822_v4, %v1695_v46  ;;  %v1308_v39 = vadd.f32 %v17344_v28, %v1183_v1  ;;  %v17352_v46 = vld [vmem:[#allocation79_spill] sm:$0xff] }
 0x186   : > { %v1708_v43 = vpop.f32.mrf.mxu0 }
 0x187   : > { %v10266_v14 = vpop.f32.mrf.mxu1  ;;  %v1709_v48 = vadd.f32 %v1708_v43, %v1585_v30  ;;  %v1847_v20 = vadd.f32 %v13378_v50, %v1716_v27  ;;  %v17346_v43 = vld [vmem:[#allocation61_spill] sm:$0xff]  ;;  %v17350_v50 = vld [vmem:[#allocation72_spill] sm:$0xff] }
 0x188   : > { %v10250_v21 = vpop.f32.mrf.mxu0 }
 0x189   : > { %v1930_v53 = vadd.f32 %v10250_v21, %v1799_v40  ;;  %v2038_v47 = vpop.f32.mrf.mxu1  ;;  %v12177_v21 = vpop.eup %12176  ;;  %v1839_v2 = vadd.f32 %v13387_v63, %v1709_v48 }
 0x18a   : > { %v1923_v37 = vpop.f32.mrf.mxu0  ;;  %v12179_v31 = vpop.eup %12178 }
 0x18b   : > { %v1924_v34 = vadd.f32 %v1923_v37, %v1791_v5  ;;  %v2045_v56 = vadd.f32 %v10266_v14, %v1930_v53  ;;  %v10269_v24 = vpop.f32.mrf.mxu1  ;;  %v1195_v53 = vadd.f32 %v17347_v42, %v17346_v43  ;;  %v12181_v14 = vpop.eup %12180 }
 0x18c   : > { %v10253_v58 = vpop.f32.mrf.mxu0  ;;  %v12183_v54 = vpop.eup %12182 }
 0x18d   : > { %12184 = vtanh.f32 %v2045_v56  ;;  %v1942_v36 = vadd.f32 %v10253_v58, %v1815_v44  ;;  %v2039_v10 = vadd.f32 %v2038_v47, %v1924_v34  ;;  %v2050_v40 = vpop.f32.mrf.mxu1  ;;  %v17349_v44 = vld [vmem:[#allocation59_spill] sm:$0xff]  ;;  %v17351_v56 = vld [vmem:[#allocation80_spill] sm:$0xff]  ;;  %v1320_v58 = vadd.f32 %v17352_v46, %v1195_v53 }
 0x18e   : > { %v1935_v60 = vpop.f32.mrf.mxu0  ;;  %v1188_v34 = vadd.f32 %v17350_v50, %v17349_v44  ;;  %v1322_v13 = vadd.f32 %v17351_v56, %v1197_v38  ;;  %v17371_v44 = vld [vmem:[#allocation14_spill] sm:$0xff] }
 0x18f   : > { %12186 = vtanh.f32 %v2039_v10  ;;  %v1936_v7 = vadd.f32 %v1935_v60, %v1807_v11  ;;  %v2057_v0 = vadd.f32 %v10269_v24, %v1942_v36  ;;  %v10272_v49 = vpop.f32.mrf.mxu1  ;;  %v17354_v36 = vld [vmem:[#allocation75_spill] sm:$0xff] }
 0x190   : > { %12188 = vtanh.f32 %v1299_v57  ;;  %v10256_v18 = vpop.f32.mrf.mxu0  ;;  %v1313_v10 = vadd.f32 %v17354_v36, %v1188_v34 }
 0x191   : > { %12190 = vtanh.f32 %v2057_v0  ;;  %v1954_v35 = vadd.f32 %v10256_v18, %v1831_v59  ;;  %v2051_v26 = vadd.f32 %v2050_v40, %v1936_v7  ;;  %v2062_v16 = vpop.f32.mrf.mxu1 }
 0x192   : > { %12192 = vtanh.f32 %v1301_v25  ;;  %v1947_v6 = vpop.f32.mrf.mxu0 }
 0x193   : > { %12194 = vtanh.f32 %v2051_v26  ;;  %v1948_v4 = vadd.f32 %v1947_v6, %v1823_v22  ;;  %v2069_v5 = vadd.f32 %v10272_v49, %v1954_v35  ;;  %v10275_v12 = vpop.f32.mrf.mxu1 }
 0x194   : > { %12196 = vtanh.f32 %v1306_v8  ;;  %v10259_v3 = vpop.f32.mrf.mxu0 }
 0x195   : > { %12198 = vtanh.f32 %v2069_v5  ;;  %v1966_v17 = vadd.f32 %v10259_v3, %v1847_v20  ;;  %v2063_v37 = vadd.f32 %v2062_v16, %v1948_v4  ;;  %v2074_v63 = vpop.f32.mrf.mxu1  ;;  %v17367_v4 = vld [vmem:[#allocation9_spill] sm:$0xff] }
 0x196   : > { %12200 = vtanh.f32 %v1308_v39  ;;  %v1959_v57 = vpop.f32.mrf.mxu0 }
 0x197   : > { %12202 = vtanh.f32 %v2063_v37  ;;  %v1960_v15 = vadd.f32 %v1959_v57, %v1839_v2  ;;  %v2081_v62 = vadd.f32 %v10275_v12, %v1966_v17 }
 0x198   : > { %12204 = vtanh.f32 %v1315_v41  ;;  %v17369_v41 = vld [vmem:[#allocation11_spill] sm:$0xff] }
 0x199   : > { %12206 = vtanh.f32 %v2081_v62  ;;  %v2075_v47 = vadd.f32 %v2074_v63, %v1960_v15 }
 0x19a   : > { %v13416_v11 = vpop.eup %12184  ;;  %12208 = vtanh.f32 %v1322_v13 }
 0x19b   : > { %17353 = vst [vmem:[#allocation60_spill] sm:$0xff] %v13416_v11  ;;  %12210 = vtanh.f32 %v2075_v47  ;;  %v13420_v29 = vsub.f32 %v12175_v55, %v13416_v11 }
 0x19c   : > { %v13422_v25 = vpop.eup %12186  ;;  %12212 = vtanh.f32 %v1320_v58 }
 0x19d   : > { %17355 = vst [vmem:[#allocation62_spill] sm:$0xff] %v13420_v29  ;;  %17356 = vst [vmem:[#allocation63_spill] sm:$0xff] %v13422_v25  ;;  %v12189_v32 = vpop.eup %12188  ;;  %v13425_v1 = vsub.f32 %v12171_v51, %v13422_v25  ;;  %v2117_v30 = vmul.f32 %v12173_v52, %v13420_v29  ;;  %12214 = vtanh.f32 %v1313_v10 }
 0x19e   : > { %v13428_v59 = vpop.eup %12190 }
 0x19f   : > { %17357 = vst [vmem:[#allocation65_spill] sm:$0xff] %v13425_v1  ;;  %17358 = vst [vmem:[#allocation81_spill] sm:$0xff] %v13428_v59  ;;  %v12193_v60 = vpop.eup %12192  ;;  %v2116_v24 = vmul.f32 %v13397_v23, %v13425_v1  ;;  %v2125_v27 = vadd.f32 %v13416_v11, %v2117_v30  ;;  %v13434_v7 = vsub.f32 %v12183_v54, %v13428_v59  ;;  %v17373_v54 = vld [vmem:[#allocation17_spill] sm:$0xff] }
 0x1a0   : > { %v13436_v0 = vpop.eup %12194 }
 0x1a1   : > { %17359 = vst [vmem:[#allocation57_spill] sm:$0xff] %v13434_v7  ;;  %17360 = vst [vmem:[#allocation64_spill] sm:$0xff] %v13436_v0  ;;  %v12197_v19 = vpop.eup %12196  ;;  %v2124_v51 = vadd.f32 %v13422_v25, %v2116_v24  ;;  %v13439_v8 = vand.u32 4294901760, %v2125_v27  ;;  %v13442_v45 = vsub.f32 %v12179_v31, %v13436_v0  ;;  %v2119_v61 = vmul.f32 %v12181_v14, %v13434_v7 }
 0x1a2   : > { %v13445_v22 = vpop.eup %12198 }
 0x1a3   : > { %17361 = vst [vmem:[#allocation82_spill] sm:$0xff] %v13442_v45  ;;  %17362 = vst [vmem:[#allocation66_spill] sm:$0xff] %v13445_v22  ;;  %v12201_v23 = vpop.eup %12200  ;;  %v13447_v18 = vand.u32 4294901760, %v2124_v51  ;;  %v13450_v40 = vsub.f32 %v2125_v27, %v13439_v8  ;;  %v2118_v52 = vmul.f32 %v12177_v21, %v13442_v45  ;;  %v2127_v48 = vadd.f32 %v13428_v59, %v2119_v61 }
 0x1a4   : > { %v13454_v35 = vpop.eup %12202  ;;  %v13457_v26 = vsub.f32 %v12201_v23, %v13445_v22  ;;  %v17376_v23 = vld [vmem:[#allocation13_spill] sm:$0xff] }
 0x1a5   : > { %17363 = vst [vmem:[#allocation83_spill] sm:$0xff] %v13454_v35  ;;  %v12205_v55 = vpop.eup %12204  ;;  %10352 = vmatprep.mubr.f32.mxu1 %v13447_v18  ;;  %v2126_v28 = vadd.f32 %v13436_v0, %v2118_v52  ;;  %v13461_v39 = vand.u32 4294901760, %v2127_v48  ;;  %v13464_v9 = vsub.f32 %v2124_v51, %v13447_v18  ;;  %v13467_v38 = vsub.f32 %v12193_v60, %v13454_v35  ;;  %v17375_v51 = vld [vmem:[#allocation10_spill] sm:$0xff] }
 0x1a6   : > { %17364 = vst [vmem:[#allocation67_spill] sm:$0xff] %v13457_v26  ;;  %v13469_v6 = vpop.eup %12206  ;;  %10353 = vmatmul.mubr.f32.vlgmr.msra.gmra.mxu1 %v13439_v8  ;;  %v2248_v49 = vand.u32 4294901760, %v13450_v40  ;;  %v2121_v21 = vmul.f32 %v12197_v19, %v13457_v26  ;;  %v17377_v52 = vld [vmem:[#allocation22_spill] sm:$0xff] }
 0x1a7   : > { %17365 = vst [vmem:[#allocation58_spill] sm:$0xff] %v13467_v38  ;;  %17366 = vst [vmem:[#allocation68_spill] sm:$0xff] %v13469_v6  ;;  %v12209_v20 = vpop.eup %12208  ;;  %10409 = vmatpush3.msra.mxu1 %v17367_v4  ;;  %v13475_v5 = vand.u32 4294901760, %v2126_v28  ;;  %v2238_v43 = vand.u32 4294901760, %v13464_v9  ;;  %v2120_v42 = vmul.f32 %v12189_v32, %v13467_v38  ;;  %v13480_v53 = vsub.f32 %v2127_v48, %v13461_v39  ;;  %v17374_v32 = vld [vmem:[#allocation20_spill] sm:$0xff] }
 0x1a8   : > { %v13482_v33 = vpop.eup %12210  ;;  %10410 = vmatprep.subr.mxu1 %v17369_v41  ;;  %v2249_v3 = vsub.f32 %v13450_v40, %v2248_v49  ;;  %v2129_v16 = vadd.f32 %v13445_v22, %v2121_v21  ;;  %v13490_v31 = vsub.f32 %v12209_v20, %v13469_v6 }
 0x1a9   : > { %17368 = vst [vmem:[#allocation69_spill] sm:$0xff] %v13482_v33  ;;  %v12213_v2 = vpop.eup %12212  ;;  %10411 = vmatpush3.msra.mxu1 %v17369_v41  ;;  %10355 = vmatprep.mubr.f32.mxu1 %v13475_v5  ;;  %v2239_v17 = vsub.f32 %v13464_v9, %v2238_v43  ;;  %v2128_v37 = vadd.f32 %v13454_v35, %v2120_v42  ;;  %v2268_v62 = vand.u32 4294901760, %v13480_v53  ;;  %v17378_v42 = vld [vmem:[#allocation16_spill] sm:$0xff] }
 0x1aa   : > { %17370 = vst [vmem:[#allocation70_spill] sm:$0xff] %v13490_v31  ;;  %v13499_v14 = vsub.f32 %v2126_v28, %v13475_v5  ;;  %10412 = vmatprep.subr.mxu1 %v17371_v44  ;;  %10356 = vmatmul.mubr.f32.gmra.mxu1 %v13461_v39  ;;  %v13503_v50 = vand.u32 4294901760, %v2129_v16  ;;  %v13506_v34 = vsub.f32 %v12205_v55, %v13482_v33  ;;  %v12215_v13 = vpop.eup %12214  ;;  %v2250_v63 = vand.u32 4294901760, %v2249_v3  ;;  %v17379_v3 = vld [vmem:[#allocation25_spill] sm:$0xff] }
 0x1ab   : > { %v2123_v56 = vmul.f32 %v12213_v2, %v13490_v31  ;;  %10413 = vmatpush3.msra.mxu1 %v17371_v44  ;;  %v2240_v57 = vand.u32 4294901760, %v2239_v17  ;;  %v13510_v12 = vand.u32 4294901760, %v2128_v37  ;;  %v2269_v27 = vsub.f32 %v13480_v53, %v2268_v62 }
 0x1ac   : > { %17372 = vst [vmem:[#allocation71_spill] sm:$0xff] %v13506_v34  ;;  %v2258_v15 = vand.u32 4294901760, %v13499_v14  ;;  %10414 = vmatprep.subr.mxu1 %v17373_v54  ;;  %v2122_v46 = vmul.f32 %v12215_v13, %v13506_v34  ;;  %v13525_v10 = vsub.f32 %v2129_v16, %v13503_v50  ;;  %v17380_v13 = vld [vmem:[#allocation19_spill] sm:$0xff] }
 0x1ad   : > { %v2131_v58 = vadd.f32 %v13469_v6, %v2123_v56  ;;  %10415 = vmatpush3.msra.mxu1 %v17373_v54  ;;  %10308 = vmatprep.mubr.f32.mxu0 %v2240_v57  ;;  %v13522_v36 = vsub.f32 %v2128_v37, %v13510_v12  ;;  %v2270_v20 = vand.u32 4294901760, %v2269_v27  ;;  %v17381_v57 = vld [vmem:[#allocation29_spill] sm:$0xff] }
 0x1ae   : > { %v2259_v47 = vsub.f32 %v13499_v14, %v2258_v15  ;;  %10358 = vmatprep.mubr.f32.mxu1 %v13510_v12  ;;  %10416 = vmatprep.subr.mxu1 %v17374_v32  ;;  %v2130_v30 = vadd.f32 %v13482_v33, %v2122_v46  ;;  %v2288_v55 = vand.u32 4294901760, %v13525_v10 }
 0x1af   : > { %v13530_v60 = vand.u32 4294901760, %v2131_v58  ;;  %10309 = vmatmul.mubr.f32.vlgmr.msra.gmra.mxu0 %v2250_v63  ;;  %10359 = vmatmul.mubr.f32.gmra.mxu1 %v13503_v50  ;;  %v2278_v19 = vand.u32 4294901760, %v13522_v36  ;;  %v17383_v63 = vld [vmem:[#allocation32_spill] sm:$0xff] }
 0x1b0   : > { %v2260_v24 = vand.u32 4294901760, %v2259_v47  ;;  %10365 = vmatpush3.msra.mxu0 %v17375_v51  ;;  %10417 = vmatpush3.msra.mxu1 %v17374_v32  ;;  %v13539_v61 = vand.u32 4294901760, %v2130_v30  ;;  %v2289_v17 = vsub.f32 %v13525_v10, %v2288_v55  ;;  %v17386_v51 = vld [vmem:[#allocation28_spill] sm:$0xff] }
 0x1b1   : > { %10366 = vmatprep.subr.mxu0 %v17376_v23  ;;  %10418 = vmatprep.subr.mxu1 %v17377_v52  ;;  %v2279_v48 = vsub.f32 %v13522_v36, %v2278_v19  ;;  %v13553_v21 = vsub.f32 %v2131_v58, %v13530_v60  ;;  %v17382_v58 = vld [vmem:[#allocation23_spill] sm:$0xff] }
 0x1b2   : > { %10367 = vmatpush3.msra.mxu0 %v17376_v23  ;;  %10419 = vmatpush3.msra.mxu1 %v17377_v52  ;;  %v13550_v28 = vsub.f32 %v2130_v30, %v13539_v61  ;;  %v2290_v46 = vand.u32 4294901760, %v2289_v17  ;;  %v17387_v23 = vld [vmem:[#allocation37_spill] sm:$0xff]  ;;  %v17392_v17 = vld [vmem:[#allocation38_spill] sm:$0xff] }
 0x1b3   : > { %10311 = vmatprep.mubr.f32.mxu0 %v2260_v24  ;;  %10361 = vmatprep.mubr.f32.mxu1 %v13539_v61  ;;  %v2280_v2 = vand.u32 4294901760, %v2279_v48  ;;  %v2308_v56 = vand.u32 4294901760, %v13553_v21  ;;  %v17385_v24 = vld [vmem:[#allocation24_spill] sm:$0xff]  ;;  %v17388_v48 = vld [vmem:[#allocation31_spill] sm:$0xff] }
 0x1b4   : > { %10368 = vmatprep.subr.mxu0 %v17378_v42  ;;  %10420 = vmatprep.subr.mxu1 %v17379_v3  ;;  %v2298_v16 = vand.u32 4294901760, %v13550_v28 }
 0x1b5   : > { %10312 = vmatmul.mubr.f32.gmra.mxu0 %v2270_v20  ;;  %10362 = vmatmul.mubr.f32.gmra.mxu1 %v13530_v60  ;;  %v2309_v30 = vsub.f32 %v13553_v21, %v2308_v56  ;;  %v17389_v20 = vld [vmem:[#allocation40_spill] sm:$0xff] }
 0x1b6   : > { %10369 = vmatpush3.msra.mxu0 %v17378_v42  ;;  %10421 = vmatpush3.msra.mxu1 %v17379_v3  ;;  %v2299_v37 = vsub.f32 %v13550_v28, %v2298_v16  ;;  %v17390_v42 = vld [vmem:[#allocation34_spill] sm:$0xff] }
 0x1b7   : > { %10370 = vmatprep.subr.mxu0 %v17380_v13  ;;  %10422 = vmatprep.subr.mxu1 %v17381_v57  ;;  %v2310_v27 = vand.u32 4294901760, %v2309_v30  ;;  %v17399_v30 = vld [vmem:[#allocation49_spill] sm:$0xff] }
 0x1b8   : > { %10440 = vmatprep.mubr.f32.mxu1 %v2238_v43  ;;  %10371 = vmatpush3.msra.mxu0 %v17380_v13  ;;  %v2300_v47 = vand.u32 4294901760, %v2299_v37  ;;  %v17384_v43 = vld [vmem:[#allocation35_spill] sm:$0xff]  ;;  %v17395_v13 = vld [vmem:[#allocation50_spill] sm:$0xff] }
 0x1b9   : > { %10423 = vmatpush3.msra.mxu1 %v17381_v57  ;;  %10314 = vmatprep.mubr.f32.mxu0 %v2280_v2  ;;  %v17391_v2 = vld [vmem:[#allocation44_spill] sm:$0xff]  ;;  %v17393_v37 = vld [vmem:[#allocation47_spill] sm:$0xff] }
 0x1ba   : > { %10372 = vmatprep.subr.mxu0 %v17382_v58  ;;  %10424 = vmatprep.subr.mxu1 %v17383_v63 }
 0x1bb   : > { %10315 = vmatmul.mubr.f32.gmra.mxu0 %v2290_v46  ;;  %10425 = vmatpush3.msra.mxu1 %v17383_v63  ;;  %v17396_v46 = vld [vmem:[#allocation43_spill] sm:$0xff] }
 0x1bc   : > { %10373 = vmatpush3.msra.mxu0 %v17382_v58  ;;  %10426 = vmatprep.subr.mxu1 %v17384_v43  ;;  %v17397_v58 = vld [vmem:[#allocation52_spill] sm:$0xff] }
 0x1bd   : > { %10374 = vmatprep.subr.mxu0 %v17385_v24  ;;  %10427 = vmatpush3.msra.mxu1 %v17384_v43 }
 0x1be   : > { %10375 = vmatpush3.msra.mxu0 %v17385_v24  ;;  %10317 = vmatprep.mubr.f32.mxu0 %v2300_v47  ;;  %v17398_v47 = vld [vmem:[#allocation46_spill] sm:$0xff]  ;;  %v17400_v24 = vld [vmem:[#allocation53_spill] sm:$0xff] }
 0x1bf   : > { %10376 = vmatprep.subr.mxu0 %v17386_v51  ;;  %10428 = vmatprep.subr.mxu1 %v17387_v23 }
 0x1c0   : > { %10318 = vmatmul.mubr.f32.gmra.mxu0 %v2310_v27  ;;  %10429 = vmatpush3.msra.mxu1 %v17387_v23 }
 0x1c1   : > { %10377 = vmatpush3.msra.mxu0 %v17386_v51  ;;  %10396 = vmatprep.mubr.f32.mxu0 %v13464_v9  ;;  %v17394_v9 = vld [vmem:[#allocation39_spill] sm:$0xff] }
 0x1c2   : > { %10378 = vmatprep.subr.mxu0 %v17388_v48  ;;  %10430 = vmatprep.subr.mxu1 %v17389_v20 }
 0x1c3   : > { %10379 = vmatpush3.msra.mxu0 %v17388_v48  ;;  %10431 = vmatpush3.msra.mxu1 %v17389_v20 }
 0x1c4   : > { %10380 = vmatprep.subr.mxu0 %v17390_v42  ;;  %10432 = vmatprep.subr.mxu1 %v17391_v2 }
 0x1c5   : > { %10381 = vmatpush3.msra.mxu0 %v17390_v42  ;;  %10433 = vmatpush3.msra.mxu1 %v17391_v2  ;;  %v3115_v42 = vld [vmem:[#allocation4 + $0x50] sm:$0xff] }
 0x1c6   : > { %10382 = vmatprep.subr.mxu0 %v17392_v17  ;;  %10434 = vmatprep.subr.mxu1 %v17393_v37 }
 0x1c7   : > { %10383 = vmatpush3.msra.mxu0 %v17392_v17  ;;  %10435 = vmatpush3.msra.mxu1 %v17393_v37 }
 0x1c8   : > { %10384 = vmatprep.subr.mxu0 %v17394_v9  ;;  %10436 = vmatprep.subr.mxu1 %v17395_v13 }
 0x1c9   : > { %10385 = vmatpush3.msra.mxu0 %v17394_v9  ;;  %10437 = vmatpush3.msra.mxu1 %v17395_v13  ;;  %v13768_v9 = vand.u32 4294901760, %v3115_v42 }
 0x1ca   : > { %10386 = vmatprep.subr.mxu0 %v17396_v46  ;;  %10438 = vmatprep.subr.mxu1 %v17397_v58 }
 0x1cb   : > { %10387 = vmatpush3.msra.mxu0 %v17396_v46  ;;  %10439 = vmatpush3.msra.mxu1 %v17397_v58  ;;  %v3114_v46 = vld [vmem:[#allocation4 + $0x48] sm:$0xff] }
 0x1cc   : > { %10388 = vmatprep.subr.mxu0 %v17398_v47  ;;  %10441 = vmatmul.mubr.f32.vlgmr.msra.gmra.mxu1 %v2248_v49  ;;  %v17401_v49 = vld [vmem:[#allocation54_spill] sm:$0xff] }
 0x1cd   : > { %10496 = vmatprep.subr.mxu1 %v17367_v4  ;;  %10389 = vmatpush3.msra.mxu0 %v17398_v47 }
 0x1ce   : > { %10443 = vmatprep.mubr.f32.mxu1 %v2258_v15  ;;  %10497 = vmatpush3.msra.mxu1 %v17367_v4  ;;  %v17402_v4 = vld [vmem:[#allocation12_spill] sm:$0xff]  ;;  %v17408_v15 = vld [vmem:[#allocation30_spill] sm:$0xff] }
 0x1cf   : > { %10390 = vmatprep.subr.mxu0 %v17399_v30  ;;  %10498 = vmatprep.subr.mxu1 %v17369_v41 }
 0x1d0   : > { %10391 = vmatpush3.msra.mxu0 %v17399_v30  ;;  %10499 = vmatpush3.msra.mxu1 %v17369_v41  ;;  %v17403_v41 = vld [vmem:[#allocation15_spill] sm:$0xff]  ;;  %v13777_v30 = vsub.f32 %v3115_v42, %v13768_v9  ;;  %v3109_v42 = vld [vmem:[#allocation4 + $0x20] sm:$0xff] }
 0x1d1   : > { %10392 = vmatprep.subr.mxu0 %v17400_v24  ;;  %10444 = vmatmul.mubr.f32.gmra.mxu1 %v2268_v62  ;;  %v17409_v62 = vld [vmem:[#allocation33_spill] sm:$0xff] }
 0x1d2   : > { %10500 = vmatprep.subr.mxu1 %v17371_v44  ;;  %10393 = vmatpush3.msra.mxu0 %v17400_v24  ;;  %17423 = vst [vmem:[#allocation77_spill] sm:$0xff] %v13777_v30  ;;  %v13779_v24 = vand.u32 4294901760, %v3114_v46 }
 0x1d3   : > { %10446 = vmatprep.mubr.f32.mxu1 %v2278_v19  ;;  %10501 = vmatpush3.msra.mxu1 %v17371_v44  ;;  %v17407_v44 = vld [vmem:[#allocation27_spill] sm:$0xff] }
 0x1d4   : > { %10394 = vmatprep.subr.mxu0 %v17401_v49  ;;  %10502 = vmatprep.subr.mxu1 %v17373_v54  ;;  %v17415_v19 = vld [vmem:[#allocation51_spill] sm:$0xff] }
 0x1d5   : > { %10395 = vmatpush3.msra.mxu0 %v17401_v49  ;;  %10503 = vmatpush3.msra.mxu1 %v17373_v54  ;;  %v17410_v54 = vld [vmem:[#allocation36_spill] sm:$0xff] }
 0x1d6   : > { %10397 = vmatmul.mubr.f32.vlgmr.msra.gmra.mxu0 %v13450_v40  ;;  %10447 = vmatmul.mubr.f32.gmra.mxu1 %v2288_v55  ;;  %v17404_v40 = vld [vmem:[#allocation18_spill] sm:$0xff]  ;;  %v17417_v55 = vld [vmem:[#allocation56_spill] sm:$0xff] }
 0x1d7   : > { %10452 = vmatprep.subr.mxu0 %v17402_v4  ;;  %10504 = vmatprep.subr.mxu1 %v17374_v32 }
 0x1d8   : > { %10399 = vmatprep.mubr.f32.mxu0 %v13499_v14  ;;  %10449 = vmatprep.mubr.f32.mxu1 %v2298_v16  ;;  %v17405_v14 = vld [vmem:[#allocation21_spill] sm:$0xff] }
 0x1d9   : > { %10453 = vmatpush3.msra.mxu0 %v17402_v4  ;;  %10505 = vmatpush3.msra.mxu1 %v17374_v32  ;;  %v17414_v32 = vld [vmem:[#allocation48_spill] sm:$0xff]  ;;  %v3113_v4 = vld [vmem:[#allocation4 + $0x40] sm:$0xff] }
 0x1da   : > { %10454 = vmatprep.subr.mxu0 %v17403_v41  ;;  %10506 = vmatprep.subr.mxu1 %v17377_v52 }
 0x1db   : > { %10455 = vmatpush3.msra.mxu0 %v17403_v41  ;;  %10507 = vmatpush3.msra.mxu1 %v17377_v52  ;;  %v17416_v52 = vld [vmem:[#allocation55_spill] sm:$0xff] }
 0x1dc   : > { %10400 = vmatmul.mubr.f32.gmra.mxu0 %v13480_v53  ;;  %10450 = vmatmul.mubr.f32.gmra.mxu1 %v2308_v56  ;;  %v17406_v53 = vld [vmem:[#allocation26_spill] sm:$0xff] }
 0x1dd   : > { %10456 = vmatprep.subr.mxu0 %v17404_v40  ;;  %10508 = vmatprep.subr.mxu1 %v17379_v3 }
 0x1de   : > { %10402 = vmatprep.mubr.f32.mxu0 %v13522_v36  ;;  %10457 = vmatpush3.msra.mxu0 %v17404_v40  ;;  %v17411_v36 = vld [vmem:[#allocation41_spill] sm:$0xff]  ;;  %v13787_v40 = vand.u32 4294901760, %v13777_v30 }
 0x1df   : > { %10509 = vmatpush3.msra.mxu1 %v17379_v3  ;;  %10528 = vmatprep.mubr.f32.mxu1 %v13447_v18 }
 0x1e0   : > { %10458 = vmatprep.subr.mxu0 %v17405_v14  ;;  %10510 = vmatprep.subr.mxu1 %v17381_v57  ;;  %17425 = vst [vmem:[#allocation72_spill] sm:$0xff] %v13787_v40 }
 0x1e1   : > { %10459 = vmatpush3.msra.mxu0 %v17405_v14  ;;  %10511 = vmatpush3.msra.mxu1 %v17381_v57  ;;  %v13790_v14 = vsub.f32 %v3114_v46, %v13779_v24 }
 0x1e2   : > { %10403 = vmatmul.mubr.f32.gmra.mxu0 %v13525_v10  ;;  %10460 = vmatprep.subr.mxu0 %v17406_v53  ;;  %v17413_v10 = vld [vmem:[#allocation45_spill] sm:$0xff] }
 0x1e3   : > { %10512 = vmatprep.subr.mxu1 %v17383_v63  ;;  %10405 = vmatprep.mubr.f32.mxu0 %v13550_v28  ;;  %v3120_v28 = vld [vmem:[#allocation4 + $0x78] sm:$0xff]  ;;  %17426 = vst [vmem:[#allocation80_spill] sm:$0xff] %v13790_v14 }
 0x1e4   : > { %10461 = vmatpush3.msra.mxu0 %v17406_v53  ;;  %10513 = vmatpush3.msra.mxu1 %v17383_v63  ;;  %v13792_v53 = vand.u32 4294901760, %v3113_v4 }
 0x1e5   : > { %10462 = vmatprep.subr.mxu0 %v17407_v44  ;;  %10514 = vmatprep.subr.mxu1 %v17384_v43 }
 0x1e6   : > { %10463 = vmatpush3.msra.mxu0 %v17407_v44  ;;  %10515 = vmatpush3.msra.mxu1 %v17384_v43  ;;  %v3116_v43 = vld [vmem:[#allocation4 + $0x58] sm:$0xff]  ;;  %17427 = vst [vmem:[#allocation79_spill] sm:$0xff] %v13792_v53 }
 0x1e7   : > { %10406 = vmatmul.mubr.f32.gmra.mxu0 %v13553_v21  ;;  %10464 = vmatprep.subr.mxu0 %v17408_v15  ;;  %v3119_v21 = vld [vmem:[#allocation4 + $0x70] sm:$0xff] }
 0x1e8   : > { %10516 = vmatprep.subr.mxu1 %v17387_v23  ;;  %10465 = vmatpush3.msra.mxu0 %v17408_v15  ;;  %v13725_v3 = vand.u32 4294901760, %v3119_v21  ;;  %v3112_v15 = vld [vmem:[#allocation4 + $0x38] sm:$0xff] }
 0x1e9   : > { %10484 = vmatprep.mubr.f32.mxu0 %v13447_v18  ;;  %10517 = vmatpush3.msra.mxu1 %v17387_v23  ;;  %v17412_v18 = vld [vmem:[#allocation42_spill] sm:$0xff] }
 0x1ea   : > { %10466 = vmatprep.subr.mxu0 %v17409_v62  ;;  %10518 = vmatprep.subr.mxu1 %v17389_v20 }
 0x1eb   : > { %10467 = vmatpush3.msra.mxu0 %v17409_v62  ;;  %10519 = vmatpush3.msra.mxu1 %v17389_v20  ;;  %v13760_v20 = vand.u32 4294901760, %v3116_v43  ;;  %v3328_v62 = vsub.f32 %v13777_v30, %v13787_v40  ;;  %v9084_v40 = vld [vmem:[%s16654_s4] ss:$0 sm:$0xff] }
 0x1ec   : > { %10468 = vmatprep.subr.mxu0 %v17410_v54  ;;  %10520 = vmatprep.subr.mxu1 %v17391_v2 }
 0x1ed   : > { %10469 = vmatpush3.msra.mxu0 %v17410_v54  ;;  %10521 = vmatpush3.msra.mxu1 %v17391_v2  ;;  %v13801_v54 = vand.u32 4294901760, %v13790_v14 }
 0x1ee   : > { %10470 = vmatprep.subr.mxu0 %v17411_v36  ;;  %10522 = vmatprep.subr.mxu1 %v17393_v37 }
 0x1ef   : > { %10471 = vmatpush3.msra.mxu0 %v17411_v36  ;;  %10523 = vmatpush3.msra.mxu1 %v17393_v37  ;;  %17428 = vst [vmem:[#allocation75_spill] sm:$0xff] %v13801_v54  ;;  %v13804_v36 = vsub.f32 %v3113_v4, %v13792_v53  ;;  %v3108_v4 = vld [vmem:[#allocation4 + $0x18] sm:$0xff] }
 0x1f0   : > { %10472 = vmatprep.subr.mxu0 %v17412_v18  ;;  %10524 = vmatprep.subr.mxu1 %v17395_v13 }
 0x1f1   : > { %10473 = vmatpush3.msra.mxu0 %v17412_v18  ;;  %10525 = vmatpush3.msra.mxu1 %v17395_v13  ;;  %v13771_v13 = vsub.f32 %v3116_v43, %v13760_v20  ;;  %17429 = vst [vmem:[#allocation9_spill] sm:$0xff] %v13804_v36  ;;  %v13806_v18 = vand.u32 4294901760, %v3112_v15 }
 0x1f2   : > { %10474 = vmatprep.subr.mxu0 %v17413_v10  ;;  %10526 = vmatprep.subr.mxu1 %v17397_v58 }
 0x1f3   : > { %10475 = vmatpush3.msra.mxu0 %v17413_v10  ;;  %10527 = vmatpush3.msra.mxu1 %v17397_v58  ;;  %17422 = vst [vmem:[#allocation76_spill] sm:$0xff] %v13771_v13  ;;  %v13783_v49 = vand.u32 4294901760, %v13771_v13  ;;  %17430 = vst [vmem:[#allocation11_spill] sm:$0xff] %v13806_v18 }
 0x1f4   : > { %10476 = vmatprep.subr.mxu0 %v17414_v32  ;;  %10529 = vmatmul.mubr.f32.vlgmr.msra.gmra.mxu1 %v13439_v8 }
 0x1f5   : > { %10477 = vmatpush3.msra.mxu0 %v17414_v32  ;;  %10531 = vmatprep.mubr.f32.mxu1 %v13475_v5  ;;  %17424 = vst [vmem:[#allocation59_spill] sm:$0xff] %v13783_v49  ;;  %v3321_v44 = vsub.f32 %v13771_v13, %v13783_v49  ;;  %v3111_v32 = vld [vmem:[#allocation4 + $0x30] sm:$0xff] }
 0x1f6   : > { %10478 = vmatprep.subr.mxu0 %v17415_v19 }
 0x1f7   : > { %10479 = vmatpush3.msra.mxu0 %v17415_v19  ;;  %v3322_v10 = vand.u32 4294901760, %v3321_v44  ;;  %v3329_v19 = vand.u32 4294901760, %v3328_v62  ;;  %v13852_v62 = vand.u32 4294901760, %v3108_v4 }
 0x1f8   : > { %10480 = vmatprep.subr.mxu0 %v17416_v52  ;;  %10532 = vmatmul.mubr.f32.gmra.mxu1 %v13461_v39 }
 0x1f9   : > { %10481 = vmatpush3.msra.mxu0 %v17416_v52  ;;  %10534 = vmatprep.mubr.f32.mxu1 %v13510_v12  ;;  %v3335_v52 = vsub.f32 %v13790_v14, %v13801_v54  ;;  %17442 = vst [vmem:[#allocation32_spill] sm:$0xff] %v13852_v62 }
 0x1fa   : > { %10482 = vmatprep.subr.mxu0 %v17417_v55 }
 0x1fb   : > { %10483 = vmatpush3.msra.mxu0 %v17417_v55  ;;  %v13813_v55 = vand.u32 4294901760, %v13804_v36 }
 0x1fc   : > { %10485 = vmatmul.mubr.f32.vlgmr.msra.gmra.mxu0 %v13439_v8  ;;  %10535 = vmatmul.mubr.f32.gmra.mxu1 %v13503_v50  ;;  %v13720_v8 = vand.u32 4294901760, %v3120_v28 }
 0x1fd   : > { %10487 = vmatprep.mubr.f32.mxu0 %v13475_v5  ;;  %10537 = vmatprep.mubr.f32.mxu1 %v13539_v61  ;;  %17431 = vst [vmem:[#allocation14_spill] sm:$0xff] %v13813_v55 }
 0x1fe   : > { %v13723_v5 = vsub.f32 %v3120_v28, %v13720_v8  ;;  %10540 = vmatprep.subr.mxu0 %v13720_v8  ;;  %v13816_v28 = vsub.f32 %v3112_v15, %v13806_v18 }
 0x1ff   : > { %10541 = vmatpush3.msra.mxu0 %v13720_v8 }
 0x200   : > { %10488 = vmatmul.mubr.f32.gmra.mxu0 %v13461_v39  ;;  %10538 = vmatmul.mubr.f32.gmra.mxu1 %v13530_v60  ;;  %v3118_v39 = vld [vmem:[#allocation4 + $0x68] sm:$0xff]  ;;  %17432 = vst [vmem:[#allocation17_spill] sm:$0xff] %v13816_v28  ;;  %v13825_v43 = vand.u32 4294901760, %v13816_v28 }
 0x201   : > { %10490 = vmatprep.mubr.f32.mxu0 %v13510_v12  ;;  %v13733_v12 = vsub.f32 %v3119_v21, %v13725_v3  ;;  %10542 = vmatprep.subr.mxu0 %v13725_v3  ;;  %v13819_v21 = vand.u32 4294901760, %v3111_v32 }
 0x202   : > { %10543 = vmatpush3.msra.mxu0 %v13725_v3  ;;  %17434 = vst [vmem:[#allocation10_spill] sm:$0xff] %v13825_v43 }
 0x203   : > { %v13742_v56 = vand.u32 4294901760, %v13733_v12  ;;  %17433 = vst [vmem:[#allocation20_spill] sm:$0xff] %v13819_v21 }
 0x204   : > { %10491 = vmatmul.mubr.f32.gmra.mxu0 %v13503_v50  ;;  %v13730_v50 = vand.u32 4294901760, %v13723_v5 }
 0x205   : > { %10493 = vmatprep.mubr.f32.mxu0 %v13539_v61  ;;  %v3117_v61 = vld [vmem:[#allocation4 + $0x60] sm:$0xff]  ;;  %17419 = vst [vmem:[#allocation73_spill] sm:$0xff] %v13742_v56  ;;  %v3300_v51 = vsub.f32 %v13733_v12, %v13742_v56 }
 0x206   : > { %17418 = vst [vmem:[#allocation74_spill] sm:$0xff] %v13730_v50  ;;  %v3293_v16 = vsub.f32 %v13723_v5, %v13730_v50  ;;  %v13747_v63 = vand.u32 4294901760, %v3117_v61 }
 0x207   : > { %v3301_v2 = vand.u32 4294901760, %v3300_v51  ;;  %v13831_v51 = vsub.f32 %v3111_v32, %v13819_v21  ;;  %v3107_v32 = vld [vmem:[#allocation4 + $0x10] sm:$0xff] }
 0x208   : > { %10494 = vmatmul.mubr.f32.gmra.mxu0 %v13530_v60  ;;  %v13735_v60 = vand.u32 4294901760, %v3118_v39  ;;  %v3294_v27 = vand.u32 4294901760, %v3293_v16  ;;  %v13757_v48 = vsub.f32 %v3117_v61, %v13747_v63  ;;  %v3336_v61 = vand.u32 4294901760, %v3335_v52 }
 0x209   : > { %v3342_v16 = vsub.f32 %v13804_v36, %v13813_v55  ;;  %17436 = vst [vmem:[#allocation22_spill] sm:$0xff] %v13831_v51 }
 0x20a   : > { %v13745_v57 = vsub.f32 %v3118_v39, %v13735_v60  ;;  %10544 = vmatprep.subr.mxu0 %v13735_v60  ;;  %10584 = vmatprep.subr.mxu1 %v3294_v27  ;;  %v13766_v37 = vand.u32 4294901760, %v13757_v48  ;;  %v3110_v39 = vld [vmem:[#allocation4 + $0x28] sm:$0xff] }
 0x20b   : > { %10545 = vmatpush3.msra.mxu0 %v13735_v60  ;;  %10585 = vmatpush3.msra.mxu1 %v3294_v27  ;;  %v13827_v27 = vand.u32 4294901760, %v3110_v39 }
 0x20c   : > { %v13754_v23 = vand.u32 4294901760, %v13745_v57  ;;  %10546 = vmatprep.subr.mxu0 %v13747_v63  ;;  %17421 = vst [vmem:[#allocation61_spill] sm:$0xff] %v13766_v37  ;;  %10586 = vmatprep.subr.mxu1 %v3301_v2  ;;  %v3314_v47 = vsub.f32 %v13757_v48, %v13766_v37 }
 0x20d   : > { %10547 = vmatpush3.msra.mxu0 %v13747_v63  ;;  %10587 = vmatpush3.msra.mxu1 %v3301_v2  ;;  %17435 = vst [vmem:[#allocation13_spill] sm:$0xff] %v13827_v27  ;;  %v3343_v2 = vand.u32 4294901760, %v3342_v16  ;;  %v13837_v46 = vsub.f32 %v3110_v39, %v13827_v27  ;;  %v13864_v39 = vsub.f32 %v3108_v4, %v13852_v62 }
 0x20e   : > { %17420 = vst [vmem:[#allocation78_spill] sm:$0xff] %v13754_v23  ;;  %v3307_v17 = vsub.f32 %v13745_v57, %v13754_v23  ;;  %10548 = vmatprep.subr.mxu0 %v13760_v20  ;;  %v3315_v41 = vand.u32 4294901760, %v3314_v47  ;;  %v13843_v47 = vand.u32 4294901760, %v13831_v51 }
 0x20f   : > { %10549 = vmatpush3.msra.mxu0 %v13760_v20  ;;  %17437 = vst [vmem:[#allocation16_spill] sm:$0xff] %v13837_v46  ;;  %v13847_v44 = vand.u32 4294901760, %v13837_v46  ;;  %17444 = vst [vmem:[#allocation24_spill] sm:$0xff] %v13864_v39  ;;  %v13873_v33 = vand.u32 4294901760, %v13864_v39 }
 0x210   : > { %v3308_v58 = vand.u32 4294901760, %v3307_v17  ;;  %10550 = vmatprep.subr.mxu0 %v13768_v9  ;;  %v3349_v17 = vsub.f32 %v13816_v28, %v13825_v43  ;;  %17439 = vst [vmem:[#allocation19_spill] sm:$0xff] %v13843_v47 }
 0x211   : > { %10551 = vmatpush3.msra.mxu0 %v13768_v9  ;;  %17440 = vst [vmem:[#allocation29_spill] sm:$0xff] %v13847_v44  ;;  %17446 = vst [vmem:[#allocation37_spill] sm:$0xff] %v13873_v33 }
 0x212   : > { %10588 = vmatprep.subr.mxu1 %v3308_v58  ;;  %10552 = vmatprep.subr.mxu0 %v13779_v24 }
 0x213   : > { %10589 = vmatpush3.msra.mxu1 %v3308_v58  ;;  %10553 = vmatpush3.msra.mxu0 %v13779_v24  ;;  %v13839_v58 = vand.u32 4294901760, %v3109_v42 }
 0x214   : > { %10590 = vmatprep.subr.mxu1 %v3315_v41  ;;  %10554 = vmatprep.subr.mxu0 %v13792_v53 }
 0x215   : > { %10591 = vmatpush3.msra.mxu1 %v3315_v41  ;;  %10555 = vmatpush3.msra.mxu0 %v13792_v53  ;;  %17438 = vst [vmem:[#allocation25_spill] sm:$0xff] %v13839_v58  ;;  %v3350_v41 = vand.u32 4294901760, %v3349_v17  ;;  %v13850_v15 = vsub.f32 %v3109_v42, %v13839_v58  ;;  %v3106_v42 = vld [vmem:[#allocation4 + $0x8] sm:$0xff] }
 0x216   : > { %10592 = vmatprep.subr.mxu1 %v3322_v10  ;;  %10556 = vmatprep.subr.mxu0 %v13806_v18  ;;  %v13879_v34 = vand.u32 4294901760, %v3106_v42 }
 0x217   : > { %10593 = vmatpush3.msra.mxu1 %v3322_v10  ;;  %10557 = vmatpush3.msra.mxu0 %v13806_v18  ;;  %17441 = vst [vmem:[#allocation23_spill] sm:$0xff] %v13850_v15  ;;  %v3356_v10 = vsub.f32 %v13831_v51, %v13843_v47  ;;  %v13861_v52 = vand.u32 4294901760, %v13850_v15 }
 0x218   : > { %10594 = vmatprep.subr.mxu1 %v3329_v19  ;;  %10558 = vmatprep.subr.mxu0 %v13819_v21  ;;  %17448 = vst [vmem:[#allocation40_spill] sm:$0xff] %v13879_v34 }
 0x219   : > { %10595 = vmatpush3.msra.mxu1 %v3329_v19  ;;  %10559 = vmatpush3.msra.mxu0 %v13819_v21  ;;  %v3363_v19 = vsub.f32 %v13837_v46, %v13847_v44  ;;  %17443 = vst [vmem:[#allocation35_spill] sm:$0xff] %v13861_v52  ;;  %v3357_v16 = vand.u32 4294901760, %v3356_v10  ;;  %v3370_v17 = vsub.f32 %v13850_v15, %v13861_v52  ;;  %v3105_v10 = vld [vmem:[#allocation4] sm:$0xff] }
 0x21a   : > { %10596 = vmatprep.subr.mxu1 %v3336_v61  ;;  %10560 = vmatprep.subr.mxu0 %v13827_v27  ;;  %v13887_v35 = vand.u32 4294901760, %v3105_v10 }
 0x21b   : > { %10597 = vmatpush3.msra.mxu1 %v3336_v61  ;;  %10561 = vmatpush3.msra.mxu0 %v13827_v27  ;;  %v13866_v61 = vand.u32 4294901760, %v3107_v32 }
 0x21c   : > { %10598 = vmatprep.subr.mxu1 %v3343_v2  ;;  %10562 = vmatprep.subr.mxu0 %v13839_v58  ;;  %17450 = vst [vmem:[#allocation44_spill] sm:$0xff] %v13887_v35 }
 0x21d   : > { %10599 = vmatpush3.msra.mxu1 %v3343_v2  ;;  %17445 = vst [vmem:[#allocation28_spill] sm:$0xff] %v13866_v61  ;;  %10563 = vmatpush3.msra.mxu0 %v13839_v58  ;;  %v3364_v2 = vand.u32 4294901760, %v3363_v19  ;;  %v13876_v4 = vsub.f32 %v3107_v32, %v13866_v61  ;;  %v3377_v19 = vsub.f32 %v13864_v39, %v13873_v33 }
 0x21e   : > { %10600 = vmatprep.subr.mxu1 %v3350_v41  ;;  %10564 = vmatprep.subr.mxu0 %v13852_v62  ;;  %v13891_v32 = vsub.f32 %v3106_v42, %v13879_v34 }
 0x21f   : > { %10601 = vmatpush3.msra.mxu1 %v3350_v41  ;;  %17447 = vst [vmem:[#allocation31_spill] sm:$0xff] %v13876_v4  ;;  %10565 = vmatpush3.msra.mxu0 %v13852_v62  ;;  %v3371_v41 = vand.u32 4294901760, %v3370_v17  ;;  %v13885_v6 = vand.u32 4294901760, %v13876_v4  ;;  %v3378_v31 = vand.u32 4294901760, %v3377_v19  ;;  %v13897_v17 = vsub.f32 %v3105_v10, %v13887_v35 }
 0x220   : > { %10602 = vmatprep.subr.mxu1 %v3357_v16  ;;  %10566 = vmatprep.subr.mxu0 %v13866_v61  ;;  %17451 = vst [vmem:[#allocation38_spill] sm:$0xff] %v13891_v32  ;;  %v13901_v38 = vand.u32 4294901760, %v13891_v32 }
 0x221   : > { %10603 = vmatpush3.msra.mxu1 %v3357_v16  ;;  %17449 = vst [vmem:[#allocation34_spill] sm:$0xff] %v13885_v6  ;;  %10567 = vmatpush3.msra.mxu0 %v13866_v61  ;;  %v3384_v16 = vsub.f32 %v13876_v4, %v13885_v6  ;;  %17452 = vst [vmem:[#allocation47_spill] sm:$0xff] %v13897_v17  ;;  %v13905_v22 = vand.u32 4294901760, %v13897_v17 }
 0x222   : > { %10604 = vmatprep.subr.mxu1 %v3364_v2  ;;  %10568 = vmatprep.subr.mxu0 %v13879_v34  ;;  %17453 = vst [vmem:[#allocation39_spill] sm:$0xff] %v13901_v38 }
 0x223   : > { %10605 = vmatpush3.msra.mxu1 %v3364_v2  ;;  %10569 = vmatpush3.msra.mxu0 %v13879_v34  ;;  %v3385_v42 = vand.u32 4294901760, %v3384_v16  ;;  %17454 = vst [vmem:[#allocation50_spill] sm:$0xff] %v13905_v22  ;;  %v3391_v2 = vsub.f32 %v13891_v32, %v13901_v38  ;;  %v3398_v10 = vsub.f32 %v13897_v17, %v13905_v22 }
 0x224   : > { %10606 = vmatprep.subr.mxu1 %v3371_v41  ;;  %10570 = vmatprep.subr.mxu0 %v13887_v35 }
 0x225   : > { %10607 = vmatpush3.msra.mxu1 %v3371_v41  ;;  %10571 = vmatpush3.msra.mxu0 %v13887_v35  ;;  %v3392_v19 = vand.u32 4294901760, %v3391_v2  ;;  %v3399_v41 = vand.u32 4294901760, %v3398_v10 }
 0x226   : > { %10608 = vmatprep.subr.mxu1 %v3378_v31  ;;  %10628 = vmatprep.subr.mxu0 %v13723_v5 }
 0x227   : > { %10609 = vmatpush3.msra.mxu1 %v3378_v31 }
 0x228   : > { %10610 = vmatprep.subr.mxu1 %v3385_v42 }
 0x229   : > { %10611 = vmatpush3.msra.mxu1 %v3385_v42 }
 0x22a   : > { %10612 = vmatprep.subr.mxu1 %v3392_v19 }
 0x22b   : > { %10613 = vmatpush3.msra.mxu1 %v3392_v19 }
 0x22c   : > { %10614 = vmatprep.subr.mxu1 %v3399_v41 }
 0x22d   : > { %10615 = vmatpush3.msra.mxu1 %v3399_v41 }
 0x22e   : > { %10672 = vmatprep.subr.mxu1 %v13720_v8 }
 0x266   : > { %v10354_v16 = vpop.f32.mrf.mxu1 }
 0x268   : > { %v2463_v26 = vpop.f32.mrf.mxu1 }
 0x26a   : > { %v10357_v0 = vpop.f32.mrf.mxu1 }
 0x26c   : > { %v2475_v59 = vpop.f32.mrf.mxu1 }
 0x26f   : > { %v10310_v45 = vpop.f32.mrf.mxu0  ;;  %v10360_v31 = vpop.f32.mrf.mxu1 }
 0x270   : > { %v2253_v23 = vadd.f32 %v10310_v45, %v9084_v40 }
 0x271   : > { %v2242_v7 = vpop.f32.mrf.mxu0  ;;  %v2487_v1 = vpop.f32.mrf.mxu1 }
 0x272   : > { %v2243_v17 = vadd.f32 %v9084_v40, %v2242_v7  ;;  %v2470_v39 = vadd.f32 %v10354_v16, %v2253_v23 }
 0x274   : > { %v2464_v61 = vadd.f32 %v2463_v26, %v2243_v17 }
 0x275   : > { %v10313_v25 = vpop.f32.mrf.mxu0  ;;  %v10363_v29 = vpop.f32.mrf.mxu1 }
 0x276   : > { %v2273_v4 = vadd.f32 %v10313_v25, %v9084_v40 }
 0x277   : > { %v2262_v11 = vpop.f32.mrf.mxu0  ;;  %v2499_v42 = vpop.f32.mrf.mxu1 }
 0x278   : > { %v2263_v34 = vadd.f32 %v9084_v40, %v2262_v11  ;;  %v2482_v58 = vadd.f32 %v10357_v0, %v2273_v4 }
 0x27a   : > { %v2476_v45 = vadd.f32 %v2475_v59, %v2263_v34 }
 0x27b   : > { %v10316_v2 = vpop.f32.mrf.mxu0 }
 0x27c   : > { %v2293_v51 = vadd.f32 %v10316_v2, %v9084_v40 }
 0x27d   : > { %v2282_v10 = vpop.f32.mrf.mxu0 }
 0x27e   : > { %v2283_v36 = vadd.f32 %v9084_v40, %v2282_v10  ;;  %v2494_v18 = vadd.f32 %v10360_v31, %v2293_v51 }
 0x280   : > { %v10319_v19 = vpop.f32.mrf.mxu0 }
 0x281   : > { %v2313_v21 = vadd.f32 %v10319_v19, %v9084_v40 }
 0x282   : > { %v2302_v41 = vpop.f32.mrf.mxu0 }
 0x283   : > { %v2303_v53 = vadd.f32 %v9084_v40, %v2302_v41 }
 0x285   : > { %v2500_v51 = vadd.f32 %v2499_v42, %v2303_v53 }
 0x28c   : > { %v10442_v22 = vpop.f32.mrf.mxu1 }
 0x28e   : > { %v2747_v38 = vpop.f32.mrf.mxu1 }
 0x291   : > { %v10445_v6 = vpop.f32.mrf.mxu1 }
 0x293   : > { %v2763_v52 = vpop.f32.mrf.mxu1 }
 0x296   : > { %v10398_v33 = vpop.f32.mrf.mxu0  ;;  %v10448_v47 = vpop.f32.mrf.mxu1 }
 0x297   : > { %v2617_v46 = vadd.f32 %v10398_v33, %v2470_v39  ;;  %v2488_v33 = vadd.f32 %v2487_v1, %v2283_v36 }
 0x298   : > { %v2609_v44 = vpop.f32.mrf.mxu0  ;;  %v2779_v55 = vpop.f32.mrf.mxu1 }
 0x299   : > { %v2610_v28 = vadd.f32 %v2609_v44, %v2464_v61  ;;  %v2756_v30 = vadd.f32 %v10442_v22, %v2617_v46  ;;  %v2506_v61 = vadd.f32 %v10363_v29, %v2313_v21 }
 0x29b   : > { %v2748_v16 = vadd.f32 %v2747_v38, %v2610_v28 }
 0x29c   : > { %v10401_v43 = vpop.f32.mrf.mxu0  ;;  %v13917_v49 = vpop.f32.mrf.mxu1 }
 0x29d   : > { %v2631_v14 = vadd.f32 %v10401_v43, %v2482_v58 }
 0x29e   : > { %v2623_v54 = vpop.f32.mrf.mxu0  ;;  %v13919_v56 = vpop.f32.mrf.mxu1 }
 0x29f   : > { %v2624_v25 = vadd.f32 %v2623_v54, %v2476_v45  ;;  %v2772_v44 = vadd.f32 %v10445_v6, %v2631_v14 }
 0x2a1   : > { %v2764_v34 = vadd.f32 %v2763_v52, %v2624_v25 }
 0x2a2   : > { %v10404_v37 = vpop.f32.mrf.mxu0 }
 0x2a3   : > { %v2645_v11 = vadd.f32 %v10404_v37, %v2494_v18 }
 0x2a4   : > { %v2637_v50 = vpop.f32.mrf.mxu0 }
 0x2a5   : > { %v2638_v0 = vadd.f32 %v2637_v50, %v2488_v33  ;;  %v2788_v54 = vadd.f32 %v10448_v47, %v2645_v11 }
 0x2a7   : > { %v10407_v35 = vpop.f32.mrf.mxu0  ;;  %v2780_v40 = vadd.f32 %v2779_v55, %v2638_v0 }
 0x2a9   : > { %v2651_v27 = vpop.f32.mrf.mxu0 }
 0x2aa   : > { %v2652_v36 = vadd.f32 %v2651_v27, %v2500_v51 }
 0x2ac   : > { %v2796_v47 = vadd.f32 %v13919_v56, %v2652_v36 }
 0x2b4   : > { %v10530_v32 = vpop.f32.mrf.mxu1 }
 0x2b6   : > { %v3051_v15 = vpop.f32.mrf.mxu1 }
 0x2b8   : > { %v10533_v62 = vpop.f32.mrf.mxu1 }
 0x2ba   : > { %v3063_v7 = vpop.f32.mrf.mxu1 }
 0x2bc   : > { %v10486_v13 = vpop.f32.mrf.mxu0  ;;  %v10536_v4 = vpop.f32.mrf.mxu1 }
 0x2bd   : > { %v2929_v23 = vadd.f32 %v10486_v13, %v2756_v30  ;;  %v2659_v13 = vadd.f32 %v10407_v35, %v2506_v61 }
 0x2be   : > { %v2922_v26 = vpop.f32.mrf.mxu0  ;;  %v3075_v1 = vpop.f32.mrf.mxu1 }
 0x2bf   : > { %v3058_v39 = vadd.f32 %v10530_v32, %v2929_v23  ;;  %v2923_v17 = vadd.f32 %v2922_v26, %v2748_v16  ;;  %v2804_v28 = vadd.f32 %v13917_v49, %v2659_v13 }
 0x2c0   : > { %v10489_v43 = vpop.f32.mrf.mxu0  ;;  %v10539_v53 = vpop.f32.mrf.mxu1 }
 0x2c1   : > { %12216 = vtanh.f32 %v3058_v39  ;;  %v3052_v59 = vadd.f32 %v3051_v15, %v2923_v17  ;;  %v2941_v22 = vadd.f32 %v10489_v43, %v2772_v44 }
 0x2c2   : > { %v2934_v46 = vpop.f32.mrf.mxu0 }
 0x2c3   : > { %12218 = vtanh.f32 %v3052_v59  ;;  %v3070_v38 = vadd.f32 %v10533_v62, %v2941_v22  ;;  %v2935_v37 = vadd.f32 %v2934_v46, %v2764_v34  ;;  %v3087_v62 = vpop.f32.mrf.mxu1 }
 0x2c4   : > { %v10492_v30 = vpop.f32.mrf.mxu0 }
 0x2c5   : > { %12220 = vtanh.f32 %v3070_v38  ;;  %v3064_v6 = vadd.f32 %v3063_v7, %v2935_v37  ;;  %v2953_v29 = vadd.f32 %v10492_v30, %v2788_v54 }
 0x2c6   : > { %v2946_v50 = vpop.f32.mrf.mxu0 }
 0x2c7   : > { %12222 = vtanh.f32 %v3064_v6  ;;  %v3082_v14 = vadd.f32 %v10536_v4, %v2953_v29  ;;  %v2947_v18 = vadd.f32 %v2946_v50, %v2780_v40 }
 0x2c8   : > { %v10495_v21 = vpop.f32.mrf.mxu0 }
 0x2c9   : > { %12224 = vtanh.f32 %v3082_v14  ;;  %v3076_v35 = vadd.f32 %v3075_v1, %v2947_v18  ;;  %v2965_v58 = vadd.f32 %v10495_v21, %v2804_v28  ;;  %v17463_v28 = vld [vmem:[#allocation79_spill] sm:$0xff] }
 0x2ca   : > { %v2958_v15 = vpop.f32.mrf.mxu0  ;;  %v17465_v21 = vld [vmem:[#allocation11_spill] sm:$0xff] }
 0x2cb   : > { %12226 = vtanh.f32 %v3076_v35  ;;  %v3094_v55 = vadd.f32 %v10539_v53, %v2965_v58  ;;  %v2959_v27 = vadd.f32 %v2958_v15, %v2796_v47  ;;  %v17466_v47 = vld [vmem:[#allocation20_spill] sm:$0xff] }
 0x2cd   : > { %12228 = vtanh.f32 %v3094_v55  ;;  %v3088_v52 = vadd.f32 %v3087_v62, %v2959_v27  ;;  %v17468_v55 = vld [vmem:[#allocation80_spill] sm:$0xff]  ;;  %v17469_v27 = vld [vmem:[#allocation13_spill] sm:$0xff] }
 0x2ce   : > { %v13923_v32 = vpop.eup %12216  ;;  %v17470_v62 = vld [vmem:[#allocation9_spill] sm:$0xff] }
 0x2cf   : > { %17455 = vst [vmem:[#allocation43_spill] sm:$0xff] %v13923_v32  ;;  %12230 = vtanh.f32 %v3088_v52  ;;  %v13926_v31 = vand.u32 4294901760, %v13923_v32  ;;  %v17471_v52 = vld [vmem:[#allocation25_spill] sm:$0xff] }
 0x2d0   : > { %v13928_v49 = vpop.eup %12218 }
 0x2d1   : > { %17456 = vst [vmem:[#allocation52_spill] sm:$0xff] %v13928_v49  ;;  %v13931_v2 = vand.u32 4294901760, %v13928_v49  ;;  %v13935_v56 = vsub.f32 %v13923_v32, %v13926_v31 }
 0x2d2   : > { %v13937_v42 = vpop.eup %12220 }
 0x2d3   : > { %17457 = vst [vmem:[#allocation46_spill] sm:$0xff] %v13937_v42  ;;  %10616 = vmatprep.mubr.f32.mxu1 %v13931_v2  ;;  %v13941_v10 = vand.u32 4294901760, %v13937_v42  ;;  %v13945_v19 = vsub.f32 %v13928_v49, %v13931_v2  ;;  %v3221_v41 = vand.u32 4294901760, %v13935_v56 }
 0x2d4   : > { %v13948_v45 = vpop.eup %12222  ;;  %10617 = vmatmul.mubr.f32.vlgmr.msra.gmra.mxu1 %v13926_v31 }
 0x2d5   : > { %17458 = vst [vmem:[#allocation49_spill] sm:$0xff] %v13948_v45  ;;  %10673 = vmatpush3.msra.mxu1 %v13720_v8  ;;  %v13953_v7 = vand.u32 4294901760, %v13948_v45  ;;  %v3211_v25 = vand.u32 4294901760, %v13945_v19  ;;  %v13958_v23 = vsub.f32 %v13937_v42, %v13941_v10  ;;  %v3222_v33 = vsub.f32 %v13935_v56, %v3221_v41 }
 0x2d6   : > { %v13960_v16 = vpop.eup %12224  ;;  %10674 = vmatprep.subr.mxu1 %v13725_v3 }
 0x2d7   : > { %17459 = vst [vmem:[#allocation53_spill] sm:$0xff] %v13960_v16  ;;  %10675 = vmatpush3.msra.mxu1 %v13725_v3  ;;  %10619 = vmatprep.mubr.f32.mxu1 %v13953_v7  ;;  %v3212_v11 = vsub.f32 %v13945_v19, %v3211_v25  ;;  %v13970_v26 = vand.u32 4294901760, %v13960_v16  ;;  %v13974_v39 = vsub.f32 %v13948_v45, %v13953_v7  ;;  %v3241_v4 = vand.u32 4294901760, %v13958_v23 }
 0x2d8   : > { %v13976_v17 = vpop.eup %12226  ;;  %10676 = vmatprep.subr.mxu1 %v13735_v60  ;;  %10620 = vmatmul.mubr.f32.gmra.mxu1 %v13941_v10  ;;  %v3223_v59 = vand.u32 4294901760, %v3222_v33  ;;  %v17474_v33 = vld [vmem:[#allocation22_spill] sm:$0xff] }
 0x2d9   : > { %17460 = vst [vmem:[#allocation54_spill] sm:$0xff] %v13976_v17  ;;  %10677 = vmatpush3.msra.mxu1 %v13735_v60  ;;  %v3213_v44 = vand.u32 4294901760, %v3212_v11  ;;  %v13982_v0 = vand.u32 4294901760, %v13976_v17  ;;  %v3231_v61 = vand.u32 4294901760, %v13974_v39  ;;  %v13999_v51 = vsub.f32 %v13960_v16, %v13970_v26  ;;  %v17473_v11 = vld [vmem:[#allocation32_spill] sm:$0xff] }
 0x2da   : > { %v13986_v43 = vpop.eup %12228  ;;  %10678 = vmatprep.subr.mxu1 %v13747_v63  ;;  %v3242_v37 = vsub.f32 %v13958_v23, %v3241_v4 }
 0x2db   : > { %17461 = vst [vmem:[#allocation12_spill] sm:$0xff] %v13986_v43  ;;  %10679 = vmatpush3.msra.mxu1 %v13747_v63  ;;  %10572 = vmatprep.mubr.f32.mxu0 %v3213_v44  ;;  %v3232_v22 = vsub.f32 %v13974_v39, %v3231_v61  ;;  %v13995_v34 = vsub.f32 %v13976_v17, %v13982_v0  ;;  %v14006_v54 = vand.u32 4294901760, %v13986_v43  ;;  %v3261_v40 = vand.u32 4294901760, %v13999_v51  ;;  %v17475_v44 = vld [vmem:[#allocation28_spill] sm:$0xff] }
 0x2dc   : > { %v14001_v46 = vpop.eup %12230  ;;  %10622 = vmatprep.mubr.f32.mxu1 %v13982_v0  ;;  %10680 = vmatprep.subr.mxu1 %v13760_v20  ;;  %v3243_v6 = vand.u32 4294901760, %v3242_v37  ;;  %v17480_v37 = vld [vmem:[#allocation24_spill] sm:$0xff] }
 0x2dd   : > { %17462 = vst [vmem:[#allocation15_spill] sm:$0xff] %v14001_v46  ;;  %10573 = vmatmul.mubr.f32.vlgmr.msra.gmra.mxu0 %v3223_v59  ;;  %10623 = vmatmul.mubr.f32.gmra.mxu1 %v13970_v26  ;;  %v3233_v13 = vand.u32 4294901760, %v3232_v22  ;;  %v14010_v38 = vand.u32 4294901760, %v14001_v46  ;;  %v3251_v1 = vand.u32 4294901760, %v13995_v34  ;;  %v3262_v50 = vsub.f32 %v13999_v51, %v3261_v40  ;;  %v17477_v59 = vld [vmem:[#allocation40_spill] sm:$0xff]  ;;  %v17478_v22 = vld [vmem:[#allocation23_spill] sm:$0xff] }
 0x2de   : > { %10629 = vmatpush3.msra.mxu0 %v13723_v5  ;;  %10681 = vmatpush3.msra.mxu1 %v13760_v20  ;;  %v14032_v5 = vsub.f32 %v13986_v43, %v14006_v54 }
 0x2df   : > { %10630 = vmatprep.subr.mxu0 %v13733_v12  ;;  %10682 = vmatprep.subr.mxu1 %v13768_v9  ;;  %v3252_v30 = vsub.f32 %v13995_v34, %v3251_v1  ;;  %v14026_v36 = vsub.f32 %v14001_v46, %v14010_v38  ;;  %v3263_v53 = vand.u32 4294901760, %v3262_v50 }
 0x2e0   : > { %10631 = vmatpush3.msra.mxu0 %v13733_v12  ;;  %10683 = vmatpush3.msra.mxu1 %v13768_v9  ;;  %v3281_v18 = vand.u32 4294901760, %v14032_v5 }
 0x2e1   : > { %10575 = vmatprep.mubr.f32.mxu0 %v3233_v13  ;;  %10625 = vmatprep.mubr.f32.mxu1 %v14010_v38  ;;  %v3271_v29 = vand.u32 4294901760, %v14026_v36  ;;  %v3253_v12 = vand.u32 4294901760, %v3252_v30  ;;  %v17479_v13 = vld [vmem:[#allocation44_spill] sm:$0xff]  ;;  %v17481_v30 = vld [vmem:[#allocation31_spill] sm:$0xff] }
 0x2e2   : > { %10632 = vmatprep.subr.mxu0 %v13745_v57  ;;  %10684 = vmatprep.subr.mxu1 %v13779_v24  ;;  %v3282_v58 = vsub.f32 %v14032_v5, %v3281_v18 }
 0x2e3   : > { %10576 = vmatmul.mubr.f32.gmra.mxu0 %v3243_v6  ;;  %10626 = vmatmul.mubr.f32.gmra.mxu1 %v14006_v54  ;;  %v3272_v14 = vsub.f32 %v14026_v36, %v3271_v29  ;;  %v17482_v6 = vld [vmem:[#allocation38_spill] sm:$0xff] }
 0x2e4   : > { %10633 = vmatpush3.msra.mxu0 %v13745_v57  ;;  %10685 = vmatpush3.msra.mxu1 %v13779_v24  ;;  %v17464_v57 = vld [vmem:[#allocation76_spill] sm:$0xff]  ;;  %v3283_v15 = vand.u32 4294901760, %v3282_v58  ;;  %v4088_v58 = vld [vmem:[#allocation6 + $0x50] sm:$0xff] }
 0x2e5   : > { %10634 = vmatprep.subr.mxu0 %v13757_v48  ;;  %10686 = vmatprep.subr.mxu1 %v17463_v28  ;;  %v3273_v35 = vand.u32 4294901760, %v3272_v14 }
 0x2e6   : > { %10704 = vmatprep.mubr.f32.mxu1 %v3211_v25  ;;  %10635 = vmatpush3.msra.mxu0 %v13757_v48  ;;  %v17467_v48 = vld [vmem:[#allocation77_spill] sm:$0xff] }
 0x2e7   : > { %10687 = vmatpush3.msra.mxu1 %v17463_v28  ;;  %10578 = vmatprep.mubr.f32.mxu0 %v3253_v12  ;;  %v17472_v25 = vld [vmem:[#allocation17_spill] sm:$0xff] }
 0x2e8   : > { %10636 = vmatprep.subr.mxu0 %v17464_v57  ;;  %10688 = vmatprep.subr.mxu1 %v17465_v21 }
 0x2e9   : > { %10579 = vmatmul.mubr.f32.gmra.mxu0 %v3263_v53  ;;  %10689 = vmatpush3.msra.mxu1 %v17465_v21 }
 0x2ea   : > { %10637 = vmatpush3.msra.mxu0 %v17464_v57  ;;  %10690 = vmatprep.subr.mxu1 %v17466_v47 }
 0x2eb   : > { %10638 = vmatprep.subr.mxu0 %v17467_v48  ;;  %10691 = vmatpush3.msra.mxu1 %v17466_v47 }
 0x2ec   : > { %10639 = vmatpush3.msra.mxu0 %v17467_v48  ;;  %10581 = vmatprep.mubr.f32.mxu0 %v3273_v35 }
 0x2ed   : > { %10640 = vmatprep.subr.mxu0 %v17468_v55  ;;  %10692 = vmatprep.subr.mxu1 %v17469_v27 }
 0x2ee   : > { %10582 = vmatmul.mubr.f32.gmra.mxu0 %v3283_v15  ;;  %10693 = vmatpush3.msra.mxu1 %v17469_v27 }
 0x2ef   : > { %10641 = vmatpush3.msra.mxu0 %v17468_v55  ;;  %10660 = vmatprep.mubr.f32.mxu0 %v13945_v19  ;;  %v17476_v19 = vld [vmem:[#allocation16_spill] sm:$0xff]  ;;  %v14245_v55 = vand.u32 4294901760, %v4088_v58 }
 0x2f0   : > { %10642 = vmatprep.subr.mxu0 %v17470_v62  ;;  %10694 = vmatprep.subr.mxu1 %v17471_v52 }
 0x2f1   : > { %10643 = vmatpush3.msra.mxu0 %v17470_v62  ;;  %10695 = vmatpush3.msra.mxu1 %v17471_v52  ;;  %v4087_v62 = vld [vmem:[#allocation6 + $0x48] sm:$0xff] }
 0x2f2   : > { %10644 = vmatprep.subr.mxu0 %v17472_v25  ;;  %10696 = vmatprep.subr.mxu1 %v17473_v11 }
 0x2f3   : > { %10645 = vmatpush3.msra.mxu0 %v17472_v25  ;;  %10697 = vmatpush3.msra.mxu1 %v17473_v11 }
 0x2f4   : > { %10646 = vmatprep.subr.mxu0 %v17474_v33  ;;  %10698 = vmatprep.subr.mxu1 %v17475_v44 }
 0x2f5   : > { %10647 = vmatpush3.msra.mxu0 %v17474_v33  ;;  %10699 = vmatpush3.msra.mxu1 %v17475_v44  ;;  %v14256_v33 = vand.u32 4294901760, %v4087_v62 }
 0x2f6   : > { %10648 = vmatprep.subr.mxu0 %v17476_v19  ;;  %10700 = vmatprep.subr.mxu1 %v17477_v59 }
 0x2f7   : > { %10649 = vmatpush3.msra.mxu0 %v17476_v19  ;;  %10701 = vmatpush3.msra.mxu1 %v17477_v59  ;;  %v4086_v19 = vld [vmem:[#allocation6 + $0x40] sm:$0xff] }
 0x2f8   : > { %10650 = vmatprep.subr.mxu0 %v17478_v22  ;;  %10702 = vmatprep.subr.mxu1 %v17479_v13 }
 0x2f9   : > { %10651 = vmatpush3.msra.mxu0 %v17478_v22  ;;  %10703 = vmatpush3.msra.mxu1 %v17479_v13 }
 0x2fa   : > { %10652 = vmatprep.subr.mxu0 %v17480_v37  ;;  %10705 = vmatmul.mubr.f32.vlgmr.msra.gmra.mxu1 %v3221_v41  ;;  %v17491_v41 = vld [vmem:[#allocation14_spill] sm:$0xff] }
 0x2fb   : > { %10760 = vmatprep.subr.mxu1 %v13720_v8  ;;  %10653 = vmatpush3.msra.mxu0 %v17480_v37  ;;  %v14269_v37 = vand.u32 4294901760, %v4086_v19 }
 0x2fc   : > { %10707 = vmatprep.mubr.f32.mxu1 %v3231_v61  ;;  %10761 = vmatpush3.msra.mxu1 %v13720_v8  ;;  %v17483_v8 = vld [vmem:[#allocation47_spill] sm:$0xff] }
 0x2fd   : > { %10654 = vmatprep.subr.mxu0 %v17481_v30  ;;  %10762 = vmatprep.subr.mxu1 %v13725_v3  ;;  %v17495_v61 = vld [vmem:[#allocation35_spill] sm:$0xff]  ;;  %17509 = vst [vmem:[#allocation45_spill] sm:$0xff] %v14269_v37 }
 0x2fe   : > { %10655 = vmatpush3.msra.mxu0 %v17481_v30  ;;  %10763 = vmatpush3.msra.mxu1 %v13725_v3  ;;  %v17484_v3 = vld [vmem:[#allocation74_spill] sm:$0xff] }
 0x2ff   : > { %10656 = vmatprep.subr.mxu0 %v17482_v6  ;;  %10708 = vmatmul.mubr.f32.gmra.mxu1 %v3241_v4  ;;  %v17496_v4 = vld [vmem:[#allocation37_spill] sm:$0xff] }
 0x300   : > { %10764 = vmatprep.subr.mxu1 %v13735_v60  ;;  %10657 = vmatpush3.msra.mxu0 %v17482_v6  ;;  %v4085_v6 = vld [vmem:[#allocation6 + $0x38] sm:$0xff] }
 0x301   : > { %10710 = vmatprep.mubr.f32.mxu1 %v3251_v1  ;;  %10765 = vmatpush3.msra.mxu1 %v13735_v60  ;;  %v17485_v60 = vld [vmem:[#allocation73_spill] sm:$0xff]  ;;  %v17499_v1 = vld [vmem:[#allocation50_spill] sm:$0xff] }
 0x302   : > { %10658 = vmatprep.subr.mxu0 %v17483_v8  ;;  %10766 = vmatprep.subr.mxu1 %v13747_v63 }
 0x303   : > { %10659 = vmatpush3.msra.mxu0 %v17483_v8  ;;  %10767 = vmatpush3.msra.mxu1 %v13747_v63  ;;  %v17486_v63 = vld [vmem:[#allocation78_spill] sm:$0xff] }
 0x304   : > { %10661 = vmatmul.mubr.f32.vlgmr.msra.gmra.mxu0 %v13935_v56  ;;  %10711 = vmatmul.mubr.f32.gmra.mxu1 %v3261_v40  ;;  %v17490_v56 = vld [vmem:[#allocation75_spill] sm:$0xff]  ;;  %v4093_v40 = vld [vmem:[#allocation6 + $0x78] sm:$0xff] }
 0x305   : > { %10716 = vmatprep.subr.mxu0 %v17484_v3  ;;  %10768 = vmatprep.subr.mxu1 %v13760_v20 }
 0x306   : > { %10663 = vmatprep.mubr.f32.mxu0 %v13974_v39  ;;  %10713 = vmatprep.mubr.f32.mxu1 %v3271_v29  ;;  %v17493_v39 = vld [vmem:[#allocation19_spill] sm:$0xff] }
 0x307   : > { %10717 = vmatpush3.msra.mxu0 %v17484_v3  ;;  %10769 = vmatpush3.msra.mxu1 %v13760_v20  ;;  %v17487_v20 = vld [vmem:[#allocation61_spill] sm:$0xff] }
 0x308   : > { %10718 = vmatprep.subr.mxu0 %v17485_v60  ;;  %10770 = vmatprep.subr.mxu1 %v13768_v9 }
 0x309   : > { %10719 = vmatpush3.msra.mxu0 %v17485_v60  ;;  %10771 = vmatpush3.msra.mxu1 %v13768_v9  ;;  %v17488_v9 = vld [vmem:[#allocation59_spill] sm:$0xff]  ;;  %v14281_v60 = vsub.f32 %v4086_v19, %v14269_v37 }
 0x30a   : > { %10664 = vmatmul.mubr.f32.gmra.mxu0 %v13958_v23  ;;  %10714 = vmatmul.mubr.f32.gmra.mxu1 %v3281_v18  ;;  %v17492_v23 = vld [vmem:[#allocation10_spill] sm:$0xff]  ;;  %v4089_v18 = vld [vmem:[#allocation6 + $0x58] sm:$0xff] }
 0x30b   : > { %10720 = vmatprep.subr.mxu0 %v17486_v63  ;;  %10772 = vmatprep.subr.mxu1 %v13779_v24  ;;  %v14237_v35 = vand.u32 4294901760, %v4089_v18  ;;  %17511 = vst [vmem:[#allocation51_spill] sm:$0xff] %v14281_v60 }
 0x30c   : > { %10666 = vmatprep.mubr.f32.mxu0 %v13995_v34  ;;  %10721 = vmatpush3.msra.mxu0 %v17486_v63  ;;  %v17497_v34 = vld [vmem:[#allocation34_spill] sm:$0xff]  ;;  %v14283_v63 = vand.u32 4294901760, %v4085_v6 }
 0x30d   : > { %10773 = vmatpush3.msra.mxu1 %v13779_v24  ;;  %10792 = vmatprep.mubr.f32.mxu1 %v13931_v2  ;;  %v17489_v24 = vld [vmem:[#allocation72_spill] sm:$0xff] }
 0x30e   : > { %10722 = vmatprep.subr.mxu0 %v17487_v20  ;;  %10774 = vmatprep.subr.mxu1 %v17463_v28  ;;  %17512 = vst [vmem:[#allocation55_spill] sm:$0xff] %v14283_v63 }
 0x30f   : > { %10723 = vmatpush3.msra.mxu0 %v17487_v20  ;;  %10775 = vmatpush3.msra.mxu1 %v17463_v28 }
 0x310   : > { %10667 = vmatmul.mubr.f32.gmra.mxu0 %v13999_v51  ;;  %10724 = vmatprep.subr.mxu0 %v17488_v9  ;;  %v17498_v51 = vld [vmem:[#allocation39_spill] sm:$0xff] }
 0x311   : > { %10776 = vmatprep.subr.mxu1 %v17465_v21  ;;  %10669 = vmatprep.mubr.f32.mxu0 %v14026_v36  ;;  %v4092_v36 = vld [vmem:[#allocation6 + $0x70] sm:$0xff] }
 0x312   : > { %10725 = vmatpush3.msra.mxu0 %v17488_v9  ;;  %10777 = vmatpush3.msra.mxu1 %v17465_v21  ;;  %v4084_v9 = vld [vmem:[#allocation6 + $0x30] sm:$0xff] }
 0x313   : > { %10726 = vmatprep.subr.mxu0 %v17489_v24  ;;  %10778 = vmatprep.subr.mxu1 %v17466_v47 }
 0x314   : > { %10727 = vmatpush3.msra.mxu0 %v17489_v24  ;;  %10779 = vmatpush3.msra.mxu1 %v17466_v47 }
 0x315   : > { %10670 = vmatmul.mubr.f32.gmra.mxu0 %v14032_v5  ;;  %10728 = vmatprep.subr.mxu0 %v17490_v56  ;;  %v14202_v5 = vand.u32 4294901760, %v4092_v36 }
 0x316   : > { %10780 = vmatprep.subr.mxu1 %v17469_v27  ;;  %10729 = vmatpush3.msra.mxu0 %v17490_v56 }
 0x317   : > { %10748 = vmatprep.mubr.f32.mxu0 %v13931_v2  ;;  %10781 = vmatpush3.msra.mxu1 %v17469_v27  ;;  %v17494_v2 = vld [vmem:[#allocation29_spill] sm:$0xff]  ;;  %v14248_v27 = vsub.f32 %v4089_v18, %v14237_v35 }
 0x318   : > { %10730 = vmatprep.subr.mxu0 %v17491_v41  ;;  %10782 = vmatprep.subr.mxu1 %v17471_v52 }
 0x319   : > { %10731 = vmatpush3.msra.mxu0 %v17491_v41  ;;  %10783 = vmatpush3.msra.mxu1 %v17471_v52  ;;  %17504 = vst [vmem:[#allocation30_spill] sm:$0xff] %v14248_v27  ;;  %v14290_v41 = vand.u32 4294901760, %v14281_v60 }
 0x31a   : > { %10732 = vmatprep.subr.mxu0 %v17492_v23  ;;  %10784 = vmatprep.subr.mxu1 %v17473_v11 }
 0x31b   : > { %10733 = vmatpush3.msra.mxu0 %v17492_v23  ;;  %10785 = vmatpush3.msra.mxu1 %v17473_v11  ;;  %v14254_v11 = vsub.f32 %v4088_v58, %v14245_v55  ;;  %17513 = vst [vmem:[#allocation56_spill] sm:$0xff] %v14290_v41  ;;  %v14293_v23 = vsub.f32 %v4085_v6, %v14283_v63 }
 0x31c   : > { %10734 = vmatprep.subr.mxu0 %v17493_v39  ;;  %10786 = vmatprep.subr.mxu1 %v17475_v44 }
 0x31d   : > { %10735 = vmatpush3.msra.mxu0 %v17493_v39  ;;  %10787 = vmatpush3.msra.mxu1 %v17475_v44  ;;  %17505 = vst [vmem:[#allocation33_spill] sm:$0xff] %v14254_v11  ;;  %v14260_v44 = vand.u32 4294901760, %v14248_v27  ;;  %v14264_v22 = vand.u32 4294901760, %v14254_v11  ;;  %17514 = vst [vmem:[#allocation79_spill] sm:$0xff] %v14293_v23  ;;  %v14296_v39 = vand.u32 4294901760, %v4084_v9 }
 0x31e   : > { %10736 = vmatprep.subr.mxu0 %v17494_v2  ;;  %10788 = vmatprep.subr.mxu1 %v17477_v59 }
 0x31f   : > { %10737 = vmatpush3.msra.mxu0 %v17494_v2  ;;  %10789 = vmatpush3.msra.mxu1 %v17477_v59  ;;  %17506 = vst [vmem:[#allocation36_spill] sm:$0xff] %v14260_v44  ;;  %17507 = vst [vmem:[#allocation41_spill] sm:$0xff] %v14264_v22  ;;  %v4294_v30 = vsub.f32 %v14248_v27, %v14260_v44  ;;  %v4301_v8 = vsub.f32 %v14254_v11, %v14264_v22  ;;  %v4083_v2 = vld [vmem:[#allocation6 + $0x28] sm:$0xff]  ;;  %v9085_v22 = vld [vmem:[%s16656_s6] ss:$0 sm:$0xff] }
 0x320   : > { %10738 = vmatprep.subr.mxu0 %v17495_v61  ;;  %10790 = vmatprep.subr.mxu1 %v17479_v13  ;;  %17515 = vst [vmem:[#allocation76_spill] sm:$0xff] %v14296_v39 }
 0x321   : > { %10739 = vmatpush3.msra.mxu0 %v17495_v61  ;;  %10791 = vmatpush3.msra.mxu1 %v17479_v13  ;;  %v14267_v13 = vsub.f32 %v4087_v62, %v14256_v33  ;;  %v4295_v20 = vand.u32 4294901760, %v4294_v30  ;;  %v4302_v24 = vand.u32 4294901760, %v4301_v8  ;;  %v4079_v8 = vld [vmem:[#allocation6 + $0x8] sm:$0xff] }
 0x322   : > { %10740 = vmatprep.subr.mxu0 %v17496_v4  ;;  %10793 = vmatmul.mubr.f32.vlgmr.msra.gmra.mxu1 %v13926_v31 }
 0x323   : > { %10741 = vmatpush3.msra.mxu0 %v17496_v4  ;;  %10795 = vmatprep.mubr.f32.mxu1 %v13953_v7  ;;  %17508 = vst [vmem:[#allocation42_spill] sm:$0xff] %v14267_v13  ;;  %v14278_v3 = vand.u32 4294901760, %v14267_v13  ;;  %v4315_v4 = vsub.f32 %v14281_v60, %v14290_v41 }
 0x324   : > { %10742 = vmatprep.subr.mxu0 %v17497_v34 }
 0x325   : > { %10743 = vmatpush3.msra.mxu0 %v17497_v34  ;;  %17510 = vst [vmem:[#allocation48_spill] sm:$0xff] %v14278_v3  ;;  %v4308_v56 = vsub.f32 %v14267_v13, %v14278_v3  ;;  %v14302_v34 = vand.u32 4294901760, %v14293_v23 }
 0x326   : > { %10744 = vmatprep.subr.mxu0 %v17498_v51  ;;  %10796 = vmatmul.mubr.f32.gmra.mxu1 %v13941_v10 }
 0x327   : > { %10745 = vmatpush3.msra.mxu0 %v17498_v51  ;;  %10798 = vmatprep.mubr.f32.mxu1 %v13982_v0  ;;  %v4309_v61 = vand.u32 4294901760, %v4308_v56  ;;  %17516 = vst [vmem:[#allocation11_spill] sm:$0xff] %v14302_v34  ;;  %v14304_v51 = vand.u32 4294901760, %v4083_v2 }
 0x328   : > { %10746 = vmatprep.subr.mxu0 %v17499_v1 }
 0x329   : > { %10747 = vmatpush3.msra.mxu0 %v17499_v1  ;;  %17517 = vst [vmem:[#allocation20_spill] sm:$0xff] %v14304_v51  ;;  %v14308_v1 = vsub.f32 %v4084_v9, %v14296_v39 }
 0x32a   : > { %10749 = vmatmul.mubr.f32.vlgmr.msra.gmra.mxu0 %v13926_v31  ;;  %10799 = vmatmul.mubr.f32.gmra.mxu1 %v13970_v26  ;;  %v14197_v31 = vand.u32 4294901760, %v4093_v40 }
 0x32b   : > { %10751 = vmatprep.mubr.f32.mxu0 %v13953_v7  ;;  %10801 = vmatprep.mubr.f32.mxu1 %v14010_v38  ;;  %17518 = vst [vmem:[#allocation77_spill] sm:$0xff] %v14308_v1  ;;  %v14320_v18 = vand.u32 4294901760, %v14308_v1 }
 0x32c   : > { %v14200_v7 = vsub.f32 %v4093_v40, %v14197_v31  ;;  %10804 = vmatprep.subr.mxu0 %v14197_v31  ;;  %v4082_v40 = vld [vmem:[#allocation6 + $0x20] sm:$0xff] }
 0x32d   : > { %10805 = vmatpush3.msra.mxu0 %v14197_v31  ;;  %17521 = vst [vmem:[#allocation9_spill] sm:$0xff] %v14320_v18  ;;  %v4329_v62 = vsub.f32 %v14308_v1, %v14320_v18 }
 0x32e   : > { %10752 = vmatmul.mubr.f32.gmra.mxu0 %v13941_v10  ;;  %10802 = vmatmul.mubr.f32.gmra.mxu1 %v14006_v54  ;;  %v4091_v10 = vld [vmem:[#allocation6 + $0x68] sm:$0xff] }
 0x32f   : > { %10754 = vmatprep.mubr.f32.mxu0 %v13982_v0  ;;  %v14210_v0 = vsub.f32 %v4092_v36, %v14202_v5  ;;  %10806 = vmatprep.subr.mxu0 %v14202_v5  ;;  %v4316_v36 = vand.u32 4294901760, %v4315_v4  ;;  %v4330_v6 = vand.u32 4294901760, %v4329_v62 }
 0x330   : > { %10807 = vmatpush3.msra.mxu0 %v14202_v5 }
 0x331   : > { %v14219_v12 = vand.u32 4294901760, %v14210_v0 }
 0x332   : > { %10755 = vmatmul.mubr.f32.gmra.mxu0 %v13970_v26  ;;  %v14207_v26 = vand.u32 4294901760, %v14200_v7 }
 0x333   : > { %10757 = vmatprep.mubr.f32.mxu0 %v14010_v38  ;;  %v4090_v38 = vld [vmem:[#allocation6 + $0x60] sm:$0xff]  ;;  %17501 = vst [vmem:[#allocation21_spill] sm:$0xff] %v14219_v12  ;;  %v4273_v53 = vsub.f32 %v14210_v0, %v14219_v12 }
 0x334   : > { %17500 = vst [vmem:[#allocation18_spill] sm:$0xff] %v14207_v26  ;;  %v4266_v29 = vsub.f32 %v14200_v7, %v14207_v26  ;;  %v14224_v14 = vand.u32 4294901760, %v4090_v38 }
 0x335   : > { %v4274_v47 = vand.u32 4294901760, %v4273_v53 }
 0x336   : > { %10758 = vmatmul.mubr.f32.gmra.mxu0 %v14006_v54  ;;  %v14212_v54 = vand.u32 4294901760, %v4091_v10  ;;  %v4267_v28 = vand.u32 4294901760, %v4266_v29  ;;  %v14234_v21 = vsub.f32 %v4090_v38, %v14224_v14  ;;  %v14314_v38 = vsub.f32 %v4083_v2, %v14304_v51 }
 0x337   : > { %v14316_v29 = vand.u32 4294901760, %v4082_v40  ;;  %v14356_v2 = vand.u32 4294901760, %v4079_v8 }
 0x338   : > { %v14222_v50 = vsub.f32 %v4091_v10, %v14212_v54  ;;  %10808 = vmatprep.subr.mxu0 %v14212_v54  ;;  %10848 = vmatprep.subr.mxu1 %v4267_v28  ;;  %v14243_v15 = vand.u32 4294901760, %v14234_v21  ;;  %v4322_v10 = vsub.f32 %v14293_v23, %v14302_v34  ;;  %17519 = vst [vmem:[#allocation80_spill] sm:$0xff] %v14314_v38  ;;  %v14324_v58 = vand.u32 4294901760, %v14314_v38 }
 0x339   : > { %10809 = vmatpush3.msra.mxu0 %v14212_v54  ;;  %10849 = vmatpush3.msra.mxu1 %v4267_v28  ;;  %17520 = vst [vmem:[#allocation13_spill] sm:$0xff] %v14316_v29  ;;  %v4081_v28 = vld [vmem:[#allocation6 + $0x18] sm:$0xff]  ;;  %17530 = vst [vmem:[#allocation44_spill] sm:$0xff] %v14356_v2 }
 0x33a   : > { %v14231_v57 = vand.u32 4294901760, %v14222_v50  ;;  %10810 = vmatprep.subr.mxu0 %v14224_v14  ;;  %17503 = vst [vmem:[#allocation27_spill] sm:$0xff] %v14243_v15  ;;  %10850 = vmatprep.subr.mxu1 %v4274_v47  ;;  %v4287_v25 = vsub.f32 %v14234_v21, %v14243_v15  ;;  %v4323_v53 = vand.u32 4294901760, %v4322_v10  ;;  %17522 = vst [vmem:[#allocation25_spill] sm:$0xff] %v14324_v58 }
 0x33b   : > { %10811 = vmatpush3.msra.mxu0 %v14224_v14  ;;  %10851 = vmatpush3.msra.mxu1 %v4274_v47  ;;  %v14327_v47 = vsub.f32 %v4082_v40, %v14316_v29 }
 0x33c   : > { %17502 = vst [vmem:[#allocation26_spill] sm:$0xff] %v14231_v57  ;;  %v4280_v48 = vsub.f32 %v14222_v50, %v14231_v57  ;;  %10812 = vmatprep.subr.mxu0 %v14237_v35  ;;  %v4288_v59 = vand.u32 4294901760, %v4287_v25  ;;  %v4336_v25 = vsub.f32 %v14314_v38, %v14324_v58 }
 0x33d   : > { %10813 = vmatpush3.msra.mxu0 %v14237_v35  ;;  %17523 = vst [vmem:[#allocation17_spill] sm:$0xff] %v14327_v47  ;;  %v14338_v19 = vand.u32 4294901760, %v14327_v47 }
 0x33e   : > { %v4281_v52 = vand.u32 4294901760, %v4280_v48  ;;  %10814 = vmatprep.subr.mxu0 %v14245_v55  ;;  %v14329_v48 = vand.u32 4294901760, %v4081_v28 }
 0x33f   : > { %10815 = vmatpush3.msra.mxu0 %v14245_v55  ;;  %17525 = vst [vmem:[#allocation22_spill] sm:$0xff] %v14338_v19  ;;  %v4343_v9 = vsub.f32 %v14327_v47, %v14338_v19 }
 0x340   : > { %10852 = vmatprep.subr.mxu1 %v4281_v52  ;;  %10816 = vmatprep.subr.mxu0 %v14256_v33  ;;  %17524 = vst [vmem:[#allocation32_spill] sm:$0xff] %v14329_v48 }
 0x341   : > { %10853 = vmatpush3.msra.mxu1 %v4281_v52  ;;  %10817 = vmatpush3.msra.mxu0 %v14256_v33  ;;  %v4080_v52 = vld [vmem:[#allocation6 + $0x10] sm:$0xff]  ;;  %v4344_v4 = vand.u32 4294901760, %v4343_v9 }
 0x342   : > { %10854 = vmatprep.subr.mxu1 %v4288_v59  ;;  %10818 = vmatprep.subr.mxu0 %v14269_v37  ;;  %v14343_v30 = vand.u32 4294901760, %v4080_v52 }
 0x343   : > { %10855 = vmatpush3.msra.mxu1 %v4288_v59  ;;  %10819 = vmatpush3.msra.mxu0 %v14269_v37  ;;  %v14341_v59 = vsub.f32 %v4081_v28, %v14329_v48  ;;  %v14368_v28 = vsub.f32 %v4079_v8, %v14356_v2 }
 0x344   : > { %10856 = vmatprep.subr.mxu1 %v4295_v20  ;;  %10820 = vmatprep.subr.mxu0 %v14283_v63  ;;  %17527 = vst [vmem:[#allocation16_spill] sm:$0xff] %v14343_v30  ;;  %v14353_v56 = vsub.f32 %v4080_v52, %v14343_v30 }
 0x345   : > { %10857 = vmatpush3.msra.mxu1 %v4295_v20  ;;  %10821 = vmatpush3.msra.mxu0 %v14283_v63  ;;  %17526 = vst [vmem:[#allocation28_spill] sm:$0xff] %v14341_v59  ;;  %v4337_v20 = vand.u32 4294901760, %v4336_v25  ;;  %17533 = vst [vmem:[#allocation38_spill] sm:$0xff] %v14368_v28  ;;  %v14378_v25 = vand.u32 4294901760, %v14368_v28 }
 0x346   : > { %10858 = vmatprep.subr.mxu1 %v4302_v24  ;;  %10822 = vmatprep.subr.mxu0 %v14296_v39  ;;  %17529 = vst [vmem:[#allocation23_spill] sm:$0xff] %v14353_v56 }
 0x347   : > { %10859 = vmatpush3.msra.mxu1 %v4302_v24  ;;  %10823 = vmatpush3.msra.mxu0 %v14296_v39  ;;  %v14350_v24 = vand.u32 4294901760, %v14341_v59  ;;  %17535 = vst [vmem:[#allocation74_spill] sm:$0xff] %v14378_v25 }
 0x348   : > { %10860 = vmatprep.subr.mxu1 %v4309_v61  ;;  %10824 = vmatprep.subr.mxu0 %v14304_v51 }
 0x349   : > { %10861 = vmatpush3.msra.mxu1 %v4309_v61  ;;  %10825 = vmatpush3.msra.mxu0 %v14304_v51  ;;  %17528 = vst [vmem:[#allocation40_spill] sm:$0xff] %v14350_v24  ;;  %v4078_v61 = vld [vmem:[#allocation6] sm:$0xff]  ;;  %v4350_v40 = vsub.f32 %v14341_v59, %v14350_v24 }
 0x34a   : > { %10862 = vmatprep.subr.mxu1 %v4316_v36  ;;  %10826 = vmatprep.subr.mxu0 %v14316_v29  ;;  %v14364_v10 = vand.u32 4294901760, %v4078_v61 }
 0x34b   : > { %10863 = vmatpush3.msra.mxu1 %v4316_v36  ;;  %10827 = vmatpush3.msra.mxu0 %v14316_v29  ;;  %v14362_v36 = vand.u32 4294901760, %v14353_v56 }
 0x34c   : > { %10864 = vmatprep.subr.mxu1 %v4323_v53  ;;  %10828 = vmatprep.subr.mxu0 %v14329_v48  ;;  %17532 = vst [vmem:[#allocation31_spill] sm:$0xff] %v14364_v10  ;;  %v14374_v52 = vsub.f32 %v4078_v61, %v14364_v10 }
 0x34d   : > { %10865 = vmatpush3.msra.mxu1 %v4323_v53  ;;  %10829 = vmatpush3.msra.mxu0 %v14329_v48  ;;  %17531 = vst [vmem:[#allocation24_spill] sm:$0xff] %v14362_v36  ;;  %v4351_v53 = vand.u32 4294901760, %v4350_v40  ;;  %v4357_v62 = vsub.f32 %v14353_v56, %v14362_v36 }
 0x34e   : > { %10866 = vmatprep.subr.mxu1 %v4330_v6  ;;  %10830 = vmatprep.subr.mxu0 %v14343_v30  ;;  %17534 = vst [vmem:[#allocation47_spill] sm:$0xff] %v14374_v52  ;;  %v14382_v8 = vand.u32 4294901760, %v14374_v52 }
 0x34f   : > { %10867 = vmatpush3.msra.mxu1 %v4330_v6  ;;  %10831 = vmatpush3.msra.mxu0 %v14343_v30  ;;  %v4358_v6 = vand.u32 4294901760, %v4357_v62 }
 0x350   : > { %10868 = vmatprep.subr.mxu1 %v4337_v20  ;;  %10832 = vmatprep.subr.mxu0 %v14356_v2  ;;  %17536 = vst [vmem:[#allocation73_spill] sm:$0xff] %v14382_v8  ;;  %v4371_v9 = vsub.f32 %v14374_v52, %v14382_v8 }
 0x351   : > { %10869 = vmatpush3.msra.mxu1 %v4337_v20  ;;  %10833 = vmatpush3.msra.mxu0 %v14356_v2  ;;  %v4364_v20 = vsub.f32 %v14368_v28, %v14378_v25 }
 0x352   : > { %10870 = vmatprep.subr.mxu1 %v4344_v4  ;;  %10834 = vmatprep.subr.mxu0 %v14364_v10 }
 0x353   : > { %10871 = vmatpush3.msra.mxu1 %v4344_v4  ;;  %10835 = vmatpush3.msra.mxu0 %v14364_v10  ;;  %v4365_v61 = vand.u32 4294901760, %v4364_v20  ;;  %v4372_v4 = vand.u32 4294901760, %v4371_v9 }
 0x354   : > { %10872 = vmatprep.subr.mxu1 %v4351_v53  ;;  %10892 = vmatprep.subr.mxu0 %v14200_v7 }
 0x355   : > { %10873 = vmatpush3.msra.mxu1 %v4351_v53 }
 0x356   : > { %10874 = vmatprep.subr.mxu1 %v4358_v6 }
 0x357   : > { %10875 = vmatpush3.msra.mxu1 %v4358_v6 }
 0x358   : > { %10876 = vmatprep.subr.mxu1 %v4365_v61 }
 0x359   : > { %10877 = vmatpush3.msra.mxu1 %v4365_v61 }
 0x35a   : > { %10878 = vmatprep.subr.mxu1 %v4372_v4 }
 0x35b   : > { %10879 = vmatpush3.msra.mxu1 %v4372_v4 }
 0x35c   : > { %10936 = vmatprep.subr.mxu1 %v14197_v31 }
 0x394   : > { %v10618_v40 = vpop.f32.mrf.mxu1 }
 0x396   : > { %v3436_v62 = vpop.f32.mrf.mxu1 }
 0x398   : > { %v10621_v46 = vpop.f32.mrf.mxu1 }
 0x39a   : > { %v3448_v17 = vpop.f32.mrf.mxu1 }
 0x39d   : > { %v10574_v43 = vpop.f32.mrf.mxu0  ;;  %v10624_v53 = vpop.f32.mrf.mxu1 }
 0x39e   : > { %v3226_v57 = vadd.f32 %v10574_v43, %v9085_v22 }
 0x39f   : > { %v3215_v16 = vpop.f32.mrf.mxu0  ;;  %v3460_v42 = vpop.f32.mrf.mxu1 }
 0x3a0   : > { %v3216_v52 = vadd.f32 %v9085_v22, %v3215_v16  ;;  %v3443_v59 = vadd.f32 %v10618_v40, %v3226_v57 }
 0x3a2   : > { %v3437_v30 = vadd.f32 %v3436_v62, %v3216_v52 }
 0x3a3   : > { %v10577_v45 = vpop.f32.mrf.mxu0  ;;  %v10627_v32 = vpop.f32.mrf.mxu1 }
 0x3a4   : > { %v3246_v56 = vadd.f32 %v10577_v45, %v9085_v22 }
 0x3a5   : > { %v3235_v49 = vpop.f32.mrf.mxu0  ;;  %v3472_v6 = vpop.f32.mrf.mxu1 }
 0x3a6   : > { %v3236_v2 = vadd.f32 %v9085_v22, %v3235_v49  ;;  %v3455_v29 = vadd.f32 %v10621_v46, %v3246_v56 }
 0x3a8   : > { %v3449_v43 = vadd.f32 %v3448_v17, %v3236_v2 }
 0x3a9   : > { %v10580_v20 = vpop.f32.mrf.mxu0 }
 0x3aa   : > { %v3266_v1 = vadd.f32 %v10580_v20, %v9085_v22 }
 0x3ab   : > { %v3255_v9 = vpop.f32.mrf.mxu0 }
 0x3ac   : > { %v3256_v60 = vadd.f32 %v9085_v22, %v3255_v9  ;;  %v3467_v63 = vadd.f32 %v10624_v53, %v3266_v1 }
 0x3ae   : > { %v10583_v61 = vpop.f32.mrf.mxu0 }
 0x3af   : > { %v3286_v39 = vadd.f32 %v10583_v61, %v9085_v22 }
 0x3b0   : > { %v3275_v4 = vpop.f32.mrf.mxu0 }
 0x3b1   : > { %v3276_v37 = vadd.f32 %v9085_v22, %v3275_v4 }
 0x3ba   : > { %v10706_v8 = vpop.f32.mrf.mxu1 }
 0x3bc   : > { %v3720_v25 = vpop.f32.mrf.mxu1 }
 0x3bf   : > { %v10709_v36 = vpop.f32.mrf.mxu1 }
 0x3c1   : > { %v3736_v19 = vpop.f32.mrf.mxu1 }
 0x3c4   : > { %v10662_v24 = vpop.f32.mrf.mxu0  ;;  %v10712_v18 = vpop.f32.mrf.mxu1 }
 0x3c5   : > { %v3590_v38 = vadd.f32 %v10662_v24, %v3443_v59  ;;  %v3461_v59 = vadd.f32 %v3460_v42, %v3256_v60 }
 0x3c6   : > { %v3582_v58 = vpop.f32.mrf.mxu0  ;;  %v3752_v41 = vpop.f32.mrf.mxu1 }
 0x3c7   : > { %v3583_v23 = vadd.f32 %v3582_v58, %v3437_v30  ;;  %v3729_v11 = vadd.f32 %v10706_v8, %v3590_v38  ;;  %v3479_v30 = vadd.f32 %v10627_v32, %v3286_v39 }
 0x3c9   : > { %v3721_v40 = vadd.f32 %v3720_v25, %v3583_v23 }
 0x3ca   : > { %v10665_v34 = vpop.f32.mrf.mxu0  ;;  %v14394_v44 = vpop.f32.mrf.mxu1 }
 0x3cb   : > { %v3604_v13 = vadd.f32 %v10665_v34, %v3455_v29  ;;  %v3473_v29 = vadd.f32 %v3472_v6, %v3276_v37 }
 0x3cc   : > { %v3596_v3 = vpop.f32.mrf.mxu0  ;;  %v14396_v12 = vpop.f32.mrf.mxu1 }
 0x3cd   : > { %v3597_v45 = vadd.f32 %v3596_v3, %v3449_v43  ;;  %v3745_v58 = vadd.f32 %v10709_v36, %v3604_v13 }
 0x3cf   : > { %v3737_v1 = vadd.f32 %v3736_v19, %v3597_v45 }
 0x3d0   : > { %v10668_v15 = vpop.f32.mrf.mxu0 }
 0x3d1   : > { %v3618_v49 = vadd.f32 %v10668_v15, %v3467_v63 }
 0x3d2   : > { %v3610_v26 = vpop.f32.mrf.mxu0 }
 0x3d3   : > { %v3611_v46 = vadd.f32 %v3610_v26, %v3461_v59  ;;  %v3761_v3 = vadd.f32 %v10712_v18, %v3618_v49 }
 0x3d5   : > { %v10671_v10 = vpop.f32.mrf.mxu0  ;;  %v3753_v60 = vadd.f32 %v3752_v41, %v3611_v46 }
 0x3d7   : > { %v3624_v51 = vpop.f32.mrf.mxu0 }
 0x3d8   : > { %v3625_v63 = vadd.f32 %v3624_v51, %v3473_v29 }
 0x3e2   : > { %v10794_v28 = vpop.f32.mrf.mxu1 }
 0x3e4   : > { %v4024_v47 = vpop.f32.mrf.mxu1 }
 0x3e6   : > { %v10797_v48 = vpop.f32.mrf.mxu1 }
 0x3e8   : > { %v4036_v16 = vpop.f32.mrf.mxu1 }
 0x3ea   : > { %v10750_v27 = vpop.f32.mrf.mxu0  ;;  %v10800_v56 = vpop.f32.mrf.mxu1 }
 0x3eb   : > { %v3902_v57 = vadd.f32 %v10750_v27, %v3729_v11  ;;  %v3632_v27 = vadd.f32 %v10671_v10, %v3479_v30 }
 0x3ec   : > { %v3895_v24 = vpop.f32.mrf.mxu0  ;;  %v4048_v42 = vpop.f32.mrf.mxu1 }
 0x3ed   : > { %v4031_v52 = vadd.f32 %v10794_v28, %v3902_v57  ;;  %v3896_v62 = vadd.f32 %v3895_v24, %v3721_v40 }
 0x3ee   : > { %v10753_v34 = vpop.f32.mrf.mxu0  ;;  %v10803_v37 = vpop.f32.mrf.mxu1 }
 0x3ef   : > { %12232 = vtanh.f32 %v4031_v52  ;;  %v4025_v17 = vadd.f32 %v4024_v47, %v3896_v62  ;;  %v3914_v38 = vadd.f32 %v10753_v34, %v3745_v58  ;;  %v3777_v47 = vadd.f32 %v14394_v44, %v3632_v27 }
 0x3f0   : > { %v3907_v2 = vpop.f32.mrf.mxu0  ;;  %v4060_v28 = vpop.f32.mrf.mxu1 }
 0x3f1   : > { %12234 = vtanh.f32 %v4025_v17  ;;  %v4043_v11 = vadd.f32 %v10797_v48, %v3914_v38  ;;  %v3908_v15 = vadd.f32 %v3907_v2, %v3737_v1  ;;  %v3769_v48 = vadd.f32 %v14396_v12, %v3625_v63 }
 0x3f2   : > { %v10756_v22 = vpop.f32.mrf.mxu0 }
 0x3f3   : > { %12236 = vtanh.f32 %v4043_v11  ;;  %v4037_v26 = vadd.f32 %v4036_v16, %v3908_v15  ;;  %v3926_v32 = vadd.f32 %v10756_v22, %v3761_v3 }
 0x3f4   : > { %v3919_v13 = vpop.f32.mrf.mxu0 }
 0x3f5   : > { %12238 = vtanh.f32 %v4037_v26  ;;  %v4055_v23 = vadd.f32 %v10800_v56, %v3926_v32  ;;  %v3920_v39 = vadd.f32 %v3919_v13, %v3753_v60 }
 0x3f6   : > { %v10759_v19 = vpop.f32.mrf.mxu0 }
 0x3f7   : > { %12240 = vtanh.f32 %v4055_v23  ;;  %v4049_v18 = vadd.f32 %v4048_v42, %v3920_v39  ;;  %v3938_v36 = vadd.f32 %v10759_v19, %v3777_v47  ;;  %v17537_v47 = vld [vmem:[#allocation45_spill] sm:$0xff]  ;;  %v17539_v19 = vld [vmem:[#allocation55_spill] sm:$0xff] }
 0x3f8   : > { %v3931_v10 = vpop.f32.mrf.mxu0 }
 0x3f9   : > { %12242 = vtanh.f32 %v4049_v18  ;;  %v4067_v41 = vadd.f32 %v10803_v37, %v3938_v36  ;;  %v3932_v51 = vadd.f32 %v3931_v10, %v3769_v48  ;;  %v17540_v48 = vld [vmem:[#allocation76_spill] sm:$0xff] }
 0x3fb   : > { %12244 = vtanh.f32 %v4067_v41  ;;  %v4061_v25 = vadd.f32 %v4060_v28, %v3932_v51  ;;  %v17542_v41 = vld [vmem:[#allocation42_spill] sm:$0xff]  ;;  %v17543_v51 = vld [vmem:[#allocation20_spill] sm:$0xff]  ;;  %v17544_v28 = vld [vmem:[#allocation51_spill] sm:$0xff] }
 0x3fc   : > { %v12233_v8 = vpop.eup %12232 }
 0x3fd   : > { %v14400_v53 = vand.u32 4294901760, %v12233_v8  ;;  %12246 = vtanh.f32 %v4061_v25  ;;  %v17545_v25 = vld [vmem:[#allocation13_spill] sm:$0xff] }
 0x3fe   : > { %v12235_v20 = vpop.eup %12234 }
 0x3ff   : > { %v14403_v44 = vsub.f32 %v12233_v8, %v14400_v53  ;;  %v14405_v6 = vand.u32 4294901760, %v12235_v20  ;;  %v17546_v8 = vld [vmem:[#allocation79_spill] sm:$0xff] }
 0x400   : > { %v12237_v9 = vpop.eup %12236 }
 0x401   : > { %10880 = vmatprep.mubr.f32.mxu1 %v14405_v6  ;;  %v14408_v12 = vand.u32 4294901760, %v12237_v9  ;;  %v14411_v61 = vsub.f32 %v12235_v20, %v14405_v6  ;;  %v4194_v4 = vand.u32 4294901760, %v14403_v44  ;;  %v17547_v20 = vld [vmem:[#allocation32_spill] sm:$0xff] }
 0x402   : > { %v12239_v43 = vpop.eup %12238  ;;  %10881 = vmatmul.mubr.f32.vlgmr.msra.gmra.mxu1 %v14400_v53 }
 0x403   : > { %10937 = vmatpush3.msra.mxu1 %v14197_v31  ;;  %v14416_v16 = vand.u32 4294901760, %v12239_v43  ;;  %v4184_v45 = vand.u32 4294901760, %v14411_v61  ;;  %v14420_v57 = vsub.f32 %v12237_v9, %v14408_v12  ;;  %v4195_v59 = vsub.f32 %v14403_v44, %v4194_v4  ;;  %v17548_v9 = vld [vmem:[#allocation77_spill] sm:$0xff] }
 0x404   : > { %v12241_v40 = vpop.eup %12240  ;;  %10938 = vmatprep.subr.mxu1 %v14202_v5 }
 0x405   : > { %10939 = vmatpush3.msra.mxu1 %v14202_v5  ;;  %10883 = vmatprep.mubr.f32.mxu1 %v14416_v16  ;;  %v4185_v49 = vsub.f32 %v14411_v61, %v4184_v45  ;;  %v14429_v24 = vand.u32 4294901760, %v12241_v40  ;;  %v14432_v52 = vsub.f32 %v12239_v43, %v14416_v16  ;;  %v4214_v56 = vand.u32 4294901760, %v14420_v57  ;;  %v17549_v43 = vld [vmem:[#allocation16_spill] sm:$0xff] }
 0x406   : > { %v12243_v62 = vpop.eup %12242  ;;  %10940 = vmatprep.subr.mxu1 %v14212_v54  ;;  %10884 = vmatmul.mubr.f32.gmra.mxu1 %v14408_v12  ;;  %v4196_v17 = vand.u32 4294901760, %v4195_v59  ;;  %v17554_v59 = vld [vmem:[#allocation28_spill] sm:$0xff] }
 0x407   : > { %10941 = vmatpush3.msra.mxu1 %v14212_v54  ;;  %v4186_v58 = vand.u32 4294901760, %v4185_v49  ;;  %v14437_v46 = vand.u32 4294901760, %v12243_v62  ;;  %v4204_v30 = vand.u32 4294901760, %v14432_v52  ;;  %v14450_v29 = vsub.f32 %v12241_v40, %v14429_v24  ;;  %v17552_v40 = vld [vmem:[#allocation17_spill] sm:$0xff]  ;;  %v17553_v49 = vld [vmem:[#allocation31_spill] sm:$0xff] }
 0x408   : > { %v12245_v34 = vpop.eup %12244  ;;  %10942 = vmatprep.subr.mxu1 %v14224_v14  ;;  %v4215_v15 = vsub.f32 %v14420_v57, %v4214_v56 }
 0x409   : > { %10943 = vmatpush3.msra.mxu1 %v14224_v14  ;;  %10836 = vmatprep.mubr.f32.mxu0 %v4186_v58  ;;  %v4205_v38 = vsub.f32 %v14432_v52, %v4204_v30  ;;  %v14447_v1 = vsub.f32 %v12243_v62, %v14437_v46  ;;  %v14454_v3 = vand.u32 4294901760, %v12245_v34  ;;  %v4234_v60 = vand.u32 4294901760, %v14450_v29  ;;  %v17555_v62 = vld [vmem:[#allocation23_spill] sm:$0xff]  ;;  %v17556_v58 = vld [vmem:[#allocation38_spill] sm:$0xff] }
 0x40a   : > { %v12247_v2 = vpop.eup %12246  ;;  %10886 = vmatprep.mubr.f32.mxu1 %v14437_v46  ;;  %10944 = vmatprep.subr.mxu1 %v14237_v35  ;;  %v4216_v26 = vand.u32 4294901760, %v4215_v15 }
 0x40b   : > { %10837 = vmatmul.mubr.f32.vlgmr.msra.gmra.mxu0 %v4196_v17  ;;  %10887 = vmatmul.mubr.f32.gmra.mxu1 %v14429_v24  ;;  %v4206_v27 = vand.u32 4294901760, %v4205_v38  ;;  %v14457_v11 = vand.u32 4294901760, %v12247_v2  ;;  %v4224_v42 = vand.u32 4294901760, %v14447_v1  ;;  %v17572_v17 = vld [vmem:[#allocation74_spill] sm:$0xff]  ;;  %v17573_v38 = vld [vmem:[#allocation73_spill] sm:$0xff] }
 0x40c   : > { %10893 = vmatpush3.msra.mxu0 %v14200_v7  ;;  %10945 = vmatpush3.msra.mxu1 %v14237_v35  ;;  %v14477_v7 = vsub.f32 %v12245_v34, %v14454_v3  ;;  %v17571_v34 = vld [vmem:[#allocation24_spill] sm:$0xff] }
 0x40d   : > { %10894 = vmatprep.subr.mxu0 %v14210_v0  ;;  %10946 = vmatprep.subr.mxu1 %v14245_v55  ;;  %v4225_v22 = vsub.f32 %v14447_v1, %v4224_v42  ;;  %v14472_v63 = vsub.f32 %v12247_v2, %v14457_v11 }
 0x40e   : > { %10895 = vmatpush3.msra.mxu0 %v14210_v0  ;;  %10947 = vmatpush3.msra.mxu1 %v14245_v55  ;;  %v4235_v0 = vsub.f32 %v14450_v29, %v4234_v60  ;;  %v4254_v39 = vand.u32 4294901760, %v14477_v7 }
 0x40f   : > { %10839 = vmatprep.mubr.f32.mxu0 %v4206_v27  ;;  %10889 = vmatprep.mubr.f32.mxu1 %v14457_v11  ;;  %v4244_v32 = vand.u32 4294901760, %v14472_v63  ;;  %v4226_v13 = vand.u32 4294901760, %v4225_v22  ;;  %v9099_v27 = vld [vmem:[%s16653_s3 + $0xe0] sm:$0xff] }
 0x410   : > { %10896 = vmatprep.subr.mxu0 %v14222_v50  ;;  %10948 = vmatprep.subr.mxu1 %v14256_v33  ;;  %v4236_v37 = vand.u32 4294901760, %v4235_v0  ;;  %v4255_v36 = vsub.f32 %v14477_v7, %v4254_v39  ;;  %v14681_v22 = vand.u32 4294901760, %v9099_v27  ;;  %v9097_v0 = vld [vmem:[%s16653_s3 + $0xd0] sm:$0xff] }
 0x411   : > { %10840 = vmatmul.mubr.f32.gmra.mxu0 %v4216_v26  ;;  %10890 = vmatmul.mubr.f32.gmra.mxu1 %v14454_v3  ;;  %v4245_v23 = vsub.f32 %v14472_v63, %v4244_v32 }
 0x412   : > { %10897 = vmatpush3.msra.mxu0 %v14222_v50  ;;  %10949 = vmatpush3.msra.mxu1 %v14256_v33  ;;  %v17538_v50 = vld [vmem:[#allocation30_spill] sm:$0xff]  ;;  %v4256_v10 = vand.u32 4294901760, %v4255_v36 }
 0x413   : > { %10898 = vmatprep.subr.mxu0 %v14234_v21  ;;  %10950 = vmatprep.subr.mxu1 %v17537_v47  ;;  %v4246_v18 = vand.u32 4294901760, %v4245_v23 }
 0x414   : > { %10968 = vmatprep.mubr.f32.mxu1 %v4184_v45  ;;  %10899 = vmatpush3.msra.mxu0 %v14234_v21  ;;  %v17541_v21 = vld [vmem:[#allocation33_spill] sm:$0xff]  ;;  %v17551_v45 = vld [vmem:[#allocation44_spill] sm:$0xff] }
 0x415   : > { %10951 = vmatpush3.msra.mxu1 %v17537_v47  ;;  %10842 = vmatprep.mubr.f32.mxu0 %v4226_v13 }
 0x416   : > { %10900 = vmatprep.subr.mxu0 %v17538_v50  ;;  %10952 = vmatprep.subr.mxu1 %v17539_v19 }
 0x417   : > { %10843 = vmatmul.mubr.f32.gmra.mxu0 %v4236_v37  ;;  %10953 = vmatpush3.msra.mxu1 %v17539_v19  ;;  %v14708_v37 = vand.u32 4294901760, %v9097_v0 }
 0x418   : > { %10901 = vmatpush3.msra.mxu0 %v17538_v50  ;;  %10954 = vmatprep.subr.mxu1 %v17540_v48 }
 0x419   : > { %10902 = vmatprep.subr.mxu0 %v17541_v21  ;;  %10955 = vmatpush3.msra.mxu1 %v17540_v48 }
 0x41a   : > { %10903 = vmatpush3.msra.mxu0 %v17541_v21  ;;  %10845 = vmatprep.mubr.f32.mxu0 %v4246_v18 }
 0x41b   : > { %10904 = vmatprep.subr.mxu0 %v17542_v41  ;;  %10956 = vmatprep.subr.mxu1 %v17543_v51 }
 0x41c   : > { %10846 = vmatmul.mubr.f32.gmra.mxu0 %v4256_v10  ;;  %10957 = vmatpush3.msra.mxu1 %v17543_v51 }
 0x41d   : > { %10905 = vmatpush3.msra.mxu0 %v17542_v41  ;;  %10924 = vmatprep.mubr.f32.mxu0 %v14411_v61  ;;  %v17550_v61 = vld [vmem:[#allocation80_spill] sm:$0xff]  ;;  %v9095_v41 = vld [vmem:[%s16653_s3 + $0xc0] sm:$0xff] }
 0x41e   : > { %10906 = vmatprep.subr.mxu0 %v17544_v28  ;;  %10958 = vmatprep.subr.mxu1 %v17545_v25 }
 0x41f   : > { %10907 = vmatpush3.msra.mxu0 %v17544_v28  ;;  %10959 = vmatpush3.msra.mxu1 %v17545_v25 }
 0x420   : > { %10908 = vmatprep.subr.mxu0 %v17546_v8  ;;  %10960 = vmatprep.subr.mxu1 %v17547_v20 }
 0x421   : > { %10909 = vmatpush3.msra.mxu0 %v17546_v8  ;;  %10961 = vmatpush3.msra.mxu1 %v17547_v20  ;;  %v14738_v8 = vand.u32 4294901760, %v9095_v41 }
 0x422   : > { %10910 = vmatprep.subr.mxu0 %v17548_v9  ;;  %10962 = vmatprep.subr.mxu1 %v17549_v43 }
 0x423   : > { %10911 = vmatpush3.msra.mxu0 %v17548_v9  ;;  %10963 = vmatpush3.msra.mxu1 %v17549_v43  ;;  %17583 = vst [vmem:[#allocation35_spill] sm:$0xff] %v14738_v8  ;;  %v9094_v9 = vld [vmem:[%s16653_s3 + $0xb8] sm:$0xff] }
 0x424   : > { %10912 = vmatprep.subr.mxu0 %v17550_v61  ;;  %10964 = vmatprep.subr.mxu1 %v17551_v45 }
 0x425   : > { %10913 = vmatpush3.msra.mxu0 %v17550_v61  ;;  %10965 = vmatpush3.msra.mxu1 %v17551_v45 }
 0x426   : > { %10914 = vmatprep.subr.mxu0 %v17552_v40  ;;  %10966 = vmatprep.subr.mxu1 %v17553_v49 }
 0x427   : > { %10915 = vmatpush3.msra.mxu0 %v17552_v40  ;;  %10967 = vmatpush3.msra.mxu1 %v17553_v49  ;;  %v14755_v40 = vand.u32 4294901760, %v9094_v9 }
 0x428   : > { %10916 = vmatprep.subr.mxu0 %v17554_v59  ;;  %10969 = vmatmul.mubr.f32.vlgmr.msra.gmra.mxu1 %v4194_v4  ;;  %v17565_v4 = vld [vmem:[#allocation56_spill] sm:$0xff] }
 0x429   : > { %11024 = vmatprep.subr.mxu1 %v14197_v31  ;;  %10917 = vmatpush3.msra.mxu0 %v17554_v59  ;;  %17586 = vst [vmem:[#allocation39_spill] sm:$0xff] %v14755_v40  ;;  %v9093_v59 = vld [vmem:[%s16653_s3 + $0xb0] sm:$0xff] }
 0x42a   : > { %10971 = vmatprep.mubr.f32.mxu1 %v4204_v30  ;;  %11025 = vmatpush3.msra.mxu1 %v14197_v31  ;;  %v17557_v31 = vld [vmem:[#allocation47_spill] sm:$0xff]  ;;  %v17569_v30 = vld [vmem:[#allocation22_spill] sm:$0xff] }
 0x42b   : > { %10918 = vmatprep.subr.mxu0 %v17555_v62  ;;  %11026 = vmatprep.subr.mxu1 %v14202_v5 }
 0x42c   : > { %10919 = vmatpush3.msra.mxu0 %v17555_v62  ;;  %11027 = vmatpush3.msra.mxu1 %v14202_v5  ;;  %v17558_v5 = vld [vmem:[#allocation18_spill] sm:$0xff] }
 0x42d   : > { %10920 = vmatprep.subr.mxu0 %v17556_v58  ;;  %10972 = vmatmul.mubr.f32.gmra.mxu1 %v4214_v56  ;;  %v17570_v56 = vld [vmem:[#allocation40_spill] sm:$0xff] }
 0x42e   : > { %11028 = vmatprep.subr.mxu1 %v14212_v54  ;;  %10921 = vmatpush3.msra.mxu0 %v17556_v58 }
 0x42f   : > { %10974 = vmatprep.mubr.f32.mxu1 %v4224_v42  ;;  %11029 = vmatpush3.msra.mxu1 %v14212_v54  ;;  %v17559_v54 = vld [vmem:[#allocation21_spill] sm:$0xff] }
 0x430   : > { %10922 = vmatprep.subr.mxu0 %v17557_v31  ;;  %11030 = vmatprep.subr.mxu1 %v14224_v14 }
 0x431   : > { %10923 = vmatpush3.msra.mxu0 %v17557_v31  ;;  %11031 = vmatpush3.msra.mxu1 %v14224_v14  ;;  %v17560_v14 = vld [vmem:[#allocation26_spill] sm:$0xff] }
 0x432   : > { %10925 = vmatmul.mubr.f32.vlgmr.msra.gmra.mxu0 %v14403_v44  ;;  %10975 = vmatmul.mubr.f32.gmra.mxu1 %v4234_v60  ;;  %v17564_v44 = vld [vmem:[#allocation48_spill] sm:$0xff]  ;;  %v9098_v60 = vld [vmem:[%s16653_s3 + $0xd8] sm:$0xff] }
 0x433   : > { %10980 = vmatprep.subr.mxu0 %v17558_v5  ;;  %11032 = vmatprep.subr.mxu1 %v14237_v35  ;;  %v14697_v13 = vand.u32 4294901760, %v9098_v60 }
 0x434   : > { %10927 = vmatprep.mubr.f32.mxu0 %v14432_v52  ;;  %10977 = vmatprep.mubr.f32.mxu1 %v4244_v32  ;;  %v17567_v52 = vld [vmem:[#allocation9_spill] sm:$0xff]  ;;  %v14694_v32 = vsub.f32 %v9099_v27, %v14681_v22 }
 0x435   : > { %10981 = vmatpush3.msra.mxu0 %v17558_v5  ;;  %11033 = vmatpush3.msra.mxu1 %v14237_v35  ;;  %v17561_v35 = vld [vmem:[#allocation27_spill] sm:$0xff]  ;;  %v14711_v50 = vsub.f32 %v9098_v60, %v14697_v13  ;;  %v14768_v5 = vsub.f32 %v9094_v9, %v14755_v40 }
 0x436   : > { %10982 = vmatprep.subr.mxu0 %v17559_v54  ;;  %11034 = vmatprep.subr.mxu1 %v14245_v55 }
 0x437   : > { %10983 = vmatpush3.msra.mxu0 %v17559_v54  ;;  %11035 = vmatpush3.msra.mxu1 %v14245_v55  ;;  %v17562_v55 = vld [vmem:[#allocation36_spill] sm:$0xff]  ;;  %17578 = vst [vmem:[#allocation75_spill] sm:$0xff] %v14711_v50  ;;  %v14726_v10 = vand.u32 4294901760, %v14711_v50  ;;  %17588 = vst [vmem:[#allocation45_spill] sm:$0xff] %v14768_v5  ;;  %v14771_v54 = vand.u32 4294901760, %v9093_v59 }
 0x438   : > { %10928 = vmatmul.mubr.f32.gmra.mxu0 %v14420_v57  ;;  %10978 = vmatmul.mubr.f32.gmra.mxu1 %v4254_v39  ;;  %v17566_v57 = vld [vmem:[#allocation11_spill] sm:$0xff] }
 0x439   : > { %10984 = vmatprep.subr.mxu0 %v17560_v14  ;;  %11036 = vmatprep.subr.mxu1 %v14256_v33  ;;  %17580 = vst [vmem:[#allocation10_spill] sm:$0xff] %v14726_v10  ;;  %17589 = vst [vmem:[#allocation30_spill] sm:$0xff] %v14771_v54 }
 0x43a   : > { %10930 = vmatprep.mubr.f32.mxu0 %v14447_v1  ;;  %10985 = vmatpush3.msra.mxu0 %v17560_v14  ;;  %v9092_v14 = vld [vmem:[%s16653_s3 + $0xa8] sm:$0xff] }
 0x43b   : > { %11037 = vmatpush3.msra.mxu1 %v14256_v33  ;;  %11056 = vmatprep.mubr.f32.mxu1 %v14405_v6  ;;  %v17563_v33 = vld [vmem:[#allocation41_spill] sm:$0xff] }
 0x43c   : > { %10986 = vmatprep.subr.mxu0 %v17561_v35  ;;  %11038 = vmatprep.subr.mxu1 %v17537_v47 }
 0x43d   : > { %10987 = vmatpush3.msra.mxu0 %v17561_v35  ;;  %11039 = vmatpush3.msra.mxu1 %v17537_v47  ;;  %v14706_v47 = vand.u32 4294901760, %v14694_v32 }
 0x43e   : > { %10931 = vmatmul.mubr.f32.gmra.mxu0 %v14450_v29  ;;  %10988 = vmatprep.subr.mxu0 %v17562_v55 }
 0x43f   : > { %11040 = vmatprep.subr.mxu1 %v17539_v19  ;;  %10933 = vmatprep.mubr.f32.mxu0 %v14472_v63  ;;  %17577 = vst [vmem:[#allocation72_spill] sm:$0xff] %v14706_v47  ;;  %v5278_v36 = vsub.f32 %v14694_v32, %v14706_v47 }
 0x440   : > { %10989 = vmatpush3.msra.mxu0 %v17562_v55  ;;  %11041 = vmatpush3.msra.mxu1 %v17539_v19  ;;  %v9096_v19 = vld [vmem:[%s16653_s3 + $0xc8] sm:$0xff] }
 0x441   : > { %10990 = vmatprep.subr.mxu0 %v17563_v33  ;;  %11042 = vmatprep.subr.mxu1 %v17540_v48  ;;  %v14722_v21 = vand.u32 4294901760, %v9096_v19 }
 0x442   : > { %10991 = vmatpush3.msra.mxu0 %v17563_v33  ;;  %11043 = vmatpush3.msra.mxu1 %v17540_v48  ;;  %v14720_v48 = vsub.f32 %v9097_v0, %v14708_v37  ;;  %v14780_v33 = vand.u32 4294901760, %v14768_v5 }
 0x443   : > { %10934 = vmatmul.mubr.f32.gmra.mxu0 %v14477_v7  ;;  %10992 = vmatprep.subr.mxu0 %v17564_v44 }
 0x444   : > { %11044 = vmatprep.subr.mxu1 %v17543_v51  ;;  %10993 = vmatpush3.msra.mxu0 %v17564_v44  ;;  %17579 = vst [vmem:[#allocation14_spill] sm:$0xff] %v14720_v48  ;;  %v14733_v28 = vand.u32 4294901760, %v14720_v48  ;;  %17590 = vst [vmem:[#allocation55_spill] sm:$0xff] %v14780_v33  ;;  %v14782_v44 = vand.u32 4294901760, %v9092_v14 }
 0x445   : > { %11012 = vmatprep.mubr.f32.mxu0 %v14405_v6  ;;  %11045 = vmatpush3.msra.mxu1 %v17543_v51  ;;  %v17568_v6 = vld [vmem:[#allocation25_spill] sm:$0xff]  ;;  %v5279_v51 = vand.u32 4294901760, %v5278_v36  ;;  %v9088_v36 = vld [vmem:[%s16653_s3 + $0x88] sm:$0xff] }
 0x446   : > { %10994 = vmatprep.subr.mxu0 %v17565_v4  ;;  %11046 = vmatprep.subr.mxu1 %v17545_v25  ;;  %17581 = vst [vmem:[#allocation19_spill] sm:$0xff] %v14733_v28  ;;  %17591 = vst [vmem:[#allocation76_spill] sm:$0xff] %v14782_v44 }
 0x447   : > { %10995 = vmatpush3.msra.mxu0 %v17565_v4  ;;  %11047 = vmatpush3.msra.mxu1 %v17545_v25  ;;  %v14736_v25 = vsub.f32 %v9096_v19, %v14722_v21  ;;  %v14786_v4 = vsub.f32 %v9093_v59, %v14771_v54 }
 0x448   : > { %10996 = vmatprep.subr.mxu0 %v17566_v57  ;;  %11048 = vmatprep.subr.mxu1 %v17547_v20 }
 0x449   : > { %10997 = vmatpush3.msra.mxu0 %v17566_v57  ;;  %11049 = vmatpush3.msra.mxu1 %v17547_v20  ;;  %17582 = vst [vmem:[#allocation29_spill] sm:$0xff] %v14736_v25  ;;  %v5285_v20 = vsub.f32 %v14711_v50, %v14726_v10  ;;  %v14750_v61 = vand.u32 4294901760, %v14736_v25  ;;  %17592 = vst [vmem:[#allocation33_spill] sm:$0xff] %v14786_v4  ;;  %v9091_v57 = vld [vmem:[%s16653_s3 + $0xa0] sm:$0xff] }
 0x44a   : > { %10998 = vmatprep.subr.mxu0 %v17567_v52  ;;  %11050 = vmatprep.subr.mxu1 %v17549_v43 }
 0x44b   : > { %10999 = vmatpush3.msra.mxu0 %v17567_v52  ;;  %11051 = vmatpush3.msra.mxu1 %v17549_v43  ;;  %v5292_v43 = vsub.f32 %v14720_v48, %v14733_v28  ;;  %17584 = vst [vmem:[#allocation37_spill] sm:$0xff] %v14750_v61  ;;  %v5299_v58 = vsub.f32 %v14736_v25, %v14750_v61  ;;  %v9086_v28 = vld [vmem:[%s16658_s8] ss:$0 sm:$0xff] }
 0x44c   : > { %11000 = vmatprep.subr.mxu0 %v17568_v6  ;;  %11052 = vmatprep.subr.mxu1 %v17551_v45 }
 0x44d   : > { %11001 = vmatpush3.msra.mxu0 %v17568_v6  ;;  %11053 = vmatpush3.msra.mxu1 %v17551_v45  ;;  %v14753_v45 = vsub.f32 %v9095_v41, %v14738_v8  ;;  %v5293_v62 = vand.u32 4294901760, %v5292_v43  ;;  %v5300_v35 = vand.u32 4294901760, %v5299_v58  ;;  %v5313_v6 = vsub.f32 %v14768_v5, %v14780_v33  ;;  %v9087_v43 = vld [vmem:[%s16653_s3 + $0x80] sm:$0xff] }
 0x44e   : > { %11002 = vmatprep.subr.mxu0 %v17569_v30  ;;  %11054 = vmatprep.subr.mxu1 %v17553_v49 }
 0x44f   : > { %11003 = vmatpush3.msra.mxu0 %v17569_v30  ;;  %11055 = vmatpush3.msra.mxu1 %v17553_v49  ;;  %17585 = vst [vmem:[#allocation34_spill] sm:$0xff] %v14753_v45  ;;  %v5286_v49 = vand.u32 4294901760, %v5285_v20  ;;  %v14765_v31 = vand.u32 4294901760, %v14753_v45  ;;  %v14795_v30 = vsub.f32 %v9092_v14, %v14782_v44 }
 0x450   : > { %11004 = vmatprep.subr.mxu0 %v17570_v56  ;;  %11057 = vmatmul.mubr.f32.vlgmr.msra.gmra.mxu1 %v14400_v53 }
 0x451   : > { %11005 = vmatpush3.msra.mxu0 %v17570_v56  ;;  %11059 = vmatprep.mubr.f32.mxu1 %v14416_v16  ;;  %17587 = vst [vmem:[#allocation50_spill] sm:$0xff] %v14765_v31  ;;  %v5306_v55 = vsub.f32 %v14753_v45, %v14765_v31  ;;  %17593 = vst [vmem:[#allocation42_spill] sm:$0xff] %v14795_v30  ;;  %v14797_v56 = vand.u32 4294901760, %v9091_v57 }
 0x452   : > { %11006 = vmatprep.subr.mxu0 %v17571_v34 }
 0x453   : > { %11007 = vmatpush3.msra.mxu0 %v17571_v34  ;;  %v5307_v52 = vand.u32 4294901760, %v5306_v55  ;;  %17594 = vst [vmem:[#allocation20_spill] sm:$0xff] %v14797_v56  ;;  %v14801_v34 = vand.u32 4294901760, %v14786_v4 }
 0x454   : > { %11008 = vmatprep.subr.mxu0 %v17572_v17  ;;  %11060 = vmatmul.mubr.f32.gmra.mxu1 %v14408_v12 }
 0x455   : > { %11009 = vmatpush3.msra.mxu0 %v17572_v17  ;;  %11062 = vmatprep.mubr.f32.mxu1 %v14437_v46  ;;  %17595 = vst [vmem:[#allocation51_spill] sm:$0xff] %v14801_v34  ;;  %v9090_v17 = vld [vmem:[%s16653_s3 + $0x98] sm:$0xff]  ;;  %v5320_v27 = vsub.f32 %v14786_v4, %v14801_v34 }
 0x456   : > { %11010 = vmatprep.subr.mxu0 %v17573_v38 }
 0x457   : > { %11011 = vmatpush3.msra.mxu0 %v17573_v38  ;;  %v5314_v38 = vand.u32 4294901760, %v5313_v6  ;;  %v5321_v0 = vand.u32 4294901760, %v5320_v27 }
 0x458   : > { %11013 = vmatmul.mubr.f32.vlgmr.msra.gmra.mxu0 %v14400_v53  ;;  %11063 = vmatmul.mubr.f32.gmra.mxu1 %v14429_v24  ;;  %v9102_v53 = vld [vmem:[%s16653_s3 + $0xf8] sm:$0xff] }
 0x459   : > { %11015 = vmatprep.mubr.f32.mxu0 %v14416_v16  ;;  %11065 = vmatprep.mubr.f32.mxu1 %v14457_v11  ;;  %v14645_v1 = vand.u32 4294901760, %v9102_v53 }
 0x45b   : > { %v14651_v16 = vsub.f32 %v9102_v53, %v14645_v1  ;;  %11068 = vmatprep.subr.mxu0 %v14645_v1  ;;  %v14808_v53 = vand.u32 4294901760, %v14795_v30 }
 0x45c   : > { %11016 = vmatmul.mubr.f32.gmra.mxu0 %v14408_v12  ;;  %11066 = vmatmul.mubr.f32.gmra.mxu1 %v14454_v3  ;;  %v9101_v12 = vld [vmem:[%s16653_s3 + $0xf0] sm:$0xff] }
 0x45d   : > { %11018 = vmatprep.mubr.f32.mxu0 %v14437_v46  ;;  %v14653_v46 = vand.u32 4294901760, %v9101_v12  ;;  %11069 = vmatpush3.msra.mxu0 %v14645_v1  ;;  %v14661_v29 = vand.u32 4294901760, %v14651_v16  ;;  %17596 = vst [vmem:[#allocation13_spill] sm:$0xff] %v14808_v53 }
 0x45f   : > { %17574 = vst [vmem:[#allocation78_spill] sm:$0xff] %v14661_v29  ;;  %v14664_v2 = vsub.f32 %v9101_v12, %v14653_v46  ;;  %11070 = vmatprep.subr.mxu0 %v14653_v46  ;;  %v14811_v12 = vsub.f32 %v9091_v57, %v14797_v56 }
 0x460   : > { %11019 = vmatmul.mubr.f32.gmra.mxu0 %v14429_v24  ;;  %v9100_v24 = vld [vmem:[%s16653_s3 + $0xe8] sm:$0xff] }
 0x461   : > { %11021 = vmatprep.mubr.f32.mxu0 %v14457_v11  ;;  %11071 = vmatpush3.msra.mxu0 %v14653_v46  ;;  %v5257_v11 = vsub.f32 %v14651_v16, %v14661_v29  ;;  %v14676_v15 = vand.u32 4294901760, %v14664_v2  ;;  %17597 = vst [vmem:[#allocation79_spill] sm:$0xff] %v14811_v12  ;;  %v14822_v60 = vand.u32 4294901760, %v14811_v12 }
 0x463   : > { %17575 = vst [vmem:[#allocation61_spill] sm:$0xff] %v14676_v15  ;;  %v5258_v63 = vand.u32 4294901760, %v5257_v11  ;;  %v5264_v7 = vsub.f32 %v14664_v2, %v14676_v15  ;;  %v5327_v11 = vsub.f32 %v14795_v30, %v14808_v53  ;;  %17599 = vst [vmem:[#allocation77_spill] sm:$0xff] %v14822_v60  ;;  %v5334_v19 = vsub.f32 %v14811_v12, %v14822_v60 }
 0x464   : > { %11022 = vmatmul.mubr.f32.gmra.mxu0 %v14454_v3  ;;  %v14666_v3 = vand.u32 4294901760, %v9100_v24 }
 0x465   : > { %11112 = vmatprep.subr.mxu1 %v5258_v63  ;;  %v5265_v23 = vand.u32 4294901760, %v5264_v7  ;;  %v9089_v7 = vld [vmem:[%s16653_s3 + $0x90] sm:$0xff]  ;;  %v5335_v20 = vand.u32 4294901760, %v5334_v19 }
 0x466   : > { %v14679_v42 = vsub.f32 %v9100_v24, %v14666_v3  ;;  %11072 = vmatprep.subr.mxu0 %v14666_v3  ;;  %11113 = vmatpush3.msra.mxu1 %v5258_v63  ;;  %v14813_v24 = vand.u32 4294901760, %v9090_v17 }
 0x467   : > { %11073 = vmatpush3.msra.mxu0 %v14666_v3  ;;  %11114 = vmatprep.subr.mxu1 %v5265_v23 }
 0x468   : > { %v14691_v26 = vand.u32 4294901760, %v14679_v42  ;;  %11074 = vmatprep.subr.mxu0 %v14681_v22  ;;  %11115 = vmatpush3.msra.mxu1 %v5265_v23  ;;  %17598 = vst [vmem:[#allocation32_spill] sm:$0xff] %v14813_v24  ;;  %v14825_v63 = vsub.f32 %v9090_v17, %v14813_v24  ;;  %v14831_v23 = vand.u32 4294901760, %v9089_v7 }
 0x469   : > { %11075 = vmatpush3.msra.mxu0 %v14681_v22 }
 0x46a   : > { %17576 = vst [vmem:[#allocation59_spill] sm:$0xff] %v14691_v26  ;;  %v5271_v39 = vsub.f32 %v14679_v42, %v14691_v26  ;;  %11076 = vmatprep.subr.mxu0 %v14697_v13  ;;  %17600 = vst [vmem:[#allocation16_spill] sm:$0xff] %v14825_v63  ;;  %v14844_v41 = vsub.f32 %v9089_v7, %v14831_v23 }
 0x46b   : > { %11077 = vmatpush3.msra.mxu0 %v14697_v13  ;;  %17601 = vst [vmem:[#allocation80_spill] sm:$0xff] %v14831_v23 }
 0x46c   : > { %v5272_v18 = vand.u32 4294901760, %v5271_v39  ;;  %11078 = vmatprep.subr.mxu0 %v14708_v37  ;;  %v5328_v39 = vand.u32 4294901760, %v5327_v11  ;;  %17603 = vst [vmem:[#allocation17_spill] sm:$0xff] %v14844_v41 }
 0x46d   : > { %11079 = vmatpush3.msra.mxu0 %v14708_v37 }
 0x46e   : > { %11116 = vmatprep.subr.mxu1 %v5272_v18  ;;  %11080 = vmatprep.subr.mxu0 %v14722_v21 }
 0x46f   : > { %11117 = vmatpush3.msra.mxu1 %v5272_v18  ;;  %11081 = vmatpush3.msra.mxu0 %v14722_v21  ;;  %v14837_v18 = vand.u32 4294901760, %v14825_v63 }
 0x470   : > { %11118 = vmatprep.subr.mxu1 %v5279_v51  ;;  %11082 = vmatprep.subr.mxu0 %v14738_v8 }
 0x471   : > { %11119 = vmatpush3.msra.mxu1 %v5279_v51  ;;  %11083 = vmatpush3.msra.mxu0 %v14738_v8  ;;  %17602 = vst [vmem:[#allocation44_spill] sm:$0xff] %v14837_v18  ;;  %v14846_v51 = vand.u32 4294901760, %v9088_v36  ;;  %v5341_v9 = vsub.f32 %v14825_v63, %v14837_v18 }
 0x472   : > { %11120 = vmatprep.subr.mxu1 %v5286_v49  ;;  %11084 = vmatprep.subr.mxu0 %v14755_v40 }
 0x473   : > { %11121 = vmatpush3.msra.mxu1 %v5286_v49  ;;  %11085 = vmatpush3.msra.mxu0 %v14755_v40  ;;  %17604 = vst [vmem:[#allocation31_spill] sm:$0xff] %v14846_v51  ;;  %v14856_v49 = vand.u32 4294901760, %v14844_v41  ;;  %v14859_v59 = vsub.f32 %v9088_v36, %v14846_v51  ;;  %v5342_v58 = vand.u32 4294901760, %v5341_v9 }
 0x474   : > { %11122 = vmatprep.subr.mxu1 %v5293_v62  ;;  %11086 = vmatprep.subr.mxu0 %v14771_v54 }
 0x475   : > { %11123 = vmatpush3.msra.mxu1 %v5293_v62  ;;  %11087 = vmatpush3.msra.mxu0 %v14771_v54  ;;  %17605 = vst [vmem:[#allocation28_spill] sm:$0xff] %v14856_v49  ;;  %17606 = vst [vmem:[#allocation23_spill] sm:$0xff] %v14859_v59  ;;  %v14861_v62 = vand.u32 4294901760, %v9087_v43  ;;  %v5348_v14 = vsub.f32 %v14844_v41, %v14856_v49 }
 0x476   : > { %11124 = vmatprep.subr.mxu1 %v5300_v35  ;;  %11088 = vmatprep.subr.mxu0 %v14782_v44 }
 0x477   : > { %11125 = vmatpush3.msra.mxu1 %v5300_v35  ;;  %11089 = vmatpush3.msra.mxu0 %v14782_v44  ;;  %17607 = vst [vmem:[#allocation38_spill] sm:$0xff] %v14861_v62  ;;  %v14868_v35 = vand.u32 4294901760, %v14859_v59  ;;  %v14871_v55 = vsub.f32 %v9087_v43, %v14861_v62  ;;  %v5349_v57 = vand.u32 4294901760, %v5348_v14 }
 0x478   : > { %11126 = vmatprep.subr.mxu1 %v5307_v52  ;;  %11090 = vmatprep.subr.mxu0 %v14797_v56 }
 0x479   : > { %11127 = vmatpush3.msra.mxu1 %v5307_v52  ;;  %11091 = vmatpush3.msra.mxu0 %v14797_v56  ;;  %17608 = vst [vmem:[#allocation47_spill] sm:$0xff] %v14868_v35  ;;  %17609 = vst [vmem:[#allocation18_spill] sm:$0xff] %v14871_v55  ;;  %v5355_v52 = vsub.f32 %v14859_v59, %v14868_v35  ;;  %v14878_v6 = vand.u32 4294901760, %v14871_v55 }
 0x47a   : > { %11128 = vmatprep.subr.mxu1 %v5314_v38  ;;  %11092 = vmatprep.subr.mxu0 %v14813_v24 }
 0x47b   : > { %11129 = vmatpush3.msra.mxu1 %v5314_v38  ;;  %11093 = vmatpush3.msra.mxu0 %v14813_v24  ;;  %17610 = vst [vmem:[#allocation21_spill] sm:$0xff] %v14878_v6  ;;  %v5356_v17 = vand.u32 4294901760, %v5355_v52  ;;  %v5362_v38 = vsub.f32 %v14871_v55, %v14878_v6 }
 0x47c   : > { %11130 = vmatprep.subr.mxu1 %v5321_v0  ;;  %11094 = vmatprep.subr.mxu0 %v14831_v23 }
 0x47d   : > { %11131 = vmatpush3.msra.mxu1 %v5321_v0  ;;  %11095 = vmatpush3.msra.mxu0 %v14831_v23  ;;  %v5363_v27 = vand.u32 4294901760, %v5362_v38 }
 0x47e   : > { %11132 = vmatprep.subr.mxu1 %v5328_v39  ;;  %11096 = vmatprep.subr.mxu0 %v14846_v51 }
 0x47f   : > { %11133 = vmatpush3.msra.mxu1 %v5328_v39  ;;  %11097 = vmatpush3.msra.mxu0 %v14846_v51 }
 0x480   : > { %11134 = vmatprep.subr.mxu1 %v5335_v20  ;;  %11098 = vmatprep.subr.mxu0 %v14861_v62 }
 0x481   : > { %11135 = vmatpush3.msra.mxu1 %v5335_v20  ;;  %11099 = vmatpush3.msra.mxu0 %v14861_v62 }
 0x482   : > { %11136 = vmatprep.subr.mxu1 %v5342_v58  ;;  %11156 = vmatprep.subr.mxu0 %v14651_v16 }
 0x483   : > { %11137 = vmatpush3.msra.mxu1 %v5342_v58 }
 0x484   : > { %11138 = vmatprep.subr.mxu1 %v5349_v57 }
 0x485   : > { %11139 = vmatpush3.msra.mxu1 %v5349_v57 }
 0x486   : > { %11140 = vmatprep.subr.mxu1 %v5356_v17 }
 0x487   : > { %11141 = vmatpush3.msra.mxu1 %v5356_v17 }
 0x488   : > { %11142 = vmatprep.subr.mxu1 %v5363_v27 }
 0x489   : > { %11143 = vmatpush3.msra.mxu1 %v5363_v27 }
 0x48a   : > { %11200 = vmatprep.subr.mxu1 %v14645_v1 }
 0x4c2   : > { %v10882_v11 = vpop.f32.mrf.mxu1 }
 0x4c4   : > { %v4409_v7 = vpop.f32.mrf.mxu1 }
 0x4c6   : > { %v10885_v0 = vpop.f32.mrf.mxu1 }
 0x4c8   : > { %v4421_v19 = vpop.f32.mrf.mxu1 }
 0x4cb   : > { %v10838_v39 = vpop.f32.mrf.mxu0  ;;  %v10888_v20 = vpop.f32.mrf.mxu1 }
 0x4cc   : > { %v4199_v26 = vadd.f32 %v10838_v39, %v9086_v28 }
 0x4cd   : > { %v4188_v36 = vpop.f32.mrf.mxu0  ;;  %v4433_v43 = vpop.f32.mrf.mxu1 }
 0x4ce   : > { %v4189_v55 = vadd.f32 %v9086_v28, %v4188_v36  ;;  %v4416_v63 = vadd.f32 %v10882_v11, %v4199_v26 }
 0x4d0   : > { %v4410_v23 = vadd.f32 %v4409_v7, %v4189_v55 }
 0x4d1   : > { %v10841_v9 = vpop.f32.mrf.mxu0  ;;  %v10891_v14 = vpop.f32.mrf.mxu1 }
 0x4d2   : > { %v4219_v41 = vadd.f32 %v10841_v9, %v9086_v28 }
 0x4d3   : > { %v4208_v58 = vpop.f32.mrf.mxu0  ;;  %v4445_v57 = vpop.f32.mrf.mxu1 }
 0x4d4   : > { %v4209_v51 = vadd.f32 %v9086_v28, %v4208_v58  ;;  %v4428_v5 = vadd.f32 %v10885_v0, %v4219_v41 }
 0x4d6   : > { %v4422_v25 = vadd.f32 %v4421_v19, %v4209_v51 }
 0x4d7   : > { %v10844_v52 = vpop.f32.mrf.mxu0 }
 0x4d8   : > { %v4239_v56 = vadd.f32 %v10844_v52, %v9086_v28  ;;  %v17616_v52 = vld [vmem:[#allocation46_spill] sm:$0xff] }
 0x4d9   : > { %v4228_v6 = vpop.f32.mrf.mxu0 }
 0x4da   : > { %v4229_v48 = vadd.f32 %v9086_v28, %v4228_v6  ;;  %v4440_v8 = vadd.f32 %v10888_v20, %v4239_v56 }
 0x4dc   : > { %v10847_v17 = vpop.f32.mrf.mxu0 }
 0x4dd   : > { %v4259_v54 = vadd.f32 %v10847_v17, %v9086_v28 }
 0x4de   : > { %v4248_v27 = vpop.f32.mrf.mxu0 }
 0x4df   : > { %v4249_v11 = vadd.f32 %v9086_v28, %v4248_v27  ;;  %v4452_v41 = vadd.f32 %v10891_v14, %v4259_v54  ;;  %v17612_v28 = vld [vmem:[#allocation62_spill] sm:$0xff]  ;;  %v17615_v14 = vld [vmem:[#allocation65_spill] sm:$0xff] }
 0x4e0   : > { %v17618_v27 = vld [vmem:[#allocation57_spill] sm:$0xff] }
 0x4e8   : > { %v10970_v38 = vpop.f32.mrf.mxu1 }
 0x4ea   : > { %v4693_v35 = vpop.f32.mrf.mxu1 }
 0x4ed   : > { %v10973_v49 = vpop.f32.mrf.mxu1 }
 0x4ef   : > { %v4709_v60 = vpop.f32.mrf.mxu1 }
 0x4f2   : > { %v10926_v18 = vpop.f32.mrf.mxu0  ;;  %v10976_v34 = vpop.f32.mrf.mxu1 }
 0x4f3   : > { %v4563_v30 = vadd.f32 %v10926_v18, %v4416_v63 }
 0x4f4   : > { %v4555_v53 = vpop.f32.mrf.mxu0  ;;  %v14884_v31 = vpop.f32.mrf.mxu1 }
 0x4f5   : > { %v4556_v24 = vadd.f32 %v4555_v53, %v4410_v23  ;;  %v4702_v39 = vadd.f32 %v10970_v38, %v4563_v30  ;;  %v4434_v23 = vadd.f32 %v4433_v43, %v4229_v48 }
 0x4f7   : > { %v4694_v26 = vadd.f32 %v4693_v35, %v4556_v24  ;;  %v17613_v35 = vld [vmem:[#allocation52_spill] sm:$0xff] }
 0x4f8   : > { %v10929_v33 = vpop.f32.mrf.mxu0  ;;  %v14889_v10 = vpop.f32.mrf.mxu1 }
 0x4f9   : > { %v4577_v44 = vadd.f32 %v10929_v33, %v4428_v5  ;;  %v17611_v33 = vld [vmem:[#allocation43_spill] sm:$0xff] }
 0x4fa   : > { %v4569_v61 = vpop.f32.mrf.mxu0  ;;  %v14891_v15 = vpop.f32.mrf.mxu1 }
 0x4fb   : > { %v4570_v50 = vadd.f32 %v4569_v61, %v4422_v25  ;;  %v4718_v55 = vadd.f32 %v10973_v49, %v4577_v44  ;;  %v4446_v61 = vadd.f32 %v4445_v57, %v4249_v11  ;;  %v17614_v49 = vld [vmem:[#allocation60_spill] sm:$0xff] }
 0x4fd   : > { %v4710_v0 = vadd.f32 %v4709_v60, %v4570_v50 }
 0x4fe   : > { %v10932_v47 = vpop.f32.mrf.mxu0 }
 0x4ff   : > { %v4591_v53 = vadd.f32 %v10932_v47, %v4440_v8 }
 0x500   : > { %v4583_v29 = vpop.f32.mrf.mxu0 }
 0x501   : > { %v4584_v19 = vadd.f32 %v4583_v29, %v4434_v23  ;;  %v4734_v8 = vadd.f32 %v10976_v34, %v4591_v53  ;;  %v17622_v23 = vld [vmem:[#allocation53_spill] sm:$0xff] }
 0x503   : > { %v10935_v62 = vpop.f32.mrf.mxu0 }
 0x504   : > { %v4605_v25 = vadd.f32 %v10935_v62, %v4452_v41  ;;  %v4726_v62 = vadd.f32 %v14884_v31, %v4584_v19  ;;  %v17620_v31 = vld [vmem:[#allocation81_spill] sm:$0xff] }
 0x505   : > { %v4597_v45 = vpop.f32.mrf.mxu0 }
 0x506   : > { %v4598_v47 = vadd.f32 %v4597_v45, %v4446_v61  ;;  %v4750_v38 = vadd.f32 %v14889_v10, %v4605_v25  ;;  %v17621_v10 = vld [vmem:[#allocation82_spill] sm:$0xff]  ;;  %v17624_v25 = vld [vmem:[#allocation67_spill] sm:$0xff] }
 0x510   : > { %v11058_v59 = vpop.f32.mrf.mxu1 }
 0x512   : > { %v4997_v12 = vpop.f32.mrf.mxu1 }
 0x514   : > { %v11061_v4 = vpop.f32.mrf.mxu1 }
 0x516   : > { %v5009_v40 = vpop.f32.mrf.mxu1 }
 0x518   : > { %v11014_v36 = vpop.f32.mrf.mxu0  ;;  %v11064_v7 = vpop.f32.mrf.mxu1 }
 0x519   : > { %v4875_v9 = vadd.f32 %v11014_v36, %v4702_v39  ;;  %v17619_v39 = vld [vmem:[#allocation49_spill] sm:$0xff] }
 0x51a   : > { %v4868_v58 = vpop.f32.mrf.mxu0  ;;  %v5021_v48 = vpop.f32.mrf.mxu1 }
 0x51b   : > { %v5004_v63 = vadd.f32 %v11058_v59, %v4875_v9  ;;  %v4869_v18 = vadd.f32 %v4868_v58, %v4694_v26 }
 0x51c   : > { %v11017_v5 = vpop.f32.mrf.mxu0  ;;  %v11067_v9 = vpop.f32.mrf.mxu1 }
 0x51d   : > { %v5044_v30 = vadd.f32 %v17611_v33, %v5004_v63  ;;  %v4998_v51 = vadd.f32 %v4997_v12, %v4869_v18  ;;  %v4887_v6 = vadd.f32 %v11017_v5, %v4718_v55 }
 0x51e   : > { %v4880_v24 = vpop.f32.mrf.mxu0  ;;  %v5033_v19 = vpop.f32.mrf.mxu1 }
 0x51f   : > { %v5052_v56 = vmul.f32 %v5044_v30, %v17612_v28  ;;  %v5043_v59 = vadd.f32 %v17613_v35, %v4998_v51  ;;  %v5016_v20 = vadd.f32 %v11061_v4, %v4887_v6  ;;  %v4881_v44 = vadd.f32 %v4880_v24, %v4710_v0  ;;  %v17617_v4 = vld [vmem:[#allocation63_spill] sm:$0xff]  ;;  %v17623_v51 = vld [vmem:[#allocation64_spill] sm:$0xff]  ;;  %v17625_v24 = vld [vmem:[#allocation54_spill] sm:$0xff] }
 0x520   : > { %v11020_v54 = vpop.f32.mrf.mxu0 }
 0x521   : > { %v5060_v43 = vadd.f32 %v17614_v49, %v5052_v56  ;;  %v5051_v12 = vmul.f32 %v5043_v59, %v17615_v14  ;;  %v5046_v50 = vadd.f32 %v17616_v52, %v5016_v20  ;;  %v5010_v29 = vadd.f32 %v5009_v40, %v4881_v44  ;;  %v17626_v20 = vld [vmem:[#allocation12_spill] sm:$0xff] }
 0x522   : > { %v4899_v60 = vadd.f32 %v11020_v54, %v4734_v8  ;;  %v4892_v57 = vpop.f32.mrf.mxu0  ;;  %v4742_v40 = vadd.f32 %v14891_v15, %v4598_v47  ;;  %v17627_v8 = vld [vmem:[#allocation66_spill] sm:$0xff] }
 0x523   : > { %v14901_v17 = vand.u32 4294901760, %v5060_v43  ;;  %v5059_v45 = vadd.f32 %v17617_v4, %v5051_v12  ;;  %v5054_v34 = vmul.f32 %v5046_v50, %v17618_v27  ;;  %v5045_v36 = vadd.f32 %v17619_v39, %v5010_v29  ;;  %v17629_v29 = vld [vmem:[#allocation70_spill] sm:$0xff] }
 0x524   : > { %v5028_v26 = vadd.f32 %v11064_v7, %v4899_v60  ;;  %v4893_v11 = vadd.f32 %v4892_v57, %v4726_v62  ;;  %v11023_v58 = vpop.f32.mrf.mxu0  ;;  %v17630_v62 = vld [vmem:[#allocation15_spill] sm:$0xff] }
 0x525   : > { %v14908_v63 = vsub.f32 %v5060_v43, %v14901_v17  ;;  %v5062_v18 = vadd.f32 %v17620_v31, %v5054_v34  ;;  %v5053_v55 = vmul.f32 %v5045_v36, %v17621_v10  ;;  %v4911_v53 = vadd.f32 %v11023_v58, %v4750_v38  ;;  %v17628_v43 = vld [vmem:[#allocation58_spill] sm:$0xff]  ;;  %v17631_v34 = vld [vmem:[#allocation83_spill] sm:$0xff] }
 0x526   : > { %v5048_v41 = vadd.f32 %v17622_v23, %v5028_v26  ;;  %v5022_v5 = vadd.f32 %v5021_v48, %v4893_v11  ;;  %v4904_v33 = vpop.f32.mrf.mxu0  ;;  %v14913_v30 = vand.u32 4294901760, %v5059_v45  ;;  %v17632_v26 = vld [vmem:[#allocation68_spill] sm:$0xff]  ;;  %v17633_v58 = vld [vmem:[#allocation71_spill] sm:$0xff] }
 0x527   : > { %v5185_v7 = vand.u32 4294901760, %v14908_v63  ;;  %v5061_v6 = vadd.f32 %v17623_v51, %v5053_v55  ;;  %v5040_v0 = vadd.f32 %v11067_v9, %v4911_v53  ;;  %v4905_v15 = vadd.f32 %v4904_v33, %v4742_v40 }
 0x528   : > { %v5056_v61 = vmul.f32 %v5048_v41, %v17624_v25  ;;  %v5047_v56 = vadd.f32 %v17625_v24, %v5022_v5  ;;  %11144 = vmatprep.mubr.f32.mxu1 %v14913_v30  ;;  %v14920_v35 = vand.u32 4294901760, %v5062_v18  ;;  %v14923_v59 = vsub.f32 %v5059_v45, %v14913_v30  ;;  %v17634_v41 = vld [vmem:[#allocation69_spill] sm:$0xff] }
 0x529   : > { %v5050_v44 = vadd.f32 %v17626_v20, %v5040_v0  ;;  %v5034_v47 = vadd.f32 %v5033_v19, %v4905_v15  ;;  %11145 = vmatmul.mubr.f32.vlgmr.msra.gmra.mxu1 %v14901_v17  ;;  %v14927_v48 = vand.u32 4294901760, %v5061_v6  ;;  %v5186_v45 = vsub.f32 %v14908_v63, %v5185_v7 }
 0x52a   : > { %v5064_v54 = vadd.f32 %v17627_v8, %v5056_v61  ;;  %v5055_v12 = vmul.f32 %v5047_v56, %v17628_v43  ;;  %11201 = vmatpush3.msra.mxu1 %v14645_v1  ;;  %v5175_v52 = vand.u32 4294901760, %v14923_v59  ;;  %v14934_v50 = vsub.f32 %v5062_v18, %v14920_v35 }
 0x52b   : > { %v5058_v60 = vmul.f32 %v5050_v44, %v17629_v29  ;;  %v5049_v57 = vadd.f32 %v17630_v62, %v5034_v47  ;;  %11202 = vmatprep.subr.mxu1 %v14653_v46  ;;  %11147 = vmatprep.mubr.f32.mxu1 %v14927_v48  ;;  %v14941_v38 = vsub.f32 %v5061_v6, %v14927_v48  ;;  %v5187_v6 = vand.u32 4294901760, %v5186_v45 }
 0x52c   : > { %v5063_v39 = vadd.f32 %v17631_v34, %v5055_v12  ;;  %11203 = vmatpush3.msra.mxu1 %v14653_v46  ;;  %v5176_v36 = vsub.f32 %v14923_v59, %v5175_v52  ;;  %v14951_v9 = vand.u32 4294901760, %v5064_v54  ;;  %v5205_v23 = vand.u32 4294901760, %v14934_v50 }
 0x52d   : > { %v5066_v11 = vadd.f32 %v17632_v26, %v5058_v60  ;;  %v5057_v40 = vmul.f32 %v5049_v57, %v17633_v58  ;;  %11204 = vmatprep.subr.mxu1 %v14666_v3  ;;  %11148 = vmatmul.mubr.f32.gmra.mxu1 %v14920_v35  ;;  %v5195_v18 = vand.u32 4294901760, %v14941_v38 }
 0x52e   : > { %11205 = vmatpush3.msra.mxu1 %v14666_v3  ;;  %v5177_v55 = vand.u32 4294901760, %v5176_v36  ;;  %v14959_v53 = vand.u32 4294901760, %v5063_v39  ;;  %v14972_v15 = vsub.f32 %v5064_v54, %v14951_v9  ;;  %v5206_v56 = vsub.f32 %v14934_v50, %v5205_v23  ;;  %v17636_v36 = vld [vmem:[#allocation75_spill] sm:$0xff] }
 0x52f   : > { %v5065_v5 = vadd.f32 %v17634_v41, %v5057_v40  ;;  %11206 = vmatprep.subr.mxu1 %v14681_v22  ;;  %v5196_v33 = vsub.f32 %v14941_v38, %v5195_v18  ;;  %v14978_v61 = vand.u32 4294901760, %v5066_v11 }
 0x530   : > { %11207 = vmatpush3.msra.mxu1 %v14681_v22  ;;  %11100 = vmatprep.mubr.f32.mxu0 %v5177_v55  ;;  %v14969_v0 = vsub.f32 %v5063_v39, %v14959_v53  ;;  %v5225_v54 = vand.u32 4294901760, %v14972_v15  ;;  %v5207_v60 = vand.u32 4294901760, %v5206_v56  ;;  %v17635_v39 = vld [vmem:[#allocation35_spill] sm:$0xff]  ;;  %v17643_v56 = vld [vmem:[#allocation20_spill] sm:$0xff] }
 0x531   : > { %11150 = vmatprep.mubr.f32.mxu1 %v14959_v53  ;;  %11208 = vmatprep.subr.mxu1 %v14697_v13  ;;  %v14976_v19 = vand.u32 4294901760, %v5065_v5  ;;  %v5197_v24 = vand.u32 4294901760, %v5196_v33  ;;  %v15000_v12 = vsub.f32 %v5066_v11, %v14978_v61  ;;  %v17637_v11 = vld [vmem:[#allocation39_spill] sm:$0xff]  ;;  %v17640_v33 = vld [vmem:[#allocation29_spill] sm:$0xff] }
 0x532   : > { %11101 = vmatmul.mubr.f32.vlgmr.msra.gmra.mxu0 %v5187_v6  ;;  %11151 = vmatmul.mubr.f32.gmra.mxu1 %v14951_v9  ;;  %v5215_v20 = vand.u32 4294901760, %v14969_v0  ;;  %v17641_v6 = vld [vmem:[#allocation76_spill] sm:$0xff] }
 0x533   : > { %11157 = vmatpush3.msra.mxu0 %v14651_v16  ;;  %11209 = vmatpush3.msra.mxu1 %v14697_v13  ;;  %v14988_v44 = vsub.f32 %v5065_v5, %v14976_v19  ;;  %v5245_v45 = vand.u32 4294901760, %v15000_v12 }
 0x534   : > { %11158 = vmatprep.subr.mxu0 %v14664_v2  ;;  %11210 = vmatprep.subr.mxu1 %v14708_v37  ;;  %v5216_v47 = vsub.f32 %v14969_v0, %v5215_v20 }
 0x535   : > { %11159 = vmatpush3.msra.mxu0 %v14664_v2  ;;  %11211 = vmatpush3.msra.mxu1 %v14708_v37  ;;  %v5235_v16 = vand.u32 4294901760, %v14988_v44  ;;  %v5226_v2 = vsub.f32 %v14972_v15, %v5225_v54  ;;  %v5246_v55 = vsub.f32 %v15000_v12, %v5245_v45 }
 0x536   : > { %11103 = vmatprep.mubr.f32.mxu0 %v5197_v24  ;;  %11153 = vmatprep.mubr.f32.mxu1 %v14976_v19  ;;  %v5217_v62 = vand.u32 4294901760, %v5216_v47  ;;  %v17642_v24 = vld [vmem:[#allocation34_spill] sm:$0xff]  ;;  %v17644_v47 = vld [vmem:[#allocation45_spill] sm:$0xff] }
 0x537   : > { %11160 = vmatprep.subr.mxu0 %v14679_v42  ;;  %11212 = vmatprep.subr.mxu1 %v14722_v21  ;;  %v5236_v57 = vsub.f32 %v14988_v44, %v5235_v16  ;;  %v5247_v5 = vand.u32 4294901760, %v5246_v55  ;;  %v17653_v55 = vld [vmem:[#allocation17_spill] sm:$0xff] }
 0x538   : > { %11104 = vmatmul.mubr.f32.gmra.mxu0 %v5207_v60  ;;  %11154 = vmatmul.mubr.f32.gmra.mxu1 %v14978_v61  ;;  %v17645_v60 = vld [vmem:[#allocation32_spill] sm:$0xff] }
 0x539   : > { %11161 = vmatpush3.msra.mxu0 %v14679_v42  ;;  %11213 = vmatpush3.msra.mxu1 %v14722_v21  ;;  %v5227_v42 = vand.u32 4294901760, %v5226_v2  ;;  %v5237_v40 = vand.u32 4294901760, %v5236_v57  ;;  %v17647_v2 = vld [vmem:[#allocation80_spill] sm:$0xff]  ;;  %v17649_v57 = vld [vmem:[#allocation31_spill] sm:$0xff] }
 0x53a   : > { %11162 = vmatprep.subr.mxu0 %v14694_v32  ;;  %11214 = vmatprep.subr.mxu1 %v17635_v39 }
 0x53b   : > { %11232 = vmatprep.mubr.f32.mxu1 %v5175_v52  ;;  %11163 = vmatpush3.msra.mxu0 %v14694_v32  ;;  %v17638_v52 = vld [vmem:[#allocation30_spill] sm:$0xff] }
 0x53c   : > { %11215 = vmatpush3.msra.mxu1 %v17635_v39  ;;  %11106 = vmatprep.mubr.f32.mxu0 %v5217_v62  ;;  %v17639_v32 = vld [vmem:[#allocation14_spill] sm:$0xff]  ;;  %v17646_v62 = vld [vmem:[#allocation33_spill] sm:$0xff] }
 0x53d   : > { %11164 = vmatprep.subr.mxu0 %v17636_v36  ;;  %11216 = vmatprep.subr.mxu1 %v17637_v11 }
 0x53e   : > { %11107 = vmatmul.mubr.f32.gmra.mxu0 %v5227_v42  ;;  %11217 = vmatpush3.msra.mxu1 %v17637_v11  ;;  %v17650_v42 = vld [vmem:[#allocation79_spill] sm:$0xff] }
 0x53f   : > { %11165 = vmatpush3.msra.mxu0 %v17636_v36  ;;  %11218 = vmatprep.subr.mxu1 %v17638_v52  ;;  %v17651_v36 = vld [vmem:[#allocation38_spill] sm:$0xff] }
 0x540   : > { %11166 = vmatprep.subr.mxu0 %v17639_v32  ;;  %11219 = vmatpush3.msra.mxu1 %v17638_v52 }
 0x541   : > { %11167 = vmatpush3.msra.mxu0 %v17639_v32  ;;  %11109 = vmatprep.mubr.f32.mxu0 %v5237_v40  ;;  %v17652_v40 = vld [vmem:[#allocation16_spill] sm:$0xff]  ;;  %v17654_v32 = vld [vmem:[#allocation23_spill] sm:$0xff] }
 0x542   : > { %11168 = vmatprep.subr.mxu0 %v17640_v33  ;;  %11220 = vmatprep.subr.mxu1 %v17641_v6 }
 0x543   : > { %11110 = vmatmul.mubr.f32.gmra.mxu0 %v5247_v5  ;;  %11221 = vmatpush3.msra.mxu1 %v17641_v6 }
 0x544   : > { %11169 = vmatpush3.msra.mxu0 %v17640_v33  ;;  %11188 = vmatprep.mubr.f32.mxu0 %v14923_v59  ;;  %v17648_v59 = vld [vmem:[#allocation42_spill] sm:$0xff] }
 0x545   : > { %11170 = vmatprep.subr.mxu0 %v17642_v24  ;;  %11222 = vmatprep.subr.mxu1 %v17643_v56 }
 0x546   : > { %11171 = vmatpush3.msra.mxu0 %v17642_v24  ;;  %11223 = vmatpush3.msra.mxu1 %v17643_v56 }
 0x547   : > { %11172 = vmatprep.subr.mxu0 %v17644_v47  ;;  %11224 = vmatprep.subr.mxu1 %v17645_v60 }
 0x548   : > { %11173 = vmatpush3.msra.mxu0 %v17644_v47  ;;  %11225 = vmatpush3.msra.mxu1 %v17645_v60  ;;  %v6053_v47 = vld [vmem:[#allocation4 + $0xd0] sm:$0xff] }
 0x549   : > { %11174 = vmatprep.subr.mxu0 %v17646_v62  ;;  %11226 = vmatprep.subr.mxu1 %v17647_v2 }
 0x54a   : > { %11175 = vmatpush3.msra.mxu0 %v17646_v62  ;;  %11227 = vmatpush3.msra.mxu1 %v17647_v2 }
 0x54b   : > { %11176 = vmatprep.subr.mxu0 %v17648_v59  ;;  %11228 = vmatprep.subr.mxu1 %v17649_v57 }
 0x54c   : > { %11177 = vmatpush3.msra.mxu0 %v17648_v59  ;;  %11229 = vmatpush3.msra.mxu1 %v17649_v57  ;;  %v15214_v59 = vand.u32 4294901760, %v6053_v47 }
 0x54d   : > { %11178 = vmatprep.subr.mxu0 %v17650_v42  ;;  %11230 = vmatprep.subr.mxu1 %v17651_v36 }
 0x54e   : > { %11179 = vmatpush3.msra.mxu0 %v17650_v42  ;;  %11231 = vmatpush3.msra.mxu1 %v17651_v36  ;;  %v6052_v42 = vld [vmem:[#allocation4 + $0xc8] sm:$0xff] }
 0x54f   : > { %11180 = vmatprep.subr.mxu0 %v17652_v40  ;;  %11233 = vmatmul.mubr.f32.vlgmr.msra.gmra.mxu1 %v5185_v7  ;;  %v17663_v7 = vld [vmem:[#allocation50_spill] sm:$0xff] }
 0x550   : > { %11288 = vmatprep.subr.mxu1 %v14645_v1  ;;  %11181 = vmatpush3.msra.mxu0 %v17652_v40 }
 0x551   : > { %11235 = vmatprep.mubr.f32.mxu1 %v5195_v18  ;;  %11289 = vmatpush3.msra.mxu1 %v14645_v1  ;;  %v17655_v1 = vld [vmem:[#allocation18_spill] sm:$0xff]  ;;  %v17667_v18 = vld [vmem:[#allocation77_spill] sm:$0xff] }
 0x552   : > { %11182 = vmatprep.subr.mxu0 %v17653_v55  ;;  %11290 = vmatprep.subr.mxu1 %v14653_v46 }
 0x553   : > { %11183 = vmatpush3.msra.mxu0 %v17653_v55  ;;  %11291 = vmatpush3.msra.mxu1 %v14653_v46  ;;  %v17656_v46 = vld [vmem:[#allocation78_spill] sm:$0xff]  ;;  %v15223_v55 = vsub.f32 %v6053_v47, %v15214_v59  ;;  %v6047_v47 = vld [vmem:[#allocation4 + $0xa0] sm:$0xff] }
 0x554   : > { %11184 = vmatprep.subr.mxu0 %v17654_v32  ;;  %11236 = vmatmul.mubr.f32.gmra.mxu1 %v5205_v23  ;;  %v17668_v23 = vld [vmem:[#allocation44_spill] sm:$0xff] }
 0x555   : > { %11292 = vmatprep.subr.mxu1 %v14666_v3  ;;  %11185 = vmatpush3.msra.mxu0 %v17654_v32  ;;  %17677 = vst [vmem:[#allocation56_spill] sm:$0xff] %v15223_v55  ;;  %v15225_v32 = vand.u32 4294901760, %v6052_v42 }
 0x556   : > { %11238 = vmatprep.mubr.f32.mxu1 %v5215_v20  ;;  %11293 = vmatpush3.msra.mxu1 %v14666_v3  ;;  %v17657_v3 = vld [vmem:[#allocation61_spill] sm:$0xff] }
 0x557   : > { %11186 = vmatprep.subr.mxu0 %v17655_v1  ;;  %11294 = vmatprep.subr.mxu1 %v14681_v22  ;;  %v17671_v20 = vld [vmem:[#allocation21_spill] sm:$0xff] }
 0x558   : > { %11187 = vmatpush3.msra.mxu0 %v17655_v1  ;;  %11295 = vmatpush3.msra.mxu1 %v14681_v22  ;;  %v17658_v22 = vld [vmem:[#allocation59_spill] sm:$0xff] }
 0x559   : > { %11189 = vmatmul.mubr.f32.vlgmr.msra.gmra.mxu0 %v14908_v63  ;;  %11239 = vmatmul.mubr.f32.gmra.mxu1 %v5225_v54  ;;  %v17662_v63 = vld [vmem:[#allocation37_spill] sm:$0xff]  ;;  %v6057_v54 = vld [vmem:[#allocation4 + $0xf0] sm:$0xff] }
 0x55a   : > { %11244 = vmatprep.subr.mxu0 %v17656_v46  ;;  %11296 = vmatprep.subr.mxu1 %v14697_v13 }
 0x55b   : > { %11191 = vmatprep.mubr.f32.mxu0 %v14941_v38  ;;  %11241 = vmatprep.mubr.f32.mxu1 %v5235_v16  ;;  %v17665_v38 = vld [vmem:[#allocation51_spill] sm:$0xff]  ;;  %v15171_v16 = vand.u32 4294901760, %v6057_v54 }
 0x55c   : > { %11245 = vmatpush3.msra.mxu0 %v17656_v46  ;;  %11297 = vmatpush3.msra.mxu1 %v14697_v13  ;;  %v17659_v13 = vld [vmem:[#allocation72_spill] sm:$0xff]  ;;  %v6051_v46 = vld [vmem:[#allocation4 + $0xc0] sm:$0xff] }
 0x55d   : > { %11246 = vmatprep.subr.mxu0 %v17657_v3  ;;  %11298 = vmatprep.subr.mxu1 %v14708_v37 }
 0x55e   : > { %11247 = vmatpush3.msra.mxu0 %v17657_v3  ;;  %11299 = vmatpush3.msra.mxu1 %v14708_v37  ;;  %v17660_v37 = vld [vmem:[#allocation10_spill] sm:$0xff] }
 0x55f   : > { %11192 = vmatmul.mubr.f32.gmra.mxu0 %v14934_v50  ;;  %11242 = vmatmul.mubr.f32.gmra.mxu1 %v5245_v45  ;;  %v17664_v50 = vld [vmem:[#allocation55_spill] sm:$0xff] }
 0x560   : > { %11248 = vmatprep.subr.mxu0 %v17658_v22  ;;  %11300 = vmatprep.subr.mxu1 %v14722_v21 }
 0x561   : > { %11194 = vmatprep.mubr.f32.mxu0 %v14969_v0  ;;  %11249 = vmatpush3.msra.mxu0 %v17658_v22  ;;  %v17669_v0 = vld [vmem:[#allocation28_spill] sm:$0xff]  ;;  %v15233_v22 = vand.u32 4294901760, %v15223_v55 }
 0x562   : > { %11301 = vmatpush3.msra.mxu1 %v14722_v21  ;;  %11320 = vmatprep.mubr.f32.mxu1 %v14913_v30  ;;  %v17661_v21 = vld [vmem:[#allocation19_spill] sm:$0xff] }
 0x563   : > { %11250 = vmatprep.subr.mxu0 %v17659_v13  ;;  %11302 = vmatprep.subr.mxu1 %v17635_v39  ;;  %17679 = vst [vmem:[#allocation9_spill] sm:$0xff] %v15233_v22 }
 0x564   : > { %11251 = vmatpush3.msra.mxu0 %v17659_v13  ;;  %11303 = vmatpush3.msra.mxu1 %v17635_v39  ;;  %v15236_v13 = vsub.f32 %v6052_v42, %v15225_v32 }
 0x565   : > { %11195 = vmatmul.mubr.f32.gmra.mxu0 %v14972_v15  ;;  %11252 = vmatprep.subr.mxu0 %v17660_v37  ;;  %v17670_v15 = vld [vmem:[#allocation47_spill] sm:$0xff] }
 0x566   : > { %11304 = vmatprep.subr.mxu1 %v17637_v11  ;;  %11197 = vmatprep.mubr.f32.mxu0 %v14988_v44  ;;  %v6058_v44 = vld [vmem:[#allocation4 + $0xf8] sm:$0xff]  ;;  %17680 = vst [vmem:[#allocation25_spill] sm:$0xff] %v15236_v13 }
 0x567   : > { %11253 = vmatpush3.msra.mxu0 %v17660_v37  ;;  %11305 = vmatpush3.msra.mxu1 %v17637_v11  ;;  %v15238_v37 = vand.u32 4294901760, %v6051_v46 }
 0x568   : > { %11254 = vmatprep.subr.mxu0 %v17661_v21  ;;  %11306 = vmatprep.subr.mxu1 %v17638_v52 }
 0x569   : > { %11255 = vmatpush3.msra.mxu0 %v17661_v21  ;;  %11307 = vmatpush3.msra.mxu1 %v17638_v52  ;;  %v6054_v52 = vld [vmem:[#allocation4 + $0xd8] sm:$0xff]  ;;  %17681 = vst [vmem:[#allocation22_spill] sm:$0xff] %v15238_v37 }
 0x56a   : > { %11198 = vmatmul.mubr.f32.gmra.mxu0 %v15000_v12  ;;  %11256 = vmatprep.subr.mxu0 %v17662_v63 }
 0x56b   : > { %11308 = vmatprep.subr.mxu1 %v17641_v6  ;;  %11257 = vmatpush3.msra.mxu0 %v17662_v63  ;;  %v6050_v63 = vld [vmem:[#allocation4 + $0xb8] sm:$0xff] }
 0x56c   : > { %11276 = vmatprep.mubr.f32.mxu0 %v14913_v30  ;;  %11309 = vmatpush3.msra.mxu1 %v17641_v6  ;;  %v17666_v30 = vld [vmem:[#allocation13_spill] sm:$0xff] }
 0x56d   : > { %11258 = vmatprep.subr.mxu0 %v17663_v7  ;;  %11310 = vmatprep.subr.mxu1 %v17643_v56 }
 0x56e   : > { %11259 = vmatpush3.msra.mxu0 %v17663_v7  ;;  %11311 = vmatpush3.msra.mxu1 %v17643_v56  ;;  %v15206_v56 = vand.u32 4294901760, %v6054_v52  ;;  %v6267_v7 = vsub.f32 %v15223_v55, %v15233_v22  ;;  %v9104_v22 = vld [vmem:[%s16654_s4 + $0x1] ss:$0 sm:$0xff] }
 0x56f   : > { %11260 = vmatprep.subr.mxu0 %v17664_v50  ;;  %11312 = vmatprep.subr.mxu1 %v17645_v60 }
 0x570   : > { %11261 = vmatpush3.msra.mxu0 %v17664_v50  ;;  %11313 = vmatpush3.msra.mxu1 %v17645_v60  ;;  %v15247_v50 = vand.u32 4294901760, %v15236_v13 }
 0x571   : > { %11262 = vmatprep.subr.mxu0 %v17665_v38  ;;  %11314 = vmatprep.subr.mxu1 %v17647_v2 }
 0x572   : > { %11263 = vmatpush3.msra.mxu0 %v17665_v38  ;;  %11315 = vmatpush3.msra.mxu1 %v17647_v2  ;;  %17682 = vst [vmem:[#allocation40_spill] sm:$0xff] %v15247_v50  ;;  %v15250_v38 = vsub.f32 %v6051_v46, %v15238_v37  ;;  %v6046_v46 = vld [vmem:[#allocation4 + $0x98] sm:$0xff] }
 0x573   : > { %11264 = vmatprep.subr.mxu0 %v17666_v30  ;;  %11316 = vmatprep.subr.mxu1 %v17649_v57 }
 0x574   : > { %11265 = vmatpush3.msra.mxu0 %v17666_v30  ;;  %11317 = vmatpush3.msra.mxu1 %v17649_v57  ;;  %v15217_v57 = vsub.f32 %v6054_v52, %v15206_v56  ;;  %17683 = vst [vmem:[#allocation24_spill] sm:$0xff] %v15250_v38  ;;  %v15252_v30 = vand.u32 4294901760, %v6050_v63 }
 0x575   : > { %11266 = vmatprep.subr.mxu0 %v17667_v18  ;;  %11318 = vmatprep.subr.mxu1 %v17651_v36 }
 0x576   : > { %11267 = vmatpush3.msra.mxu0 %v17667_v18  ;;  %11319 = vmatpush3.msra.mxu1 %v17651_v36  ;;  %17676 = vst [vmem:[#allocation48_spill] sm:$0xff] %v15217_v57  ;;  %v15229_v1 = vand.u32 4294901760, %v15217_v57  ;;  %17684 = vst [vmem:[#allocation74_spill] sm:$0xff] %v15252_v30 }
 0x577   : > { %11268 = vmatprep.subr.mxu0 %v17668_v23  ;;  %11321 = vmatmul.mubr.f32.vlgmr.msra.gmra.mxu1 %v14901_v17 }
 0x578   : > { %11269 = vmatpush3.msra.mxu0 %v17668_v23  ;;  %11323 = vmatprep.mubr.f32.mxu1 %v14927_v48  ;;  %17678 = vst [vmem:[#allocation11_spill] sm:$0xff] %v15229_v1  ;;  %v6260_v21 = vsub.f32 %v15217_v57, %v15229_v1  ;;  %v6049_v23 = vld [vmem:[#allocation4 + $0xb0] sm:$0xff] }
 0x579   : > { %11270 = vmatprep.subr.mxu0 %v17669_v0 }
 0x57a   : > { %11271 = vmatpush3.msra.mxu0 %v17669_v0  ;;  %v6261_v18 = vand.u32 4294901760, %v6260_v21  ;;  %v6268_v0 = vand.u32 4294901760, %v6267_v7  ;;  %v15298_v7 = vand.u32 4294901760, %v6046_v46 }
 0x57b   : > { %11272 = vmatprep.subr.mxu0 %v17670_v15  ;;  %11324 = vmatmul.mubr.f32.gmra.mxu1 %v14920_v35 }
 0x57c   : > { %11273 = vmatpush3.msra.mxu0 %v17670_v15  ;;  %11326 = vmatprep.mubr.f32.mxu1 %v14959_v53  ;;  %v6274_v15 = vsub.f32 %v15236_v13, %v15247_v50  ;;  %17696 = vst [vmem:[#allocation39_spill] sm:$0xff] %v15298_v7 }
 0x57d   : > { %11274 = vmatprep.subr.mxu0 %v17671_v20 }
 0x57e   : > { %11275 = vmatpush3.msra.mxu0 %v17671_v20  ;;  %v15259_v20 = vand.u32 4294901760, %v15250_v38 }
 0x57f   : > { %11277 = vmatmul.mubr.f32.vlgmr.msra.gmra.mxu0 %v14901_v17  ;;  %11327 = vmatmul.mubr.f32.gmra.mxu1 %v14951_v9  ;;  %v15166_v17 = vand.u32 4294901760, %v6058_v44 }
 0x580   : > { %11279 = vmatprep.mubr.f32.mxu0 %v14927_v48  ;;  %11329 = vmatprep.mubr.f32.mxu1 %v14976_v19  ;;  %17685 = vst [vmem:[#allocation73_spill] sm:$0xff] %v15259_v20 }
 0x581   : > { %v15169_v48 = vsub.f32 %v6058_v44, %v15166_v17  ;;  %11332 = vmatprep.subr.mxu0 %v15166_v17  ;;  %v15262_v44 = vsub.f32 %v6050_v63, %v15252_v30 }
 0x582   : > { %11333 = vmatpush3.msra.mxu0 %v15166_v17 }
 0x583   : > { %11280 = vmatmul.mubr.f32.gmra.mxu0 %v14920_v35  ;;  %11330 = vmatmul.mubr.f32.gmra.mxu1 %v14978_v61  ;;  %v6056_v35 = vld [vmem:[#allocation4 + $0xe8] sm:$0xff]  ;;  %17686 = vst [vmem:[#allocation43_spill] sm:$0xff] %v15262_v44  ;;  %v15271_v52 = vand.u32 4294901760, %v15262_v44 }
 0x584   : > { %11282 = vmatprep.mubr.f32.mxu0 %v14959_v53  ;;  %v15179_v53 = vsub.f32 %v6057_v54, %v15171_v16  ;;  %11334 = vmatprep.subr.mxu0 %v15171_v16  ;;  %v15265_v54 = vand.u32 4294901760, %v6049_v23 }
 0x585   : > { %11335 = vmatpush3.msra.mxu0 %v15171_v16  ;;  %17688 = vst [vmem:[#allocation46_spill] sm:$0xff] %v15271_v52 }
 0x586   : > { %v15188_v45 = vand.u32 4294901760, %v15179_v53  ;;  %17687 = vst [vmem:[#allocation52_spill] sm:$0xff] %v15265_v54 }
 0x587   : > { %11283 = vmatmul.mubr.f32.gmra.mxu0 %v14951_v9  ;;  %v15176_v9 = vand.u32 4294901760, %v15169_v48 }
 0x588   : > { %11285 = vmatprep.mubr.f32.mxu0 %v14976_v19  ;;  %v15181_v19 = vand.u32 4294901760, %v6056_v35  ;;  %17673 = vst [vmem:[#allocation27_spill] sm:$0xff] %v15188_v45  ;;  %v6239_v33 = vsub.f32 %v15179_v53, %v15188_v45 }
 0x589   : > { %17672 = vst [vmem:[#allocation26_spill] sm:$0xff] %v15176_v9  ;;  %v6232_v12 = vsub.f32 %v15169_v48, %v15176_v9 }
 0x58a   : > { %v15191_v39 = vsub.f32 %v6056_v35, %v15181_v19  ;;  %11336 = vmatprep.subr.mxu0 %v15181_v19  ;;  %v6240_v60 = vand.u32 4294901760, %v6239_v33  ;;  %v6048_v35 = vld [vmem:[#allocation4 + $0xa8] sm:$0xff]  ;;  %v15277_v33 = vsub.f32 %v6049_v23, %v15265_v54  ;;  %v6045_v23 = vld [vmem:[#allocation4 + $0x90] sm:$0xff] }
 0x58b   : > { %11286 = vmatmul.mubr.f32.gmra.mxu0 %v14978_v61  ;;  %v6055_v61 = vld [vmem:[#allocation4 + $0xe0] sm:$0xff]  ;;  %v6233_v5 = vand.u32 4294901760, %v6232_v12  ;;  %v6281_v12 = vsub.f32 %v15250_v38, %v15259_v20 }
 0x58c   : > { %v15193_v11 = vand.u32 4294901760, %v6055_v61  ;;  %11337 = vmatpush3.msra.mxu0 %v15181_v19  ;;  %v15200_v6 = vand.u32 4294901760, %v15191_v39  ;;  %17690 = vst [vmem:[#allocation53_spill] sm:$0xff] %v15277_v33 }
 0x58d   : > { %11376 = vmatprep.subr.mxu1 %v6233_v5 }
 0x58e   : > { %17674 = vst [vmem:[#allocation36_spill] sm:$0xff] %v15200_v6  ;;  %v15203_v24 = vsub.f32 %v6055_v61, %v15193_v11  ;;  %11338 = vmatprep.subr.mxu0 %v15193_v11  ;;  %v6246_v62 = vsub.f32 %v15191_v39, %v15200_v6  ;;  %11377 = vmatpush3.msra.mxu1 %v6233_v5  ;;  %v6275_v61 = vand.u32 4294901760, %v6274_v15  ;;  %v15273_v5 = vand.u32 4294901760, %v6048_v35 }
 0x58f   : > { %11339 = vmatpush3.msra.mxu0 %v15193_v11  ;;  %11378 = vmatprep.subr.mxu1 %v6240_v60 }
 0x590   : > { %v15212_v2 = vand.u32 4294901760, %v15203_v24  ;;  %11340 = vmatprep.subr.mxu0 %v15206_v56  ;;  %v6247_v36 = vand.u32 4294901760, %v6246_v62  ;;  %11379 = vmatpush3.msra.mxu1 %v6240_v60  ;;  %17689 = vst [vmem:[#allocation49_spill] sm:$0xff] %v15273_v5  ;;  %v6282_v60 = vand.u32 4294901760, %v6281_v12  ;;  %v6288_v62 = vsub.f32 %v15262_v44, %v15271_v52 }
 0x591   : > { %11341 = vmatpush3.msra.mxu0 %v15206_v56  ;;  %v15283_v42 = vsub.f32 %v6048_v35, %v15273_v5  ;;  %v15310_v35 = vsub.f32 %v6046_v46, %v15298_v7 }
 0x592   : > { %17675 = vst [vmem:[#allocation41_spill] sm:$0xff] %v15212_v2  ;;  %v6253_v40 = vsub.f32 %v15203_v24, %v15212_v2  ;;  %11342 = vmatprep.subr.mxu0 %v15214_v59  ;;  %11380 = vmatprep.subr.mxu1 %v6247_v36 }
 0x593   : > { %11343 = vmatpush3.msra.mxu0 %v15214_v59  ;;  %11381 = vmatpush3.msra.mxu1 %v6247_v36  ;;  %17691 = vst [vmem:[#allocation54_spill] sm:$0xff] %v15283_v42  ;;  %v15285_v36 = vand.u32 4294901760, %v6047_v47  ;;  %v15293_v21 = vand.u32 4294901760, %v15283_v42  ;;  %17698 = vst [vmem:[#allocation14_spill] sm:$0xff] %v15310_v35  ;;  %v15319_v41 = vand.u32 4294901760, %v15310_v35 }
 0x594   : > { %v6254_v3 = vand.u32 4294901760, %v6253_v40  ;;  %11344 = vmatprep.subr.mxu0 %v15225_v32  ;;  %v15289_v40 = vand.u32 4294901760, %v15277_v33 }
 0x595   : > { %11345 = vmatpush3.msra.mxu0 %v15225_v32  ;;  %17692 = vst [vmem:[#allocation12_spill] sm:$0xff] %v15285_v36  ;;  %17694 = vst [vmem:[#allocation35_spill] sm:$0xff] %v15293_v21  ;;  %v15296_v63 = vsub.f32 %v6047_v47, %v15285_v36  ;;  %v6044_v47 = vld [vmem:[#allocation4 + $0x88] sm:$0xff] }
 0x596   : > { %11382 = vmatprep.subr.mxu1 %v6254_v3  ;;  %11346 = vmatprep.subr.mxu0 %v15238_v37  ;;  %17693 = vst [vmem:[#allocation15_spill] sm:$0xff] %v15289_v40  ;;  %17700 = vst [vmem:[#allocation76_spill] sm:$0xff] %v15319_v41  ;;  %v15325_v58 = vand.u32 4294901760, %v6044_v47 }
 0x597   : > { %11383 = vmatpush3.msra.mxu1 %v6254_v3  ;;  %11347 = vmatpush3.msra.mxu0 %v15238_v37  ;;  %v6289_v3 = vand.u32 4294901760, %v6288_v62  ;;  %17695 = vst [vmem:[#allocation75_spill] sm:$0xff] %v15296_v63  ;;  %v15307_v15 = vand.u32 4294901760, %v15296_v63 }
 0x598   : > { %11384 = vmatprep.subr.mxu1 %v6261_v18  ;;  %11348 = vmatprep.subr.mxu0 %v15252_v30  ;;  %17702 = vst [vmem:[#allocation20_spill] sm:$0xff] %v15325_v58 }
 0x599   : > { %11385 = vmatpush3.msra.mxu1 %v6261_v18  ;;  %11349 = vmatpush3.msra.mxu0 %v15252_v30  ;;  %v6295_v18 = vsub.f32 %v15277_v33, %v15289_v40  ;;  %17697 = vst [vmem:[#allocation30_spill] sm:$0xff] %v15307_v15  ;;  %v6309_v62 = vsub.f32 %v15296_v63, %v15307_v15 }
 0x59a   : > { %11386 = vmatprep.subr.mxu1 %v6268_v0  ;;  %11350 = vmatprep.subr.mxu0 %v15265_v54 }
 0x59b   : > { %11387 = vmatpush3.msra.mxu1 %v6268_v0  ;;  %11351 = vmatpush3.msra.mxu0 %v15265_v54  ;;  %v6302_v0 = vsub.f32 %v15283_v42, %v15293_v21  ;;  %v6296_v12 = vand.u32 4294901760, %v6295_v18  ;;  %v6043_v18 = vld [vmem:[#allocation4 + $0x80] sm:$0xff] }
 0x59c   : > { %11388 = vmatprep.subr.mxu1 %v6275_v61  ;;  %11352 = vmatprep.subr.mxu0 %v15273_v5  ;;  %v15333_v34 = vand.u32 4294901760, %v6043_v18 }
 0x59d   : > { %11389 = vmatpush3.msra.mxu1 %v6275_v61  ;;  %11353 = vmatpush3.msra.mxu0 %v15273_v5  ;;  %v15312_v61 = vand.u32 4294901760, %v6045_v23 }
 0x59e   : > { %11390 = vmatprep.subr.mxu1 %v6282_v60  ;;  %11354 = vmatprep.subr.mxu0 %v15285_v36  ;;  %17704 = vst [vmem:[#allocation32_spill] sm:$0xff] %v15333_v34 }
 0x59f   : > { %11391 = vmatpush3.msra.mxu1 %v6282_v60  ;;  %17699 = vst [vmem:[#allocation29_spill] sm:$0xff] %v15312_v61  ;;  %11355 = vmatpush3.msra.mxu0 %v15285_v36  ;;  %v6303_v60 = vand.u32 4294901760, %v6302_v0  ;;  %v15322_v46 = vsub.f32 %v6045_v23, %v15312_v61  ;;  %v6316_v0 = vsub.f32 %v15310_v35, %v15319_v41 }
 0x5a0   : > { %11392 = vmatprep.subr.mxu1 %v6289_v3  ;;  %11356 = vmatprep.subr.mxu0 %v15298_v7  ;;  %v15337_v23 = vsub.f32 %v6044_v47, %v15325_v58 }
 0x5a1   : > { %11393 = vmatpush3.msra.mxu1 %v6289_v3  ;;  %17701 = vst [vmem:[#allocation34_spill] sm:$0xff] %v15322_v46  ;;  %11357 = vmatpush3.msra.mxu0 %v15298_v7  ;;  %v6310_v3 = vand.u32 4294901760, %v6309_v62  ;;  %v15331_v26 = vand.u32 4294901760, %v15322_v46  ;;  %v6317_v29 = vand.u32 4294901760, %v6316_v0  ;;  %v15343_v62 = vsub.f32 %v6043_v18, %v15333_v34 }
 0x5a2   : > { %11394 = vmatprep.subr.mxu1 %v6296_v12  ;;  %11358 = vmatprep.subr.mxu0 %v15312_v61  ;;  %17705 = vst [vmem:[#allocation33_spill] sm:$0xff] %v15337_v23  ;;  %v15347_v43 = vand.u32 4294901760, %v15337_v23 }
 0x5a3   : > { %11395 = vmatpush3.msra.mxu1 %v6296_v12  ;;  %17703 = vst [vmem:[#allocation45_spill] sm:$0xff] %v15331_v26  ;;  %11359 = vmatpush3.msra.mxu0 %v15312_v61  ;;  %v6323_v12 = vsub.f32 %v15322_v46, %v15331_v26  ;;  %17706 = vst [vmem:[#allocation80_spill] sm:$0xff] %v15343_v62  ;;  %v15351_v8 = vand.u32 4294901760, %v15343_v62 }
 0x5a4   : > { %11396 = vmatprep.subr.mxu1 %v6303_v60  ;;  %11360 = vmatprep.subr.mxu0 %v15325_v58  ;;  %17707 = vst [vmem:[#allocation42_spill] sm:$0xff] %v15347_v43 }
 0x5a5   : > { %11397 = vmatpush3.msra.mxu1 %v6303_v60  ;;  %11361 = vmatpush3.msra.mxu0 %v15325_v58  ;;  %v6324_v47 = vand.u32 4294901760, %v6323_v12  ;;  %17708 = vst [vmem:[#allocation31_spill] sm:$0xff] %v15351_v8  ;;  %v6330_v60 = vsub.f32 %v15337_v23, %v15347_v43  ;;  %v6337_v18 = vsub.f32 %v15343_v62, %v15351_v8 }
 0x5a6   : > { %11398 = vmatprep.subr.mxu1 %v6310_v3  ;;  %11362 = vmatprep.subr.mxu0 %v15333_v34 }
 0x5a7   : > { %11399 = vmatpush3.msra.mxu1 %v6310_v3  ;;  %11363 = vmatpush3.msra.mxu0 %v15333_v34  ;;  %v6331_v0 = vand.u32 4294901760, %v6330_v60  ;;  %v6338_v3 = vand.u32 4294901760, %v6337_v18 }
 0x5a8   : > { %11400 = vmatprep.subr.mxu1 %v6317_v29  ;;  %11420 = vmatprep.subr.mxu0 %v15169_v48 }
 0x5a9   : > { %11401 = vmatpush3.msra.mxu1 %v6317_v29 }
 0x5aa   : > { %11402 = vmatprep.subr.mxu1 %v6324_v47 }
 0x5ab   : > { %11403 = vmatpush3.msra.mxu1 %v6324_v47 }
 0x5ac   : > { %11404 = vmatprep.subr.mxu1 %v6331_v0 }
 0x5ad   : > { %11405 = vmatpush3.msra.mxu1 %v6331_v0 }
 0x5ae   : > { %11406 = vmatprep.subr.mxu1 %v6338_v3 }
 0x5af   : > { %11407 = vmatpush3.msra.mxu1 %v6338_v3 }
 0x5b0   : > { %11464 = vmatprep.subr.mxu1 %v15166_v17 }
 0x5e9   : > { %v11146_v12 = vpop.f32.mrf.mxu1 }
 0x5eb   : > { %v5400_v25 = vpop.f32.mrf.mxu1 }
 0x5ed   : > { %v11149_v51 = vpop.f32.mrf.mxu1 }
 0x5ef   : > { %v5412_v31 = vpop.f32.mrf.mxu1 }
 0x5f2   : > { %v11102_v10 = vpop.f32.mrf.mxu0  ;;  %v11152_v29 = vpop.f32.mrf.mxu1 }
 0x5f3   : > { %v5190_v6 = vadd.f32 %v11102_v10, %v9104_v22 }
 0x5f4   : > { %v5179_v27 = vpop.f32.mrf.mxu0  ;;  %v5424_v14 = vpop.f32.mrf.mxu1 }
 0x5f5   : > { %v5180_v62 = vadd.f32 %v9104_v22, %v5179_v27  ;;  %v5407_v35 = vadd.f32 %v11146_v12, %v5190_v6 }
 0x5f7   : > { %v5401_v61 = vadd.f32 %v5400_v25, %v5180_v62 }
 0x5f8   : > { %v11105_v4 = vpop.f32.mrf.mxu0  ;;  %v11155_v28 = vpop.f32.mrf.mxu1 }
 0x5f9   : > { %v5210_v46 = vadd.f32 %v11105_v4, %v9104_v22 }
 0x5fa   : > { %v5199_v49 = vpop.f32.mrf.mxu0  ;;  %v5436_v47 = vpop.f32.mrf.mxu1 }
 0x5fb   : > { %v5200_v58 = vadd.f32 %v9104_v22, %v5199_v49  ;;  %v5419_v36 = vadd.f32 %v11149_v51, %v5210_v46 }
 0x5fd   : > { %v5413_v10 = vadd.f32 %v5412_v31, %v5200_v58 }
 0x5fe   : > { %v11108_v60 = vpop.f32.mrf.mxu0 }
 0x5ff   : > { %v5230_v33 = vadd.f32 %v11108_v60, %v9104_v22 }
 0x600   : > { %v5219_v18 = vpop.f32.mrf.mxu0 }
 0x601   : > { %v5220_v38 = vadd.f32 %v9104_v22, %v5219_v18  ;;  %v5431_v30 = vadd.f32 %v11152_v29, %v5230_v33 }
 0x603   : > { %v11111_v0 = vpop.f32.mrf.mxu0 }
 0x604   : > { %v5250_v54 = vadd.f32 %v11111_v0, %v9104_v22 }
 0x605   : > { %v5239_v3 = vpop.f32.mrf.mxu0 }
 0x606   : > { %v5240_v37 = vadd.f32 %v9104_v22, %v5239_v3 }
 0x608   : > { %v5437_v33 = vadd.f32 %v5436_v47, %v5240_v37 }
 0x60f   : > { %v11234_v8 = vpop.f32.mrf.mxu1 }
 0x611   : > { %v5684_v43 = vpop.f32.mrf.mxu1 }
 0x614   : > { %v11237_v26 = vpop.f32.mrf.mxu1 }
 0x616   : > { %v5700_v15 = vpop.f32.mrf.mxu1 }
 0x619   : > { %v11190_v41 = vpop.f32.mrf.mxu0  ;;  %v11240_v40 = vpop.f32.mrf.mxu1 }
 0x61a   : > { %v5554_v42 = vadd.f32 %v11190_v41, %v5407_v35  ;;  %v5425_v41 = vadd.f32 %v5424_v14, %v5220_v38 }
 0x61b   : > { %v5546_v21 = vpop.f32.mrf.mxu0  ;;  %v5716_v20 = vpop.f32.mrf.mxu1 }
 0x61c   : > { %v5547_v44 = vadd.f32 %v5546_v21, %v5401_v61  ;;  %v5693_v55 = vadd.f32 %v11234_v8, %v5554_v42  ;;  %v5443_v61 = vadd.f32 %v11155_v28, %v5250_v54 }
 0x61e   : > { %v5685_v12 = vadd.f32 %v5684_v43, %v5547_v44 }
 0x61f   : > { %v11193_v52 = vpop.f32.mrf.mxu0  ;;  %v15363_v1 = vpop.f32.mrf.mxu1 }
 0x620   : > { %v5568_v13 = vadd.f32 %v11193_v52, %v5419_v36 }
 0x621   : > { %v5560_v50 = vpop.f32.mrf.mxu0  ;;  %v15365_v45 = vpop.f32.mrf.mxu1 }
 0x622   : > { %v5561_v4 = vadd.f32 %v5560_v50, %v5413_v10  ;;  %v5709_v21 = vadd.f32 %v11237_v26, %v5568_v13 }
 0x624   : > { %v5701_v58 = vadd.f32 %v5700_v15, %v5561_v4 }
 0x625   : > { %v11196_v2 = vpop.f32.mrf.mxu0 }
 0x626   : > { %v5582_v49 = vadd.f32 %v11196_v2, %v5431_v30 }
 0x627   : > { %v5574_v9 = vpop.f32.mrf.mxu0 }
 0x628   : > { %v5575_v51 = vadd.f32 %v5574_v9, %v5425_v41  ;;  %v5725_v50 = vadd.f32 %v11240_v40, %v5582_v49 }
 0x62a   : > { %v11199_v34 = vpop.f32.mrf.mxu0  ;;  %v5717_v22 = vadd.f32 %v5716_v20, %v5575_v51 }
 0x62c   : > { %v5588_v5 = vpop.f32.mrf.mxu0 }
 0x62d   : > { %v5589_v38 = vadd.f32 %v5588_v5, %v5437_v33 }
 0x62f   : > { %v5733_v40 = vadd.f32 %v15365_v45, %v5589_v38 }
 0x637   : > { %v11322_v23 = vpop.f32.mrf.mxu1 }
 0x639   : > { %v5988_v63 = vpop.f32.mrf.mxu1 }
 0x63b   : > { %v11325_v7 = vpop.f32.mrf.mxu1 }
 0x63d   : > { %v6000_v27 = vpop.f32.mrf.mxu1 }
 0x63f   : > { %v11278_v57 = vpop.f32.mrf.mxu0  ;;  %v11328_v46 = vpop.f32.mrf.mxu1 }
 0x640   : > { %v5866_v6 = vadd.f32 %v11278_v57, %v5693_v55  ;;  %v5596_v57 = vadd.f32 %v11199_v34, %v5443_v61 }
 0x641   : > { %v5859_v25 = vpop.f32.mrf.mxu0  ;;  %v6012_v14 = vpop.f32.mrf.mxu1 }
 0x642   : > { %v5995_v35 = vadd.f32 %v11322_v23, %v5866_v6  ;;  %v5860_v62 = vadd.f32 %v5859_v25, %v5685_v12  ;;  %v5741_v44 = vadd.f32 %v15363_v1, %v5596_v57 }
 0x643   : > { %v11281_v52 = vpop.f32.mrf.mxu0  ;;  %v11331_v37 = vpop.f32.mrf.mxu1 }
 0x644   : > { %12248 = vtanh.f32 %v5995_v35  ;;  %v5989_v31 = vadd.f32 %v5988_v63, %v5860_v62  ;;  %v5878_v8 = vadd.f32 %v11281_v52, %v5709_v21 }
 0x645   : > { %v5871_v42 = vpop.f32.mrf.mxu0 }
 0x646   : > { %12250 = vtanh.f32 %v5989_v31  ;;  %v6007_v43 = vadd.f32 %v11325_v7, %v5878_v8  ;;  %v5872_v2 = vadd.f32 %v5871_v42, %v5701_v58  ;;  %v6024_v7 = vpop.f32.mrf.mxu1 }
 0x647   : > { %v11284_v55 = vpop.f32.mrf.mxu0 }
 0x648   : > { %12252 = vtanh.f32 %v6007_v43  ;;  %v6001_v26 = vadd.f32 %v6000_v27, %v5872_v2  ;;  %v5890_v28 = vadd.f32 %v11284_v55, %v5725_v50 }
 0x649   : > { %v5883_v9 = vpop.f32.mrf.mxu0 }
 0x64a   : > { %12254 = vtanh.f32 %v6001_v26  ;;  %v6019_v13 = vadd.f32 %v11328_v46, %v5890_v28  ;;  %v5884_v30 = vadd.f32 %v5883_v9, %v5717_v22 }
 0x64b   : > { %v11287_v54 = vpop.f32.mrf.mxu0 }
 0x64c   : > { %12256 = vtanh.f32 %v6019_v13  ;;  %v6013_v34 = vadd.f32 %v6012_v14, %v5884_v30  ;;  %v5902_v36 = vadd.f32 %v11287_v54, %v5741_v44  ;;  %v17717_v44 = vld [vmem:[#allocation22_spill] sm:$0xff] }
 0x64d   : > { %v5895_v63 = vpop.f32.mrf.mxu0  ;;  %v17719_v54 = vld [vmem:[#allocation74_spill] sm:$0xff] }
 0x64e   : > { %12258 = vtanh.f32 %v6013_v34  ;;  %v6031_v20 = vadd.f32 %v11331_v37, %v5902_v36  ;;  %v5896_v5 = vadd.f32 %v5895_v63, %v5733_v40  ;;  %v17720_v40 = vld [vmem:[#allocation52_spill] sm:$0xff] }
 0x650   : > { %12260 = vtanh.f32 %v6031_v20  ;;  %v6025_v15 = vadd.f32 %v6024_v7, %v5896_v5  ;;  %v17722_v20 = vld [vmem:[#allocation25_spill] sm:$0xff]  ;;  %v17724_v7 = vld [vmem:[#allocation24_spill] sm:$0xff] }
 0x651   : > { %v15369_v23 = vpop.eup %12248  ;;  %v17723_v5 = vld [vmem:[#allocation49_spill] sm:$0xff] }
 0x652   : > { %17709 = vst [vmem:[#allocation79_spill] sm:$0xff] %v15369_v23  ;;  %12262 = vtanh.f32 %v6025_v15  ;;  %v15372_v29 = vand.u32 4294901760, %v15369_v23  ;;  %v17725_v15 = vld [vmem:[#allocation12_spill] sm:$0xff] }
 0x653   : > { %v15374_v1 = vpop.eup %12250 }
 0x654   : > { %17710 = vst [vmem:[#allocation38_spill] sm:$0xff] %v15374_v1  ;;  %v15377_v60 = vand.u32 4294901760, %v15374_v1  ;;  %v15381_v45 = vsub.f32 %v15369_v23, %v15372_v29 }
 0x655   : > { %v15383_v47 = vpop.eup %12252 }
 0x656   : > { %17711 = vst [vmem:[#allocation16_spill] sm:$0xff] %v15383_v47  ;;  %11408 = vmatprep.mubr.f32.mxu1 %v15377_v60  ;;  %v15387_v18 = vand.u32 4294901760, %v15383_v47  ;;  %v15391_v0 = vsub.f32 %v15374_v1, %v15377_v60  ;;  %v6160_v3 = vand.u32 4294901760, %v15381_v45 }
 0x657   : > { %v15394_v10 = vpop.eup %12254  ;;  %11409 = vmatmul.mubr.f32.vlgmr.msra.gmra.mxu1 %v15372_v29 }
 0x658   : > { %17712 = vst [vmem:[#allocation17_spill] sm:$0xff] %v15394_v10  ;;  %11465 = vmatpush3.msra.mxu1 %v15166_v17  ;;  %v15399_v27 = vand.u32 4294901760, %v15394_v10  ;;  %v6150_v4 = vand.u32 4294901760, %v15391_v0  ;;  %v15404_v6 = vsub.f32 %v15383_v47, %v15387_v18  ;;  %v6161_v41 = vsub.f32 %v15381_v45, %v6160_v3 }
 0x659   : > { %v15406_v12 = vpop.eup %12256  ;;  %11466 = vmatprep.subr.mxu1 %v15171_v16 }
 0x65a   : > { %17713 = vst [vmem:[#allocation23_spill] sm:$0xff] %v15406_v12  ;;  %11467 = vmatpush3.msra.mxu1 %v15171_v16  ;;  %11411 = vmatprep.mubr.f32.mxu1 %v15399_v27  ;;  %v6151_v49 = vsub.f32 %v15391_v0, %v6150_v4  ;;  %v15416_v25 = vand.u32 4294901760, %v15406_v12  ;;  %v15420_v35 = vsub.f32 %v15394_v10, %v15399_v27  ;;  %v6180_v46 = vand.u32 4294901760, %v15404_v6 }
 0x65b   : > { %v15422_v62 = vpop.eup %12258  ;;  %11468 = vmatprep.subr.mxu1 %v15181_v19  ;;  %11412 = vmatmul.mubr.f32.gmra.mxu1 %v15387_v18  ;;  %v6162_v31 = vand.u32 4294901760, %v6161_v41  ;;  %v17728_v41 = vld [vmem:[#allocation53_spill] sm:$0xff] }
 0x65c   : > { %17714 = vst [vmem:[#allocation18_spill] sm:$0xff] %v15422_v62  ;;  %11469 = vmatpush3.msra.mxu1 %v15181_v19  ;;  %v6152_v21 = vand.u32 4294901760, %v6151_v49  ;;  %v15428_v51 = vand.u32 4294901760, %v15422_v62  ;;  %v6170_v61 = vand.u32 4294901760, %v15420_v35  ;;  %v15445_v33 = vsub.f32 %v15406_v12, %v15416_v25  ;;  %v17727_v49 = vld [vmem:[#allocation39_spill] sm:$0xff] }
 0x65d   : > { %v15432_v52 = vpop.eup %12260  ;;  %11470 = vmatprep.subr.mxu1 %v15193_v11  ;;  %v6181_v2 = vsub.f32 %v15404_v6, %v6180_v46 }
 0x65e   : > { %17715 = vst [vmem:[#allocation78_spill] sm:$0xff] %v15432_v52  ;;  %11471 = vmatpush3.msra.mxu1 %v15193_v11  ;;  %11364 = vmatprep.mubr.f32.mxu0 %v6152_v21  ;;  %v6171_v8 = vsub.f32 %v15420_v35, %v6170_v61  ;;  %v15441_v58 = vsub.f32 %v15422_v62, %v15428_v51  ;;  %v15452_v50 = vand.u32 4294901760, %v15432_v52  ;;  %v6200_v22 = vand.u32 4294901760, %v15445_v33  ;;  %v17729_v21 = vld [vmem:[#allocation29_spill] sm:$0xff] }
 0x65f   : > { %v15447_v42 = vpop.eup %12262  ;;  %11414 = vmatprep.mubr.f32.mxu1 %v15428_v51  ;;  %11472 = vmatprep.subr.mxu1 %v15206_v56  ;;  %v6182_v26 = vand.u32 4294901760, %v6181_v2  ;;  %v17734_v2 = vld [vmem:[#allocation14_spill] sm:$0xff] }
 0x660   : > { %17716 = vst [vmem:[#allocation61_spill] sm:$0xff] %v15447_v42  ;;  %11365 = vmatmul.mubr.f32.vlgmr.msra.gmra.mxu0 %v6162_v31  ;;  %11415 = vmatmul.mubr.f32.gmra.mxu1 %v15416_v25  ;;  %v6172_v57 = vand.u32 4294901760, %v6171_v8  ;;  %v15456_v43 = vand.u32 4294901760, %v15447_v42  ;;  %v6190_v14 = vand.u32 4294901760, %v15441_v58  ;;  %v6201_v9 = vsub.f32 %v15445_v33, %v6200_v22  ;;  %v17731_v31 = vld [vmem:[#allocation20_spill] sm:$0xff]  ;;  %v17732_v8 = vld [vmem:[#allocation75_spill] sm:$0xff] }
 0x661   : > { %11421 = vmatpush3.msra.mxu0 %v15169_v48  ;;  %11473 = vmatpush3.msra.mxu1 %v15206_v56  ;;  %v15478_v48 = vsub.f32 %v15432_v52, %v15452_v50 }
 0x662   : > { %11422 = vmatprep.subr.mxu0 %v15179_v53  ;;  %11474 = vmatprep.subr.mxu1 %v15214_v59  ;;  %v6191_v55 = vsub.f32 %v15441_v58, %v6190_v14  ;;  %v15472_v38 = vsub.f32 %v15447_v42, %v15456_v43  ;;  %v6202_v37 = vand.u32 4294901760, %v6201_v9 }
 0x663   : > { %11423 = vmatpush3.msra.mxu0 %v15179_v53  ;;  %11475 = vmatpush3.msra.mxu1 %v15214_v59  ;;  %v6220_v30 = vand.u32 4294901760, %v15478_v48 }
 0x664   : > { %11367 = vmatprep.mubr.f32.mxu0 %v6172_v57  ;;  %11417 = vmatprep.mubr.f32.mxu1 %v15456_v43  ;;  %v6210_v28 = vand.u32 4294901760, %v15472_v38  ;;  %v6192_v53 = vand.u32 4294901760, %v6191_v55  ;;  %v17733_v57 = vld [vmem:[#allocation32_spill] sm:$0xff]  ;;  %v17735_v55 = vld [vmem:[#allocation34_spill] sm:$0xff] }
 0x665   : > { %11424 = vmatprep.subr.mxu0 %v15191_v39  ;;  %11476 = vmatprep.subr.mxu1 %v15225_v32  ;;  %v6221_v36 = vsub.f32 %v15478_v48, %v6220_v30 }
 0x666   : > { %11368 = vmatmul.mubr.f32.gmra.mxu0 %v6182_v26  ;;  %11418 = vmatmul.mubr.f32.gmra.mxu1 %v15452_v50  ;;  %v6211_v13 = vsub.f32 %v15472_v38, %v6210_v28  ;;  %v17736_v26 = vld [vmem:[#allocation33_spill] sm:$0xff] }
 0x667   : > { %11425 = vmatpush3.msra.mxu0 %v15191_v39  ;;  %11477 = vmatpush3.msra.mxu1 %v15225_v32  ;;  %v17718_v39 = vld [vmem:[#allocation48_spill] sm:$0xff]  ;;  %v6222_v63 = vand.u32 4294901760, %v6221_v36  ;;  %v7028_v36 = vld [vmem:[#allocation6 + $0xd0] sm:$0xff] }
 0x668   : > { %11426 = vmatprep.subr.mxu0 %v15203_v24  ;;  %11478 = vmatprep.subr.mxu1 %v17717_v44  ;;  %v6212_v34 = vand.u32 4294901760, %v6211_v13 }
 0x669   : > { %11496 = vmatprep.mubr.f32.mxu1 %v6150_v4  ;;  %11427 = vmatpush3.msra.mxu0 %v15203_v24  ;;  %v17721_v24 = vld [vmem:[#allocation56_spill] sm:$0xff]  ;;  %v17726_v4 = vld [vmem:[#allocation43_spill] sm:$0xff] }
 0x66a   : > { %11479 = vmatpush3.msra.mxu1 %v17717_v44  ;;  %11370 = vmatprep.mubr.f32.mxu0 %v6192_v53 }
 0x66b   : > { %11428 = vmatprep.subr.mxu0 %v17718_v39  ;;  %11480 = vmatprep.subr.mxu1 %v17719_v54 }
 0x66c   : > { %11371 = vmatmul.mubr.f32.gmra.mxu0 %v6202_v37  ;;  %11481 = vmatpush3.msra.mxu1 %v17719_v54 }
 0x66d   : > { %11429 = vmatpush3.msra.mxu0 %v17718_v39  ;;  %11482 = vmatprep.subr.mxu1 %v17720_v40 }
 0x66e   : > { %11430 = vmatprep.subr.mxu0 %v17721_v24  ;;  %11483 = vmatpush3.msra.mxu1 %v17720_v40 }
 0x66f   : > { %11431 = vmatpush3.msra.mxu0 %v17721_v24  ;;  %11373 = vmatprep.mubr.f32.mxu0 %v6212_v34 }
 0x670   : > { %11432 = vmatprep.subr.mxu0 %v17722_v20  ;;  %11484 = vmatprep.subr.mxu1 %v17723_v5 }
 0x671   : > { %11374 = vmatmul.mubr.f32.gmra.mxu0 %v6222_v63  ;;  %11485 = vmatpush3.msra.mxu1 %v17723_v5 }
 0x672   : > { %11433 = vmatpush3.msra.mxu0 %v17722_v20  ;;  %11452 = vmatprep.mubr.f32.mxu0 %v15391_v0  ;;  %v17730_v0 = vld [vmem:[#allocation54_spill] sm:$0xff]  ;;  %v15691_v20 = vand.u32 4294901760, %v7028_v36 }
 0x673   : > { %11434 = vmatprep.subr.mxu0 %v17724_v7  ;;  %11486 = vmatprep.subr.mxu1 %v17725_v15 }
 0x674   : > { %11435 = vmatpush3.msra.mxu0 %v17724_v7  ;;  %11487 = vmatpush3.msra.mxu1 %v17725_v15  ;;  %v7027_v7 = vld [vmem:[#allocation6 + $0xc8] sm:$0xff] }
 0x675   : > { %11436 = vmatprep.subr.mxu0 %v17726_v4  ;;  %11488 = vmatprep.subr.mxu1 %v17727_v49 }
 0x676   : > { %11437 = vmatpush3.msra.mxu0 %v17726_v4  ;;  %11489 = vmatpush3.msra.mxu1 %v17727_v49 }
 0x677   : > { %11438 = vmatprep.subr.mxu0 %v17728_v41  ;;  %11490 = vmatprep.subr.mxu1 %v17729_v21 }
 0x678   : > { %11439 = vmatpush3.msra.mxu0 %v17728_v41  ;;  %11491 = vmatpush3.msra.mxu1 %v17729_v21  ;;  %v15702_v41 = vand.u32 4294901760, %v7027_v7 }
 0x679   : > { %11440 = vmatprep.subr.mxu0 %v17730_v0  ;;  %11492 = vmatprep.subr.mxu1 %v17731_v31 }
 0x67a   : > { %11441 = vmatpush3.msra.mxu0 %v17730_v0  ;;  %11493 = vmatpush3.msra.mxu1 %v17731_v31  ;;  %v7026_v0 = vld [vmem:[#allocation6 + $0xc0] sm:$0xff] }
 0x67b   : > { %11442 = vmatprep.subr.mxu0 %v17732_v8  ;;  %11494 = vmatprep.subr.mxu1 %v17733_v57 }
 0x67c   : > { %11443 = vmatpush3.msra.mxu0 %v17732_v8  ;;  %11495 = vmatpush3.msra.mxu1 %v17733_v57 }
 0x67d   : > { %11444 = vmatprep.subr.mxu0 %v17734_v2  ;;  %11497 = vmatmul.mubr.f32.vlgmr.msra.gmra.mxu1 %v6160_v3  ;;  %v17745_v3 = vld [vmem:[#allocation73_spill] sm:$0xff] }
 0x67e   : > { %11552 = vmatprep.subr.mxu1 %v15166_v17  ;;  %11445 = vmatpush3.msra.mxu0 %v17734_v2  ;;  %v15715_v2 = vand.u32 4294901760, %v7026_v0 }
 0x67f   : > { %11499 = vmatprep.mubr.f32.mxu1 %v6170_v61  ;;  %11553 = vmatpush3.msra.mxu1 %v15166_v17  ;;  %v17737_v17 = vld [vmem:[#allocation80_spill] sm:$0xff]  ;;  %v17749_v61 = vld [vmem:[#allocation30_spill] sm:$0xff] }
 0x680   : > { %11446 = vmatprep.subr.mxu0 %v17735_v55  ;;  %11554 = vmatprep.subr.mxu1 %v15171_v16  ;;  %17763 = vst [vmem:[#allocation77_spill] sm:$0xff] %v15715_v2 }
 0x681   : > { %11447 = vmatpush3.msra.mxu0 %v17735_v55  ;;  %11555 = vmatpush3.msra.mxu1 %v15171_v16  ;;  %v17738_v16 = vld [vmem:[#allocation26_spill] sm:$0xff] }
 0x682   : > { %11448 = vmatprep.subr.mxu0 %v17736_v26  ;;  %11500 = vmatmul.mubr.f32.gmra.mxu1 %v6180_v46  ;;  %v17750_v46 = vld [vmem:[#allocation76_spill] sm:$0xff] }
 0x683   : > { %11556 = vmatprep.subr.mxu1 %v15181_v19  ;;  %11449 = vmatpush3.msra.mxu0 %v17736_v26  ;;  %v7025_v26 = vld [vmem:[#allocation6 + $0xb8] sm:$0xff] }
 0x684   : > { %11502 = vmatprep.mubr.f32.mxu1 %v6190_v14  ;;  %11557 = vmatpush3.msra.mxu1 %v15181_v19  ;;  %v17739_v19 = vld [vmem:[#allocation27_spill] sm:$0xff] }
 0x685   : > { %11450 = vmatprep.subr.mxu0 %v17737_v17  ;;  %11558 = vmatprep.subr.mxu1 %v15193_v11  ;;  %v17753_v14 = vld [vmem:[#allocation31_spill] sm:$0xff] }
 0x686   : > { %11451 = vmatpush3.msra.mxu0 %v17737_v17  ;;  %11559 = vmatpush3.msra.mxu1 %v15193_v11  ;;  %v17740_v11 = vld [vmem:[#allocation36_spill] sm:$0xff] }
 0x687   : > { %11453 = vmatmul.mubr.f32.vlgmr.msra.gmra.mxu0 %v15381_v45  ;;  %11503 = vmatmul.mubr.f32.gmra.mxu1 %v6200_v22  ;;  %v17744_v45 = vld [vmem:[#allocation40_spill] sm:$0xff] }
 0x688   : > { %11508 = vmatprep.subr.mxu0 %v17738_v16  ;;  %11560 = vmatprep.subr.mxu1 %v15206_v56  ;;  %v7033_v22 = vld [vmem:[#allocation6 + $0xf8] sm:$0xff] }
 0x689   : > { %11455 = vmatprep.mubr.f32.mxu0 %v15420_v35  ;;  %11505 = vmatprep.mubr.f32.mxu1 %v6210_v28  ;;  %v17747_v35 = vld [vmem:[#allocation15_spill] sm:$0xff] }
 0x68a   : > { %11509 = vmatpush3.msra.mxu0 %v17738_v16  ;;  %11561 = vmatpush3.msra.mxu1 %v15206_v56  ;;  %v17741_v56 = vld [vmem:[#allocation41_spill] sm:$0xff] }
 0x68b   : > { %11510 = vmatprep.subr.mxu0 %v17739_v19  ;;  %11562 = vmatprep.subr.mxu1 %v15214_v59 }
 0x68c   : > { %11511 = vmatpush3.msra.mxu0 %v17739_v19  ;;  %11563 = vmatpush3.msra.mxu1 %v15214_v59  ;;  %v17742_v59 = vld [vmem:[#allocation11_spill] sm:$0xff]  ;;  %v15727_v19 = vsub.f32 %v7026_v0, %v15715_v2 }
 0x68d   : > { %11456 = vmatmul.mubr.f32.gmra.mxu0 %v15404_v6  ;;  %11506 = vmatmul.mubr.f32.gmra.mxu1 %v6220_v30  ;;  %v17746_v6 = vld [vmem:[#allocation46_spill] sm:$0xff]  ;;  %v7029_v30 = vld [vmem:[#allocation6 + $0xd8] sm:$0xff] }
 0x68e   : > { %11512 = vmatprep.subr.mxu0 %v17740_v11  ;;  %11564 = vmatprep.subr.mxu1 %v15225_v32  ;;  %v15683_v34 = vand.u32 4294901760, %v7029_v30  ;;  %17765 = vst [vmem:[#allocation28_spill] sm:$0xff] %v15727_v19 }
 0x68f   : > { %11458 = vmatprep.mubr.f32.mxu0 %v15441_v58  ;;  %11513 = vmatpush3.msra.mxu0 %v17740_v11  ;;  %v17751_v58 = vld [vmem:[#allocation45_spill] sm:$0xff]  ;;  %v15729_v11 = vand.u32 4294901760, %v7025_v26 }
 0x690   : > { %11565 = vmatpush3.msra.mxu1 %v15225_v32  ;;  %11584 = vmatprep.mubr.f32.mxu1 %v15377_v60  ;;  %v17743_v32 = vld [vmem:[#allocation9_spill] sm:$0xff] }
 0x691   : > { %11514 = vmatprep.subr.mxu0 %v17741_v56  ;;  %11566 = vmatprep.subr.mxu1 %v17717_v44  ;;  %17766 = vst [vmem:[#allocation47_spill] sm:$0xff] %v15729_v11 }
 0x692   : > { %11515 = vmatpush3.msra.mxu0 %v17741_v56  ;;  %11567 = vmatpush3.msra.mxu1 %v17717_v44 }
 0x693   : > { %11459 = vmatmul.mubr.f32.gmra.mxu0 %v15445_v33  ;;  %11516 = vmatprep.subr.mxu0 %v17742_v59  ;;  %v17752_v33 = vld [vmem:[#allocation42_spill] sm:$0xff] }
 0x694   : > { %11568 = vmatprep.subr.mxu1 %v17719_v54  ;;  %11461 = vmatprep.mubr.f32.mxu0 %v15472_v38  ;;  %v7032_v38 = vld [vmem:[#allocation6 + $0xf0] sm:$0xff] }
 0x695   : > { %11517 = vmatpush3.msra.mxu0 %v17742_v59  ;;  %11569 = vmatpush3.msra.mxu1 %v17719_v54  ;;  %v7024_v59 = vld [vmem:[#allocation6 + $0xb0] sm:$0xff] }
 0x696   : > { %11518 = vmatprep.subr.mxu0 %v17743_v32  ;;  %11570 = vmatprep.subr.mxu1 %v17720_v40 }
 0x697   : > { %11519 = vmatpush3.msra.mxu0 %v17743_v32  ;;  %11571 = vmatpush3.msra.mxu1 %v17720_v40 }
 0x698   : > { %11462 = vmatmul.mubr.f32.gmra.mxu0 %v15478_v48  ;;  %11520 = vmatprep.subr.mxu0 %v17744_v45  ;;  %v15648_v48 = vand.u32 4294901760, %v7032_v38 }
 0x699   : > { %11572 = vmatprep.subr.mxu1 %v17723_v5  ;;  %11521 = vmatpush3.msra.mxu0 %v17744_v45 }
 0x69a   : > { %11540 = vmatprep.mubr.f32.mxu0 %v15377_v60  ;;  %11573 = vmatpush3.msra.mxu1 %v17723_v5  ;;  %v17748_v60 = vld [vmem:[#allocation35_spill] sm:$0xff]  ;;  %v15694_v5 = vsub.f32 %v7029_v30, %v15683_v34 }
 0x69b   : > { %11522 = vmatprep.subr.mxu0 %v17745_v3  ;;  %11574 = vmatprep.subr.mxu1 %v17725_v15 }
 0x69c   : > { %11523 = vmatpush3.msra.mxu0 %v17745_v3  ;;  %11575 = vmatpush3.msra.mxu1 %v17725_v15  ;;  %17758 = vst [vmem:[#allocation37_spill] sm:$0xff] %v15694_v5  ;;  %v15736_v3 = vand.u32 4294901760, %v15727_v19 }
 0x69d   : > { %11524 = vmatprep.subr.mxu0 %v17746_v6  ;;  %11576 = vmatprep.subr.mxu1 %v17727_v49 }
 0x69e   : > { %11525 = vmatpush3.msra.mxu0 %v17746_v6  ;;  %11577 = vmatpush3.msra.mxu1 %v17727_v49  ;;  %v15700_v49 = vsub.f32 %v7028_v36, %v15691_v20  ;;  %17767 = vst [vmem:[#allocation21_spill] sm:$0xff] %v15736_v3  ;;  %v15739_v6 = vsub.f32 %v7025_v26, %v15729_v11 }
 0x69f   : > { %11526 = vmatprep.subr.mxu0 %v17747_v35  ;;  %11578 = vmatprep.subr.mxu1 %v17729_v21 }
 0x6a0   : > { %11527 = vmatpush3.msra.mxu0 %v17747_v35  ;;  %11579 = vmatpush3.msra.mxu1 %v17729_v21  ;;  %17759 = vst [vmem:[#allocation50_spill] sm:$0xff] %v15700_v49  ;;  %v15706_v21 = vand.u32 4294901760, %v15694_v5  ;;  %v15710_v8 = vand.u32 4294901760, %v15700_v49  ;;  %17768 = vst [vmem:[#allocation22_spill] sm:$0xff] %v15739_v6  ;;  %v15742_v35 = vand.u32 4294901760, %v7024_v59 }
 0x6a1   : > { %11528 = vmatprep.subr.mxu0 %v17748_v60  ;;  %11580 = vmatprep.subr.mxu1 %v17731_v31 }
 0x6a2   : > { %11529 = vmatpush3.msra.mxu0 %v17748_v60  ;;  %11581 = vmatpush3.msra.mxu1 %v17731_v31  ;;  %17760 = vst [vmem:[#allocation55_spill] sm:$0xff] %v15706_v21  ;;  %17761 = vst [vmem:[#allocation51_spill] sm:$0xff] %v15710_v8  ;;  %v7235_v55 = vsub.f32 %v15694_v5, %v15706_v21  ;;  %v7242_v17 = vsub.f32 %v15700_v49, %v15710_v8  ;;  %v7023_v60 = vld [vmem:[#allocation6 + $0xa8] sm:$0xff]  ;;  %v9106_v8 = vld [vmem:[%s16656_s6 + $0x1] ss:$0 sm:$0xff] }
 0x6a3   : > { %11530 = vmatprep.subr.mxu0 %v17749_v61  ;;  %11582 = vmatprep.subr.mxu1 %v17733_v57  ;;  %17769 = vst [vmem:[#allocation48_spill] sm:$0xff] %v15742_v35 }
 0x6a4   : > { %11531 = vmatpush3.msra.mxu0 %v17749_v61  ;;  %11583 = vmatpush3.msra.mxu1 %v17733_v57  ;;  %v15713_v57 = vsub.f32 %v7027_v7, %v15702_v41  ;;  %v7236_v56 = vand.u32 4294901760, %v7235_v55  ;;  %v7243_v32 = vand.u32 4294901760, %v7242_v17  ;;  %v7019_v17 = vld [vmem:[#allocation6 + $0x88] sm:$0xff] }
 0x6a5   : > { %11532 = vmatprep.subr.mxu0 %v17750_v46  ;;  %11585 = vmatmul.mubr.f32.vlgmr.msra.gmra.mxu1 %v15372_v29 }
 0x6a6   : > { %11533 = vmatpush3.msra.mxu0 %v17750_v46  ;;  %11587 = vmatprep.mubr.f32.mxu1 %v15399_v27  ;;  %17762 = vst [vmem:[#allocation13_spill] sm:$0xff] %v15713_v57  ;;  %v15724_v16 = vand.u32 4294901760, %v15713_v57  ;;  %v7256_v46 = vsub.f32 %v15727_v19, %v15736_v3 }
 0x6a7   : > { %11534 = vmatprep.subr.mxu0 %v17751_v58 }
 0x6a8   : > { %11535 = vmatpush3.msra.mxu0 %v17751_v58  ;;  %17764 = vst [vmem:[#allocation44_spill] sm:$0xff] %v15724_v16  ;;  %v7249_v45 = vsub.f32 %v15713_v57, %v15724_v16  ;;  %v15748_v58 = vand.u32 4294901760, %v15739_v6 }
 0x6a9   : > { %11536 = vmatprep.subr.mxu0 %v17752_v33  ;;  %11588 = vmatmul.mubr.f32.gmra.mxu1 %v15387_v18 }
 0x6aa   : > { %11537 = vmatpush3.msra.mxu0 %v17752_v33  ;;  %11590 = vmatprep.mubr.f32.mxu1 %v15428_v51  ;;  %v7250_v61 = vand.u32 4294901760, %v7249_v45  ;;  %17770 = vst [vmem:[#allocation74_spill] sm:$0xff] %v15748_v58  ;;  %v15750_v33 = vand.u32 4294901760, %v7023_v60 }
 0x6ab   : > { %11538 = vmatprep.subr.mxu0 %v17753_v14 }
 0x6ac   : > { %11539 = vmatpush3.msra.mxu0 %v17753_v14  ;;  %17771 = vst [vmem:[#allocation52_spill] sm:$0xff] %v15750_v33  ;;  %v15754_v14 = vsub.f32 %v7024_v59, %v15742_v35 }
 0x6ad   : > { %11541 = vmatmul.mubr.f32.vlgmr.msra.gmra.mxu0 %v15372_v29  ;;  %11591 = vmatmul.mubr.f32.gmra.mxu1 %v15416_v25  ;;  %v15643_v29 = vand.u32 4294901760, %v7033_v22 }
 0x6ae   : > { %11543 = vmatprep.mubr.f32.mxu0 %v15399_v27  ;;  %11593 = vmatprep.mubr.f32.mxu1 %v15456_v43  ;;  %17772 = vst [vmem:[#allocation56_spill] sm:$0xff] %v15754_v14  ;;  %v15766_v30 = vand.u32 4294901760, %v15754_v14 }
 0x6af   : > { %v15646_v27 = vsub.f32 %v7033_v22, %v15643_v29  ;;  %11596 = vmatprep.subr.mxu0 %v15643_v29  ;;  %v7022_v22 = vld [vmem:[#allocation6 + $0xa0] sm:$0xff] }
 0x6b0   : > { %11597 = vmatpush3.msra.mxu0 %v15643_v29  ;;  %17775 = vst [vmem:[#allocation24_spill] sm:$0xff] %v15766_v30  ;;  %v7270_v7 = vsub.f32 %v15754_v14, %v15766_v30 }
 0x6b1   : > { %11544 = vmatmul.mubr.f32.gmra.mxu0 %v15387_v18  ;;  %11594 = vmatmul.mubr.f32.gmra.mxu1 %v15452_v50  ;;  %v7031_v18 = vld [vmem:[#allocation6 + $0xe8] sm:$0xff] }
 0x6b2   : > { %11546 = vmatprep.mubr.f32.mxu0 %v15428_v51  ;;  %v15656_v51 = vsub.f32 %v7032_v38, %v15648_v48  ;;  %11598 = vmatprep.subr.mxu0 %v15648_v48  ;;  %v7257_v38 = vand.u32 4294901760, %v7256_v46  ;;  %v7271_v26 = vand.u32 4294901760, %v7270_v7 }
 0x6b3   : > { %11599 = vmatpush3.msra.mxu0 %v15648_v48 }
 0x6b4   : > { %v15665_v53 = vand.u32 4294901760, %v15656_v51 }
 0x6b5   : > { %11547 = vmatmul.mubr.f32.gmra.mxu0 %v15416_v25  ;;  %v15653_v25 = vand.u32 4294901760, %v15646_v27 }
 0x6b6   : > { %11549 = vmatprep.mubr.f32.mxu0 %v15456_v43  ;;  %v7030_v43 = vld [vmem:[#allocation6 + $0xe0] sm:$0xff]  ;;  %17755 = vst [vmem:[#allocation72_spill] sm:$0xff] %v15665_v53  ;;  %v7214_v37 = vsub.f32 %v15656_v51, %v15665_v53 }
 0x6b7   : > { %17754 = vst [vmem:[#allocation59_spill] sm:$0xff] %v15653_v25  ;;  %v7207_v28 = vsub.f32 %v15646_v27, %v15653_v25  ;;  %v15670_v13 = vand.u32 4294901760, %v7030_v43 }
 0x6b8   : > { %v7215_v40 = vand.u32 4294901760, %v7214_v37 }
 0x6b9   : > { %11550 = vmatmul.mubr.f32.gmra.mxu0 %v15452_v50  ;;  %v15658_v50 = vand.u32 4294901760, %v7031_v18  ;;  %v7208_v44 = vand.u32 4294901760, %v7207_v28  ;;  %v15680_v54 = vsub.f32 %v7030_v43, %v15670_v13  ;;  %v15760_v43 = vsub.f32 %v7023_v60, %v15750_v33 }
 0x6ba   : > { %v15762_v28 = vand.u32 4294901760, %v7022_v22  ;;  %v15802_v60 = vand.u32 4294901760, %v7019_v17 }
 0x6bb   : > { %v15668_v9 = vsub.f32 %v7031_v18, %v15658_v50  ;;  %11600 = vmatprep.subr.mxu0 %v15658_v50  ;;  %11640 = vmatprep.subr.mxu1 %v7208_v44  ;;  %v15689_v63 = vand.u32 4294901760, %v15680_v54  ;;  %v7263_v18 = vsub.f32 %v15739_v6, %v15748_v58  ;;  %17773 = vst [vmem:[#allocation25_spill] sm:$0xff] %v15760_v43  ;;  %v15770_v36 = vand.u32 4294901760, %v15760_v43 }
 0x6bc   : > { %11601 = vmatpush3.msra.mxu0 %v15658_v50  ;;  %11641 = vmatpush3.msra.mxu1 %v7208_v44  ;;  %17774 = vst [vmem:[#allocation49_spill] sm:$0xff] %v15762_v28  ;;  %v7021_v44 = vld [vmem:[#allocation6 + $0x98] sm:$0xff]  ;;  %17784 = vst [vmem:[#allocation32_spill] sm:$0xff] %v15802_v60 }
 0x6bd   : > { %v15677_v39 = vand.u32 4294901760, %v15668_v9  ;;  %11602 = vmatprep.subr.mxu0 %v15670_v13  ;;  %17757 = vst [vmem:[#allocation19_spill] sm:$0xff] %v15689_v63  ;;  %11642 = vmatprep.subr.mxu1 %v7215_v40  ;;  %v7228_v4 = vsub.f32 %v15680_v54, %v15689_v63  ;;  %v7264_v37 = vand.u32 4294901760, %v7263_v18  ;;  %17776 = vst [vmem:[#allocation12_spill] sm:$0xff] %v15770_v36 }
 0x6be   : > { %11603 = vmatpush3.msra.mxu0 %v15670_v13  ;;  %11643 = vmatpush3.msra.mxu1 %v7215_v40  ;;  %v15773_v40 = vsub.f32 %v7022_v22, %v15762_v28 }
 0x6bf   : > { %17756 = vst [vmem:[#allocation10_spill] sm:$0xff] %v15677_v39  ;;  %v7221_v24 = vsub.f32 %v15668_v9, %v15677_v39  ;;  %11604 = vmatprep.subr.mxu0 %v15683_v34  ;;  %v7229_v31 = vand.u32 4294901760, %v7228_v4  ;;  %v7277_v4 = vsub.f32 %v15760_v43, %v15770_v36 }
 0x6c0   : > { %11605 = vmatpush3.msra.mxu0 %v15683_v34  ;;  %17777 = vst [vmem:[#allocation43_spill] sm:$0xff] %v15773_v40  ;;  %v15784_v0 = vand.u32 4294901760, %v15773_v40 }
 0x6c1   : > { %v7222_v15 = vand.u32 4294901760, %v7221_v24  ;;  %11606 = vmatprep.subr.mxu0 %v15691_v20  ;;  %v15775_v24 = vand.u32 4294901760, %v7021_v44 }
 0x6c2   : > { %11607 = vmatpush3.msra.mxu0 %v15691_v20  ;;  %17779 = vst [vmem:[#allocation53_spill] sm:$0xff] %v15784_v0  ;;  %v7284_v59 = vsub.f32 %v15773_v40, %v15784_v0 }
 0x6c3   : > { %11644 = vmatprep.subr.mxu1 %v7222_v15  ;;  %11608 = vmatprep.subr.mxu0 %v15702_v41  ;;  %17778 = vst [vmem:[#allocation39_spill] sm:$0xff] %v15775_v24 }
 0x6c4   : > { %11645 = vmatpush3.msra.mxu1 %v7222_v15  ;;  %11609 = vmatpush3.msra.mxu0 %v15702_v41  ;;  %v7020_v15 = vld [vmem:[#allocation6 + $0x90] sm:$0xff]  ;;  %v7285_v46 = vand.u32 4294901760, %v7284_v59 }
 0x6c5   : > { %11646 = vmatprep.subr.mxu1 %v7229_v31  ;;  %11610 = vmatprep.subr.mxu0 %v15715_v2  ;;  %v15789_v55 = vand.u32 4294901760, %v7020_v15 }
 0x6c6   : > { %11647 = vmatpush3.msra.mxu1 %v7229_v31  ;;  %11611 = vmatpush3.msra.mxu0 %v15715_v2  ;;  %v15787_v31 = vsub.f32 %v7021_v44, %v15775_v24  ;;  %v15814_v44 = vsub.f32 %v7019_v17, %v15802_v60 }
 0x6c7   : > { %11648 = vmatprep.subr.mxu1 %v7236_v56  ;;  %11612 = vmatprep.subr.mxu0 %v15729_v11  ;;  %17781 = vst [vmem:[#allocation54_spill] sm:$0xff] %v15789_v55  ;;  %v15799_v45 = vsub.f32 %v7020_v15, %v15789_v55 }
 0x6c8   : > { %11649 = vmatpush3.msra.mxu1 %v7236_v56  ;;  %11613 = vmatpush3.msra.mxu0 %v15729_v11  ;;  %17780 = vst [vmem:[#allocation29_spill] sm:$0xff] %v15787_v31  ;;  %v7278_v56 = vand.u32 4294901760, %v7277_v4  ;;  %17787 = vst [vmem:[#allocation33_spill] sm:$0xff] %v15814_v44  ;;  %v15824_v4 = vand.u32 4294901760, %v15814_v44 }
 0x6c9   : > { %11650 = vmatprep.subr.mxu1 %v7243_v32  ;;  %11614 = vmatprep.subr.mxu0 %v15742_v35  ;;  %17783 = vst [vmem:[#allocation75_spill] sm:$0xff] %v15799_v45 }
 0x6ca   : > { %11651 = vmatpush3.msra.mxu1 %v7243_v32  ;;  %11615 = vmatpush3.msra.mxu0 %v15742_v35  ;;  %v15796_v32 = vand.u32 4294901760, %v15787_v31  ;;  %17789 = vst [vmem:[#allocation26_spill] sm:$0xff] %v15824_v4 }
 0x6cb   : > { %11652 = vmatprep.subr.mxu1 %v7250_v61  ;;  %11616 = vmatprep.subr.mxu0 %v15750_v33 }
 0x6cc   : > { %11653 = vmatpush3.msra.mxu1 %v7250_v61  ;;  %11617 = vmatpush3.msra.mxu0 %v15750_v33  ;;  %17782 = vst [vmem:[#allocation20_spill] sm:$0xff] %v15796_v32  ;;  %v7018_v61 = vld [vmem:[#allocation6 + $0x80] sm:$0xff]  ;;  %v7291_v22 = vsub.f32 %v15787_v31, %v15796_v32 }
 0x6cd   : > { %11654 = vmatprep.subr.mxu1 %v7257_v38  ;;  %11618 = vmatprep.subr.mxu0 %v15762_v28  ;;  %v15810_v18 = vand.u32 4294901760, %v7018_v61 }
 0x6ce   : > { %11655 = vmatpush3.msra.mxu1 %v7257_v38  ;;  %11619 = vmatpush3.msra.mxu0 %v15762_v28  ;;  %v15808_v38 = vand.u32 4294901760, %v15799_v45 }
 0x6cf   : > { %11656 = vmatprep.subr.mxu1 %v7264_v37  ;;  %11620 = vmatprep.subr.mxu0 %v15775_v24  ;;  %17786 = vst [vmem:[#allocation34_spill] sm:$0xff] %v15810_v18  ;;  %v15820_v15 = vsub.f32 %v7018_v61, %v15810_v18 }
 0x6d0   : > { %11657 = vmatpush3.msra.mxu1 %v7264_v37  ;;  %11621 = vmatpush3.msra.mxu0 %v15775_v24  ;;  %17785 = vst [vmem:[#allocation14_spill] sm:$0xff] %v15808_v38  ;;  %v7292_v37 = vand.u32 4294901760, %v7291_v22  ;;  %v7298_v7 = vsub.f32 %v15799_v45, %v15808_v38 }
 0x6d1   : > { %11658 = vmatprep.subr.mxu1 %v7271_v26  ;;  %11622 = vmatprep.subr.mxu0 %v15789_v55  ;;  %17788 = vst [vmem:[#allocation80_spill] sm:$0xff] %v15820_v15  ;;  %v15828_v17 = vand.u32 4294901760, %v15820_v15 }
 0x6d2   : > { %11659 = vmatpush3.msra.mxu1 %v7271_v26  ;;  %11623 = vmatpush3.msra.mxu0 %v15789_v55  ;;  %v7299_v26 = vand.u32 4294901760, %v7298_v7 }
 0x6d3   : > { %11660 = vmatprep.subr.mxu1 %v7278_v56  ;;  %11624 = vmatprep.subr.mxu0 %v15802_v60  ;;  %17790 = vst [vmem:[#allocation27_spill] sm:$0xff] %v15828_v17  ;;  %v7312_v59 = vsub.f32 %v15820_v15, %v15828_v17 }
 0x6d4   : > { %11661 = vmatpush3.msra.mxu1 %v7278_v56  ;;  %11625 = vmatpush3.msra.mxu0 %v15802_v60  ;;  %v7305_v56 = vsub.f32 %v15814_v44, %v15824_v4 }
 0x6d5   : > { %11662 = vmatprep.subr.mxu1 %v7285_v46  ;;  %11626 = vmatprep.subr.mxu0 %v15810_v18 }
 0x6d6   : > { %11663 = vmatpush3.msra.mxu1 %v7285_v46  ;;  %11627 = vmatpush3.msra.mxu0 %v15810_v18  ;;  %v7306_v61 = vand.u32 4294901760, %v7305_v56  ;;  %v7313_v46 = vand.u32 4294901760, %v7312_v59 }
 0x6d7   : > { %11664 = vmatprep.subr.mxu1 %v7292_v37  ;;  %11684 = vmatprep.subr.mxu0 %v15646_v27 }
 0x6d8   : > { %11665 = vmatpush3.msra.mxu1 %v7292_v37 }
 0x6d9   : > { %11666 = vmatprep.subr.mxu1 %v7299_v26 }
 0x6da   : > { %11667 = vmatpush3.msra.mxu1 %v7299_v26 }
 0x6db   : > { %11668 = vmatprep.subr.mxu1 %v7306_v61 }
 0x6dc   : > { %11669 = vmatpush3.msra.mxu1 %v7306_v61 }
 0x6dd   : > { %11670 = vmatprep.subr.mxu1 %v7313_v46 }
 0x6de   : > { %11671 = vmatpush3.msra.mxu1 %v7313_v46 }
 0x6df   : > { %11728 = vmatprep.subr.mxu1 %v15643_v29 }
 0x717   : > { %v11410_v22 = vpop.f32.mrf.mxu1 }
 0x719   : > { %v6375_v7 = vpop.f32.mrf.mxu1 }
 0x71b   : > { %v11413_v42 = vpop.f32.mrf.mxu1 }
 0x71d   : > { %v6387_v62 = vpop.f32.mrf.mxu1 }
 0x720   : > { %v11366_v52 = vpop.f32.mrf.mxu0  ;;  %v11416_v37 = vpop.f32.mrf.mxu1 }
 0x721   : > { %v6165_v39 = vadd.f32 %v11366_v52, %v9106_v8 }
 0x722   : > { %v6154_v12 = vpop.f32.mrf.mxu0  ;;  %v6399_v47 = vpop.f32.mrf.mxu1 }
 0x723   : > { %v6155_v15 = vadd.f32 %v9106_v8, %v6154_v12  ;;  %v6382_v31 = vadd.f32 %v11410_v22, %v6165_v39 }
 0x725   : > { %v6376_v55 = vadd.f32 %v6375_v7, %v6155_v15 }
 0x726   : > { %v11369_v10 = vpop.f32.mrf.mxu0  ;;  %v11419_v23 = vpop.f32.mrf.mxu1 }
 0x727   : > { %v6185_v45 = vadd.f32 %v11369_v10, %v9106_v8 }
 0x728   : > { %v6174_v1 = vpop.f32.mrf.mxu0  ;;  %v6411_v26 = vpop.f32.mrf.mxu1 }
 0x729   : > { %v6175_v60 = vadd.f32 %v9106_v8, %v6174_v1  ;;  %v6394_v28 = vadd.f32 %v11413_v42, %v6185_v45 }
 0x72b   : > { %v6388_v52 = vadd.f32 %v6387_v62, %v6175_v60 }
 0x72c   : > { %v11372_v56 = vpop.f32.mrf.mxu0 }
 0x72d   : > { %v6205_v14 = vadd.f32 %v11372_v56, %v9106_v8 }
 0x72e   : > { %v6194_v59 = vpop.f32.mrf.mxu0 }
 0x72f   : > { %v6195_v19 = vadd.f32 %v9106_v8, %v6194_v59  ;;  %v6406_v11 = vadd.f32 %v11416_v37, %v6205_v14 }
 0x731   : > { %v11375_v61 = vpop.f32.mrf.mxu0 }
 0x732   : > { %v6225_v35 = vadd.f32 %v11375_v61, %v9106_v8 }
 0x733   : > { %v6214_v46 = vpop.f32.mrf.mxu0 }
 0x734   : > { %v6215_v2 = vadd.f32 %v9106_v8, %v6214_v46 }
 0x73d   : > { %v11498_v17 = vpop.f32.mrf.mxu1 }
 0x73f   : > { %v6659_v4 = vpop.f32.mrf.mxu1 }
 0x742   : > { %v11501_v38 = vpop.f32.mrf.mxu1 }
 0x744   : > { %v6675_v0 = vpop.f32.mrf.mxu1 }
 0x747   : > { %v11454_v32 = vpop.f32.mrf.mxu0  ;;  %v11504_v30 = vpop.f32.mrf.mxu1 }
 0x748   : > { %v6529_v43 = vadd.f32 %v11454_v32, %v6382_v31  ;;  %v6400_v31 = vadd.f32 %v6399_v47, %v6195_v19 }
 0x749   : > { %v6521_v36 = vpop.f32.mrf.mxu0  ;;  %v6691_v3 = vpop.f32.mrf.mxu1 }
 0x74a   : > { %v6522_v6 = vadd.f32 %v6521_v36, %v6376_v55  ;;  %v6668_v49 = vadd.f32 %v11498_v17, %v6529_v43  ;;  %v6418_v55 = vadd.f32 %v11419_v23, %v6225_v35 }
 0x74c   : > { %v6660_v22 = vadd.f32 %v6659_v4, %v6522_v6 }
 0x74d   : > { %v11457_v58 = vpop.f32.mrf.mxu0  ;;  %v15840_v21 = vpop.f32.mrf.mxu1 }
 0x74e   : > { %v6543_v57 = vadd.f32 %v11457_v58, %v6394_v28  ;;  %v6412_v28 = vadd.f32 %v6411_v26, %v6215_v2 }
 0x74f   : > { %v6535_v16 = vpop.f32.mrf.mxu0  ;;  %v15842_v53 = vpop.f32.mrf.mxu1 }
 0x750   : > { %v6536_v10 = vadd.f32 %v6535_v16, %v6388_v52  ;;  %v6684_v36 = vadd.f32 %v11501_v38, %v6543_v57 }
 0x752   : > { %v6676_v14 = vadd.f32 %v6675_v0, %v6536_v10 }
 0x753   : > { %v11460_v63 = vpop.f32.mrf.mxu0 }
 0x754   : > { %v6557_v1 = vadd.f32 %v11460_v63, %v6406_v11 }
 0x755   : > { %v6549_v25 = vpop.f32.mrf.mxu0 }
 0x756   : > { %v6550_v42 = vadd.f32 %v6549_v25, %v6400_v31  ;;  %v6700_v16 = vadd.f32 %v11504_v30, %v6557_v1 }
 0x758   : > { %v11463_v18 = vpop.f32.mrf.mxu0  ;;  %v6692_v19 = vadd.f32 %v6691_v3, %v6550_v42 }
 0x75a   : > { %v6563_v33 = vpop.f32.mrf.mxu0 }
 0x75b   : > { %v6564_v11 = vadd.f32 %v6563_v33, %v6412_v28 }
 0x765   : > { %v11586_v44 = vpop.f32.mrf.mxu1 }
 0x767   : > { %v6963_v40 = vpop.f32.mrf.mxu1 }
 0x769   : > { %v11589_v24 = vpop.f32.mrf.mxu1 }
 0x76b   : > { %v6975_v12 = vpop.f32.mrf.mxu1 }
 0x76d   : > { %v11542_v5 = vpop.f32.mrf.mxu0  ;;  %v11592_v45 = vpop.f32.mrf.mxu1 }
 0x76e   : > { %v6841_v39 = vadd.f32 %v11542_v5, %v6668_v49  ;;  %v6571_v5 = vadd.f32 %v11463_v18, %v6418_v55 }
 0x76f   : > { %v6834_v32 = vpop.f32.mrf.mxu0  ;;  %v6987_v47 = vpop.f32.mrf.mxu1 }
 0x770   : > { %v6970_v15 = vadd.f32 %v11586_v44, %v6841_v39  ;;  %v6835_v7 = vadd.f32 %v6834_v32, %v6660_v22 }
 0x771   : > { %v11545_v58 = vpop.f32.mrf.mxu0  ;;  %v11595_v2 = vpop.f32.mrf.mxu1 }
 0x772   : > { %12264 = vtanh.f32 %v6970_v15  ;;  %v6964_v62 = vadd.f32 %v6963_v40, %v6835_v7  ;;  %v6853_v43 = vadd.f32 %v11545_v58, %v6684_v36  ;;  %v6716_v40 = vadd.f32 %v15840_v21, %v6571_v5 }
 0x773   : > { %v6846_v60 = vpop.f32.mrf.mxu0  ;;  %v6999_v44 = vpop.f32.mrf.mxu1 }
 0x774   : > { %12266 = vtanh.f32 %v6964_v62  ;;  %v6982_v49 = vadd.f32 %v11589_v24, %v6853_v43  ;;  %v6847_v63 = vadd.f32 %v6846_v60, %v6676_v14  ;;  %v6708_v24 = vadd.f32 %v15842_v53, %v6564_v11 }
 0x775   : > { %v11548_v8 = vpop.f32.mrf.mxu0 }
 0x776   : > { %12268 = vtanh.f32 %v6982_v49  ;;  %v6976_v25 = vadd.f32 %v6975_v12, %v6847_v63  ;;  %v6865_v23 = vadd.f32 %v11548_v8, %v6700_v16 }
 0x777   : > { %v6858_v57 = vpop.f32.mrf.mxu0 }
 0x778   : > { %12270 = vtanh.f32 %v6976_v25  ;;  %v6994_v6 = vadd.f32 %v11592_v45, %v6865_v23  ;;  %v6859_v35 = vadd.f32 %v6858_v57, %v6692_v19 }
 0x779   : > { %v11551_v0 = vpop.f32.mrf.mxu0 }
 0x77a   : > { %12272 = vtanh.f32 %v6994_v6  ;;  %v6988_v30 = vadd.f32 %v6987_v47, %v6859_v35  ;;  %v6877_v38 = vadd.f32 %v11551_v0, %v6716_v40  ;;  %v17791_v40 = vld [vmem:[#allocation77_spill] sm:$0xff]  ;;  %v17793_v0 = vld [vmem:[#allocation47_spill] sm:$0xff] }
 0x77b   : > { %v6870_v18 = vpop.f32.mrf.mxu0 }
 0x77c   : > { %12274 = vtanh.f32 %v6988_v30  ;;  %v7006_v3 = vadd.f32 %v11595_v2, %v6877_v38  ;;  %v6871_v33 = vadd.f32 %v6870_v18, %v6708_v24  ;;  %v17794_v24 = vld [vmem:[#allocation48_spill] sm:$0xff] }
 0x77e   : > { %12276 = vtanh.f32 %v7006_v3  ;;  %v7000_v4 = vadd.f32 %v6999_v44, %v6871_v33  ;;  %v17796_v3 = vld [vmem:[#allocation13_spill] sm:$0xff]  ;;  %v17797_v33 = vld [vmem:[#allocation52_spill] sm:$0xff] }
 0x77f   : > { %v12265_v17 = vpop.eup %12264  ;;  %v17798_v44 = vld [vmem:[#allocation28_spill] sm:$0xff] }
 0x780   : > { %v15846_v37 = vand.u32 4294901760, %v12265_v17  ;;  %12278 = vtanh.f32 %v7000_v4  ;;  %v17799_v4 = vld [vmem:[#allocation49_spill] sm:$0xff] }
 0x781   : > { %v12267_v56 = vpop.eup %12266 }
 0x782   : > { %v15849_v21 = vsub.f32 %v12265_v17, %v15846_v37  ;;  %v15851_v26 = vand.u32 4294901760, %v12267_v56  ;;  %v17800_v17 = vld [vmem:[#allocation22_spill] sm:$0xff] }
 0x783   : > { %v12269_v59 = vpop.eup %12268 }
 0x784   : > { %11672 = vmatprep.mubr.f32.mxu1 %v15851_v26  ;;  %v15854_v53 = vand.u32 4294901760, %v12269_v59  ;;  %v15857_v61 = vsub.f32 %v12267_v56, %v15851_v26  ;;  %v7135_v46 = vand.u32 4294901760, %v15849_v21  ;;  %v17801_v56 = vld [vmem:[#allocation39_spill] sm:$0xff] }
 0x785   : > { %v12271_v52 = vpop.eup %12270  ;;  %11673 = vmatmul.mubr.f32.vlgmr.msra.gmra.mxu1 %v15846_v37 }
 0x786   : > { %11729 = vmatpush3.msra.mxu1 %v15643_v29  ;;  %v15862_v12 = vand.u32 4294901760, %v12271_v52  ;;  %v7125_v10 = vand.u32 4294901760, %v15857_v61  ;;  %v15866_v39 = vsub.f32 %v12269_v59, %v15854_v53  ;;  %v7136_v31 = vsub.f32 %v15849_v21, %v7135_v46  ;;  %v17802_v59 = vld [vmem:[#allocation56_spill] sm:$0xff] }
 0x787   : > { %v12273_v22 = vpop.eup %12272  ;;  %11730 = vmatprep.subr.mxu1 %v15648_v48 }
 0x788   : > { %11731 = vmatpush3.msra.mxu1 %v15648_v48  ;;  %11675 = vmatprep.mubr.f32.mxu1 %v15862_v12  ;;  %v7126_v1 = vsub.f32 %v15857_v61, %v7125_v10  ;;  %v15875_v32 = vand.u32 4294901760, %v12273_v22  ;;  %v15878_v15 = vsub.f32 %v12271_v52, %v15862_v12  ;;  %v7155_v45 = vand.u32 4294901760, %v15866_v39  ;;  %v17803_v52 = vld [vmem:[#allocation54_spill] sm:$0xff] }
 0x789   : > { %v12275_v7 = vpop.eup %12274  ;;  %11732 = vmatprep.subr.mxu1 %v15658_v50  ;;  %11676 = vmatmul.mubr.f32.gmra.mxu1 %v15854_v53  ;;  %v7137_v62 = vand.u32 4294901760, %v7136_v31  ;;  %v17808_v31 = vld [vmem:[#allocation29_spill] sm:$0xff] }
 0x78a   : > { %11733 = vmatpush3.msra.mxu1 %v15658_v50  ;;  %v7127_v36 = vand.u32 4294901760, %v7126_v1  ;;  %v15883_v42 = vand.u32 4294901760, %v12275_v7  ;;  %v7145_v55 = vand.u32 4294901760, %v15878_v15  ;;  %v15896_v28 = vsub.f32 %v12273_v22, %v15875_v32  ;;  %v17806_v22 = vld [vmem:[#allocation43_spill] sm:$0xff]  ;;  %v17807_v1 = vld [vmem:[#allocation34_spill] sm:$0xff] }
 0x78b   : > { %v12277_v58 = vpop.eup %12276  ;;  %11734 = vmatprep.subr.mxu1 %v15670_v13  ;;  %v7156_v63 = vsub.f32 %v15866_v39, %v7155_v45 }
 0x78c   : > { %11735 = vmatpush3.msra.mxu1 %v15670_v13  ;;  %11628 = vmatprep.mubr.f32.mxu0 %v7127_v36  ;;  %v7146_v43 = vsub.f32 %v15878_v15, %v7145_v55  ;;  %v15893_v14 = vsub.f32 %v12275_v7, %v15883_v42  ;;  %v15900_v16 = vand.u32 4294901760, %v12277_v58  ;;  %v7175_v19 = vand.u32 4294901760, %v15896_v28  ;;  %v17809_v7 = vld [vmem:[#allocation75_spill] sm:$0xff]  ;;  %v17810_v36 = vld [vmem:[#allocation33_spill] sm:$0xff] }
 0x78d   : > { %v12279_v60 = vpop.eup %12278  ;;  %11678 = vmatprep.mubr.f32.mxu1 %v15883_v42  ;;  %11736 = vmatprep.subr.mxu1 %v15683_v34  ;;  %v7157_v25 = vand.u32 4294901760, %v7156_v63 }
 0x78e   : > { %11629 = vmatmul.mubr.f32.vlgmr.msra.gmra.mxu0 %v7137_v62  ;;  %11679 = vmatmul.mubr.f32.gmra.mxu1 %v15875_v32  ;;  %v7147_v5 = vand.u32 4294901760, %v7146_v43  ;;  %v15903_v49 = vand.u32 4294901760, %v12279_v60  ;;  %v7165_v47 = vand.u32 4294901760, %v15893_v14  ;;  %v17826_v62 = vld [vmem:[#allocation26_spill] sm:$0xff]  ;;  %v17827_v43 = vld [vmem:[#allocation27_spill] sm:$0xff] }
 0x78f   : > { %11685 = vmatpush3.msra.mxu0 %v15646_v27  ;;  %11737 = vmatpush3.msra.mxu1 %v15683_v34  ;;  %v15923_v27 = vsub.f32 %v12277_v58, %v15900_v16  ;;  %v17825_v58 = vld [vmem:[#allocation14_spill] sm:$0xff] }
 0x790   : > { %11686 = vmatprep.subr.mxu0 %v15656_v51  ;;  %11738 = vmatprep.subr.mxu1 %v15691_v20  ;;  %v7166_v8 = vsub.f32 %v15893_v14, %v7165_v47  ;;  %v15918_v11 = vsub.f32 %v12279_v60, %v15903_v49 }
 0x791   : > { %11687 = vmatpush3.msra.mxu0 %v15656_v51  ;;  %11739 = vmatpush3.msra.mxu1 %v15691_v20  ;;  %v7176_v51 = vsub.f32 %v15896_v28, %v7175_v19  ;;  %v7195_v35 = vand.u32 4294901760, %v15923_v27 }
 0x792   : > { %11631 = vmatprep.mubr.f32.mxu0 %v7147_v5  ;;  %11681 = vmatprep.mubr.f32.mxu1 %v15903_v49  ;;  %v7185_v23 = vand.u32 4294901760, %v15918_v11  ;;  %v7167_v57 = vand.u32 4294901760, %v7166_v8  ;;  %v8020_v5 = vld [vmem:[%s16659_s9 + $0x60] sm:$0xff] }
 0x793   : > { %11688 = vmatprep.subr.mxu0 %v15668_v9  ;;  %11740 = vmatprep.subr.mxu1 %v15702_v41  ;;  %v7177_v2 = vand.u32 4294901760, %v7176_v51  ;;  %v7196_v38 = vsub.f32 %v15923_v27, %v7195_v35  ;;  %v16127_v8 = vand.u32 4294901760, %v8020_v5  ;;  %v8018_v51 = vld [vmem:[%s16659_s9 + $0x50] sm:$0xff] }
 0x794   : > { %11632 = vmatmul.mubr.f32.gmra.mxu0 %v7157_v25  ;;  %11682 = vmatmul.mubr.f32.gmra.mxu1 %v15900_v16  ;;  %v7186_v6 = vsub.f32 %v15918_v11, %v7185_v23 }
 0x795   : > { %11689 = vmatpush3.msra.mxu0 %v15668_v9  ;;  %11741 = vmatpush3.msra.mxu1 %v15702_v41  ;;  %v17792_v9 = vld [vmem:[#allocation37_spill] sm:$0xff]  ;;  %v7197_v18 = vand.u32 4294901760, %v7196_v38 }
 0x796   : > { %11690 = vmatprep.subr.mxu0 %v15680_v54  ;;  %11742 = vmatprep.subr.mxu1 %v17791_v40  ;;  %v7187_v30 = vand.u32 4294901760, %v7186_v6 }
 0x797   : > { %11760 = vmatprep.mubr.f32.mxu1 %v7125_v10  ;;  %11691 = vmatpush3.msra.mxu0 %v15680_v54  ;;  %v17795_v54 = vld [vmem:[#allocation50_spill] sm:$0xff]  ;;  %v17805_v10 = vld [vmem:[#allocation32_spill] sm:$0xff] }
 0x798   : > { %11743 = vmatpush3.msra.mxu1 %v17791_v40  ;;  %11634 = vmatprep.mubr.f32.mxu0 %v7167_v57 }
 0x799   : > { %11692 = vmatprep.subr.mxu0 %v17792_v9  ;;  %11744 = vmatprep.subr.mxu1 %v17793_v0 }
 0x79a   : > { %11635 = vmatmul.mubr.f32.gmra.mxu0 %v7177_v2  ;;  %11745 = vmatpush3.msra.mxu1 %v17793_v0  ;;  %v16154_v2 = vand.u32 4294901760, %v8018_v51 }
 0x79b   : > { %11693 = vmatpush3.msra.mxu0 %v17792_v9  ;;  %11746 = vmatprep.subr.mxu1 %v17794_v24 }
 0x79c   : > { %11694 = vmatprep.subr.mxu0 %v17795_v54  ;;  %11747 = vmatpush3.msra.mxu1 %v17794_v24 }
 0x79d   : > { %11695 = vmatpush3.msra.mxu0 %v17795_v54  ;;  %11637 = vmatprep.mubr.f32.mxu0 %v7187_v30 }
 0x79e   : > { %11696 = vmatprep.subr.mxu0 %v17796_v3  ;;  %11748 = vmatprep.subr.mxu1 %v17797_v33 }
 0x79f   : > { %11638 = vmatmul.mubr.f32.gmra.mxu0 %v7197_v18  ;;  %11749 = vmatpush3.msra.mxu1 %v17797_v33 }
 0x7a0   : > { %11697 = vmatpush3.msra.mxu0 %v17796_v3  ;;  %11716 = vmatprep.mubr.f32.mxu0 %v15857_v61  ;;  %v17804_v61 = vld [vmem:[#allocation25_spill] sm:$0xff]  ;;  %v8016_v3 = vld [vmem:[%s16659_s9 + $0x40] sm:$0xff] }
 0x7a1   : > { %11698 = vmatprep.subr.mxu0 %v17798_v44  ;;  %11750 = vmatprep.subr.mxu1 %v17799_v4 }
 0x7a2   : > { %11699 = vmatpush3.msra.mxu0 %v17798_v44  ;;  %11751 = vmatpush3.msra.mxu1 %v17799_v4 }
 0x7a3   : > { %11700 = vmatprep.subr.mxu0 %v17800_v17  ;;  %11752 = vmatprep.subr.mxu1 %v17801_v56 }
 0x7a4   : > { %11701 = vmatpush3.msra.mxu0 %v17800_v17  ;;  %11753 = vmatpush3.msra.mxu1 %v17801_v56  ;;  %v16184_v17 = vand.u32 4294901760, %v8016_v3 }
 0x7a5   : > { %11702 = vmatprep.subr.mxu0 %v17802_v59  ;;  %11754 = vmatprep.subr.mxu1 %v17803_v52 }
 0x7a6   : > { %11703 = vmatpush3.msra.mxu0 %v17802_v59  ;;  %11755 = vmatpush3.msra.mxu1 %v17803_v52  ;;  %17837 = vst [vmem:[#allocation30_spill] sm:$0xff] %v16184_v17  ;;  %v8015_v59 = vld [vmem:[%s16659_s9 + $0x38] sm:$0xff] }
 0x7a7   : > { %11704 = vmatprep.subr.mxu0 %v17804_v61  ;;  %11756 = vmatprep.subr.mxu1 %v17805_v10 }
 0x7a8   : > { %11705 = vmatpush3.msra.mxu0 %v17804_v61  ;;  %11757 = vmatpush3.msra.mxu1 %v17805_v10 }
 0x7a9   : > { %11706 = vmatprep.subr.mxu0 %v17806_v22  ;;  %11758 = vmatprep.subr.mxu1 %v17807_v1 }
 0x7aa   : > { %11707 = vmatpush3.msra.mxu0 %v17806_v22  ;;  %11759 = vmatpush3.msra.mxu1 %v17807_v1  ;;  %v16201_v22 = vand.u32 4294901760, %v8015_v59 }
 0x7ab   : > { %11708 = vmatprep.subr.mxu0 %v17808_v31  ;;  %11761 = vmatmul.mubr.f32.vlgmr.msra.gmra.mxu1 %v7135_v46  ;;  %v17819_v46 = vld [vmem:[#allocation21_spill] sm:$0xff] }
 0x7ac   : > { %11816 = vmatprep.subr.mxu1 %v15643_v29  ;;  %11709 = vmatpush3.msra.mxu0 %v17808_v31  ;;  %17840 = vst [vmem:[#allocation42_spill] sm:$0xff] %v16201_v22  ;;  %v8014_v31 = vld [vmem:[%s16659_s9 + $0x30] sm:$0xff] }
 0x7ad   : > { %11763 = vmatprep.mubr.f32.mxu1 %v7145_v55  ;;  %11817 = vmatpush3.msra.mxu1 %v15643_v29  ;;  %v17811_v29 = vld [vmem:[#allocation80_spill] sm:$0xff]  ;;  %v17823_v55 = vld [vmem:[#allocation53_spill] sm:$0xff] }
 0x7ae   : > { %11710 = vmatprep.subr.mxu0 %v17809_v7  ;;  %11818 = vmatprep.subr.mxu1 %v15648_v48 }
 0x7af   : > { %11711 = vmatpush3.msra.mxu0 %v17809_v7  ;;  %11819 = vmatpush3.msra.mxu1 %v15648_v48  ;;  %v17812_v48 = vld [vmem:[#allocation59_spill] sm:$0xff] }
 0x7b0   : > { %11712 = vmatprep.subr.mxu0 %v17810_v36  ;;  %11764 = vmatmul.mubr.f32.gmra.mxu1 %v7155_v45  ;;  %v17824_v45 = vld [vmem:[#allocation20_spill] sm:$0xff] }
 0x7b1   : > { %11820 = vmatprep.subr.mxu1 %v15658_v50  ;;  %11713 = vmatpush3.msra.mxu0 %v17810_v36 }
 0x7b2   : > { %11766 = vmatprep.mubr.f32.mxu1 %v7165_v47  ;;  %11821 = vmatpush3.msra.mxu1 %v15658_v50  ;;  %v17813_v50 = vld [vmem:[#allocation72_spill] sm:$0xff] }
 0x7b3   : > { %11714 = vmatprep.subr.mxu0 %v17811_v29  ;;  %11822 = vmatprep.subr.mxu1 %v15670_v13 }
 0x7b4   : > { %11715 = vmatpush3.msra.mxu0 %v17811_v29  ;;  %11823 = vmatpush3.msra.mxu1 %v15670_v13  ;;  %v17814_v13 = vld [vmem:[#allocation10_spill] sm:$0xff] }
 0x7b5   : > { %11717 = vmatmul.mubr.f32.vlgmr.msra.gmra.mxu0 %v15849_v21  ;;  %11767 = vmatmul.mubr.f32.gmra.mxu1 %v7175_v19  ;;  %v17818_v21 = vld [vmem:[#allocation44_spill] sm:$0xff]  ;;  %v8019_v19 = vld [vmem:[%s16659_s9 + $0x58] sm:$0xff] }
 0x7b6   : > { %11772 = vmatprep.subr.mxu0 %v17812_v48  ;;  %11824 = vmatprep.subr.mxu1 %v15683_v34  ;;  %v16143_v57 = vand.u32 4294901760, %v8019_v19 }
 0x7b7   : > { %11719 = vmatprep.mubr.f32.mxu0 %v15878_v15  ;;  %11769 = vmatprep.mubr.f32.mxu1 %v7185_v23  ;;  %v17821_v15 = vld [vmem:[#allocation24_spill] sm:$0xff]  ;;  %v16140_v23 = vsub.f32 %v8020_v5, %v16127_v8 }
 0x7b8   : > { %11773 = vmatpush3.msra.mxu0 %v17812_v48  ;;  %11825 = vmatpush3.msra.mxu1 %v15683_v34  ;;  %v17815_v34 = vld [vmem:[#allocation19_spill] sm:$0xff]  ;;  %v16157_v9 = vsub.f32 %v8019_v19, %v16143_v57  ;;  %v16214_v48 = vsub.f32 %v8015_v59, %v16201_v22 }
 0x7b9   : > { %11774 = vmatprep.subr.mxu0 %v17813_v50  ;;  %11826 = vmatprep.subr.mxu1 %v15691_v20 }
 0x7ba   : > { %11775 = vmatpush3.msra.mxu0 %v17813_v50  ;;  %11827 = vmatpush3.msra.mxu1 %v15691_v20  ;;  %v17816_v20 = vld [vmem:[#allocation55_spill] sm:$0xff]  ;;  %17832 = vst [vmem:[#allocation40_spill] sm:$0xff] %v16157_v9  ;;  %v16172_v18 = vand.u32 4294901760, %v16157_v9  ;;  %17842 = vst [vmem:[#allocation77_spill] sm:$0xff] %v16214_v48  ;;  %v16217_v50 = vand.u32 4294901760, %v8014_v31 }
 0x7bb   : > { %11720 = vmatmul.mubr.f32.gmra.mxu0 %v15866_v39  ;;  %11770 = vmatmul.mubr.f32.gmra.mxu1 %v7195_v35  ;;  %v17820_v39 = vld [vmem:[#allocation74_spill] sm:$0xff] }
 0x7bc   : > { %11776 = vmatprep.subr.mxu0 %v17814_v13  ;;  %11828 = vmatprep.subr.mxu1 %v15702_v41  ;;  %17834 = vst [vmem:[#allocation46_spill] sm:$0xff] %v16172_v18  ;;  %17843 = vst [vmem:[#allocation37_spill] sm:$0xff] %v16217_v50 }
 0x7bd   : > { %11722 = vmatprep.mubr.f32.mxu0 %v15893_v14  ;;  %11777 = vmatpush3.msra.mxu0 %v17814_v13  ;;  %v8013_v13 = vld [vmem:[%s16659_s9 + $0x28] sm:$0xff] }
 0x7be   : > { %11829 = vmatpush3.msra.mxu1 %v15702_v41  ;;  %11848 = vmatprep.mubr.f32.mxu1 %v15851_v26  ;;  %v17817_v41 = vld [vmem:[#allocation51_spill] sm:$0xff] }
 0x7bf   : > { %11778 = vmatprep.subr.mxu0 %v17815_v34  ;;  %11830 = vmatprep.subr.mxu1 %v17791_v40 }
 0x7c0   : > { %11779 = vmatpush3.msra.mxu0 %v17815_v34  ;;  %11831 = vmatpush3.msra.mxu1 %v17791_v40  ;;  %v16152_v40 = vand.u32 4294901760, %v16140_v23 }
 0x7c1   : > { %11723 = vmatmul.mubr.f32.gmra.mxu0 %v15896_v28  ;;  %11780 = vmatprep.subr.mxu0 %v17816_v20 }
 0x7c2   : > { %11832 = vmatprep.subr.mxu1 %v17793_v0  ;;  %11725 = vmatprep.mubr.f32.mxu0 %v15918_v11  ;;  %17831 = vst [vmem:[#allocation9_spill] sm:$0xff] %v16152_v40  ;;  %v8217_v38 = vsub.f32 %v16140_v23, %v16152_v40 }
 0x7c3   : > { %11781 = vmatpush3.msra.mxu0 %v17816_v20  ;;  %11833 = vmatpush3.msra.mxu1 %v17793_v0  ;;  %v8017_v0 = vld [vmem:[%s16659_s9 + $0x48] sm:$0xff] }
 0x7c4   : > { %11782 = vmatprep.subr.mxu0 %v17817_v41  ;;  %11834 = vmatprep.subr.mxu1 %v17794_v24  ;;  %v16168_v54 = vand.u32 4294901760, %v8017_v0 }
 0x7c5   : > { %11783 = vmatpush3.msra.mxu0 %v17817_v41  ;;  %11835 = vmatpush3.msra.mxu1 %v17794_v24  ;;  %v16166_v24 = vsub.f32 %v8018_v51, %v16154_v2  ;;  %v16226_v41 = vand.u32 4294901760, %v16214_v48 }
 0x7c6   : > { %11726 = vmatmul.mubr.f32.gmra.mxu0 %v15923_v27  ;;  %11784 = vmatprep.subr.mxu0 %v17818_v21 }
 0x7c7   : > { %11836 = vmatprep.subr.mxu1 %v17797_v33  ;;  %11785 = vmatpush3.msra.mxu0 %v17818_v21  ;;  %17833 = vst [vmem:[#allocation73_spill] sm:$0xff] %v16166_v24  ;;  %v16179_v44 = vand.u32 4294901760, %v16166_v24  ;;  %17844 = vst [vmem:[#allocation47_spill] sm:$0xff] %v16226_v41  ;;  %v16228_v21 = vand.u32 4294901760, %v8013_v13 }
 0x7c8   : > { %11804 = vmatprep.mubr.f32.mxu0 %v15851_v26  ;;  %11837 = vmatpush3.msra.mxu1 %v17797_v33  ;;  %v17822_v26 = vld [vmem:[#allocation12_spill] sm:$0xff]  ;;  %v8218_v33 = vand.u32 4294901760, %v8217_v38 }
 0x7c9   : > { %11786 = vmatprep.subr.mxu0 %v17819_v46  ;;  %11838 = vmatprep.subr.mxu1 %v17799_v4  ;;  %17835 = vst [vmem:[#allocation15_spill] sm:$0xff] %v16179_v44  ;;  %17845 = vst [vmem:[#allocation48_spill] sm:$0xff] %v16228_v21  ;;  %v8009_v38 = vld [vmem:[%s16659_s9 + $0x8] sm:$0xff] }
 0x7ca   : > { %11787 = vmatpush3.msra.mxu0 %v17819_v46  ;;  %11839 = vmatpush3.msra.mxu1 %v17799_v4  ;;  %v16182_v4 = vsub.f32 %v8017_v0, %v16168_v54  ;;  %v16232_v46 = vsub.f32 %v8014_v31, %v16217_v50 }
 0x7cb   : > { %11788 = vmatprep.subr.mxu0 %v17820_v39  ;;  %11840 = vmatprep.subr.mxu1 %v17801_v56 }
 0x7cc   : > { %11789 = vmatpush3.msra.mxu0 %v17820_v39  ;;  %11841 = vmatpush3.msra.mxu1 %v17801_v56  ;;  %17836 = vst [vmem:[#allocation35_spill] sm:$0xff] %v16182_v4  ;;  %v8224_v56 = vsub.f32 %v16157_v9, %v16172_v18  ;;  %v16196_v61 = vand.u32 4294901760, %v16182_v4  ;;  %17846 = vst [vmem:[#allocation50_spill] sm:$0xff] %v16232_v46  ;;  %v8012_v39 = vld [vmem:[%s16659_s9 + $0x20] sm:$0xff] }
 0x7cd   : > { %11790 = vmatprep.subr.mxu0 %v17821_v15  ;;  %11842 = vmatprep.subr.mxu1 %v17803_v52 }
 0x7ce   : > { %11791 = vmatpush3.msra.mxu0 %v17821_v15  ;;  %11843 = vmatpush3.msra.mxu1 %v17803_v52  ;;  %v8231_v52 = vsub.f32 %v16166_v24, %v16179_v44  ;;  %17838 = vst [vmem:[#allocation76_spill] sm:$0xff] %v16196_v61  ;;  %v8238_v36 = vsub.f32 %v16182_v4, %v16196_v61  ;;  %v9108_v44 = vld [vmem:[%s16658_s8 + $0x1] ss:$0 sm:$0xff] }
 0x7cf   : > { %11792 = vmatprep.subr.mxu0 %v17822_v26  ;;  %11844 = vmatprep.subr.mxu1 %v17805_v10 }
 0x7d0   : > { %11793 = vmatpush3.msra.mxu0 %v17822_v26  ;;  %11845 = vmatpush3.msra.mxu1 %v17805_v10  ;;  %v16199_v10 = vsub.f32 %v8016_v3, %v16184_v17  ;;  %v8232_v7 = vand.u32 4294901760, %v8231_v52  ;;  %v8239_v34 = vand.u32 4294901760, %v8238_v36  ;;  %v8252_v26 = vsub.f32 %v16214_v48, %v16226_v41  ;;  %v8008_v52 = vld [vmem:[%s16659_s9] sm:$0xff] }
 0x7d1   : > { %11794 = vmatprep.subr.mxu0 %v17823_v55  ;;  %11846 = vmatprep.subr.mxu1 %v17807_v1 }
 0x7d2   : > { %11795 = vmatpush3.msra.mxu0 %v17823_v55  ;;  %11847 = vmatpush3.msra.mxu1 %v17807_v1  ;;  %17839 = vst [vmem:[#allocation45_spill] sm:$0xff] %v16199_v10  ;;  %v8225_v1 = vand.u32 4294901760, %v8224_v56  ;;  %v16211_v29 = vand.u32 4294901760, %v16199_v10  ;;  %v16241_v55 = vsub.f32 %v8013_v13, %v16228_v21 }
 0x7d3   : > { %11796 = vmatprep.subr.mxu0 %v17824_v45  ;;  %11849 = vmatmul.mubr.f32.vlgmr.msra.gmra.mxu1 %v15846_v37 }
 0x7d4   : > { %11797 = vmatpush3.msra.mxu0 %v17824_v45  ;;  %11851 = vmatprep.mubr.f32.mxu1 %v15862_v12  ;;  %17841 = vst [vmem:[#allocation31_spill] sm:$0xff] %v16211_v29  ;;  %v8245_v20 = vsub.f32 %v16199_v10, %v16211_v29  ;;  %17847 = vst [vmem:[#allocation13_spill] sm:$0xff] %v16241_v55  ;;  %v16243_v45 = vand.u32 4294901760, %v8012_v39 }
 0x7d5   : > { %11798 = vmatprep.subr.mxu0 %v17825_v58 }
 0x7d6   : > { %11799 = vmatpush3.msra.mxu0 %v17825_v58  ;;  %v8246_v15 = vand.u32 4294901760, %v8245_v20  ;;  %17848 = vst [vmem:[#allocation52_spill] sm:$0xff] %v16243_v45  ;;  %v16247_v58 = vand.u32 4294901760, %v16232_v46 }
 0x7d7   : > { %11800 = vmatprep.subr.mxu0 %v17826_v62  ;;  %11852 = vmatmul.mubr.f32.gmra.mxu1 %v15854_v53 }
 0x7d8   : > { %11801 = vmatpush3.msra.mxu0 %v17826_v62  ;;  %11854 = vmatprep.mubr.f32.mxu1 %v15883_v42  ;;  %17849 = vst [vmem:[#allocation28_spill] sm:$0xff] %v16247_v58  ;;  %v8011_v62 = vld [vmem:[%s16659_s9 + $0x18] sm:$0xff]  ;;  %v8259_v5 = vsub.f32 %v16232_v46, %v16247_v58 }
 0x7d9   : > { %11802 = vmatprep.subr.mxu0 %v17827_v43 }
 0x7da   : > { %11803 = vmatpush3.msra.mxu0 %v17827_v43  ;;  %v8253_v43 = vand.u32 4294901760, %v8252_v26  ;;  %v8260_v51 = vand.u32 4294901760, %v8259_v5 }
 0x7db   : > { %11805 = vmatmul.mubr.f32.vlgmr.msra.gmra.mxu0 %v15846_v37  ;;  %11855 = vmatmul.mubr.f32.gmra.mxu1 %v15875_v32  ;;  %v8023_v37 = vld [vmem:[%s16659_s9 + $0x78] sm:$0xff] }
 0x7dc   : > { %11807 = vmatprep.mubr.f32.mxu0 %v15862_v12  ;;  %11857 = vmatprep.mubr.f32.mxu1 %v15903_v49  ;;  %v16091_v14 = vand.u32 4294901760, %v8023_v37 }
 0x7de   : > { %v16097_v12 = vsub.f32 %v8023_v37, %v16091_v14  ;;  %11860 = vmatprep.subr.mxu0 %v16091_v14  ;;  %v16254_v37 = vand.u32 4294901760, %v16241_v55 }
 0x7df   : > { %11808 = vmatmul.mubr.f32.gmra.mxu0 %v15854_v53  ;;  %11858 = vmatmul.mubr.f32.gmra.mxu1 %v15900_v16  ;;  %v8022_v53 = vld [vmem:[%s16659_s9 + $0x70] sm:$0xff] }
 0x7e0   : > { %11810 = vmatprep.mubr.f32.mxu0 %v15883_v42  ;;  %v16099_v42 = vand.u32 4294901760, %v8022_v53  ;;  %11861 = vmatpush3.msra.mxu0 %v16091_v14  ;;  %v16107_v28 = vand.u32 4294901760, %v16097_v12  ;;  %17850 = vst [vmem:[#allocation49_spill] sm:$0xff] %v16254_v37 }
 0x7e2   : > { %17828 = vst [vmem:[#allocation36_spill] sm:$0xff] %v16107_v28  ;;  %v16110_v60 = vsub.f32 %v8022_v53, %v16099_v42  ;;  %11862 = vmatprep.subr.mxu0 %v16099_v42  ;;  %v16257_v53 = vsub.f32 %v8012_v39, %v16243_v45 }
 0x7e3   : > { %11811 = vmatmul.mubr.f32.gmra.mxu0 %v15875_v32  ;;  %v8021_v32 = vld [vmem:[%s16659_s9 + $0x68] sm:$0xff] }
 0x7e4   : > { %11813 = vmatprep.mubr.f32.mxu0 %v15903_v49  ;;  %11863 = vmatpush3.msra.mxu0 %v16099_v42  ;;  %v8196_v49 = vsub.f32 %v16097_v12, %v16107_v28  ;;  %v16122_v63 = vand.u32 4294901760, %v16110_v60  ;;  %17851 = vst [vmem:[#allocation22_spill] sm:$0xff] %v16257_v53  ;;  %v16268_v19 = vand.u32 4294901760, %v16257_v53 }
 0x7e6   : > { %17829 = vst [vmem:[#allocation41_spill] sm:$0xff] %v16122_v63  ;;  %v8197_v11 = vand.u32 4294901760, %v8196_v49  ;;  %v8203_v27 = vsub.f32 %v16110_v60, %v16122_v63  ;;  %v8266_v49 = vsub.f32 %v16241_v55, %v16254_v37  ;;  %17853 = vst [vmem:[#allocation56_spill] sm:$0xff] %v16268_v19  ;;  %v8273_v0 = vsub.f32 %v16257_v53, %v16268_v19 }
 0x7e7   : > { %11814 = vmatmul.mubr.f32.gmra.mxu0 %v15900_v16  ;;  %v16112_v16 = vand.u32 4294901760, %v8021_v32 }
 0x7e8   : > { %11904 = vmatprep.subr.mxu1 %v8197_v11  ;;  %v8204_v6 = vand.u32 4294901760, %v8203_v27  ;;  %v8010_v27 = vld [vmem:[%s16659_s9 + $0x10] sm:$0xff]  ;;  %v8274_v56 = vand.u32 4294901760, %v8273_v0 }
 0x7e9   : > { %v16125_v47 = vsub.f32 %v8021_v32, %v16112_v16  ;;  %11864 = vmatprep.subr.mxu0 %v16112_v16  ;;  %11905 = vmatpush3.msra.mxu1 %v8197_v11  ;;  %v16259_v32 = vand.u32 4294901760, %v8011_v62 }
 0x7ea   : > { %11865 = vmatpush3.msra.mxu0 %v16112_v16  ;;  %11906 = vmatprep.subr.mxu1 %v8204_v6 }
 0x7eb   : > { %v16137_v25 = vand.u32 4294901760, %v16125_v47  ;;  %11866 = vmatprep.subr.mxu0 %v16127_v8  ;;  %11907 = vmatpush3.msra.mxu1 %v8204_v6  ;;  %17852 = vst [vmem:[#allocation39_spill] sm:$0xff] %v16259_v32  ;;  %v16271_v11 = vsub.f32 %v8011_v62, %v16259_v32  ;;  %v16277_v6 = vand.u32 4294901760, %v8010_v27 }
 0x7ec   : > { %11867 = vmatpush3.msra.mxu0 %v16127_v8 }
 0x7ed   : > { %17830 = vst [vmem:[#allocation11_spill] sm:$0xff] %v16137_v25  ;;  %v8210_v35 = vsub.f32 %v16125_v47, %v16137_v25  ;;  %11868 = vmatprep.subr.mxu0 %v16143_v57  ;;  %17854 = vst [vmem:[#allocation54_spill] sm:$0xff] %v16271_v11  ;;  %v16290_v3 = vsub.f32 %v8010_v27, %v16277_v6 }
 0x7ee   : > { %11869 = vmatpush3.msra.mxu0 %v16143_v57  ;;  %17855 = vst [vmem:[#allocation25_spill] sm:$0xff] %v16277_v6 }
 0x7ef   : > { %v8211_v30 = vand.u32 4294901760, %v8210_v35  ;;  %11870 = vmatprep.subr.mxu0 %v16154_v2  ;;  %v8267_v35 = vand.u32 4294901760, %v8266_v49  ;;  %17857 = vst [vmem:[#allocation43_spill] sm:$0xff] %v16290_v3 }
 0x7f0   : > { %11871 = vmatpush3.msra.mxu0 %v16154_v2 }
 0x7f1   : > { %11908 = vmatprep.subr.mxu1 %v8211_v30  ;;  %11872 = vmatprep.subr.mxu0 %v16168_v54 }
 0x7f2   : > { %11909 = vmatpush3.msra.mxu1 %v8211_v30  ;;  %11873 = vmatpush3.msra.mxu0 %v16168_v54  ;;  %v16283_v30 = vand.u32 4294901760, %v16271_v11 }
 0x7f3   : > { %11910 = vmatprep.subr.mxu1 %v8218_v33  ;;  %11874 = vmatprep.subr.mxu0 %v16184_v17 }
 0x7f4   : > { %11911 = vmatpush3.msra.mxu1 %v8218_v33  ;;  %11875 = vmatpush3.msra.mxu0 %v16184_v17  ;;  %17856 = vst [vmem:[#allocation32_spill] sm:$0xff] %v16283_v30  ;;  %v16292_v33 = vand.u32 4294901760, %v8009_v38  ;;  %v8280_v59 = vsub.f32 %v16271_v11, %v16283_v30 }
 0x7f5   : > { %11912 = vmatprep.subr.mxu1 %v8225_v1  ;;  %11876 = vmatprep.subr.mxu0 %v16201_v22 }
 0x7f6   : > { %11913 = vmatpush3.msra.mxu1 %v8225_v1  ;;  %11877 = vmatpush3.msra.mxu0 %v16201_v22  ;;  %17858 = vst [vmem:[#allocation34_spill] sm:$0xff] %v16292_v33  ;;  %v16302_v1 = vand.u32 4294901760, %v16290_v3  ;;  %v16305_v31 = vsub.f32 %v8009_v38, %v16292_v33  ;;  %v8281_v36 = vand.u32 4294901760, %v8280_v59 }
 0x7f7   : > { %11914 = vmatprep.subr.mxu1 %v8232_v7  ;;  %11878 = vmatprep.subr.mxu0 %v16217_v50 }
 0x7f8   : > { %11915 = vmatpush3.msra.mxu1 %v8232_v7  ;;  %11879 = vmatpush3.msra.mxu0 %v16217_v50  ;;  %17859 = vst [vmem:[#allocation29_spill] sm:$0xff] %v16302_v1  ;;  %17860 = vst [vmem:[#allocation75_spill] sm:$0xff] %v16305_v31  ;;  %v16307_v7 = vand.u32 4294901760, %v8008_v52  ;;  %v8287_v13 = vsub.f32 %v16290_v3, %v16302_v1 }
 0x7f9   : > { %11916 = vmatprep.subr.mxu1 %v8239_v34  ;;  %11880 = vmatprep.subr.mxu0 %v16228_v21 }
 0x7fa   : > { %11917 = vmatpush3.msra.mxu1 %v8239_v34  ;;  %11881 = vmatpush3.msra.mxu0 %v16228_v21  ;;  %17861 = vst [vmem:[#allocation33_spill] sm:$0xff] %v16307_v7  ;;  %v16314_v34 = vand.u32 4294901760, %v16305_v31  ;;  %v16317_v20 = vsub.f32 %v8008_v52, %v16307_v7  ;;  %v8288_v39 = vand.u32 4294901760, %v8287_v13 }
 0x7fb   : > { %11918 = vmatprep.subr.mxu1 %v8246_v15  ;;  %11882 = vmatprep.subr.mxu0 %v16243_v45 }
 0x7fc   : > { %11919 = vmatpush3.msra.mxu1 %v8246_v15  ;;  %11883 = vmatpush3.msra.mxu0 %v16243_v45  ;;  %17862 = vst [vmem:[#allocation80_spill] sm:$0xff] %v16314_v34  ;;  %17863 = vst [vmem:[#allocation59_spill] sm:$0xff] %v16317_v20  ;;  %v8294_v15 = vsub.f32 %v16305_v31, %v16314_v34  ;;  %v16324_v26 = vand.u32 4294901760, %v16317_v20 }
 0x7fd   : > { %11920 = vmatprep.subr.mxu1 %v8253_v43  ;;  %11884 = vmatprep.subr.mxu0 %v16259_v32 }
 0x7fe   : > { %11921 = vmatpush3.msra.mxu1 %v8253_v43  ;;  %11885 = vmatpush3.msra.mxu0 %v16259_v32  ;;  %17864 = vst [vmem:[#allocation72_spill] sm:$0xff] %v16324_v26  ;;  %v8295_v62 = vand.u32 4294901760, %v8294_v15  ;;  %v8301_v43 = vsub.f32 %v16317_v20, %v16324_v26 }
 0x7ff   : > { %11922 = vmatprep.subr.mxu1 %v8260_v51  ;;  %11886 = vmatprep.subr.mxu0 %v16277_v6 }
 0x800   : > { %11923 = vmatpush3.msra.mxu1 %v8260_v51  ;;  %11887 = vmatpush3.msra.mxu0 %v16277_v6  ;;  %v8302_v5 = vand.u32 4294901760, %v8301_v43 }
 0x801   : > { %11924 = vmatprep.subr.mxu1 %v8267_v35  ;;  %11888 = vmatprep.subr.mxu0 %v16292_v33 }
 0x802   : > { %11925 = vmatpush3.msra.mxu1 %v8267_v35  ;;  %11889 = vmatpush3.msra.mxu0 %v16292_v33 }
 0x803   : > { %11926 = vmatprep.subr.mxu1 %v8274_v56  ;;  %11890 = vmatprep.subr.mxu0 %v16307_v7 }
 0x804   : > { %11927 = vmatpush3.msra.mxu1 %v8274_v56  ;;  %11891 = vmatpush3.msra.mxu0 %v16307_v7 }
 0x805   : > { %11928 = vmatprep.subr.mxu1 %v8281_v36  ;;  %11948 = vmatprep.subr.mxu0 %v16097_v12 }
 0x806   : > { %11929 = vmatpush3.msra.mxu1 %v8281_v36 }
 0x807   : > { %11930 = vmatprep.subr.mxu1 %v8288_v39 }
 0x808   : > { %11931 = vmatpush3.msra.mxu1 %v8288_v39 }
 0x809   : > { %11932 = vmatprep.subr.mxu1 %v8295_v62 }
 0x80a   : > { %11933 = vmatpush3.msra.mxu1 %v8295_v62 }
 0x80b   : > { %11934 = vmatprep.subr.mxu1 %v8302_v5 }
 0x80c   : > { %11935 = vmatpush3.msra.mxu1 %v8302_v5 }
 0x80d   : > { %11992 = vmatprep.subr.mxu1 %v16091_v14 }
 0x845   : > { %v11674_v49 = vpop.f32.mrf.mxu1 }
 0x847   : > { %v7350_v27 = vpop.f32.mrf.mxu1 }
 0x849   : > { %v11677_v51 = vpop.f32.mrf.mxu1 }
 0x84b   : > { %v7362_v0 = vpop.f32.mrf.mxu1 }
 0x84e   : > { %v11630_v35 = vpop.f32.mrf.mxu0  ;;  %v11680_v56 = vpop.f32.mrf.mxu1 }
 0x84f   : > { %v7140_v25 = vadd.f32 %v11630_v35, %v9108_v44 }
 0x850   : > { %v7129_v38 = vpop.f32.mrf.mxu0  ;;  %v7374_v52 = vpop.f32.mrf.mxu1 }
 0x851   : > { %v7130_v20 = vadd.f32 %v9108_v44, %v7129_v38  ;;  %v7357_v11 = vadd.f32 %v11674_v49, %v7140_v25 }
 0x853   : > { %v7351_v6 = vadd.f32 %v7350_v27, %v7130_v20 }
 0x854   : > { %v11633_v59 = vpop.f32.mrf.mxu0  ;;  %v11683_v13 = vpop.f32.mrf.mxu1 }
 0x855   : > { %v7160_v3 = vadd.f32 %v11633_v59, %v9108_v44 }
 0x856   : > { %v7149_v36 = vpop.f32.mrf.mxu0  ;;  %v7386_v39 = vpop.f32.mrf.mxu1 }
 0x857   : > { %v7150_v33 = vadd.f32 %v9108_v44, %v7149_v36  ;;  %v7369_v48 = vadd.f32 %v11677_v51, %v7160_v3 }
 0x859   : > { %v7363_v4 = vadd.f32 %v7362_v0, %v7150_v33 }
 0x85a   : > { %v11636_v15 = vpop.f32.mrf.mxu0 }
 0x85b   : > { %v7180_v45 = vadd.f32 %v11636_v15, %v9108_v44  ;;  %v17870_v15 = vld [vmem:[#allocation16_spill] sm:$0xff] }
 0x85c   : > { %v7169_v26 = vpop.f32.mrf.mxu0 }
 0x85d   : > { %v7170_v24 = vadd.f32 %v9108_v44, %v7169_v26  ;;  %v7381_v17 = vadd.f32 %v11680_v56, %v7180_v45 }
 0x85f   : > { %v11639_v62 = vpop.f32.mrf.mxu0 }
 0x860   : > { %v7200_v50 = vadd.f32 %v11639_v62, %v9108_v44 }
 0x861   : > { %v7189_v5 = vpop.f32.mrf.mxu0 }
 0x862   : > { %v7190_v49 = vadd.f32 %v9108_v44, %v7189_v5  ;;  %v7393_v3 = vadd.f32 %v11683_v13, %v7200_v50  ;;  %v17866_v44 = vld [vmem:[#allocation62_spill] sm:$0xff]  ;;  %v17869_v13 = vld [vmem:[#allocation65_spill] sm:$0xff] }
 0x863   : > { %v17872_v5 = vld [vmem:[#allocation57_spill] sm:$0xff] }
 0x86b   : > { %v11762_v43 = vpop.f32.mrf.mxu1 }
 0x86d   : > { %v7634_v34 = vpop.f32.mrf.mxu1 }
 0x870   : > { %v11765_v1 = vpop.f32.mrf.mxu1 }
 0x872   : > { %v7650_v19 = vpop.f32.mrf.mxu1 }
 0x875   : > { %v11718_v30 = vpop.f32.mrf.mxu0  ;;  %v11768_v58 = vpop.f32.mrf.mxu1 }
 0x876   : > { %v7504_v55 = vadd.f32 %v11718_v30, %v7357_v11 }
 0x877   : > { %v7496_v37 = vpop.f32.mrf.mxu0  ;;  %v16330_v29 = vpop.f32.mrf.mxu1 }
 0x878   : > { %v7497_v32 = vadd.f32 %v7496_v37, %v7351_v6  ;;  %v7643_v35 = vadd.f32 %v11762_v43, %v7504_v55  ;;  %v7375_v6 = vadd.f32 %v7374_v52, %v7170_v24 }
 0x87a   : > { %v7635_v25 = vadd.f32 %v7634_v34, %v7497_v32  ;;  %v17867_v34 = vld [vmem:[#allocation38_spill] sm:$0xff] }
 0x87b   : > { %v11721_v41 = vpop.f32.mrf.mxu0  ;;  %v16335_v18 = vpop.f32.mrf.mxu1 }
 0x87c   : > { %v7518_v21 = vadd.f32 %v11721_v41, %v7369_v48  ;;  %v17865_v41 = vld [vmem:[#allocation79_spill] sm:$0xff] }
 0x87d   : > { %v7510_v61 = vpop.f32.mrf.mxu0  ;;  %v16337_v63 = vpop.f32.mrf.mxu1 }
 0x87e   : > { %v7511_v9 = vadd.f32 %v7510_v61, %v7363_v4  ;;  %v7659_v20 = vadd.f32 %v11765_v1, %v7518_v21  ;;  %v7387_v61 = vadd.f32 %v7386_v39, %v7190_v49  ;;  %v17868_v1 = vld [vmem:[#allocation60_spill] sm:$0xff] }
 0x880   : > { %v7651_v51 = vadd.f32 %v7650_v19, %v7511_v9 }
 0x881   : > { %v11724_v40 = vpop.f32.mrf.mxu0 }
 0x882   : > { %v7532_v37 = vadd.f32 %v11724_v40, %v7381_v17 }
 0x883   : > { %v7524_v28 = vpop.f32.mrf.mxu0 }
 0x884   : > { %v7525_v0 = vadd.f32 %v7524_v28, %v7375_v6  ;;  %v7675_v17 = vadd.f32 %v11768_v58, %v7532_v37  ;;  %v17876_v6 = vld [vmem:[#allocation23_spill] sm:$0xff] }
 0x886   : > { %v11727_v7 = vpop.f32.mrf.mxu0 }
 0x887   : > { %v7546_v4 = vadd.f32 %v11727_v7, %v7393_v3  ;;  %v7667_v7 = vadd.f32 %v16330_v29, %v7525_v0  ;;  %v17874_v29 = vld [vmem:[#allocation81_spill] sm:$0xff] }
 0x888   : > { %v7538_v10 = vpop.f32.mrf.mxu0 }
 0x889   : > { %v7539_v40 = vadd.f32 %v7538_v10, %v7387_v61  ;;  %v7691_v43 = vadd.f32 %v16335_v18, %v7546_v4  ;;  %v17875_v18 = vld [vmem:[#allocation82_spill] sm:$0xff]  ;;  %v17878_v4 = vld [vmem:[#allocation67_spill] sm:$0xff] }
 0x893   : > { %v11850_v31 = vpop.f32.mrf.mxu1 }
 0x895   : > { %v7938_v53 = vpop.f32.mrf.mxu1 }
 0x897   : > { %v11853_v46 = vpop.f32.mrf.mxu1 }
 0x899   : > { %v7950_v22 = vpop.f32.mrf.mxu1 }
 0x89b   : > { %v11806_v38 = vpop.f32.mrf.mxu0  ;;  %v11856_v27 = vpop.f32.mrf.mxu1 }
 0x89c   : > { %v7816_v59 = vadd.f32 %v11806_v38, %v7643_v35  ;;  %v17873_v35 = vld [vmem:[#allocation17_spill] sm:$0xff] }
 0x89d   : > { %v7809_v36 = vpop.f32.mrf.mxu0  ;;  %v7962_v24 = vpop.f32.mrf.mxu1 }
 0x89e   : > { %v7945_v11 = vadd.f32 %v11850_v31, %v7816_v59  ;;  %v7810_v30 = vadd.f32 %v7809_v36, %v7635_v25 }
 0x89f   : > { %v11809_v48 = vpop.f32.mrf.mxu0  ;;  %v11859_v59 = vpop.f32.mrf.mxu1 }
 0x8a0   : > { %v7985_v55 = vadd.f32 %v17865_v41, %v7945_v11  ;;  %v7939_v33 = vadd.f32 %v7938_v53, %v7810_v30  ;;  %v7828_v26 = vadd.f32 %v11809_v48, %v7659_v20 }
 0x8a1   : > { %v7821_v32 = vpop.f32.mrf.mxu0  ;;  %v7974_v0 = vpop.f32.mrf.mxu1 }
 0x8a2   : > { %v7993_v45 = vmul.f32 %v7985_v55, %v17866_v44  ;;  %v7984_v31 = vadd.f32 %v17867_v34, %v7939_v33  ;;  %v7957_v56 = vadd.f32 %v11853_v46, %v7828_v26  ;;  %v7822_v21 = vadd.f32 %v7821_v32, %v7651_v51  ;;  %v17871_v46 = vld [vmem:[#allocation63_spill] sm:$0xff]  ;;  %v17877_v33 = vld [vmem:[#allocation64_spill] sm:$0xff]  ;;  %v17879_v32 = vld [vmem:[#allocation18_spill] sm:$0xff] }
 0x8a3   : > { %v11812_v50 = vpop.f32.mrf.mxu0 }
 0x8a4   : > { %v8001_v52 = vadd.f32 %v17868_v1, %v7993_v45  ;;  %v7992_v53 = vmul.f32 %v7984_v31, %v17869_v13  ;;  %v7987_v9 = vadd.f32 %v17870_v15, %v7957_v56  ;;  %v7951_v28 = vadd.f32 %v7950_v22, %v7822_v21  ;;  %v17880_v31 = vld [vmem:[#allocation78_spill] sm:$0xff] }
 0x8a5   : > { %v7840_v19 = vadd.f32 %v11812_v50, %v7675_v17  ;;  %v7833_v39 = vpop.f32.mrf.mxu0  ;;  %v7683_v22 = vadd.f32 %v16337_v63, %v7539_v40  ;;  %v17882_v50 = vld [vmem:[#allocation58_spill] sm:$0xff] }
 0x8a6   : > { %v16347_v62 = vand.u32 4294901760, %v8001_v52  ;;  %v8000_v10 = vadd.f32 %v17871_v46, %v7992_v53  ;;  %v7995_v58 = vmul.f32 %v7987_v9, %v17872_v5  ;;  %v7986_v38 = vadd.f32 %v17873_v35, %v7951_v28  ;;  %v17883_v53 = vld [vmem:[#allocation70_spill] sm:$0xff]  ;;  %v17884_v9 = vld [vmem:[#allocation61_spill] sm:$0xff]  ;;  %v17886_v5 = vld [vmem:[#allocation68_spill] sm:$0xff] }
 0x8a7   : > { %v7969_v25 = vadd.f32 %v11856_v27, %v7840_v19  ;;  %v7834_v49 = vadd.f32 %v7833_v39, %v7667_v7  ;;  %v11815_v36 = vpop.f32.mrf.mxu0  ;;  %v17885_v39 = vld [vmem:[#allocation83_spill] sm:$0xff] }
 0x8a8   : > { %v16354_v11 = vsub.f32 %v8001_v52, %v16347_v62  ;;  %v8003_v30 = vadd.f32 %v17874_v29, %v7995_v58  ;;  %v7994_v20 = vmul.f32 %v7986_v38, %v17875_v18  ;;  %v7852_v37 = vadd.f32 %v11815_v36, %v7691_v43  ;;  %v17887_v35 = vld [vmem:[#allocation71_spill] sm:$0xff] }
 0x8a9   : > { %v7989_v3 = vadd.f32 %v17876_v6, %v7969_v25  ;;  %v7963_v48 = vadd.f32 %v7962_v24, %v7834_v49  ;;  %v7845_v41 = vpop.f32.mrf.mxu0  ;;  %v16359_v55 = vand.u32 4294901760, %v8000_v10  ;;  %v17881_v24 = vld [vmem:[#allocation66_spill] sm:$0xff] }
 0x8aa   : > { %v8124_v27 = vand.u32 4294901760, %v16354_v11  ;;  %v8002_v26 = vadd.f32 %v17877_v33, %v7994_v20  ;;  %v7981_v51 = vadd.f32 %v11859_v59, %v7852_v37  ;;  %v7846_v63 = vadd.f32 %v7845_v41, %v7683_v22  ;;  %v17888_v22 = vld [vmem:[#allocation69_spill] sm:$0xff] }
 0x8ab   : > { %v7997_v61 = vmul.f32 %v7989_v3, %v17878_v4  ;;  %v7988_v44 = vadd.f32 %v17879_v32, %v7963_v48  ;;  %11936 = vmatprep.mubr.f32.mxu1 %v16359_v55  ;;  %v16366_v45 = vand.u32 4294901760, %v8003_v30  ;;  %v16369_v34 = vsub.f32 %v8000_v10, %v16359_v55 }
 0x8ac   : > { %v7991_v56 = vadd.f32 %v17880_v31, %v7981_v51  ;;  %v7975_v21 = vadd.f32 %v7974_v0, %v7846_v63  ;;  %11937 = vmatmul.mubr.f32.vlgmr.msra.gmra.mxu1 %v16347_v62  ;;  %v16373_v40 = vand.u32 4294901760, %v8002_v26  ;;  %v8125_v7 = vsub.f32 %v16354_v11, %v8124_v27  ;;  %v17889_v31 = vld [vmem:[#allocation30_spill] sm:$0xff] }
 0x8ad   : > { %v8005_v17 = vadd.f32 %v17881_v24, %v7997_v61  ;;  %v7996_v1 = vmul.f32 %v7988_v44, %v17882_v50  ;;  %11993 = vmatpush3.msra.mxu1 %v16091_v14  ;;  %v8114_v52 = vand.u32 4294901760, %v16369_v34  ;;  %v16380_v13 = vsub.f32 %v8003_v30, %v16366_v45  ;;  %v17892_v50 = vld [vmem:[#allocation37_spill] sm:$0xff] }
 0x8ae   : > { %v7999_v15 = vmul.f32 %v7991_v56, %v17883_v53  ;;  %v7990_v28 = vadd.f32 %v17884_v9, %v7975_v21  ;;  %11994 = vmatprep.subr.mxu1 %v16099_v42  ;;  %11939 = vmatprep.mubr.f32.mxu1 %v16373_v40  ;;  %v16387_v19 = vsub.f32 %v8002_v26, %v16373_v40  ;;  %v8126_v18 = vand.u32 4294901760, %v8125_v7  ;;  %v17890_v56 = vld [vmem:[#allocation40_spill] sm:$0xff]  ;;  %v17891_v21 = vld [vmem:[#allocation42_spill] sm:$0xff]  ;;  %v17899_v7 = vld [vmem:[#allocation39_spill] sm:$0xff] }
 0x8af   : > { %v8004_v43 = vadd.f32 %v17885_v39, %v7996_v1  ;;  %11995 = vmatpush3.msra.mxu1 %v16099_v42  ;;  %v8115_v46 = vsub.f32 %v16369_v34, %v8114_v52  ;;  %v16397_v10 = vand.u32 4294901760, %v8005_v17  ;;  %v8144_v36 = vand.u32 4294901760, %v16380_v13  ;;  %v17895_v53 = vld [vmem:[#allocation48_spill] sm:$0xff]  ;;  %v17900_v39 = vld [vmem:[#allocation50_spill] sm:$0xff] }
 0x8b0   : > { %v8007_v58 = vadd.f32 %v17886_v5, %v7999_v15  ;;  %v7998_v38 = vmul.f32 %v7990_v28, %v17887_v35  ;;  %11996 = vmatprep.subr.mxu1 %v16112_v16  ;;  %11940 = vmatmul.mubr.f32.gmra.mxu1 %v16366_v45  ;;  %v8134_v59 = vand.u32 4294901760, %v16387_v19  ;;  %v17896_v15 = vld [vmem:[#allocation45_spill] sm:$0xff]  ;;  %v17897_v9 = vld [vmem:[#allocation52_spill] sm:$0xff]  ;;  %v17904_v5 = vld [vmem:[#allocation22_spill] sm:$0xff] }
 0x8b1   : > { %11997 = vmatpush3.msra.mxu1 %v16112_v16  ;;  %v8116_v25 = vand.u32 4294901760, %v8115_v46  ;;  %v16405_v49 = vand.u32 4294901760, %v8004_v43  ;;  %v16418_v37 = vsub.f32 %v8005_v17, %v16397_v10  ;;  %v8145_v41 = vsub.f32 %v16380_v13, %v8144_v36  ;;  %v17898_v28 = vld [vmem:[#allocation77_spill] sm:$0xff]  ;;  %v17903_v46 = vld [vmem:[#allocation34_spill] sm:$0xff] }
 0x8b2   : > { %v8006_v29 = vadd.f32 %v17888_v22, %v7998_v38  ;;  %11998 = vmatprep.subr.mxu1 %v16127_v8  ;;  %v8135_v30 = vsub.f32 %v16387_v19, %v8134_v59  ;;  %v16424_v3 = vand.u32 4294901760, %v8007_v58  ;;  %v17906_v35 = vld [vmem:[#allocation54_spill] sm:$0xff]  ;;  %v17907_v38 = vld [vmem:[#allocation43_spill] sm:$0xff]  ;;  %v17923_v22 = vld [vmem:[#allocation29_spill] sm:$0xff] }
 0x8b3   : > { %11999 = vmatpush3.msra.mxu1 %v16127_v8  ;;  %11892 = vmatprep.mubr.f32.mxu0 %v8116_v25  ;;  %v16415_v20 = vsub.f32 %v8004_v43, %v16405_v49  ;;  %v8164_v63 = vand.u32 4294901760, %v16418_v37  ;;  %v8146_v4 = vand.u32 4294901760, %v8145_v41  ;;  %v17901_v43 = vld [vmem:[#allocation25_spill] sm:$0xff]  ;;  %v17908_v25 = vld [vmem:[#allocation75_spill] sm:$0xff] }
 0x8b4   : > { %11942 = vmatprep.mubr.f32.mxu1 %v16405_v49  ;;  %12000 = vmatprep.subr.mxu1 %v16143_v57  ;;  %v16422_v6 = vand.u32 4294901760, %v8006_v29  ;;  %v8136_v48 = vand.u32 4294901760, %v8135_v30  ;;  %v16446_v0 = vsub.f32 %v8007_v58, %v16424_v3  ;;  %v17905_v58 = vld [vmem:[#allocation33_spill] sm:$0xff]  ;;  %v17925_v30 = vld [vmem:[#allocation72_spill] sm:$0xff] }
 0x8b5   : > { %11893 = vmatmul.mubr.f32.vlgmr.msra.gmra.mxu0 %v8126_v18  ;;  %11943 = vmatmul.mubr.f32.gmra.mxu1 %v16397_v10  ;;  %v8154_v33 = vand.u32 4294901760, %v16415_v20 }
 0x8b6   : > { %11949 = vmatpush3.msra.mxu0 %v16097_v12  ;;  %12001 = vmatpush3.msra.mxu1 %v16143_v57  ;;  %v16434_v26 = vsub.f32 %v8006_v29, %v16422_v6  ;;  %v8184_v44 = vand.u32 4294901760, %v16446_v0  ;;  %v17924_v29 = vld [vmem:[#allocation80_spill] sm:$0xff] }
 0x8b7   : > { %11950 = vmatprep.subr.mxu0 %v16110_v60  ;;  %12002 = vmatprep.subr.mxu1 %v16154_v2  ;;  %v8155_v51 = vsub.f32 %v16415_v20, %v8154_v33 }
 0x8b8   : > { %11951 = vmatpush3.msra.mxu0 %v16110_v60  ;;  %12003 = vmatpush3.msra.mxu1 %v16154_v2  ;;  %v8174_v12 = vand.u32 4294901760, %v16434_v26  ;;  %v8165_v60 = vsub.f32 %v16418_v37, %v8164_v63  ;;  %v8185_v17 = vsub.f32 %v16446_v0, %v8184_v44 }
 0x8b9   : > { %11895 = vmatprep.mubr.f32.mxu0 %v8136_v48  ;;  %11945 = vmatprep.mubr.f32.mxu1 %v16422_v6  ;;  %v8156_v61 = vand.u32 4294901760, %v8155_v51 }
 0x8ba   : > { %11952 = vmatprep.subr.mxu0 %v16125_v47  ;;  %12004 = vmatprep.subr.mxu1 %v16168_v54  ;;  %v8175_v32 = vsub.f32 %v16434_v26, %v8174_v12  ;;  %v8186_v1 = vand.u32 4294901760, %v8185_v17 }
 0x8bb   : > { %11896 = vmatmul.mubr.f32.gmra.mxu0 %v8146_v4  ;;  %11946 = vmatmul.mubr.f32.gmra.mxu1 %v16424_v3 }
 0x8bc   : > { %11953 = vmatpush3.msra.mxu0 %v16125_v47  ;;  %12005 = vmatpush3.msra.mxu1 %v16168_v54  ;;  %v8166_v47 = vand.u32 4294901760, %v8165_v60  ;;  %v8176_v24 = vand.u32 4294901760, %v8175_v32 }
 0x8bd   : > { %11954 = vmatprep.subr.mxu0 %v16140_v23  ;;  %12006 = vmatprep.subr.mxu1 %v17889_v31 }
 0x8be   : > { %12024 = vmatprep.mubr.f32.mxu1 %v8114_v52  ;;  %11955 = vmatpush3.msra.mxu0 %v16140_v23  ;;  %v17893_v23 = vld [vmem:[#allocation73_spill] sm:$0xff]  ;;  %v17894_v52 = vld [vmem:[#allocation35_spill] sm:$0xff] }
 0x8bf   : > { %12007 = vmatpush3.msra.mxu1 %v17889_v31  ;;  %11898 = vmatprep.mubr.f32.mxu0 %v8156_v61 }
 0x8c0   : > { %11956 = vmatprep.subr.mxu0 %v17890_v56  ;;  %12008 = vmatprep.subr.mxu1 %v17891_v21 }
 0x8c1   : > { %11899 = vmatmul.mubr.f32.gmra.mxu0 %v8166_v47  ;;  %12009 = vmatpush3.msra.mxu1 %v17891_v21 }
 0x8c2   : > { %11957 = vmatpush3.msra.mxu0 %v17890_v56  ;;  %12010 = vmatprep.subr.mxu1 %v17892_v50 }
 0x8c3   : > { %11958 = vmatprep.subr.mxu0 %v17893_v23  ;;  %12011 = vmatpush3.msra.mxu1 %v17892_v50 }
 0x8c4   : > { %11959 = vmatpush3.msra.mxu0 %v17893_v23  ;;  %11901 = vmatprep.mubr.f32.mxu0 %v8176_v24 }
 0x8c5   : > { %11960 = vmatprep.subr.mxu0 %v17894_v52  ;;  %12012 = vmatprep.subr.mxu1 %v17895_v53 }
 0x8c6   : > { %11902 = vmatmul.mubr.f32.gmra.mxu0 %v8186_v1  ;;  %12013 = vmatpush3.msra.mxu1 %v17895_v53 }
 0x8c7   : > { %11961 = vmatpush3.msra.mxu0 %v17894_v52  ;;  %11980 = vmatprep.mubr.f32.mxu0 %v16369_v34  ;;  %v17902_v34 = vld [vmem:[#allocation13_spill] sm:$0xff] }
 0x8c8   : > { %11962 = vmatprep.subr.mxu0 %v17896_v15  ;;  %12014 = vmatprep.subr.mxu1 %v17897_v9 }
 0x8c9   : > { %11963 = vmatpush3.msra.mxu0 %v17896_v15  ;;  %12015 = vmatpush3.msra.mxu1 %v17897_v9 }
 0x8ca   : > { %11964 = vmatprep.subr.mxu0 %v17898_v28  ;;  %12016 = vmatprep.subr.mxu1 %v17899_v7 }
 0x8cb   : > { %11965 = vmatpush3.msra.mxu0 %v17898_v28  ;;  %12017 = vmatpush3.msra.mxu1 %v17899_v7 }
 0x8cc   : > { %11966 = vmatprep.subr.mxu0 %v17900_v39  ;;  %12018 = vmatprep.subr.mxu1 %v17901_v43 }
 0x8cd   : > { %11967 = vmatpush3.msra.mxu0 %v17900_v39  ;;  %12019 = vmatpush3.msra.mxu1 %v17901_v43 }
 0x8ce   : > { %11968 = vmatprep.subr.mxu0 %v17902_v34  ;;  %12020 = vmatprep.subr.mxu1 %v17903_v46 }
 0x8cf   : > { %11969 = vmatpush3.msra.mxu0 %v17902_v34  ;;  %12021 = vmatpush3.msra.mxu1 %v17903_v46 }
 0x8d0   : > { %11970 = vmatprep.subr.mxu0 %v17904_v5  ;;  %12022 = vmatprep.subr.mxu1 %v17905_v58 }
 0x8d1   : > { %11971 = vmatpush3.msra.mxu0 %v17904_v5  ;;  %12023 = vmatpush3.msra.mxu1 %v17905_v58 }
 0x8d2   : > { %11972 = vmatprep.subr.mxu0 %v17906_v35  ;;  %12025 = vmatmul.mubr.f32.vlgmr.msra.gmra.mxu1 %v8124_v27  ;;  %v17917_v27 = vld [vmem:[#allocation31_spill] sm:$0xff] }
 0x8d3   : > { %12080 = vmatprep.subr.mxu1 %v16091_v14  ;;  %11973 = vmatpush3.msra.mxu0 %v17906_v35 }
 0x8d4   : > { %12027 = vmatprep.mubr.f32.mxu1 %v8134_v59  ;;  %12081 = vmatpush3.msra.mxu1 %v16091_v14  ;;  %v17909_v14 = vld [vmem:[#allocation59_spill] sm:$0xff]  ;;  %v17921_v59 = vld [vmem:[#allocation56_spill] sm:$0xff] }
 0x8d5   : > { %11974 = vmatprep.subr.mxu0 %v17907_v38  ;;  %12082 = vmatprep.subr.mxu1 %v16099_v42 }
 0x8d6   : > { %11975 = vmatpush3.msra.mxu0 %v17907_v38  ;;  %12083 = vmatpush3.msra.mxu1 %v16099_v42  ;;  %v17910_v42 = vld [vmem:[#allocation36_spill] sm:$0xff] }
 0x8d7   : > { %11976 = vmatprep.subr.mxu0 %v17908_v25  ;;  %12028 = vmatmul.mubr.f32.gmra.mxu1 %v8144_v36  ;;  %v17922_v36 = vld [vmem:[#allocation32_spill] sm:$0xff] }
 0x8d8   : > { %12084 = vmatprep.subr.mxu1 %v16112_v16  ;;  %11977 = vmatpush3.msra.mxu0 %v17908_v25 }
 0x8d9   : > { %12030 = vmatprep.mubr.f32.mxu1 %v8154_v33  ;;  %12085 = vmatpush3.msra.mxu1 %v16112_v16  ;;  %v17911_v16 = vld [vmem:[#allocation41_spill] sm:$0xff] }
 0x8da   : > { %11978 = vmatprep.subr.mxu0 %v17909_v14  ;;  %12086 = vmatprep.subr.mxu1 %v16127_v8 }
 0x8db   : > { %11979 = vmatpush3.msra.mxu0 %v17909_v14  ;;  %12087 = vmatpush3.msra.mxu1 %v16127_v8  ;;  %v17912_v8 = vld [vmem:[#allocation11_spill] sm:$0xff] }
 0x8dc   : > { %11981 = vmatmul.mubr.f32.vlgmr.msra.gmra.mxu0 %v16354_v11  ;;  %12031 = vmatmul.mubr.f32.gmra.mxu1 %v8164_v63  ;;  %v17916_v11 = vld [vmem:[#allocation76_spill] sm:$0xff] }
 0x8dd   : > { %12036 = vmatprep.subr.mxu0 %v17910_v42  ;;  %12088 = vmatprep.subr.mxu1 %v16143_v57 }
 0x8de   : > { %11983 = vmatprep.mubr.f32.mxu0 %v16387_v19  ;;  %12033 = vmatprep.mubr.f32.mxu1 %v8174_v12  ;;  %v17919_v19 = vld [vmem:[#allocation28_spill] sm:$0xff] }
 0x8df   : > { %12037 = vmatpush3.msra.mxu0 %v17910_v42  ;;  %12089 = vmatpush3.msra.mxu1 %v16143_v57  ;;  %v17913_v57 = vld [vmem:[#allocation9_spill] sm:$0xff] }
 0x8e0   : > { %12038 = vmatprep.subr.mxu0 %v17911_v16  ;;  %12090 = vmatprep.subr.mxu1 %v16154_v2 }
 0x8e1   : > { %12039 = vmatpush3.msra.mxu0 %v17911_v16  ;;  %12091 = vmatpush3.msra.mxu1 %v16154_v2  ;;  %v17914_v2 = vld [vmem:[#allocation46_spill] sm:$0xff] }
 0x8e2   : > { %11984 = vmatmul.mubr.f32.gmra.mxu0 %v16380_v13  ;;  %12034 = vmatmul.mubr.f32.gmra.mxu1 %v8184_v44  ;;  %v17918_v13 = vld [vmem:[#allocation47_spill] sm:$0xff] }
 0x8e3   : > { %12040 = vmatprep.subr.mxu0 %v17912_v8  ;;  %12092 = vmatprep.subr.mxu1 %v16168_v54 }
 0x8e4   : > { %11986 = vmatprep.mubr.f32.mxu0 %v16415_v20  ;;  %12041 = vmatpush3.msra.mxu0 %v17912_v8 }
 0x8e5   : > { %12093 = vmatpush3.msra.mxu1 %v16168_v54  ;;  %12112 = vmatprep.mubr.f32.mxu1 %v16359_v55  ;;  %v17915_v54 = vld [vmem:[#allocation15_spill] sm:$0xff] }
 0x8e6   : > { %12042 = vmatprep.subr.mxu0 %v17913_v57  ;;  %12094 = vmatprep.subr.mxu1 %v17889_v31 }
 0x8e7   : > { %12043 = vmatpush3.msra.mxu0 %v17913_v57  ;;  %12095 = vmatpush3.msra.mxu1 %v17889_v31 }
 0x8e8   : > { %11987 = vmatmul.mubr.f32.gmra.mxu0 %v16418_v37  ;;  %12044 = vmatprep.subr.mxu0 %v17914_v2 }
 0x8e9   : > { %12096 = vmatprep.subr.mxu1 %v17891_v21  ;;  %11989 = vmatprep.mubr.f32.mxu0 %v16434_v26 }
 0x8ea   : > { %12045 = vmatpush3.msra.mxu0 %v17914_v2  ;;  %12097 = vmatpush3.msra.mxu1 %v17891_v21  ;;  %v9109_v21 = vld [vmem:[%s16660_s10] ss:$0 sm:$0xff] }
 0x8eb   : > { %12046 = vmatprep.subr.mxu0 %v17915_v54  ;;  %12098 = vmatprep.subr.mxu1 %v17892_v50 }
 0x8ec   : > { %12047 = vmatpush3.msra.mxu0 %v17915_v54  ;;  %12099 = vmatpush3.msra.mxu1 %v17892_v50 }
 0x8ed   : > { %11990 = vmatmul.mubr.f32.gmra.mxu0 %v16446_v0  ;;  %12048 = vmatprep.subr.mxu0 %v17916_v11 }
 0x8ee   : > { %12100 = vmatprep.subr.mxu1 %v17895_v53  ;;  %12049 = vmatpush3.msra.mxu0 %v17916_v11 }
 0x8ef   : > { %12068 = vmatprep.mubr.f32.mxu0 %v16359_v55  ;;  %12101 = vmatpush3.msra.mxu1 %v17895_v53  ;;  %v17920_v55 = vld [vmem:[#allocation49_spill] sm:$0xff] }
 0x8f0   : > { %12050 = vmatprep.subr.mxu0 %v17917_v27  ;;  %12102 = vmatprep.subr.mxu1 %v17897_v9 }
 0x8f1   : > { %12051 = vmatpush3.msra.mxu0 %v17917_v27  ;;  %12103 = vmatpush3.msra.mxu1 %v17897_v9 }
 0x8f2   : > { %12052 = vmatprep.subr.mxu0 %v17918_v13  ;;  %12104 = vmatprep.subr.mxu1 %v17899_v7 }
 0x8f3   : > { %12053 = vmatpush3.msra.mxu0 %v17918_v13  ;;  %12105 = vmatpush3.msra.mxu1 %v17899_v7 }
 0x8f4   : > { %12054 = vmatprep.subr.mxu0 %v17919_v19  ;;  %12106 = vmatprep.subr.mxu1 %v17901_v43 }
 0x8f5   : > { %12055 = vmatpush3.msra.mxu0 %v17919_v19  ;;  %12107 = vmatpush3.msra.mxu1 %v17901_v43 }
 0x8f6   : > { %12056 = vmatprep.subr.mxu0 %v17920_v55  ;;  %12108 = vmatprep.subr.mxu1 %v17903_v46 }
 0x8f7   : > { %12057 = vmatpush3.msra.mxu0 %v17920_v55  ;;  %12109 = vmatpush3.msra.mxu1 %v17903_v46 }
 0x8f8   : > { %12058 = vmatprep.subr.mxu0 %v17921_v59  ;;  %12110 = vmatprep.subr.mxu1 %v17905_v58 }
 0x8f9   : > { %12059 = vmatpush3.msra.mxu0 %v17921_v59  ;;  %12111 = vmatpush3.msra.mxu1 %v17905_v58 }
 0x8fa   : > { %12060 = vmatprep.subr.mxu0 %v17922_v36  ;;  %12113 = vmatmul.mubr.f32.vlgmr.msra.gmra.mxu1 %v16347_v62 }
 0x8fb   : > { %12061 = vmatpush3.msra.mxu0 %v17922_v36  ;;  %12115 = vmatprep.mubr.f32.mxu1 %v16373_v40 }
 0x8fc   : > { %12062 = vmatprep.subr.mxu0 %v17923_v22 }
 0x8fd   : > { %12063 = vmatpush3.msra.mxu0 %v17923_v22 }
 0x8fe   : > { %12064 = vmatprep.subr.mxu0 %v17924_v29  ;;  %12116 = vmatmul.mubr.f32.gmra.mxu1 %v16366_v45 }
 0x8ff   : > { %12065 = vmatpush3.msra.mxu0 %v17924_v29  ;;  %12118 = vmatprep.mubr.f32.mxu1 %v16405_v49 }
 0x900   : > { %12066 = vmatprep.subr.mxu0 %v17925_v30 }
 0x901   : > { %12067 = vmatpush3.msra.mxu0 %v17925_v30 }
 0x902   : > { %12069 = vmatmul.mubr.f32.vlgmr.msra.gmra.mxu0 %v16347_v62  ;;  %12119 = vmatmul.mubr.f32.gmra.mxu1 %v16397_v10 }
 0x903   : > { %12071 = vmatprep.mubr.f32.mxu0 %v16373_v40  ;;  %12121 = vmatprep.mubr.f32.mxu1 %v16422_v6 }
 0x906   : > { %12072 = vmatmul.mubr.f32.gmra.mxu0 %v16366_v45  ;;  %12122 = vmatmul.mubr.f32.gmra.mxu1 %v16424_v3 }
 0x907   : > { %12074 = vmatprep.mubr.f32.mxu0 %v16405_v49 }
 0x90a   : > { %12075 = vmatmul.mubr.f32.gmra.mxu0 %v16397_v10 }
 0x90b   : > { %12077 = vmatprep.mubr.f32.mxu0 %v16422_v6 }
 0x90e   : > { %12078 = vmatmul.mubr.f32.gmra.mxu0 %v16424_v3 }
 0x96c   : > { %v11938_v18 = vpop.f32.mrf.mxu1 }
 0x96e   : > { %v8339_v62 = vpop.f32.mrf.mxu1 }
 0x970   : > { %v11941_v20 = vpop.f32.mrf.mxu1 }
 0x972   : > { %v8351_v48 = vpop.f32.mrf.mxu1 }
 0x975   : > { %v11894_v37 = vpop.f32.mrf.mxu0  ;;  %v11944_v41 = vpop.f32.mrf.mxu1 }
 0x976   : > { %v8129_v50 = vadd.f32 %v11894_v37, %v9109_v21 }
 0x977   : > { %v8118_v40 = vpop.f32.mrf.mxu0  ;;  %v8363_v26 = vpop.f32.mrf.mxu1 }
 0x978   : > { %v8119_v52 = vadd.f32 %v9109_v21, %v8118_v40  ;;  %v8346_v9 = vadd.f32 %v11938_v18, %v8129_v50 }
 0x97a   : > { %v8340_v34 = vadd.f32 %v8339_v62, %v8119_v52 }
 0x97b   : > { %v11897_v33 = vpop.f32.mrf.mxu0  ;;  %v11947_v51 = vpop.f32.mrf.mxu1 }
 0x97c   : > { %v8149_v15 = vadd.f32 %v11897_v33, %v9109_v21 }
 0x97d   : > { %v8138_v45 = vpop.f32.mrf.mxu0  ;;  %v8375_v12 = vpop.f32.mrf.mxu1 }
 0x97e   : > { %v8139_v39 = vadd.f32 %v9109_v21, %v8138_v45  ;;  %v8358_v35 = vadd.f32 %v11941_v20, %v8149_v15 }
 0x980   : > { %v8352_v42 = vadd.f32 %v8351_v48, %v8139_v39 }
 0x981   : > { %v11900_v63 = vpop.f32.mrf.mxu0 }
 0x982   : > { %v8169_v5 = vadd.f32 %v11900_v63, %v9109_v21 }
 0x983   : > { %v8158_v49 = vpop.f32.mrf.mxu0 }
 0x984   : > { %v8159_v38 = vadd.f32 %v9109_v21, %v8158_v49  ;;  %v8370_v11 = vadd.f32 %v11944_v41, %v8169_v5 }
 0x986   : > { %v11903_v10 = vpop.f32.mrf.mxu0  ;;  %v8364_v55 = vadd.f32 %v8363_v26, %v8159_v38 }
 0x987   : > { %v8189_v8 = vadd.f32 %v11903_v10, %v9109_v21 }
 0x988   : > { %v8178_v6 = vpop.f32.mrf.mxu0 }
 0x989   : > { %v8179_v19 = vadd.f32 %v9109_v21, %v8178_v6  ;;  %v8382_v18 = vadd.f32 %v11947_v51, %v8189_v8 }
 0x98b   : > { %v8376_v33 = vadd.f32 %v8375_v12, %v8179_v19 }
 0x992   : > { %v12026_v0 = vpop.f32.mrf.mxu1 }
 0x994   : > { %v8623_v4 = vpop.f32.mrf.mxu1 }
 0x997   : > { %v12029_v61 = vpop.f32.mrf.mxu1 }
 0x999   : > { %v8639_v60 = vpop.f32.mrf.mxu1 }
 0x99c   : > { %v11982_v3 = vpop.f32.mrf.mxu0  ;;  %v12032_v44 = vpop.f32.mrf.mxu1 }
 0x99d   : > { %v8493_v43 = vadd.f32 %v11982_v3, %v8346_v9 }
 0x99e   : > { %v8485_v32 = vpop.f32.mrf.mxu0  ;;  %v16612_v47 = vpop.f32.mrf.mxu1 }
 0x99f   : > { %v8486_v58 = vadd.f32 %v8485_v32, %v8340_v34  ;;  %v8632_v16 = vadd.f32 %v12026_v0, %v8493_v43 }
 0x9a1   : > { %v8624_v13 = vadd.f32 %v8623_v4, %v8486_v58 }
 0x9a2   : > { %v11985_v31 = vpop.f32.mrf.mxu0  ;;  %v16617_v24 = vpop.f32.mrf.mxu1 }
 0x9a3   : > { %v8507_v14 = vadd.f32 %v11985_v31, %v8358_v35 }
 0x9a4   : > { %v8499_v56 = vpop.f32.mrf.mxu0  ;;  %v16619_v23 = vpop.f32.mrf.mxu1 }
 0x9a5   : > { %v8500_v54 = vadd.f32 %v8499_v56, %v8352_v42  ;;  %v8648_v30 = vadd.f32 %v12029_v61, %v8507_v14 }
 0x9a7   : > { %v8640_v41 = vadd.f32 %v8639_v60, %v8500_v54 }
 0x9a8   : > { %v11988_v17 = vpop.f32.mrf.mxu0 }
 0x9a9   : > { %v8521_v36 = vadd.f32 %v11988_v17, %v8370_v11 }
 0x9aa   : > { %v8513_v1 = vpop.f32.mrf.mxu0 }
 0x9ab   : > { %v8514_v37 = vadd.f32 %v8513_v1, %v8364_v55  ;;  %v8664_v0 = vadd.f32 %v12032_v44, %v8521_v36 }
 0x9ad   : > { %v11991_v28 = vpop.f32.mrf.mxu0  ;;  %v8656_v3 = vadd.f32 %v16612_v47, %v8514_v37 }
 0x9ae   : > { %v8535_v45 = vadd.f32 %v11991_v28, %v8382_v18 }
 0x9af   : > { %v8527_v25 = vpop.f32.mrf.mxu0 }
 0x9b0   : > { %v8528_v4 = vadd.f32 %v8527_v25, %v8376_v33  ;;  %v8680_v31 = vadd.f32 %v16617_v24, %v8535_v45 }
 0x9b2   : > { %v8672_v50 = vadd.f32 %v16619_v23, %v8528_v4 }
 0x9ba   : > { %v12114_v53 = vpop.f32.mrf.mxu1 }
 0x9bc   : > { %v8927_v7 = vpop.f32.mrf.mxu1 }
 0x9be   : > { %v12117_v46 = vpop.f32.mrf.mxu1 }
 0x9c0   : > { %v8939_v57 = vpop.f32.mrf.mxu1 }
 0x9c2   : > { %v12070_v2 = vpop.f32.mrf.mxu0  ;;  %v12120_v62 = vpop.f32.mrf.mxu1 }
 0x9c3   : > { %v8805_v27 = vadd.f32 %v12070_v2, %v8632_v16 }
 0x9c4   : > { %v8798_v59 = vpop.f32.mrf.mxu0  ;;  %v8951_v51 = vpop.f32.mrf.mxu1 }
 0x9c5   : > { %v8934_v22 = vadd.f32 %v12114_v53, %v8805_v27  ;;  %v8799_v29 = vadd.f32 %v8798_v59, %v8624_v13 }
 0x9c6   : > { %v12073_v20 = vpop.f32.mrf.mxu0  ;;  %v12123_v44 = vpop.f32.mrf.mxu1 }
 0x9c7   : > { %8975 = vst.msk [vmem:[%s16626_s30 + $0x8] sm:$0xff] %vm8973_vm1, %v8934_v22  ;;  %v8928_v48 = vadd.f32 %v8927_v7, %v8799_v29  ;;  %v8817_v40 = vadd.f32 %v12073_v20, %v8648_v30 }
 0x9c8   : > { %v8810_v26 = vpop.f32.mrf.mxu0  ;;  %v8963_v53 = vpop.f32.mrf.mxu1 }
 0x9c9   : > { %8974 = vst.msk [vmem:[%s16626_s30] sm:$0xff] %vm8973_vm1, %v8928_v48  ;;  %v8946_v63 = vadd.f32 %v12117_v46, %v8817_v40  ;;  %v8811_v49 = vadd.f32 %v8810_v26, %v8640_v41 }
 0x9ca   : > { %v12076_v10 = vpop.f32.mrf.mxu0 }
 0x9cb   : > { %8977 = vst.msk [vmem:[%s16626_s30 + $0x18] sm:$0xff] %vm8973_vm1, %v8946_v63  ;;  %v8940_v6 = vadd.f32 %v8939_v57, %v8811_v49  ;;  %v8829_v61 = vadd.f32 %v12076_v10, %v8664_v0 }
 0x9cc   : > { %v8822_v60 = vpop.f32.mrf.mxu0 }
 0x9cd   : > { %8976 = vst.msk [vmem:[%s16626_s30 + $0x10] sm:$0xff] %vm8973_vm1, %v8940_v6  ;;  %v8958_v12 = vadd.f32 %v12120_v62, %v8829_v61  ;;  %v8823_v32 = vadd.f32 %v8822_v60, %v8656_v3 }
 0x9ce   : > { %v12079_v56 = vpop.f32.mrf.mxu0 }
 0x9cf   : > { %8979 = vst.msk [vmem:[%s16626_s30 + $0x28] sm:$0xff] %vm8973_vm1, %v8958_v12  ;;  %v8952_v21 = vadd.f32 %v8951_v51, %v8823_v32  ;;  %v8841_v17 = vadd.f32 %v12079_v56, %v8680_v31 }
 0x9d0   : > { %v8834_v1 = vpop.f32.mrf.mxu0 }
 0x9d1   : > { %8978 = vst.msk [vmem:[%s16626_s30 + $0x20] sm:$0xff] %vm8973_vm1, %v8952_v21  ;;  %v8970_v47 = vadd.f32 %v12123_v44, %v8841_v17  ;;  %v8835_v52 = vadd.f32 %v8834_v1, %v8672_v50 }
 0x9d3   : > { %8981 = vst.msk [vmem:[%s16626_s30 + $0x38] sm:$0xff] %vm8973_vm1, %v8970_v47  ;;  %v8964_v15 = vadd.f32 %v8963_v53, %v8835_v52 }
 0x9d5   : > { %8980 = vst.msk [vmem:[%s16626_s30 + $0x30] sm:$0xff] %vm8973_vm1, %v8964_v15 }
 0x9d6 PF: > { %s23_s17 = sadd.s32 1, %s12372_s17  }
 0x9d7   : > { %p20_p2 = scmp.ge.s32.totalorder %s23_s17, 4  }
 0x9d9   :  { %22 = sbr.rel (!%p20_p2) target bundleno = 2 (0x2), region = 113 }
 0x9de   :  { %9004 = vsyncpa [#allocation3], 1 }
 0x9df   :  { %9006 = vsyncpa [#allocation3 + $0x1], 1 }
 0x9e0   :  { %9007 = vsyncpa [#allocation5], 1 }

</bundles_post_ra>
